<compile_context>
chip_gen: v5e
topology: v5e:2x2
jax: 0.10.0
libtpu: 0.0.40
codegen_flags: <defaults>
</compile_context>

<pallas_src>
import jax
import jax.numpy as jnp
from jax import lax
from jax.experimental import pallas as pl
from jax.experimental.pallas import tpu as pltpu


def _round_up(x, m):
    return (x + m - 1) // m * m


# --------------------------------------------------------------------------
# Fused BaseBlock kernel (static-shape builder).
# --------------------------------------------------------------------------
def _make_base_block_kernel(h, w, wpad, c, r_strip):
    m_strip = r_strip * wpad          # flattened rows per strip (MXU M)
    n_strips = h // r_strip
    assert h % r_strip == 0

    def kernel(xp_ref, w_ref, b_ref, o_ref, h1p_ref):
        # xp_ref : (1, H+2, Wp, C) f32   zero rows 0 / H+1, zero cols >= W
        # w_ref  : (18, C, C)      bf16  conv1 taps 0..8, conv2 taps 9..17
        #                                (eval-mode BN scale folded in)
        # b_ref  : (2, C)          f32   BN biases (beta - mean*scale)
        # o_ref  : (1, H, W, C)    f32   block output
        # h1p_ref: (H+2, Wp, C)    f32   scratch: padded intermediate
        col_ok = lax.broadcasted_iota(jnp.int32, (1, wpad, c), 1) < w  # hoisted
        b1v = b_ref[0:1, :]
        b2v = b_ref[1:2, :]

        # Zero only the two halo rows of the scratch (interior rows are fully
        # overwritten, column-masked, below).
        zrow = jnp.zeros((1, wpad, c), jnp.float32)
        h1p_ref[0:1, :, :] = zrow
        h1p_ref[h + 1:h + 2, :, :] = zrow

        def conv_strip(get_rows, row0, tap_base):
            # 3x3 conv over one strip of r_strip output rows starting at image
            # row `row0`.  Accumulator stays register-resident (f32).
            acc = None
            for dy in range(3):
                rows = get_rows(row0 + dy).reshape(m_strip, c)   # f32, free reshape
                for dx in range(3):
                    shift = (1 - dx) % m_strip
                    a = rows if shift == 0 else pltpu.roll(rows, shift, axis=0)
                    a = a.astype(jnp.bfloat16)                   # MXU operand
                    d = jnp.dot(a, w_ref[tap_base + dy * 3 + dx],
                                preferred_element_type=jnp.float32)
                    acc = d if acc is None else acc + d
            return acc

        x_rows = lambda r: xp_ref[0, r:r + r_strip, :, :]
        h_rows = lambda r: h1p_ref[r:r + r_strip, :, :]

        # ---- conv1 -> BN1 (folded) -> ReLU, strip by strip into the scratch.
        for s in range(n_strips):
            r0 = s * r_strip
            acc = conv_strip(x_rows, r0, 0) + b1v
            h1 = jnp.maximum(acc, 0.0).reshape(r_strip, wpad, c)
            h1 = jnp.where(col_ok, h1, 0.0)          # zero the padding columns
            h1p_ref[r0 + 1:r0 + 1 + r_strip, :, :] = h1   # dense aligned store

        # ---- conv2 -> BN2 (folded) -> +identity -> ReLU (f32 residual).
        for s in range(n_strips):
            r0 = s * r_strip
            acc = conv_strip(h_rows, r0, 9) + b2v
            y = acc.reshape(r_strip, wpad, c) + xp_ref[0, r0 + 1:r0 + 1 + r_strip, :, :]
            y = jnp.maximum(y, 0.0)
            o_ref[0, r0:r0 + r_strip, :, :] = y[:, 0:w, :]   # aligned crop

    return kernel


# --------------------------------------------------------------------------
# Wrapper: NCHW in / NCHW out, single fused pallas_call over the batch.
# --------------------------------------------------------------------------
def base_block_forward(x_nchw, params):
    # TODO(synk): the c_in != c_out branch (1x1 stride-2 pointwise projection)
    # is not implemented -- in the reference forward that branch adds tensors
    # of mismatched spatial size, so only the c_in == c_out path is valid.
    w_all, b_all = params["w"], params["b"]
    n, c, h, w_sp = x_nchw.shape
    c_out = w_all.shape[-1]
    assert c == c_out, "only the c_in == c_out residual path is implemented"
    assert c % 128 == 0, "channels must be lane-dense (multiple of 128)"

    wpad = _round_up(w_sp + 1, 8)        # >=1 zero col on the right, 8-aligned
    r_strip = next(r for r in (4, 2, 1) if h % r == 0)

    # NCHW -> NHWC + halo/W padding: fuses into a single XLA copy.
    x_nhwc = jnp.transpose(x_nchw, (0, 2, 3, 1)).astype(jnp.float32)
    xp = jnp.pad(x_nhwc, ((0, 0), (1, 1), (0, wpad - w_sp), (0, 0)))

    kernel = _make_base_block_kernel(h, w_sp, wpad, c, r_strip)
    out = pl.pallas_call(
        kernel,
        out_shape=jax.ShapeDtypeStruct((n, h, w_sp, c_out), jnp.float32),
        grid_spec=pltpu.PrefetchScalarGridSpec(
            num_scalar_prefetch=0,
            grid=(n,),                                           # image-parallel
            in_specs=[
                pl.BlockSpec((1, h + 2, wpad, c), lambda i: (i, 0, 0, 0)),
                pl.BlockSpec((18, c, c_out), lambda i: (0, 0, 0)),  # resident
                pl.BlockSpec((2, c_out), lambda i: (0, 0)),
            ],
            out_specs=pl.BlockSpec((1, h, w_sp, c_out), lambda i: (i, 0, 0, 0)),
            scratch_shapes=[pltpu.VMEM((h + 2, wpad, c_out), jnp.float32)],
        ),
        compiler_params=pltpu.CompilerParams(
            dimension_semantics=("parallel",),   # split images across TCs
            vmem_limit_bytes=32 * 1024 * 1024,
        ),
    )(xp, w_all, b_all)
    return jnp.transpose(out, (0, 3, 1, 2))                      # NHWC -> NCHW


# --------------------------------------------------------------------------
# Parameters: fold eval-mode BatchNorm into the conv weights / bias.
# --------------------------------------------------------------------------
def _fold_conv_bn(w_hwio, gamma, beta, mean, var, eps=1e-5):
    scale = gamma / jnp.sqrt(var + eps)                # (Cout,)
    w_folded = w_hwio * scale                          # BN scale into weights
    bias = beta - mean * scale
    kh, kw, cin, cout = w_hwio.shape
    return w_folded.reshape(kh * kw, cin, cout), w_folded, bias


def init_params(key, c, eps=1e-5):
    ks = jax.random.split(key, 4)

    def conv_w(k, cin, cout):
        std = (2.0 / (9 * cin)) ** 0.5
        return std * jax.random.normal(k, (3, 3, cin, cout), jnp.float32)

    def bn_stats(k, ch):
        k1, k2, k3, k4 = jax.random.split(k, 4)
        gamma = 1.0 + 0.1 * jax.random.normal(k1, (ch,), jnp.float32)
        beta = 0.1 * jax.random.normal(k2, (ch,), jnp.float32)
        mean = 0.1 * jax.random.normal(k3, (ch,), jnp.float32)
        var = 1.0 + 0.1 * jax.random.uniform(k4, (ch,), jnp.float32)
        return gamma, beta, mean, var

    w1t, w1f, b1 = _fold_conv_bn(conv_w(ks[0], c, c), *bn_stats(ks[1], c), eps=eps)
    w2t, w2f, b2 = _fold_conv_bn(conv_w(ks[2], c, c), *bn_stats(ks[3], c), eps=eps)

    kernel_params = dict(
        w=jnp.concatenate([w1t, w2t], axis=0).astype(jnp.bfloat16),  # (18, C, C)
        b=jnp.stack([b1, b2], axis=0).astype(jnp.float32),           # (2, C)
    )
    ref_params = dict(w1=w1f, b1=b1, w2=w2f, b2=b2)
    return kernel_params, ref_params


# Pure-JAX f32 reference (eval-mode BN folded the same way) for validation.
def base_block_reference(x_nchw, p):
    x = jnp.transpose(x_nchw, (0, 2, 3, 1))
    dn = ("NHWC", "HWIO", "NHWC")
    y = lax.conv_general_dilated(x, p["w1"], (1, 1), "SAME",
                                 dimension_numbers=dn) + p["b1"]
    y = jnp.maximum(y, 0.0)
    y = lax.conv_general_dilated(y, p["w2"], (1, 1), "SAME",
                                 dimension_numbers=dn) + p["b2"]
    y = jnp.maximum(y + x, 0.0)
    return jnp.transpose(y, (0, 3, 1, 2))


if __name__ == "__main__":
    key = jax.random.PRNGKey(0)
    k_x, k_p = jax.random.split(key)

    N, C, H, W = 2, 128, 16, 16          # BaseBlock(c_in=c_out=128), 16x16 maps
    x = jax.random.normal(k_x, (N, C, H, W), jnp.float32)
    kernel_params, ref_params = init_params(k_p, C)

    out = jax.jit(base_block_forward)(x, kernel_params)
    out = jax.block_until_ready(out)

    assert out.shape == (N, C, H, W), out.shape
    assert bool(jnp.all(jnp.isfinite(out)))

    # Validate against the f32 reference (tolerance covers bf16 MXU operands).
    ref = base_block_reference(x, ref_params)
    max_err = float(jnp.max(jnp.abs(out - ref)))
    tol = 5e-2 * float(jnp.max(jnp.abs(ref))) + 1e-3
    assert max_err < tol, (max_err, tol)

    print("KERNEL_OK")
</pallas_src>

<mosaic_0001>
module attributes {stable_mosaic.version = 11 : i64} {
  func.func @kernel(%arg0: i32, %arg1: memref<1x18x24x128xf32, #tpu.memory_space<vmem>>, %arg2: memref<18x128x128xbf16, #tpu.memory_space<vmem>>, %arg3: memref<2x128xf32, #tpu.memory_space<vmem>>, %arg4: memref<1x16x16x128xf32, #tpu.memory_space<vmem>>, %arg5: memref<18x24x128xf32, #tpu.memory_space<vmem>>) attributes {dimension_semantics = [#tpu.dimension_semantics<parallel>], iteration_bounds = array<i64: 2>, scalar_prefetch = 0 : i64, scratch_operands = 1 : i64, tpu.core_type = #tpu.core_type<tc>, window_params = [{transform_indices = @transform_0, window_bounds = array<i64: 1, 18, 24, 128>}, {pipeline_mode = #tpu.pipeline_mode<synchronous>, transform_indices = @transform_1, window_bounds = array<i64: 18, 128, 128>}, {pipeline_mode = #tpu.pipeline_mode<synchronous>, transform_indices = @transform_2, window_bounds = array<i64: 2, 128>}, {transform_indices = @transform_3, window_bounds = array<i64: 1, 16, 16, 128>}]} {
    %0 = tpu.iota {dimensions = array<i32: 1>} : vector<1x24x128xi32>
    %c16_i32 = arith.constant 16 : i32
    %1 = vector.broadcast %c16_i32 : i32 to vector<1x24x128xi32>
    %2 = arith.cmpi slt, %0, %1 : vector<1x24x128xi32>
    %c0 = arith.constant 0 : index
    %c0_0 = arith.constant 0 : index
    %3 = vector.load %arg3[%c0, %c0_0] : memref<2x128xf32, #tpu.memory_space<vmem>>, vector<1x128xf32>
    %c1 = arith.constant 1 : index
    %c0_1 = arith.constant 0 : index
    %4 = vector.load %arg3[%c1, %c0_1] : memref<2x128xf32, #tpu.memory_space<vmem>>, vector<1x128xf32>
    %cst = arith.constant 0.000000e+00 : f32
    %5 = vector.broadcast %cst : f32 to vector<1x24x128xf32>
    %c0_2 = arith.constant 0 : index
    %c0_3 = arith.constant 0 : index
    %c0_4 = arith.constant 0 : index
    %6 = vector.load %arg5[%c0_2, %c0_3, %c0_4] : memref<18x24x128xf32, #tpu.memory_space<vmem>>, vector<1x24x128xf32>
    tpu.vector_store %arg5[%c0_2, %c0_3, %c0_4], %5 {strides = array<i32>} : memref<18x24x128xf32, #tpu.memory_space<vmem>>, vector<1x24x128xf32>,
    %c17 = arith.constant 17 : index
    %c0_5 = arith.constant 0 : index
    %c0_6 = arith.constant 0 : index
    %7 = vector.load %arg5[%c17, %c0_5, %c0_6] : memref<18x24x128xf32, #tpu.memory_space<vmem>>, vector<1x24x128xf32>
    tpu.vector_store %arg5[%c17, %c0_5, %c0_6], %5 {strides = array<i32>} : memref<18x24x128xf32, #tpu.memory_space<vmem>>, vector<1x24x128xf32>,
    %c0_7 = arith.constant 0 : index
    %c0_8 = arith.constant 0 : index
    %c0_9 = arith.constant 0 : index
    %c0_10 = arith.constant 0 : index
    %8 = vector.load %arg1[%c0_7, %c0_8, %c0_9, %c0_10] : memref<1x18x24x128xf32, #tpu.memory_space<vmem>>, vector<1x4x24x128xf32>
    %9 = vector.shape_cast %8 : vector<1x4x24x128xf32> to vector<4x24x128xf32>
    %10 = vector.shape_cast %9 : vector<4x24x128xf32> to vector<96x128xf32>
    %c1_i32 = arith.constant 1 : i32
    %11 = tpu.dynamic_rotate %10 by %c1_i32 dim 0 : vector<96x128xf32>, i32 -> vector<96x128xf32>
    %12 = arith.truncf %11 : vector<96x128xf32> to vector<96x128xbf16>
    %c0_11 = arith.constant 0 : index
    %c0_12 = arith.constant 0 : index
    %c0_13 = arith.constant 0 : index
    %13 = vector.load %arg2[%c0_11, %c0_12, %c0_13] : memref<18x128x128xbf16, #tpu.memory_space<vmem>>, vector<1x128x128xbf16>
    %14 = vector.shape_cast %13 : vector<1x128x128xbf16> to vector<128x128xbf16>
    %cst_14 = arith.constant dense<0.000000e+00> : vector<96x128xf32>
    %15 = tpu.matmul %12, %14, %cst_14 {dimension_numbers = #tpu.dot_dimension_numbers<[1], [0], [0], [1], [0, 0, 1, 1], [], []>} : vector<96x128xbf16>, vector<128x128xbf16>, vector<96x128xf32> -> vector<96x128xf32>
    %16 = arith.truncf %10 : vector<96x128xf32> to vector<96x128xbf16>
    %c1_15 = arith.constant 1 : index
    %c0_16 = arith.constant 0 : index
    %c0_17 = arith.constant 0 : index
    %17 = vector.load %arg2[%c1_15, %c0_16, %c0_17] : memref<18x128x128xbf16, #tpu.memory_space<vmem>>, vector<1x128x128xbf16>
    %18 = vector.shape_cast %17 : vector<1x128x128xbf16> to vector<128x128xbf16>
    %cst_18 = arith.constant dense<0.000000e+00> : vector<96x128xf32>
    %19 = tpu.matmul %16, %18, %cst_18 {dimension_numbers = #tpu.dot_dimension_numbers<[1], [0], [0], [1], [0, 0, 1, 1], [], []>} : vector<96x128xbf16>, vector<128x128xbf16>, vector<96x128xf32> -> vector<96x128xf32>
    %20 = arith.addf %15, %19 : vector<96x128xf32>
    %c95_i32 = arith.constant 95 : i32
    %21 = tpu.dynamic_rotate %10 by %c95_i32 dim 0 : vector<96x128xf32>, i32 -> vector<96x128xf32>
    %22 = arith.truncf %21 : vector<96x128xf32> to vector<96x128xbf16>
    %c2 = arith.constant 2 : index
    %c0_19 = arith.constant 0 : index
    %c0_20 = arith.constant 0 : index
    %23 = vector.load %arg2[%c2, %c0_19, %c0_20] : memref<18x128x128xbf16, #tpu.memory_space<vmem>>, vector<1x128x128xbf16>
    %24 = vector.shape_cast %23 : vector<1x128x128xbf16> to vector<128x128xbf16>
    %cst_21 = arith.constant dense<0.000000e+00> : vector<96x128xf32>
    %25 = tpu.matmul %22, %24, %cst_21 {dimension_numbers = #tpu.dot_dimension_numbers<[1], [0], [0], [1], [0, 0, 1, 1], [], []>} : vector<96x128xbf16>, vector<128x128xbf16>, vector<96x128xf32> -> vector<96x128xf32>
    %26 = arith.addf %20, %25 : vector<96x128xf32>
    %c0_22 = arith.constant 0 : index
    %c1_23 = arith.constant 1 : index
    %c0_24 = arith.constant 0 : index
    %c0_25 = arith.constant 0 : index
    %27 = vector.load %arg1[%c0_22, %c1_23, %c0_24, %c0_25] : memref<1x18x24x128xf32, #tpu.memory_space<vmem>>, vector<1x4x24x128xf32>
    %28 = vector.shape_cast %27 : vector<1x4x24x128xf32> to vector<4x24x128xf32>
    %29 = vector.shape_cast %28 : vector<4x24x128xf32> to vector<96x128xf32>
    %c1_i32_26 = arith.constant 1 : i32
    %30 = tpu.dynamic_rotate %29 by %c1_i32_26 dim 0 : vector<96x128xf32>, i32 -> vector<96x128xf32>
    %31 = arith.truncf %30 : vector<96x128xf32> to vector<96x128xbf16>
    %c3 = arith.constant 3 : index
    %c0_27 = arith.constant 0 : index
    %c0_28 = arith.constant 0 : index
    %32 = vector.load %arg2[%c3, %c0_27, %c0_28] : memref<18x128x128xbf16, #tpu.memory_space<vmem>>, vector<1x128x128xbf16>
    %33 = vector.shape_cast %32 : vector<1x128x128xbf16> to vector<128x128xbf16>
    %cst_29 = arith.constant dense<0.000000e+00> : vector<96x128xf32>
    %34 = tpu.matmul %31, %33, %cst_29 {dimension_numbers = #tpu.dot_dimension_numbers<[1], [0], [0], [1], [0, 0, 1, 1], [], []>} : vector<96x128xbf16>, vector<128x128xbf16>, vector<96x128xf32> -> vector<96x128xf32>
    %35 = arith.addf %26, %34 : vector<96x128xf32>
    %36 = arith.truncf %29 : vector<96x128xf32> to vector<96x128xbf16>
    %c4 = arith.constant 4 : index
    %c0_30 = arith.constant 0 : index
    %c0_31 = arith.constant 0 : index
    %37 = vector.load %arg2[%c4, %c0_30, %c0_31] : memref<18x128x128xbf16, #tpu.memory_space<vmem>>, vector<1x128x128xbf16>
    %38 = vector.shape_cast %37 : vector<1x128x128xbf16> to vector<128x128xbf16>
    %cst_32 = arith.constant dense<0.000000e+00> : vector<96x128xf32>
    %39 = tpu.matmul %36, %38, %cst_32 {dimension_numbers = #tpu.dot_dimension_numbers<[1], [0], [0], [1], [0, 0, 1, 1], [], []>} : vector<96x128xbf16>, vector<128x128xbf16>, vector<96x128xf32> -> vector<96x128xf32>
    %40 = arith.addf %35, %39 : vector<96x128xf32>
    %c95_i32_33 = arith.constant 95 : i32
    %41 = tpu.dynamic_rotate %29 by %c95_i32_33 dim 0 : vector<96x128xf32>, i32 -> vector<96x128xf32>
    %42 = arith.truncf %41 : vector<96x128xf32> to vector<96x128xbf16>
    %c5 = arith.constant 5 : index
    %c0_34 = arith.constant 0 : index
    %c0_35 = arith.constant 0 : index
    %43 = vector.load %arg2[%c5, %c0_34, %c0_35] : memref<18x128x128xbf16, #tpu.memory_space<vmem>>, vector<1x128x128xbf16>
    %44 = vector.shape_cast %43 : vector<1x128x128xbf16> to vector<128x128xbf16>
    %cst_36 = arith.constant dense<0.000000e+00> : vector<96x128xf32>
    %45 = tpu.matmul %42, %44, %cst_36 {dimension_numbers = #tpu.dot_dimension_numbers<[1], [0], [0], [1], [0, 0, 1, 1], [], []>} : vector<96x128xbf16>, vector<128x128xbf16>, vector<96x128xf32> -> vector<96x128xf32>
    %46 = arith.addf %40, %45 : vector<96x128xf32>
    %c0_37 = arith.constant 0 : index
    %c2_38 = arith.constant 2 : index
    %c0_39 = arith.constant 0 : index
    %c0_40 = arith.constant 0 : index
    %47 = vector.load %arg1[%c0_37, %c2_38, %c0_39, %c0_40] : memref<1x18x24x128xf32, #tpu.memory_space<vmem>>, vector<1x4x24x128xf32>
    %48 = vector.shape_cast %47 : vector<1x4x24x128xf32> to vector<4x24x128xf32>
    %49 = vector.shape_cast %48 : vector<4x24x128xf32> to vector<96x128xf32>
    %c1_i32_41 = arith.constant 1 : i32
    %50 = tpu.dynamic_rotate %49 by %c1_i32_41 dim 0 : vector<96x128xf32>, i32 -> vector<96x128xf32>
    %51 = arith.truncf %50 : vector<96x128xf32> to vector<96x128xbf16>
    %c6 = arith.constant 6 : index
    %c0_42 = arith.constant 0 : index
    %c0_43 = arith.constant 0 : index
    %52 = vector.load %arg2[%c6, %c0_42, %c0_43] : memref<18x128x128xbf16, #tpu.memory_space<vmem>>, vector<1x128x128xbf16>
    %53 = vector.shape_cast %52 : vector<1x128x128xbf16> to vector<128x128xbf16>
    %cst_44 = arith.constant dense<0.000000e+00> : vector<96x128xf32>
    %54 = tpu.matmul %51, %53, %cst_44 {dimension_numbers = #tpu.dot_dimension_numbers<[1], [0], [0], [1], [0, 0, 1, 1], [], []>} : vector<96x128xbf16>, vector<128x128xbf16>, vector<96x128xf32> -> vector<96x128xf32>
    %55 = arith.addf %46, %54 : vector<96x128xf32>
    %56 = arith.truncf %49 : vector<96x128xf32> to vector<96x128xbf16>
    %c7 = arith.constant 7 : index
    %c0_45 = arith.constant 0 : index
    %c0_46 = arith.constant 0 : index
    %57 = vector.load %arg2[%c7, %c0_45, %c0_46] : memref<18x128x128xbf16, #tpu.memory_space<vmem>>, vector<1x128x128xbf16>
    %58 = vector.shape_cast %57 : vector<1x128x128xbf16> to vector<128x128xbf16>
    %cst_47 = arith.constant dense<0.000000e+00> : vector<96x128xf32>
    %59 = tpu.matmul %56, %58, %cst_47 {dimension_numbers = #tpu.dot_dimension_numbers<[1], [0], [0], [1], [0, 0, 1, 1], [], []>} : vector<96x128xbf16>, vector<128x128xbf16>, vector<96x128xf32> -> vector<96x128xf32>
    %60 = arith.addf %55, %59 : vector<96x128xf32>
    %c95_i32_48 = arith.constant 95 : i32
    %61 = tpu.dynamic_rotate %49 by %c95_i32_48 dim 0 : vector<96x128xf32>, i32 -> vector<96x128xf32>
    %62 = arith.truncf %61 : vector<96x128xf32> to vector<96x128xbf16>
    %c8 = arith.constant 8 : index
    %c0_49 = arith.constant 0 : index
    %c0_50 = arith.constant 0 : index
    %63 = vector.load %arg2[%c8, %c0_49, %c0_50] : memref<18x128x128xbf16, #tpu.memory_space<vmem>>, vector<1x128x128xbf16>
    %64 = vector.shape_cast %63 : vector<1x128x128xbf16> to vector<128x128xbf16>
    %cst_51 = arith.constant dense<0.000000e+00> : vector<96x128xf32>
    %65 = tpu.matmul %62, %64, %cst_51 {dimension_numbers = #tpu.dot_dimension_numbers<[1], [0], [0], [1], [0, 0, 1, 1], [], []>} : vector<96x128xbf16>, vector<128x128xbf16>, vector<96x128xf32> -> vector<96x128xf32>
    %66 = arith.addf %60, %65 : vector<96x128xf32>
    %67 = vector.broadcast %3 : vector<1x128xf32> to vector<96x128xf32>
    %68 = arith.addf %66, %67 : vector<96x128xf32>
    %cst_52 = arith.constant 0.000000e+00 : f32
    %69 = vector.broadcast %cst_52 : f32 to vector<96x128xf32>
    %70 = arith.maximumf %68, %69 : vector<96x128xf32>
    %71 = vector.shape_cast %70 : vector<96x128xf32> to vector<4x24x128xf32>
    %cst_53 = arith.constant 0.000000e+00 : f32
    %72 = vector.shape_cast %2 : vector<1x24x128xi1> to vector<1x24x128xi1>
    %73 = vector.broadcast %72 : vector<1x24x128xi1> to vector<4x24x128xi1>
    %74 = vector.broadcast %cst_53 : f32 to vector<4x24x128xf32>
    %75 = arith.select %73, %71, %74 : vector<4x24x128xi1>, vector<4x24x128xf32>
    %c1_54 = arith.constant 1 : index
    %c0_55 = arith.constant 0 : index
    %c0_56 = arith.constant 0 : index
    %76 = vector.load %arg5[%c1_54, %c0_55, %c0_56] : memref<18x24x128xf32, #tpu.memory_space<vmem>>, vector<4x24x128xf32>
    tpu.vector_store %arg5[%c1_54, %c0_55, %c0_56], %75 {strides = array<i32>} : memref<18x24x128xf32, #tpu.memory_space<vmem>>, vector<4x24x128xf32>,
    %c0_57 = arith.constant 0 : index
    %c4_58 = arith.constant 4 : index
    %c0_59 = arith.constant 0 : index
    %c0_60 = arith.constant 0 : index
    %77 = vector.load %arg1[%c0_57, %c4_58, %c0_59, %c0_60] : memref<1x18x24x128xf32, #tpu.memory_space<vmem>>, vector<1x4x24x128xf32>
    %78 = vector.shape_cast %77 : vector<1x4x24x128xf32> to vector<4x24x128xf32>
    %79 = vector.shape_cast %78 : vector<4x24x128xf32> to vector<96x128xf32>
    %c1_i32_61 = arith.constant 1 : i32
    %80 = tpu.dynamic_rotate %79 by %c1_i32_61 dim 0 : vector<96x128xf32>, i32 -> vector<96x128xf32>
    %81 = arith.truncf %80 : vector<96x128xf32> to vector<96x128xbf16>
    %c0_62 = arith.constant 0 : index
    %c0_63 = arith.constant 0 : index
    %c0_64 = arith.constant 0 : index
    %82 = vector.load %arg2[%c0_62, %c0_63, %c0_64] : memref<18x128x128xbf16, #tpu.memory_space<vmem>>, vector<1x128x128xbf16>
    %83 = vector.shape_cast %82 : vector<1x128x128xbf16> to vector<128x128xbf16>
    %cst_65 = arith.constant dense<0.000000e+00> : vector<96x128xf32>
    %84 = tpu.matmul %81, %83, %cst_65 {dimension_numbers = #tpu.dot_dimension_numbers<[1], [0], [0], [1], [0, 0, 1, 1], [], []>} : vector<96x128xbf16>, vector<128x128xbf16>, vector<96x128xf32> -> vector<96x128xf32>
    %85 = arith.truncf %79 : vector<96x128xf32> to vector<96x128xbf16>
    %c1_66 = arith.constant 1 : index
    %c0_67 = arith.constant 0 : index
    %c0_68 = arith.constant 0 : index
    %86 = vector.load %arg2[%c1_66, %c0_67, %c0_68] : memref<18x128x128xbf16, #tpu.memory_space<vmem>>, vector<1x128x128xbf16>
    %87 = vector.shape_cast %86 : vector<1x128x128xbf16> to vector<128x128xbf16>
    %cst_69 = arith.constant dense<0.000000e+00> : vector<96x128xf32>
    %88 = tpu.matmul %85, %87, %cst_69 {dimension_numbers = #tpu.dot_dimension_numbers<[1], [0], [0], [1], [0, 0, 1, 1], [], []>} : vector<96x128xbf16>, vector<128x128xbf16>, vector<96x128xf32> -> vector<96x128xf32>
    %89 = arith.addf %84, %88 : vector<96x128xf32>
    %c95_i32_70 = arith.constant 95 : i32
    %90 = tpu.dynamic_rotate %79 by %c95_i32_70 dim 0 : vector<96x128xf32>, i32 -> vector<96x128xf32>
    %91 = arith.truncf %90 : vector<96x128xf32> to vector<96x128xbf16>
    %c2_71 = arith.constant 2 : index
    %c0_72 = arith.constant 0 : index
    %c0_73 = arith.constant 0 : index
    %92 = vector.load %arg2[%c2_71, %c0_72, %c0_73] : memref<18x128x128xbf16, #tpu.memory_space<vmem>>, vector<1x128x128xbf16>
    %93 = vector.shape_cast %92 : vector<1x128x128xbf16> to vector<128x128xbf16>
    %cst_74 = arith.constant dense<0.000000e+00> : vector<96x128xf32>
    %94 = tpu.matmul %91, %93, %cst_74 {dimension_numbers = #tpu.dot_dimension_numbers<[1], [0], [0], [1], [0, 0, 1, 1], [], []>} : vector<96x128xbf16>, vector<128x128xbf16>, vector<96x128xf32> -> vector<96x128xf32>
    %95 = arith.addf %89, %94 : vector<96x128xf32>
    %c0_75 = arith.constant 0 : index
    %c5_76 = arith.constant 5 : index
    %c0_77 = arith.constant 0 : index
    %c0_78 = arith.constant 0 : index
    %96 = vector.load %arg1[%c0_75, %c5_76, %c0_77, %c0_78] : memref<1x18x24x128xf32, #tpu.memory_space<vmem>>, vector<1x4x24x128xf32>
    %97 = vector.shape_cast %96 : vector<1x4x24x128xf32> to vector<4x24x128xf32>
    %98 = vector.shape_cast %97 : vector<4x24x128xf32> to vector<96x128xf32>
    %c1_i32_79 = arith.constant 1 : i32
    %99 = tpu.dynamic_rotate %98 by %c1_i32_79 dim 0 : vector<96x128xf32>, i32 -> vector<96x128xf32>
    %100 = arith.truncf %99 : vector<96x128xf32> to vector<96x128xbf16>
    %c3_80 = arith.constant 3 : index
    %c0_81 = arith.constant 0 : index
    %c0_82 = arith.constant 0 : index
    %101 = vector.load %arg2[%c3_80, %c0_81, %c0_82] : memref<18x128x128xbf16, #tpu.memory_space<vmem>>, vector<1x128x128xbf16>
    %102 = vector.shape_cast %101 : vector<1x128x128xbf16> to vector<128x128xbf16>
    %cst_83 = arith.constant dense<0.000000e+00> : vector<96x128xf32>
    %103 = tpu.matmul %100, %102, %cst_83 {dimension_numbers = #tpu.dot_dimension_numbers<[1], [0], [0], [1], [0, 0, 1, 1], [], []>} : vector<96x128xbf16>, vector<128x128xbf16>, vector<96x128xf32> -> vector<96x128xf32>
    %104 = arith.addf %95, %103 : vector<96x128xf32>
    %105 = arith.truncf %98 : vector<96x128xf32> to vector<96x128xbf16>
    %c4_84 = arith.constant 4 : index
    %c0_85 = arith.constant 0 : index
    %c0_86 = arith.constant 0 : index
    %106 = vector.load %arg2[%c4_84, %c0_85, %c0_86] : memref<18x128x128xbf16, #tpu.memory_space<vmem>>, vector<1x128x128xbf16>
    %107 = vector.shape_cast %106 : vector<1x128x128xbf16> to vector<128x128xbf16>
    %cst_87 = arith.constant dense<0.000000e+00> : vector<96x128xf32>
    %108 = tpu.matmul %105, %107, %cst_87 {dimension_numbers = #tpu.dot_dimension_numbers<[1], [0], [0], [1], [0, 0, 1, 1], [], []>} : vector<96x128xbf16>, vector<128x128xbf16>, vector<96x128xf32> -> vector<96x128xf32>
    %109 = arith.addf %104, %108 : vector<96x128xf32>
    %c95_i32_88 = arith.constant 95 : i32
    %110 = tpu.dynamic_rotate %98 by %c95_i32_88 dim 0 : vector<96x128xf32>, i32 -> vector<96x128xf32>
    %111 = arith.truncf %110 : vector<96x128xf32> to vector<96x128xbf16>
    %c5_89 = arith.constant 5 : index
    %c0_90 = arith.constant 0 : index
    %c0_91 = arith.constant 0 : index
    %112 = vector.load %arg2[%c5_89, %c0_90, %c0_91] : memref<18x128x128xbf16, #tpu.memory_space<vmem>>, vector<1x128x128xbf16>
    %113 = vector.shape_cast %112 : vector<1x128x128xbf16> to vector<128x128xbf16>
    %cst_92 = arith.constant dense<0.000000e+00> : vector<96x128xf32>
    %114 = tpu.matmul %111, %113, %cst_92 {dimension_numbers = #tpu.dot_dimension_numbers<[1], [0], [0], [1], [0, 0, 1, 1], [], []>} : vector<96x128xbf16>, vector<128x128xbf16>, vector<96x128xf32> -> vector<96x128xf32>
    %115 = arith.addf %109, %114 : vector<96x128xf32>
    %c0_93 = arith.constant 0 : index
    %c6_94 = arith.constant 6 : index
    %c0_95 = arith.constant 0 : index
    %c0_96 = arith.constant 0 : index
    %116 = vector.load %arg1[%c0_93, %c6_94, %c0_95, %c0_96] : memref<1x18x24x128xf32, #tpu.memory_space<vmem>>, vector<1x4x24x128xf32>
    %117 = vector.shape_cast %116 : vector<1x4x24x128xf32> to vector<4x24x128xf32>
    %118 = vector.shape_cast %117 : vector<4x24x128xf32> to vector<96x128xf32>
    %c1_i32_97 = arith.constant 1 : i32
    %119 = tpu.dynamic_rotate %118 by %c1_i32_97 dim 0 : vector<96x128xf32>, i32 -> vector<96x128xf32>
    %120 = arith.truncf %119 : vector<96x128xf32> to vector<96x128xbf16>
    %c6_98 = arith.constant 6 : index
    %c0_99 = arith.constant 0 : index
    %c0_100 = arith.constant 0 : index
    %121 = vector.load %arg2[%c6_98, %c0_99, %c0_100] : memref<18x128x128xbf16, #tpu.memory_space<vmem>>, vector<1x128x128xbf16>
    %122 = vector.shape_cast %121 : vector<1x128x128xbf16> to vector<128x128xbf16>
    %cst_101 = arith.constant dense<0.000000e+00> : vector<96x128xf32>
    %123 = tpu.matmul %120, %122, %cst_101 {dimension_numbers = #tpu.dot_dimension_numbers<[1], [0], [0], [1], [0, 0, 1, 1], [], []>} : vector<96x128xbf16>, vector<128x128xbf16>, vector<96x128xf32> -> vector<96x128xf32>
    %124 = arith.addf %115, %123 : vector<96x128xf32>
    %125 = arith.truncf %118 : vector<96x128xf32> to vector<96x128xbf16>
    %c7_102 = arith.constant 7 : index
    %c0_103 = arith.constant 0 : index
    %c0_104 = arith.constant 0 : index
    %126 = vector.load %arg2[%c7_102, %c0_103, %c0_104] : memref<18x128x128xbf16, #tpu.memory_space<vmem>>, vector<1x128x128xbf16>
    %127 = vector.shape_cast %126 : vector<1x128x128xbf16> to vector<128x128xbf16>
    %cst_105 = arith.constant dense<0.000000e+00> : vector<96x128xf32>
    %128 = tpu.matmul %125, %127, %cst_105 {dimension_numbers = #tpu.dot_dimension_numbers<[1], [0], [0], [1], [0, 0, 1, 1], [], []>} : vector<96x128xbf16>, vector<128x128xbf16>, vector<96x128xf32> -> vector<96x128xf32>
    %129 = arith.addf %124, %128 : vector<96x128xf32>
    %c95_i32_106 = arith.constant 95 : i32
    %130 = tpu.dynamic_rotate %118 by %c95_i32_106 dim 0 : vector<96x128xf32>, i32 -> vector<96x128xf32>
    %131 = arith.truncf %130 : vector<96x128xf32> to vector<96x128xbf16>
    %c8_107 = arith.constant 8 : index
    %c0_108 = arith.constant 0 : index
    %c0_109 = arith.constant 0 : index
    %132 = vector.load %arg2[%c8_107, %c0_108, %c0_109] : memref<18x128x128xbf16, #tpu.memory_space<vmem>>, vector<1x128x128xbf16>
    %133 = vector.shape_cast %132 : vector<1x128x128xbf16> to vector<128x128xbf16>
    %cst_110 = arith.constant dense<0.000000e+00> : vector<96x128xf32>
    %134 = tpu.matmul %131, %133, %cst_110 {dimension_numbers = #tpu.dot_dimension_numbers<[1], [0], [0], [1], [0, 0, 1, 1], [], []>} : vector<96x128xbf16>, vector<128x128xbf16>, vector<96x128xf32> -> vector<96x128xf32>
    %135 = arith.addf %129, %134 : vector<96x128xf32>
    %136 = vector.broadcast %3 : vector<1x128xf32> to vector<96x128xf32>
    %137 = arith.addf %135, %136 : vector<96x128xf32>
    %cst_111 = arith.constant 0.000000e+00 : f32
    %138 = vector.broadcast %cst_111 : f32 to vector<96x128xf32>
    %139 = arith.maximumf %137, %138 : vector<96x128xf32>
    %140 = vector.shape_cast %139 : vector<96x128xf32> to vector<4x24x128xf32>
    %cst_112 = arith.constant 0.000000e+00 : f32
    %141 = vector.shape_cast %2 : vector<1x24x128xi1> to vector<1x24x128xi1>
    %142 = vector.broadcast %141 : vector<1x24x128xi1> to vector<4x24x128xi1>
    %143 = vector.broadcast %cst_112 : f32 to vector<4x24x128xf32>
    %144 = arith.select %142, %140, %143 : vector<4x24x128xi1>, vector<4x24x128xf32>
    %c5_113 = arith.constant 5 : index
    %c0_114 = arith.constant 0 : index
    %c0_115 = arith.constant 0 : index
    %145 = vector.load %arg5[%c5_113, %c0_114, %c0_115] : memref<18x24x128xf32, #tpu.memory_space<vmem>>, vector<4x24x128xf32>
    tpu.vector_store %arg5[%c5_113, %c0_114, %c0_115], %144 {strides = array<i32>} : memref<18x24x128xf32, #tpu.memory_space<vmem>>, vector<4x24x128xf32>,
    %c0_116 = arith.constant 0 : index
    %c8_117 = arith.constant 8 : index
    %c0_118 = arith.constant 0 : index
    %c0_119 = arith.constant 0 : index
    %146 = vector.load %arg1[%c0_116, %c8_117, %c0_118, %c0_119] : memref<1x18x24x128xf32, #tpu.memory_space<vmem>>, vector<1x4x24x128xf32>
    %147 = vector.shape_cast %146 : vector<1x4x24x128xf32> to vector<4x24x128xf32>
    %148 = vector.shape_cast %147 : vector<4x24x128xf32> to vector<96x128xf32>
    %c1_i32_120 = arith.constant 1 : i32
    %149 = tpu.dynamic_rotate %148 by %c1_i32_120 dim 0 : vector<96x128xf32>, i32 -> vector<96x128xf32>
    %150 = arith.truncf %149 : vector<96x128xf32> to vector<96x128xbf16>
    %c0_121 = arith.constant 0 : index
    %c0_122 = arith.constant 0 : index
    %c0_123 = arith.constant 0 : index
    %151 = vector.load %arg2[%c0_121, %c0_122, %c0_123] : memref<18x128x128xbf16, #tpu.memory_space<vmem>>, vector<1x128x128xbf16>
    %152 = vector.shape_cast %151 : vector<1x128x128xbf16> to vector<128x128xbf16>
    %cst_124 = arith.constant dense<0.000000e+00> : vector<96x128xf32>
    %153 = tpu.matmul %150, %152, %cst_124 {dimension_numbers = #tpu.dot_dimension_numbers<[1], [0], [0], [1], [0, 0, 1, 1], [], []>} : vector<96x128xbf16>, vector<128x128xbf16>, vector<96x128xf32> -> vector<96x128xf32>
    %154 = arith.truncf %148 : vector<96x128xf32> to vector<96x128xbf16>
    %c1_125 = arith.constant 1 : index
    %c0_126 = arith.constant 0 : index
    %c0_127 = arith.constant 0 : index
    %155 = vector.load %arg2[%c1_125, %c0_126, %c0_127] : memref<18x128x128xbf16, #tpu.memory_space<vmem>>, vector<1x128x128xbf16>
    %156 = vector.shape_cast %155 : vector<1x128x128xbf16> to vector<128x128xbf16>
    %cst_128 = arith.constant dense<0.000000e+00> : vector<96x128xf32>
    %157 = tpu.matmul %154, %156, %cst_128 {dimension_numbers = #tpu.dot_dimension_numbers<[1], [0], [0], [1], [0, 0, 1, 1], [], []>} : vector<96x128xbf16>, vector<128x128xbf16>, vector<96x128xf32> -> vector<96x128xf32>
    %158 = arith.addf %153, %157 : vector<96x128xf32>
    %c95_i32_129 = arith.constant 95 : i32
    %159 = tpu.dynamic_rotate %148 by %c95_i32_129 dim 0 : vector<96x128xf32>, i32 -> vector<96x128xf32>
    %160 = arith.truncf %159 : vector<96x128xf32> to vector<96x128xbf16>
    %c2_130 = arith.constant 2 : index
    %c0_131 = arith.constant 0 : index
    %c0_132 = arith.constant 0 : index
    %161 = vector.load %arg2[%c2_130, %c0_131, %c0_132] : memref<18x128x128xbf16, #tpu.memory_space<vmem>>, vector<1x128x128xbf16>
    %162 = vector.shape_cast %161 : vector<1x128x128xbf16> to vector<128x128xbf16>
    %cst_133 = arith.constant dense<0.000000e+00> : vector<96x128xf32>
    %163 = tpu.matmul %160, %162, %cst_133 {dimension_numbers = #tpu.dot_dimension_numbers<[1], [0], [0], [1], [0, 0, 1, 1], [], []>} : vector<96x128xbf16>, vector<128x128xbf16>, vector<96x128xf32> -> vector<96x128xf32>
    %164 = arith.addf %158, %163 : vector<96x128xf32>
    %c0_134 = arith.constant 0 : index
    %c9 = arith.constant 9 : index
    %c0_135 = arith.constant 0 : index
    %c0_136 = arith.constant 0 : index
    %165 = vector.load %arg1[%c0_134, %c9, %c0_135, %c0_136] : memref<1x18x24x128xf32, #tpu.memory_space<vmem>>, vector<1x4x24x128xf32>
    %166 = vector.shape_cast %165 : vector<1x4x24x128xf32> to vector<4x24x128xf32>
    %167 = vector.shape_cast %166 : vector<4x24x128xf32> to vector<96x128xf32>
    %c1_i32_137 = arith.constant 1 : i32
    %168 = tpu.dynamic_rotate %167 by %c1_i32_137 dim 0 : vector<96x128xf32>, i32 -> vector<96x128xf32>
    %169 = arith.truncf %168 : vector<96x128xf32> to vector<96x128xbf16>
    %c3_138 = arith.constant 3 : index
    %c0_139 = arith.constant 0 : index
    %c0_140 = arith.constant 0 : index
    %170 = vector.load %arg2[%c3_138, %c0_139, %c0_140] : memref<18x128x128xbf16, #tpu.memory_space<vmem>>, vector<1x128x128xbf16>
    %171 = vector.shape_cast %170 : vector<1x128x128xbf16> to vector<128x128xbf16>
    %cst_141 = arith.constant dense<0.000000e+00> : vector<96x128xf32>
    %172 = tpu.matmul %169, %171, %cst_141 {dimension_numbers = #tpu.dot_dimension_numbers<[1], [0], [0], [1], [0, 0, 1, 1], [], []>} : vector<96x128xbf16>, vector<128x128xbf16>, vector<96x128xf32> -> vector<96x128xf32>
    %173 = arith.addf %164, %172 : vector<96x128xf32>
    %174 = arith.truncf %167 : vector<96x128xf32> to vector<96x128xbf16>
    %c4_142 = arith.constant 4 : index
    %c0_143 = arith.constant 0 : index
    %c0_144 = arith.constant 0 : index
    %175 = vector.load %arg2[%c4_142, %c0_143, %c0_144] : memref<18x128x128xbf16, #tpu.memory_space<vmem>>, vector<1x128x128xbf16>
    %176 = vector.shape_cast %175 : vector<1x128x128xbf16> to vector<128x128xbf16>
    %cst_145 = arith.constant dense<0.000000e+00> : vector<96x128xf32>
    %177 = tpu.matmul %174, %176, %cst_145 {dimension_numbers = #tpu.dot_dimension_numbers<[1], [0], [0], [1], [0, 0, 1, 1], [], []>} : vector<96x128xbf16>, vector<128x128xbf16>, vector<96x128xf32> -> vector<96x128xf32>
    %178 = arith.addf %173, %177 : vector<96x128xf32>
    %c95_i32_146 = arith.constant 95 : i32
    %179 = tpu.dynamic_rotate %167 by %c95_i32_146 dim 0 : vector<96x128xf32>, i32 -> vector<96x128xf32>
    %180 = arith.truncf %179 : vector<96x128xf32> to vector<96x128xbf16>
    %c5_147 = arith.constant 5 : index
    %c0_148 = arith.constant 0 : index
    %c0_149 = arith.constant 0 : index
    %181 = vector.load %arg2[%c5_147, %c0_148, %c0_149] : memref<18x128x128xbf16, #tpu.memory_space<vmem>>, vector<1x128x128xbf16>
    %182 = vector.shape_cast %181 : vector<1x128x128xbf16> to vector<128x128xbf16>
    %cst_150 = arith.constant dense<0.000000e+00> : vector<96x128xf32>
    %183 = tpu.matmul %180, %182, %cst_150 {dimension_numbers = #tpu.dot_dimension_numbers<[1], [0], [0], [1], [0, 0, 1, 1], [], []>} : vector<96x128xbf16>, vector<128x128xbf16>, vector<96x128xf32> -> vector<96x128xf32>
    %184 = arith.addf %178, %183 : vector<96x128xf32>
    %c0_151 = arith.constant 0 : index
    %c10 = arith.constant 10 : index
    %c0_152 = arith.constant 0 : index
    %c0_153 = arith.constant 0 : index
    %185 = vector.load %arg1[%c0_151, %c10, %c0_152, %c0_153] : memref<1x18x24x128xf32, #tpu.memory_space<vmem>>, vector<1x4x24x128xf32>
    %186 = vector.shape_cast %185 : vector<1x4x24x128xf32> to vector<4x24x128xf32>
    %187 = vector.shape_cast %186 : vector<4x24x128xf32> to vector<96x128xf32>
    %c1_i32_154 = arith.constant 1 : i32
    %188 = tpu.dynamic_rotate %187 by %c1_i32_154 dim 0 : vector<96x128xf32>, i32 -> vector<96x128xf32>
    %189 = arith.truncf %188 : vector<96x128xf32> to vector<96x128xbf16>
    %c6_155 = arith.constant 6 : index
    %c0_156 = arith.constant 0 : index
    %c0_157 = arith.constant 0 : index
    %190 = vector.load %arg2[%c6_155, %c0_156, %c0_157] : memref<18x128x128xbf16, #tpu.memory_space<vmem>>, vector<1x128x128xbf16>
    %191 = vector.shape_cast %190 : vector<1x128x128xbf16> to vector<128x128xbf16>
    %cst_158 = arith.constant dense<0.000000e+00> : vector<96x128xf32>
    %192 = tpu.matmul %189, %191, %cst_158 {dimension_numbers = #tpu.dot_dimension_numbers<[1], [0], [0], [1], [0, 0, 1, 1], [], []>} : vector<96x128xbf16>, vector<128x128xbf16>, vector<96x128xf32> -> vector<96x128xf32>
    %193 = arith.addf %184, %192 : vector<96x128xf32>
    %194 = arith.truncf %187 : vector<96x128xf32> to vector<96x128xbf16>
    %c7_159 = arith.constant 7 : index
    %c0_160 = arith.constant 0 : index
    %c0_161 = arith.constant 0 : index
    %195 = vector.load %arg2[%c7_159, %c0_160, %c0_161] : memref<18x128x128xbf16, #tpu.memory_space<vmem>>, vector<1x128x128xbf16>
    %196 = vector.shape_cast %195 : vector<1x128x128xbf16> to vector<128x128xbf16>
    %cst_162 = arith.constant dense<0.000000e+00> : vector<96x128xf32>
    %197 = tpu.matmul %194, %196, %cst_162 {dimension_numbers = #tpu.dot_dimension_numbers<[1], [0], [0], [1], [0, 0, 1, 1], [], []>} : vector<96x128xbf16>, vector<128x128xbf16>, vector<96x128xf32> -> vector<96x128xf32>
    %198 = arith.addf %193, %197 : vector<96x128xf32>
    %c95_i32_163 = arith.constant 95 : i32
    %199 = tpu.dynamic_rotate %187 by %c95_i32_163 dim 0 : vector<96x128xf32>, i32 -> vector<96x128xf32>
    %200 = arith.truncf %199 : vector<96x128xf32> to vector<96x128xbf16>
    %c8_164 = arith.constant 8 : index
    %c0_165 = arith.constant 0 : index
    %c0_166 = arith.constant 0 : index
    %201 = vector.load %arg2[%c8_164, %c0_165, %c0_166] : memref<18x128x128xbf16, #tpu.memory_space<vmem>>, vector<1x128x128xbf16>
    %202 = vector.shape_cast %201 : vector<1x128x128xbf16> to vector<128x128xbf16>
    %cst_167 = arith.constant dense<0.000000e+00> : vector<96x128xf32>
    %203 = tpu.matmul %200, %202, %cst_167 {dimension_numbers = #tpu.dot_dimension_numbers<[1], [0], [0], [1], [0, 0, 1, 1], [], []>} : vector<96x128xbf16>, vector<128x128xbf16>, vector<96x128xf32> -> vector<96x128xf32>
    %204 = arith.addf %198, %203 : vector<96x128xf32>
    %205 = vector.broadcast %3 : vector<1x128xf32> to vector<96x128xf32>
    %206 = arith.addf %204, %205 : vector<96x128xf32>
    %cst_168 = arith.constant 0.000000e+00 : f32
    %207 = vector.broadcast %cst_168 : f32 to vector<96x128xf32>
    %208 = arith.maximumf %206, %207 : vector<96x128xf32>
    %209 = vector.shape_cast %208 : vector<96x128xf32> to vector<4x24x128xf32>
    %cst_169 = arith.constant 0.000000e+00 : f32
    %210 = vector.shape_cast %2 : vector<1x24x128xi1> to vector<1x24x128xi1>
    %211 = vector.broadcast %210 : vector<1x24x128xi1> to vector<4x24x128xi1>
    %212 = vector.broadcast %cst_169 : f32 to vector<4x24x128xf32>
    %213 = arith.select %211, %209, %212 : vector<4x24x128xi1>, vector<4x24x128xf32>
    %c9_170 = arith.constant 9 : index
    %c0_171 = arith.constant 0 : index
    %c0_172 = arith.constant 0 : index
    %214 = vector.load %arg5[%c9_170, %c0_171, %c0_172] : memref<18x24x128xf32, #tpu.memory_space<vmem>>, vector<4x24x128xf32>
    tpu.vector_store %arg5[%c9_170, %c0_171, %c0_172], %213 {strides = array<i32>} : memref<18x24x128xf32, #tpu.memory_space<vmem>>, vector<4x24x128xf32>,
    %c0_173 = arith.constant 0 : index
    %c12 = arith.constant 12 : index
    %c0_174 = arith.constant 0 : index
    %c0_175 = arith.constant 0 : index
    %215 = vector.load %arg1[%c0_173, %c12, %c0_174, %c0_175] : memref<1x18x24x128xf32, #tpu.memory_space<vmem>>, vector<1x4x24x128xf32>
    %216 = vector.shape_cast %215 : vector<1x4x24x128xf32> to vector<4x24x128xf32>
    %217 = vector.shape_cast %216 : vector<4x24x128xf32> to vector<96x128xf32>
    %c1_i32_176 = arith.constant 1 : i32
    %218 = tpu.dynamic_rotate %217 by %c1_i32_176 dim 0 : vector<96x128xf32>, i32 -> vector<96x128xf32>
    %219 = arith.truncf %218 : vector<96x128xf32> to vector<96x128xbf16>
    %c0_177 = arith.constant 0 : index
    %c0_178 = arith.constant 0 : index
    %c0_179 = arith.constant 0 : index
    %220 = vector.load %arg2[%c0_177, %c0_178, %c0_179] : memref<18x128x128xbf16, #tpu.memory_space<vmem>>, vector<1x128x128xbf16>
    %221 = vector.shape_cast %220 : vector<1x128x128xbf16> to vector<128x128xbf16>
    %cst_180 = arith.constant dense<0.000000e+00> : vector<96x128xf32>
    %222 = tpu.matmul %219, %221, %cst_180 {dimension_numbers = #tpu.dot_dimension_numbers<[1], [0], [0], [1], [0, 0, 1, 1], [], []>} : vector<96x128xbf16>, vector<128x128xbf16>, vector<96x128xf32> -> vector<96x128xf32>
    %223 = arith.truncf %217 : vector<96x128xf32> to vector<96x128xbf16>
    %c1_181 = arith.constant 1 : index
    %c0_182 = arith.constant 0 : index
    %c0_183 = arith.constant 0 : index
    %224 = vector.load %arg2[%c1_181, %c0_182, %c0_183] : memref<18x128x128xbf16, #tpu.memory_space<vmem>>, vector<1x128x128xbf16>
    %225 = vector.shape_cast %224 : vector<1x128x128xbf16> to vector<128x128xbf16>
    %cst_184 = arith.constant dense<0.000000e+00> : vector<96x128xf32>
    %226 = tpu.matmul %223, %225, %cst_184 {dimension_numbers = #tpu.dot_dimension_numbers<[1], [0], [0], [1], [0, 0, 1, 1], [], []>} : vector<96x128xbf16>, vector<128x128xbf16>, vector<96x128xf32> -> vector<96x128xf32>
    %227 = arith.addf %222, %226 : vector<96x128xf32>
    %c95_i32_185 = arith.constant 95 : i32
    %228 = tpu.dynamic_rotate %217 by %c95_i32_185 dim 0 : vector<96x128xf32>, i32 -> vector<96x128xf32>
    %229 = arith.truncf %228 : vector<96x128xf32> to vector<96x128xbf16>
    %c2_186 = arith.constant 2 : index
    %c0_187 = arith.constant 0 : index
    %c0_188 = arith.constant 0 : index
    %230 = vector.load %arg2[%c2_186, %c0_187, %c0_188] : memref<18x128x128xbf16, #tpu.memory_space<vmem>>, vector<1x128x128xbf16>
    %231 = vector.shape_cast %230 : vector<1x128x128xbf16> to vector<128x128xbf16>
    %cst_189 = arith.constant dense<0.000000e+00> : vector<96x128xf32>
    %232 = tpu.matmul %229, %231, %cst_189 {dimension_numbers = #tpu.dot_dimension_numbers<[1], [0], [0], [1], [0, 0, 1, 1], [], []>} : vector<96x128xbf16>, vector<128x128xbf16>, vector<96x128xf32> -> vector<96x128xf32>
    %233 = arith.addf %227, %232 : vector<96x128xf32>
    %c0_190 = arith.constant 0 : index
    %c13 = arith.constant 13 : index
    %c0_191 = arith.constant 0 : index
    %c0_192 = arith.constant 0 : index
    %234 = vector.load %arg1[%c0_190, %c13, %c0_191, %c0_192] : memref<1x18x24x128xf32, #tpu.memory_space<vmem>>, vector<1x4x24x128xf32>
    %235 = vector.shape_cast %234 : vector<1x4x24x128xf32> to vector<4x24x128xf32>
    %236 = vector.shape_cast %235 : vector<4x24x128xf32> to vector<96x128xf32>
    %c1_i32_193 = arith.constant 1 : i32
    %237 = tpu.dynamic_rotate %236 by %c1_i32_193 dim 0 : vector<96x128xf32>, i32 -> vector<96x128xf32>
    %238 = arith.truncf %237 : vector<96x128xf32> to vector<96x128xbf16>
    %c3_194 = arith.constant 3 : index
    %c0_195 = arith.constant 0 : index
    %c0_196 = arith.constant 0 : index
    %239 = vector.load %arg2[%c3_194, %c0_195, %c0_196] : memref<18x128x128xbf16, #tpu.memory_space<vmem>>, vector<1x128x128xbf16>
    %240 = vector.shape_cast %239 : vector<1x128x128xbf16> to vector<128x128xbf16>
    %cst_197 = arith.constant dense<0.000000e+00> : vector<96x128xf32>
    %241 = tpu.matmul %238, %240, %cst_197 {dimension_numbers = #tpu.dot_dimension_numbers<[1], [0], [0], [1], [0, 0, 1, 1], [], []>} : vector<96x128xbf16>, vector<128x128xbf16>, vector<96x128xf32> -> vector<96x128xf32>
    %242 = arith.addf %233, %241 : vector<96x128xf32>
    %243 = arith.truncf %236 : vector<96x128xf32> to vector<96x128xbf16>
    %c4_198 = arith.constant 4 : index
    %c0_199 = arith.constant 0 : index
    %c0_200 = arith.constant 0 : index
    %244 = vector.load %arg2[%c4_198, %c0_199, %c0_200] : memref<18x128x128xbf16, #tpu.memory_space<vmem>>, vector<1x128x128xbf16>
    %245 = vector.shape_cast %244 : vector<1x128x128xbf16> to vector<128x128xbf16>
    %cst_201 = arith.constant dense<0.000000e+00> : vector<96x128xf32>
    %246 = tpu.matmul %243, %245, %cst_201 {dimension_numbers = #tpu.dot_dimension_numbers<[1], [0], [0], [1], [0, 0, 1, 1], [], []>} : vector<96x128xbf16>, vector<128x128xbf16>, vector<96x128xf32> -> vector<96x128xf32>
    %247 = arith.addf %242, %246 : vector<96x128xf32>
    %c95_i32_202 = arith.constant 95 : i32
    %248 = tpu.dynamic_rotate %236 by %c95_i32_202 dim 0 : vector<96x128xf32>, i32 -> vector<96x128xf32>
    %249 = arith.truncf %248 : vector<96x128xf32> to vector<96x128xbf16>
    %c5_203 = arith.constant 5 : index
    %c0_204 = arith.constant 0 : index
    %c0_205 = arith.constant 0 : index
    %250 = vector.load %arg2[%c5_203, %c0_204, %c0_205] : memref<18x128x128xbf16, #tpu.memory_space<vmem>>, vector<1x128x128xbf16>
    %251 = vector.shape_cast %250 : vector<1x128x128xbf16> to vector<128x128xbf16>
    %cst_206 = arith.constant dense<0.000000e+00> : vector<96x128xf32>
    %252 = tpu.matmul %249, %251, %cst_206 {dimension_numbers = #tpu.dot_dimension_numbers<[1], [0], [0], [1], [0, 0, 1, 1], [], []>} : vector<96x128xbf16>, vector<128x128xbf16>, vector<96x128xf32> -> vector<96x128xf32>
    %253 = arith.addf %247, %252 : vector<96x128xf32>
    %c0_207 = arith.constant 0 : index
    %c14 = arith.constant 14 : index
    %c0_208 = arith.constant 0 : index
    %c0_209 = arith.constant 0 : index
    %254 = vector.load %arg1[%c0_207, %c14, %c0_208, %c0_209] : memref<1x18x24x128xf32, #tpu.memory_space<vmem>>, vector<1x4x24x128xf32>
    %255 = vector.shape_cast %254 : vector<1x4x24x128xf32> to vector<4x24x128xf32>
    %256 = vector.shape_cast %255 : vector<4x24x128xf32> to vector<96x128xf32>
    %c1_i32_210 = arith.constant 1 : i32
    %257 = tpu.dynamic_rotate %256 by %c1_i32_210 dim 0 : vector<96x128xf32>, i32 -> vector<96x128xf32>
    %258 = arith.truncf %257 : vector<96x128xf32> to vector<96x128xbf16>
    %c6_211 = arith.constant 6 : index
    %c0_212 = arith.constant 0 : index
    %c0_213 = arith.constant 0 : index
    %259 = vector.load %arg2[%c6_211, %c0_212, %c0_213] : memref<18x128x128xbf16, #tpu.memory_space<vmem>>, vector<1x128x128xbf16>
    %260 = vector.shape_cast %259 : vector<1x128x128xbf16> to vector<128x128xbf16>
    %cst_214 = arith.constant dense<0.000000e+00> : vector<96x128xf32>
    %261 = tpu.matmul %258, %260, %cst_214 {dimension_numbers = #tpu.dot_dimension_numbers<[1], [0], [0], [1], [0, 0, 1, 1], [], []>} : vector<96x128xbf16>, vector<128x128xbf16>, vector<96x128xf32> -> vector<96x128xf32>
    %262 = arith.addf %253, %261 : vector<96x128xf32>
    %263 = arith.truncf %256 : vector<96x128xf32> to vector<96x128xbf16>
    %c7_215 = arith.constant 7 : index
    %c0_216 = arith.constant 0 : index
    %c0_217 = arith.constant 0 : index
    %264 = vector.load %arg2[%c7_215, %c0_216, %c0_217] : memref<18x128x128xbf16, #tpu.memory_space<vmem>>, vector<1x128x128xbf16>
    %265 = vector.shape_cast %264 : vector<1x128x128xbf16> to vector<128x128xbf16>
    %cst_218 = arith.constant dense<0.000000e+00> : vector<96x128xf32>
    %266 = tpu.matmul %263, %265, %cst_218 {dimension_numbers = #tpu.dot_dimension_numbers<[1], [0], [0], [1], [0, 0, 1, 1], [], []>} : vector<96x128xbf16>, vector<128x128xbf16>, vector<96x128xf32> -> vector<96x128xf32>
    %267 = arith.addf %262, %266 : vector<96x128xf32>
    %c95_i32_219 = arith.constant 95 : i32
    %268 = tpu.dynamic_rotate %256 by %c95_i32_219 dim 0 : vector<96x128xf32>, i32 -> vector<96x128xf32>
    %269 = arith.truncf %268 : vector<96x128xf32> to vector<96x128xbf16>
    %c8_220 = arith.constant 8 : index
    %c0_221 = arith.constant 0 : index
    %c0_222 = arith.constant 0 : index
    %270 = vector.load %arg2[%c8_220, %c0_221, %c0_222] : memref<18x128x128xbf16, #tpu.memory_space<vmem>>, vector<1x128x128xbf16>
    %271 = vector.shape_cast %270 : vector<1x128x128xbf16> to vector<128x128xbf16>
    %cst_223 = arith.constant dense<0.000000e+00> : vector<96x128xf32>
    %272 = tpu.matmul %269, %271, %cst_223 {dimension_numbers = #tpu.dot_dimension_numbers<[1], [0], [0], [1], [0, 0, 1, 1], [], []>} : vector<96x128xbf16>, vector<128x128xbf16>, vector<96x128xf32> -> vector<96x128xf32>
    %273 = arith.addf %267, %272 : vector<96x128xf32>
    %274 = vector.broadcast %3 : vector<1x128xf32> to vector<96x128xf32>
    %275 = arith.addf %273, %274 : vector<96x128xf32>
    %cst_224 = arith.constant 0.000000e+00 : f32
    %276 = vector.broadcast %cst_224 : f32 to vector<96x128xf32>
    %277 = arith.maximumf %275, %276 : vector<96x128xf32>
    %278 = vector.shape_cast %277 : vector<96x128xf32> to vector<4x24x128xf32>
    %cst_225 = arith.constant 0.000000e+00 : f32
    %279 = vector.shape_cast %2 : vector<1x24x128xi1> to vector<1x24x128xi1>
    %280 = vector.broadcast %279 : vector<1x24x128xi1> to vector<4x24x128xi1>
    %281 = vector.broadcast %cst_225 : f32 to vector<4x24x128xf32>
    %282 = arith.select %280, %278, %281 : vector<4x24x128xi1>, vector<4x24x128xf32>
    %c13_226 = arith.constant 13 : index
    %c0_227 = arith.constant 0 : index
    %c0_228 = arith.constant 0 : index
    %283 = vector.load %arg5[%c13_226, %c0_227, %c0_228] : memref<18x24x128xf32, #tpu.memory_space<vmem>>, vector<4x24x128xf32>
    tpu.vector_store %arg5[%c13_226, %c0_227, %c0_228], %282 {strides = array<i32>} : memref<18x24x128xf32, #tpu.memory_space<vmem>>, vector<4x24x128xf32>,
    %c0_229 = arith.constant 0 : index
    %c0_230 = arith.constant 0 : index
    %c0_231 = arith.constant 0 : index
    %284 = vector.load %arg5[%c0_229, %c0_230, %c0_231] : memref<18x24x128xf32, #tpu.memory_space<vmem>>, vector<4x24x128xf32>
    %285 = vector.shape_cast %284 : vector<4x24x128xf32> to vector<96x128xf32>
    %c1_i32_232 = arith.constant 1 : i32
    %286 = tpu.dynamic_rotate %285 by %c1_i32_232 dim 0 : vector<96x128xf32>, i32 -> vector<96x128xf32>
    %287 = arith.truncf %286 : vector<96x128xf32> to vector<96x128xbf16>
    %c9_233 = arith.constant 9 : index
    %c0_234 = arith.constant 0 : index
    %c0_235 = arith.constant 0 : index
    %288 = vector.load %arg2[%c9_233, %c0_234, %c0_235] : memref<18x128x128xbf16, #tpu.memory_space<vmem>>, vector<1x128x128xbf16>
    %289 = vector.shape_cast %288 : vector<1x128x128xbf16> to vector<128x128xbf16>
    %cst_236 = arith.constant dense<0.000000e+00> : vector<96x128xf32>
    %290 = tpu.matmul %287, %289, %cst_236 {dimension_numbers = #tpu.dot_dimension_numbers<[1], [0], [0], [1], [0, 0, 1, 1], [], []>} : vector<96x128xbf16>, vector<128x128xbf16>, vector<96x128xf32> -> vector<96x128xf32>
    %291 = arith.truncf %285 : vector<96x128xf32> to vector<96x128xbf16>
    %c10_237 = arith.constant 10 : index
    %c0_238 = arith.constant 0 : index
    %c0_239 = arith.constant 0 : index
    %292 = vector.load %arg2[%c10_237, %c0_238, %c0_239] : memref<18x128x128xbf16, #tpu.memory_space<vmem>>, vector<1x128x128xbf16>
    %293 = vector.shape_cast %292 : vector<1x128x128xbf16> to vector<128x128xbf16>
    %cst_240 = arith.constant dense<0.000000e+00> : vector<96x128xf32>
    %294 = tpu.matmul %291, %293, %cst_240 {dimension_numbers = #tpu.dot_dimension_numbers<[1], [0], [0], [1], [0, 0, 1, 1], [], []>} : vector<96x128xbf16>, vector<128x128xbf16>, vector<96x128xf32> -> vector<96x128xf32>
    %295 = arith.addf %290, %294 : vector<96x128xf32>
    %c95_i32_241 = arith.constant 95 : i32
    %296 = tpu.dynamic_rotate %285 by %c95_i32_241 dim 0 : vector<96x128xf32>, i32 -> vector<96x128xf32>
    %297 = arith.truncf %296 : vector<96x128xf32> to vector<96x128xbf16>
    %c11 = arith.constant 11 : index
    %c0_242 = arith.constant 0 : index
    %c0_243 = arith.constant 0 : index
    %298 = vector.load %arg2[%c11, %c0_242, %c0_243] : memref<18x128x128xbf16, #tpu.memory_space<vmem>>, vector<1x128x128xbf16>
    %299 = vector.shape_cast %298 : vector<1x128x128xbf16> to vector<128x128xbf16>
    %cst_244 = arith.constant dense<0.000000e+00> : vector<96x128xf32>
    %300 = tpu.matmul %297, %299, %cst_244 {dimension_numbers = #tpu.dot_dimension_numbers<[1], [0], [0], [1], [0, 0, 1, 1], [], []>} : vector<96x128xbf16>, vector<128x128xbf16>, vector<96x128xf32> -> vector<96x128xf32>
    %301 = arith.addf %295, %300 : vector<96x128xf32>
    %c1_245 = arith.constant 1 : index
    %c0_246 = arith.constant 0 : index
    %c0_247 = arith.constant 0 : index
    %302 = vector.load %arg5[%c1_245, %c0_246, %c0_247] : memref<18x24x128xf32, #tpu.memory_space<vmem>>, vector<4x24x128xf32>
    %303 = vector.shape_cast %302 : vector<4x24x128xf32> to vector<96x128xf32>
    %c1_i32_248 = arith.constant 1 : i32
    %304 = tpu.dynamic_rotate %303 by %c1_i32_248 dim 0 : vector<96x128xf32>, i32 -> vector<96x128xf32>
    %305 = arith.truncf %304 : vector<96x128xf32> to vector<96x128xbf16>
    %c12_249 = arith.constant 12 : index
    %c0_250 = arith.constant 0 : index
    %c0_251 = arith.constant 0 : index
    %306 = vector.load %arg2[%c12_249, %c0_250, %c0_251] : memref<18x128x128xbf16, #tpu.memory_space<vmem>>, vector<1x128x128xbf16>
    %307 = vector.shape_cast %306 : vector<1x128x128xbf16> to vector<128x128xbf16>
    %cst_252 = arith.constant dense<0.000000e+00> : vector<96x128xf32>
    %308 = tpu.matmul %305, %307, %cst_252 {dimension_numbers = #tpu.dot_dimension_numbers<[1], [0], [0], [1], [0, 0, 1, 1], [], []>} : vector<96x128xbf16>, vector<128x128xbf16>, vector<96x128xf32> -> vector<96x128xf32>
    %309 = arith.addf %301, %308 : vector<96x128xf32>
    %310 = arith.truncf %303 : vector<96x128xf32> to vector<96x128xbf16>
    %c13_253 = arith.constant 13 : index
    %c0_254 = arith.constant 0 : index
    %c0_255 = arith.constant 0 : index
    %311 = vector.load %arg2[%c13_253, %c0_254, %c0_255] : memref<18x128x128xbf16, #tpu.memory_space<vmem>>, vector<1x128x128xbf16>
    %312 = vector.shape_cast %311 : vector<1x128x128xbf16> to vector<128x128xbf16>
    %cst_256 = arith.constant dense<0.000000e+00> : vector<96x128xf32>
    %313 = tpu.matmul %310, %312, %cst_256 {dimension_numbers = #tpu.dot_dimension_numbers<[1], [0], [0], [1], [0, 0, 1, 1], [], []>} : vector<96x128xbf16>, vector<128x128xbf16>, vector<96x128xf32> -> vector<96x128xf32>
    %314 = arith.addf %309, %313 : vector<96x128xf32>
    %c95_i32_257 = arith.constant 95 : i32
    %315 = tpu.dynamic_rotate %303 by %c95_i32_257 dim 0 : vector<96x128xf32>, i32 -> vector<96x128xf32>
    %316 = arith.truncf %315 : vector<96x128xf32> to vector<96x128xbf16>
    %c14_258 = arith.constant 14 : index
    %c0_259 = arith.constant 0 : index
    %c0_260 = arith.constant 0 : index
    %317 = vector.load %arg2[%c14_258, %c0_259, %c0_260] : memref<18x128x128xbf16, #tpu.memory_space<vmem>>, vector<1x128x128xbf16>
    %318 = vector.shape_cast %317 : vector<1x128x128xbf16> to vector<128x128xbf16>
    %cst_261 = arith.constant dense<0.000000e+00> : vector<96x128xf32>
    %319 = tpu.matmul %316, %318, %cst_261 {dimension_numbers = #tpu.dot_dimension_numbers<[1], [0], [0], [1], [0, 0, 1, 1], [], []>} : vector<96x128xbf16>, vector<128x128xbf16>, vector<96x128xf32> -> vector<96x128xf32>
    %320 = arith.addf %314, %319 : vector<96x128xf32>
    %c2_262 = arith.constant 2 : index
    %c0_263 = arith.constant 0 : index
    %c0_264 = arith.constant 0 : index
    %321 = vector.load %arg5[%c2_262, %c0_263, %c0_264] : memref<18x24x128xf32, #tpu.memory_space<vmem>>, vector<4x24x128xf32>
    %322 = vector.shape_cast %321 : vector<4x24x128xf32> to vector<96x128xf32>
    %c1_i32_265 = arith.constant 1 : i32
    %323 = tpu.dynamic_rotate %322 by %c1_i32_265 dim 0 : vector<96x128xf32>, i32 -> vector<96x128xf32>
    %324 = arith.truncf %323 : vector<96x128xf32> to vector<96x128xbf16>
    %c15 = arith.constant 15 : index
    %c0_266 = arith.constant 0 : index
    %c0_267 = arith.constant 0 : index
    %325 = vector.load %arg2[%c15, %c0_266, %c0_267] : memref<18x128x128xbf16, #tpu.memory_space<vmem>>, vector<1x128x128xbf16>
    %326 = vector.shape_cast %325 : vector<1x128x128xbf16> to vector<128x128xbf16>
    %cst_268 = arith.constant dense<0.000000e+00> : vector<96x128xf32>
    %327 = tpu.matmul %324, %326, %cst_268 {dimension_numbers = #tpu.dot_dimension_numbers<[1], [0], [0], [1], [0, 0, 1, 1], [], []>} : vector<96x128xbf16>, vector<128x128xbf16>, vector<96x128xf32> -> vector<96x128xf32>
    %328 = arith.addf %320, %327 : vector<96x128xf32>
    %329 = arith.truncf %322 : vector<96x128xf32> to vector<96x128xbf16>
    %c16 = arith.constant 16 : index
    %c0_269 = arith.constant 0 : index
    %c0_270 = arith.constant 0 : index
    %330 = vector.load %arg2[%c16, %c0_269, %c0_270] : memref<18x128x128xbf16, #tpu.memory_space<vmem>>, vector<1x128x128xbf16>
    %331 = vector.shape_cast %330 : vector<1x128x128xbf16> to vector<128x128xbf16>
    %cst_271 = arith.constant dense<0.000000e+00> : vector<96x128xf32>
    %332 = tpu.matmul %329, %331, %cst_271 {dimension_numbers = #tpu.dot_dimension_numbers<[1], [0], [0], [1], [0, 0, 1, 1], [], []>} : vector<96x128xbf16>, vector<128x128xbf16>, vector<96x128xf32> -> vector<96x128xf32>
    %333 = arith.addf %328, %332 : vector<96x128xf32>
    %c95_i32_272 = arith.constant 95 : i32
    %334 = tpu.dynamic_rotate %322 by %c95_i32_272 dim 0 : vector<96x128xf32>, i32 -> vector<96x128xf32>
    %335 = arith.truncf %334 : vector<96x128xf32> to vector<96x128xbf16>
    %c17_273 = arith.constant 17 : index
    %c0_274 = arith.constant 0 : index
    %c0_275 = arith.constant 0 : index
    %336 = vector.load %arg2[%c17_273, %c0_274, %c0_275] : memref<18x128x128xbf16, #tpu.memory_space<vmem>>, vector<1x128x128xbf16>
    %337 = vector.shape_cast %336 : vector<1x128x128xbf16> to vector<128x128xbf16>
    %cst_276 = arith.constant dense<0.000000e+00> : vector<96x128xf32>
    %338 = tpu.matmul %335, %337, %cst_276 {dimension_numbers = #tpu.dot_dimension_numbers<[1], [0], [0], [1], [0, 0, 1, 1], [], []>} : vector<96x128xbf16>, vector<128x128xbf16>, vector<96x128xf32> -> vector<96x128xf32>
    %339 = arith.addf %333, %338 : vector<96x128xf32>
    %340 = vector.broadcast %4 : vector<1x128xf32> to vector<96x128xf32>
    %341 = arith.addf %339, %340 : vector<96x128xf32>
    %342 = vector.shape_cast %341 : vector<96x128xf32> to vector<4x24x128xf32>
    %c0_277 = arith.constant 0 : index
    %c1_278 = arith.constant 1 : index
    %c0_279 = arith.constant 0 : index
    %c0_280 = arith.constant 0 : index
    %343 = vector.load %arg1[%c0_277, %c1_278, %c0_279, %c0_280] : memref<1x18x24x128xf32, #tpu.memory_space<vmem>>, vector<1x4x24x128xf32>
    %344 = vector.shape_cast %343 : vector<1x4x24x128xf32> to vector<4x24x128xf32>
    %345 = arith.addf %342, %344 : vector<4x24x128xf32>
    %cst_281 = arith.constant 0.000000e+00 : f32
    %346 = vector.broadcast %cst_281 : f32 to vector<4x24x128xf32>
    %347 = arith.maximumf %345, %346 : vector<4x24x128xf32>
    %348 = vector.extract_strided_slice %347 {offsets = [0, 0, 0], sizes = [4, 16, 128], strides = [1, 1, 1]} : vector<4x24x128xf32> to vector<4x16x128xf32>
    %c0_282 = arith.constant 0 : index
    %c0_283 = arith.constant 0 : index
    %c0_284 = arith.constant 0 : index
    %c0_285 = arith.constant 0 : index
    %349 = vector.load %arg4[%c0_282, %c0_283, %c0_284, %c0_285] : memref<1x16x16x128xf32, #tpu.memory_space<vmem>>, vector<1x4x16x128xf32>
    %350 = vector.shape_cast %349 : vector<1x4x16x128xf32> to vector<4x16x128xf32>
    %351 = vector.shape_cast %348 : vector<4x16x128xf32> to vector<1x4x16x128xf32>
    tpu.vector_store %arg4[%c0_282, %c0_283, %c0_284, %c0_285], %351 {strides = array<i32>} : memref<1x16x16x128xf32, #tpu.memory_space<vmem>>, vector<1x4x16x128xf32>,
    %c4_286 = arith.constant 4 : index
    %c0_287 = arith.constant 0 : index
    %c0_288 = arith.constant 0 : index
    %352 = vector.load %arg5[%c4_286, %c0_287, %c0_288] : memref<18x24x128xf32, #tpu.memory_space<vmem>>, vector<4x24x128xf32>
    %353 = vector.shape_cast %352 : vector<4x24x128xf32> to vector<96x128xf32>
    %c1_i32_289 = arith.constant 1 : i32
    %354 = tpu.dynamic_rotate %353 by %c1_i32_289 dim 0 : vector<96x128xf32>, i32 -> vector<96x128xf32>
    %355 = arith.truncf %354 : vector<96x128xf32> to vector<96x128xbf16>
    %c9_290 = arith.constant 9 : index
    %c0_291 = arith.constant 0 : index
    %c0_292 = arith.constant 0 : index
    %356 = vector.load %arg2[%c9_290, %c0_291, %c0_292] : memref<18x128x128xbf16, #tpu.memory_space<vmem>>, vector<1x128x128xbf16>
    %357 = vector.shape_cast %356 : vector<1x128x128xbf16> to vector<128x128xbf16>
    %cst_293 = arith.constant dense<0.000000e+00> : vector<96x128xf32>
    %358 = tpu.matmul %355, %357, %cst_293 {dimension_numbers = #tpu.dot_dimension_numbers<[1], [0], [0], [1], [0, 0, 1, 1], [], []>} : vector<96x128xbf16>, vector<128x128xbf16>, vector<96x128xf32> -> vector<96x128xf32>
    %359 = arith.truncf %353 : vector<96x128xf32> to vector<96x128xbf16>
    %c10_294 = arith.constant 10 : index
    %c0_295 = arith.constant 0 : index
    %c0_296 = arith.constant 0 : index
    %360 = vector.load %arg2[%c10_294, %c0_295, %c0_296] : memref<18x128x128xbf16, #tpu.memory_space<vmem>>, vector<1x128x128xbf16>
    %361 = vector.shape_cast %360 : vector<1x128x128xbf16> to vector<128x128xbf16>
    %cst_297 = arith.constant dense<0.000000e+00> : vector<96x128xf32>
    %362 = tpu.matmul %359, %361, %cst_297 {dimension_numbers = #tpu.dot_dimension_numbers<[1], [0], [0], [1], [0, 0, 1, 1], [], []>} : vector<96x128xbf16>, vector<128x128xbf16>, vector<96x128xf32> -> vector<96x128xf32>
    %363 = arith.addf %358, %362 : vector<96x128xf32>
    %c95_i32_298 = arith.constant 95 : i32
    %364 = tpu.dynamic_rotate %353 by %c95_i32_298 dim 0 : vector<96x128xf32>, i32 -> vector<96x128xf32>
    %365 = arith.truncf %364 : vector<96x128xf32> to vector<96x128xbf16>
    %c11_299 = arith.constant 11 : index
    %c0_300 = arith.constant 0 : index
    %c0_301 = arith.constant 0 : index
    %366 = vector.load %arg2[%c11_299, %c0_300, %c0_301] : memref<18x128x128xbf16, #tpu.memory_space<vmem>>, vector<1x128x128xbf16>
    %367 = vector.shape_cast %366 : vector<1x128x128xbf16> to vector<128x128xbf16>
    %cst_302 = arith.constant dense<0.000000e+00> : vector<96x128xf32>
    %368 = tpu.matmul %365, %367, %cst_302 {dimension_numbers = #tpu.dot_dimension_numbers<[1], [0], [0], [1], [0, 0, 1, 1], [], []>} : vector<96x128xbf16>, vector<128x128xbf16>, vector<96x128xf32> -> vector<96x128xf32>
    %369 = arith.addf %363, %368 : vector<96x128xf32>
    %c5_303 = arith.constant 5 : index
    %c0_304 = arith.constant 0 : index
    %c0_305 = arith.constant 0 : index
    %370 = vector.load %arg5[%c5_303, %c0_304, %c0_305] : memref<18x24x128xf32, #tpu.memory_space<vmem>>, vector<4x24x128xf32>
    %371 = vector.shape_cast %370 : vector<4x24x128xf32> to vector<96x128xf32>
    %c1_i32_306 = arith.constant 1 : i32
    %372 = tpu.dynamic_rotate %371 by %c1_i32_306 dim 0 : vector<96x128xf32>, i32 -> vector<96x128xf32>
    %373 = arith.truncf %372 : vector<96x128xf32> to vector<96x128xbf16>
    %c12_307 = arith.constant 12 : index
    %c0_308 = arith.constant 0 : index
    %c0_309 = arith.constant 0 : index
    %374 = vector.load %arg2[%c12_307, %c0_308, %c0_309] : memref<18x128x128xbf16, #tpu.memory_space<vmem>>, vector<1x128x128xbf16>
    %375 = vector.shape_cast %374 : vector<1x128x128xbf16> to vector<128x128xbf16>
    %cst_310 = arith.constant dense<0.000000e+00> : vector<96x128xf32>
    %376 = tpu.matmul %373, %375, %cst_310 {dimension_numbers = #tpu.dot_dimension_numbers<[1], [0], [0], [1], [0, 0, 1, 1], [], []>} : vector<96x128xbf16>, vector<128x128xbf16>, vector<96x128xf32> -> vector<96x128xf32>
    %377 = arith.addf %369, %376 : vector<96x128xf32>
    %378 = arith.truncf %371 : vector<96x128xf32> to vector<96x128xbf16>
    %c13_311 = arith.constant 13 : index
    %c0_312 = arith.constant 0 : index
    %c0_313 = arith.constant 0 : index
    %379 = vector.load %arg2[%c13_311, %c0_312, %c0_313] : memref<18x128x128xbf16, #tpu.memory_space<vmem>>, vector<1x128x128xbf16>
    %380 = vector.shape_cast %379 : vector<1x128x128xbf16> to vector<128x128xbf16>
    %cst_314 = arith.constant dense<0.000000e+00> : vector<96x128xf32>
    %381 = tpu.matmul %378, %380, %cst_314 {dimension_numbers = #tpu.dot_dimension_numbers<[1], [0], [0], [1], [0, 0, 1, 1], [], []>} : vector<96x128xbf16>, vector<128x128xbf16>, vector<96x128xf32> -> vector<96x128xf32>
    %382 = arith.addf %377, %381 : vector<96x128xf32>
    %c95_i32_315 = arith.constant 95 : i32
    %383 = tpu.dynamic_rotate %371 by %c95_i32_315 dim 0 : vector<96x128xf32>, i32 -> vector<96x128xf32>
    %384 = arith.truncf %383 : vector<96x128xf32> to vector<96x128xbf16>
    %c14_316 = arith.constant 14 : index
    %c0_317 = arith.constant 0 : index
    %c0_318 = arith.constant 0 : index
    %385 = vector.load %arg2[%c14_316, %c0_317, %c0_318] : memref<18x128x128xbf16, #tpu.memory_space<vmem>>, vector<1x128x128xbf16>
    %386 = vector.shape_cast %385 : vector<1x128x128xbf16> to vector<128x128xbf16>
    %cst_319 = arith.constant dense<0.000000e+00> : vector<96x128xf32>
    %387 = tpu.matmul %384, %386, %cst_319 {dimension_numbers = #tpu.dot_dimension_numbers<[1], [0], [0], [1], [0, 0, 1, 1], [], []>} : vector<96x128xbf16>, vector<128x128xbf16>, vector<96x128xf32> -> vector<96x128xf32>
    %388 = arith.addf %382, %387 : vector<96x128xf32>
    %c6_320 = arith.constant 6 : index
    %c0_321 = arith.constant 0 : index
    %c0_322 = arith.constant 0 : index
    %389 = vector.load %arg5[%c6_320, %c0_321, %c0_322] : memref<18x24x128xf32, #tpu.memory_space<vmem>>, vector<4x24x128xf32>
    %390 = vector.shape_cast %389 : vector<4x24x128xf32> to vector<96x128xf32>
    %c1_i32_323 = arith.constant 1 : i32
    %391 = tpu.dynamic_rotate %390 by %c1_i32_323 dim 0 : vector<96x128xf32>, i32 -> vector<96x128xf32>
    %392 = arith.truncf %391 : vector<96x128xf32> to vector<96x128xbf16>
    %c15_324 = arith.constant 15 : index
    %c0_325 = arith.constant 0 : index
    %c0_326 = arith.constant 0 : index
    %393 = vector.load %arg2[%c15_324, %c0_325, %c0_326] : memref<18x128x128xbf16, #tpu.memory_space<vmem>>, vector<1x128x128xbf16>
    %394 = vector.shape_cast %393 : vector<1x128x128xbf16> to vector<128x128xbf16>
    %cst_327 = arith.constant dense<0.000000e+00> : vector<96x128xf32>
    %395 = tpu.matmul %392, %394, %cst_327 {dimension_numbers = #tpu.dot_dimension_numbers<[1], [0], [0], [1], [0, 0, 1, 1], [], []>} : vector<96x128xbf16>, vector<128x128xbf16>, vector<96x128xf32> -> vector<96x128xf32>
    %396 = arith.addf %388, %395 : vector<96x128xf32>
    %397 = arith.truncf %390 : vector<96x128xf32> to vector<96x128xbf16>
    %c16_328 = arith.constant 16 : index
    %c0_329 = arith.constant 0 : index
    %c0_330 = arith.constant 0 : index
    %398 = vector.load %arg2[%c16_328, %c0_329, %c0_330] : memref<18x128x128xbf16, #tpu.memory_space<vmem>>, vector<1x128x128xbf16>
    %399 = vector.shape_cast %398 : vector<1x128x128xbf16> to vector<128x128xbf16>
    %cst_331 = arith.constant dense<0.000000e+00> : vector<96x128xf32>
    %400 = tpu.matmul %397, %399, %cst_331 {dimension_numbers = #tpu.dot_dimension_numbers<[1], [0], [0], [1], [0, 0, 1, 1], [], []>} : vector<96x128xbf16>, vector<128x128xbf16>, vector<96x128xf32> -> vector<96x128xf32>
    %401 = arith.addf %396, %400 : vector<96x128xf32>
    %c95_i32_332 = arith.constant 95 : i32
    %402 = tpu.dynamic_rotate %390 by %c95_i32_332 dim 0 : vector<96x128xf32>, i32 -> vector<96x128xf32>
    %403 = arith.truncf %402 : vector<96x128xf32> to vector<96x128xbf16>
    %c17_333 = arith.constant 17 : index
    %c0_334 = arith.constant 0 : index
    %c0_335 = arith.constant 0 : index
    %404 = vector.load %arg2[%c17_333, %c0_334, %c0_335] : memref<18x128x128xbf16, #tpu.memory_space<vmem>>, vector<1x128x128xbf16>
    %405 = vector.shape_cast %404 : vector<1x128x128xbf16> to vector<128x128xbf16>
    %cst_336 = arith.constant dense<0.000000e+00> : vector<96x128xf32>
    %406 = tpu.matmul %403, %405, %cst_336 {dimension_numbers = #tpu.dot_dimension_numbers<[1], [0], [0], [1], [0, 0, 1, 1], [], []>} : vector<96x128xbf16>, vector<128x128xbf16>, vector<96x128xf32> -> vector<96x128xf32>
    %407 = arith.addf %401, %406 : vector<96x128xf32>
    %408 = vector.broadcast %4 : vector<1x128xf32> to vector<96x128xf32>
    %409 = arith.addf %407, %408 : vector<96x128xf32>
    %410 = vector.shape_cast %409 : vector<96x128xf32> to vector<4x24x128xf32>
    %c0_337 = arith.constant 0 : index
    %c5_338 = arith.constant 5 : index
    %c0_339 = arith.constant 0 : index
    %c0_340 = arith.constant 0 : index
    %411 = vector.load %arg1[%c0_337, %c5_338, %c0_339, %c0_340] : memref<1x18x24x128xf32, #tpu.memory_space<vmem>>, vector<1x4x24x128xf32>
    %412 = vector.shape_cast %411 : vector<1x4x24x128xf32> to vector<4x24x128xf32>
    %413 = arith.addf %410, %412 : vector<4x24x128xf32>
    %cst_341 = arith.constant 0.000000e+00 : f32
    %414 = vector.broadcast %cst_341 : f32 to vector<4x24x128xf32>
    %415 = arith.maximumf %413, %414 : vector<4x24x128xf32>
    %416 = vector.extract_strided_slice %415 {offsets = [0, 0, 0], sizes = [4, 16, 128], strides = [1, 1, 1]} : vector<4x24x128xf32> to vector<4x16x128xf32>
    %c0_342 = arith.constant 0 : index
    %c4_343 = arith.constant 4 : index
    %c0_344 = arith.constant 0 : index
    %c0_345 = arith.constant 0 : index
    %417 = vector.load %arg4[%c0_342, %c4_343, %c0_344, %c0_345] : memref<1x16x16x128xf32, #tpu.memory_space<vmem>>, vector<1x4x16x128xf32>
    %418 = vector.shape_cast %417 : vector<1x4x16x128xf32> to vector<4x16x128xf32>
    %419 = vector.shape_cast %416 : vector<4x16x128xf32> to vector<1x4x16x128xf32>
    tpu.vector_store %arg4[%c0_342, %c4_343, %c0_344, %c0_345], %419 {strides = array<i32>} : memref<1x16x16x128xf32, #tpu.memory_space<vmem>>, vector<1x4x16x128xf32>,
    %c8_346 = arith.constant 8 : index
    %c0_347 = arith.constant 0 : index
    %c0_348 = arith.constant 0 : index
    %420 = vector.load %arg5[%c8_346, %c0_347, %c0_348] : memref<18x24x128xf32, #tpu.memory_space<vmem>>, vector<4x24x128xf32>
    %421 = vector.shape_cast %420 : vector<4x24x128xf32> to vector<96x128xf32>
    %c1_i32_349 = arith.constant 1 : i32
    %422 = tpu.dynamic_rotate %421 by %c1_i32_349 dim 0 : vector<96x128xf32>, i32 -> vector<96x128xf32>
    %423 = arith.truncf %422 : vector<96x128xf32> to vector<96x128xbf16>
    %c9_350 = arith.constant 9 : index
    %c0_351 = arith.constant 0 : index
    %c0_352 = arith.constant 0 : index
    %424 = vector.load %arg2[%c9_350, %c0_351, %c0_352] : memref<18x128x128xbf16, #tpu.memory_space<vmem>>, vector<1x128x128xbf16>
    %425 = vector.shape_cast %424 : vector<1x128x128xbf16> to vector<128x128xbf16>
    %cst_353 = arith.constant dense<0.000000e+00> : vector<96x128xf32>
    %426 = tpu.matmul %423, %425, %cst_353 {dimension_numbers = #tpu.dot_dimension_numbers<[1], [0], [0], [1], [0, 0, 1, 1], [], []>} : vector<96x128xbf16>, vector<128x128xbf16>, vector<96x128xf32> -> vector<96x128xf32>
    %427 = arith.truncf %421 : vector<96x128xf32> to vector<96x128xbf16>
    %c10_354 = arith.constant 10 : index
    %c0_355 = arith.constant 0 : index
    %c0_356 = arith.constant 0 : index
    %428 = vector.load %arg2[%c10_354, %c0_355, %c0_356] : memref<18x128x128xbf16, #tpu.memory_space<vmem>>, vector<1x128x128xbf16>
    %429 = vector.shape_cast %428 : vector<1x128x128xbf16> to vector<128x128xbf16>
    %cst_357 = arith.constant dense<0.000000e+00> : vector<96x128xf32>
    %430 = tpu.matmul %427, %429, %cst_357 {dimension_numbers = #tpu.dot_dimension_numbers<[1], [0], [0], [1], [0, 0, 1, 1], [], []>} : vector<96x128xbf16>, vector<128x128xbf16>, vector<96x128xf32> -> vector<96x128xf32>
    %431 = arith.addf %426, %430 : vector<96x128xf32>
    %c95_i32_358 = arith.constant 95 : i32
    %432 = tpu.dynamic_rotate %421 by %c95_i32_358 dim 0 : vector<96x128xf32>, i32 -> vector<96x128xf32>
    %433 = arith.truncf %432 : vector<96x128xf32> to vector<96x128xbf16>
    %c11_359 = arith.constant 11 : index
    %c0_360 = arith.constant 0 : index
    %c0_361 = arith.constant 0 : index
    %434 = vector.load %arg2[%c11_359, %c0_360, %c0_361] : memref<18x128x128xbf16, #tpu.memory_space<vmem>>, vector<1x128x128xbf16>
    %435 = vector.shape_cast %434 : vector<1x128x128xbf16> to vector<128x128xbf16>
    %cst_362 = arith.constant dense<0.000000e+00> : vector<96x128xf32>
    %436 = tpu.matmul %433, %435, %cst_362 {dimension_numbers = #tpu.dot_dimension_numbers<[1], [0], [0], [1], [0, 0, 1, 1], [], []>} : vector<96x128xbf16>, vector<128x128xbf16>, vector<96x128xf32> -> vector<96x128xf32>
    %437 = arith.addf %431, %436 : vector<96x128xf32>
    %c9_363 = arith.constant 9 : index
    %c0_364 = arith.constant 0 : index
    %c0_365 = arith.constant 0 : index
    %438 = vector.load %arg5[%c9_363, %c0_364, %c0_365] : memref<18x24x128xf32, #tpu.memory_space<vmem>>, vector<4x24x128xf32>
    %439 = vector.shape_cast %438 : vector<4x24x128xf32> to vector<96x128xf32>
    %c1_i32_366 = arith.constant 1 : i32
    %440 = tpu.dynamic_rotate %439 by %c1_i32_366 dim 0 : vector<96x128xf32>, i32 -> vector<96x128xf32>
    %441 = arith.truncf %440 : vector<96x128xf32> to vector<96x128xbf16>
    %c12_367 = arith.constant 12 : index
    %c0_368 = arith.constant 0 : index
    %c0_369 = arith.constant 0 : index
    %442 = vector.load %arg2[%c12_367, %c0_368, %c0_369] : memref<18x128x128xbf16, #tpu.memory_space<vmem>>, vector<1x128x128xbf16>
    %443 = vector.shape_cast %442 : vector<1x128x128xbf16> to vector<128x128xbf16>
    %cst_370 = arith.constant dense<0.000000e+00> : vector<96x128xf32>
    %444 = tpu.matmul %441, %443, %cst_370 {dimension_numbers = #tpu.dot_dimension_numbers<[1], [0], [0], [1], [0, 0, 1, 1], [], []>} : vector<96x128xbf16>, vector<128x128xbf16>, vector<96x128xf32> -> vector<96x128xf32>
    %445 = arith.addf %437, %444 : vector<96x128xf32>
    %446 = arith.truncf %439 : vector<96x128xf32> to vector<96x128xbf16>
    %c13_371 = arith.constant 13 : index
    %c0_372 = arith.constant 0 : index
    %c0_373 = arith.constant 0 : index
    %447 = vector.load %arg2[%c13_371, %c0_372, %c0_373] : memref<18x128x128xbf16, #tpu.memory_space<vmem>>, vector<1x128x128xbf16>
    %448 = vector.shape_cast %447 : vector<1x128x128xbf16> to vector<128x128xbf16>
    %cst_374 = arith.constant dense<0.000000e+00> : vector<96x128xf32>
    %449 = tpu.matmul %446, %448, %cst_374 {dimension_numbers = #tpu.dot_dimension_numbers<[1], [0], [0], [1], [0, 0, 1, 1], [], []>} : vector<96x128xbf16>, vector<128x128xbf16>, vector<96x128xf32> -> vector<96x128xf32>
    %450 = arith.addf %445, %449 : vector<96x128xf32>
    %c95_i32_375 = arith.constant 95 : i32
    %451 = tpu.dynamic_rotate %439 by %c95_i32_375 dim 0 : vector<96x128xf32>, i32 -> vector<96x128xf32>
    %452 = arith.truncf %451 : vector<96x128xf32> to vector<96x128xbf16>
    %c14_376 = arith.constant 14 : index
    %c0_377 = arith.constant 0 : index
    %c0_378 = arith.constant 0 : index
    %453 = vector.load %arg2[%c14_376, %c0_377, %c0_378] : memref<18x128x128xbf16, #tpu.memory_space<vmem>>, vector<1x128x128xbf16>
    %454 = vector.shape_cast %453 : vector<1x128x128xbf16> to vector<128x128xbf16>
    %cst_379 = arith.constant dense<0.000000e+00> : vector<96x128xf32>
    %455 = tpu.matmul %452, %454, %cst_379 {dimension_numbers = #tpu.dot_dimension_numbers<[1], [0], [0], [1], [0, 0, 1, 1], [], []>} : vector<96x128xbf16>, vector<128x128xbf16>, vector<96x128xf32> -> vector<96x128xf32>
    %456 = arith.addf %450, %455 : vector<96x128xf32>
    %c10_380 = arith.constant 10 : index
    %c0_381 = arith.constant 0 : index
    %c0_382 = arith.constant 0 : index
    %457 = vector.load %arg5[%c10_380, %c0_381, %c0_382] : memref<18x24x128xf32, #tpu.memory_space<vmem>>, vector<4x24x128xf32>
    %458 = vector.shape_cast %457 : vector<4x24x128xf32> to vector<96x128xf32>
    %c1_i32_383 = arith.constant 1 : i32
    %459 = tpu.dynamic_rotate %458 by %c1_i32_383 dim 0 : vector<96x128xf32>, i32 -> vector<96x128xf32>
    %460 = arith.truncf %459 : vector<96x128xf32> to vector<96x128xbf16>
    %c15_384 = arith.constant 15 : index
    %c0_385 = arith.constant 0 : index
    %c0_386 = arith.constant 0 : index
    %461 = vector.load %arg2[%c15_384, %c0_385, %c0_386] : memref<18x128x128xbf16, #tpu.memory_space<vmem>>, vector<1x128x128xbf16>
    %462 = vector.shape_cast %461 : vector<1x128x128xbf16> to vector<128x128xbf16>
    %cst_387 = arith.constant dense<0.000000e+00> : vector<96x128xf32>
    %463 = tpu.matmul %460, %462, %cst_387 {dimension_numbers = #tpu.dot_dimension_numbers<[1], [0], [0], [1], [0, 0, 1, 1], [], []>} : vector<96x128xbf16>, vector<128x128xbf16>, vector<96x128xf32> -> vector<96x128xf32>
    %464 = arith.addf %456, %463 : vector<96x128xf32>
    %465 = arith.truncf %458 : vector<96x128xf32> to vector<96x128xbf16>
    %c16_388 = arith.constant 16 : index
    %c0_389 = arith.constant 0 : index
    %c0_390 = arith.constant 0 : index
    %466 = vector.load %arg2[%c16_388, %c0_389, %c0_390] : memref<18x128x128xbf16, #tpu.memory_space<vmem>>, vector<1x128x128xbf16>
    %467 = vector.shape_cast %466 : vector<1x128x128xbf16> to vector<128x128xbf16>
    %cst_391 = arith.constant dense<0.000000e+00> : vector<96x128xf32>
    %468 = tpu.matmul %465, %467, %cst_391 {dimension_numbers = #tpu.dot_dimension_numbers<[1], [0], [0], [1], [0, 0, 1, 1], [], []>} : vector<96x128xbf16>, vector<128x128xbf16>, vector<96x128xf32> -> vector<96x128xf32>
    %469 = arith.addf %464, %468 : vector<96x128xf32>
    %c95_i32_392 = arith.constant 95 : i32
    %470 = tpu.dynamic_rotate %458 by %c95_i32_392 dim 0 : vector<96x128xf32>, i32 -> vector<96x128xf32>
    %471 = arith.truncf %470 : vector<96x128xf32> to vector<96x128xbf16>
    %c17_393 = arith.constant 17 : index
    %c0_394 = arith.constant 0 : index
    %c0_395 = arith.constant 0 : index
    %472 = vector.load %arg2[%c17_393, %c0_394, %c0_395] : memref<18x128x128xbf16, #tpu.memory_space<vmem>>, vector<1x128x128xbf16>
    %473 = vector.shape_cast %472 : vector<1x128x128xbf16> to vector<128x128xbf16>
    %cst_396 = arith.constant dense<0.000000e+00> : vector<96x128xf32>
    %474 = tpu.matmul %471, %473, %cst_396 {dimension_numbers = #tpu.dot_dimension_numbers<[1], [0], [0], [1], [0, 0, 1, 1], [], []>} : vector<96x128xbf16>, vector<128x128xbf16>, vector<96x128xf32> -> vector<96x128xf32>
    %475 = arith.addf %469, %474 : vector<96x128xf32>
    %476 = vector.broadcast %4 : vector<1x128xf32> to vector<96x128xf32>
    %477 = arith.addf %475, %476 : vector<96x128xf32>
    %478 = vector.shape_cast %477 : vector<96x128xf32> to vector<4x24x128xf32>
    %c0_397 = arith.constant 0 : index
    %c9_398 = arith.constant 9 : index
    %c0_399 = arith.constant 0 : index
    %c0_400 = arith.constant 0 : index
    %479 = vector.load %arg1[%c0_397, %c9_398, %c0_399, %c0_400] : memref<1x18x24x128xf32, #tpu.memory_space<vmem>>, vector<1x4x24x128xf32>
    %480 = vector.shape_cast %479 : vector<1x4x24x128xf32> to vector<4x24x128xf32>
    %481 = arith.addf %478, %480 : vector<4x24x128xf32>
    %cst_401 = arith.constant 0.000000e+00 : f32
    %482 = vector.broadcast %cst_401 : f32 to vector<4x24x128xf32>
    %483 = arith.maximumf %481, %482 : vector<4x24x128xf32>
    %484 = vector.extract_strided_slice %483 {offsets = [0, 0, 0], sizes = [4, 16, 128], strides = [1, 1, 1]} : vector<4x24x128xf32> to vector<4x16x128xf32>
    %c0_402 = arith.constant 0 : index
    %c8_403 = arith.constant 8 : index
    %c0_404 = arith.constant 0 : index
    %c0_405 = arith.constant 0 : index
    %485 = vector.load %arg4[%c0_402, %c8_403, %c0_404, %c0_405] : memref<1x16x16x128xf32, #tpu.memory_space<vmem>>, vector<1x4x16x128xf32>
    %486 = vector.shape_cast %485 : vector<1x4x16x128xf32> to vector<4x16x128xf32>
    %487 = vector.shape_cast %484 : vector<4x16x128xf32> to vector<1x4x16x128xf32>
    tpu.vector_store %arg4[%c0_402, %c8_403, %c0_404, %c0_405], %487 {strides = array<i32>} : memref<1x16x16x128xf32, #tpu.memory_space<vmem>>, vector<1x4x16x128xf32>,
    %c12_406 = arith.constant 12 : index
    %c0_407 = arith.constant 0 : index
    %c0_408 = arith.constant 0 : index
    %488 = vector.load %arg5[%c12_406, %c0_407, %c0_408] : memref<18x24x128xf32, #tpu.memory_space<vmem>>, vector<4x24x128xf32>
    %489 = vector.shape_cast %488 : vector<4x24x128xf32> to vector<96x128xf32>
    %c1_i32_409 = arith.constant 1 : i32
    %490 = tpu.dynamic_rotate %489 by %c1_i32_409 dim 0 : vector<96x128xf32>, i32 -> vector<96x128xf32>
    %491 = arith.truncf %490 : vector<96x128xf32> to vector<96x128xbf16>
    %c9_410 = arith.constant 9 : index
    %c0_411 = arith.constant 0 : index
    %c0_412 = arith.constant 0 : index
    %492 = vector.load %arg2[%c9_410, %c0_411, %c0_412] : memref<18x128x128xbf16, #tpu.memory_space<vmem>>, vector<1x128x128xbf16>
    %493 = vector.shape_cast %492 : vector<1x128x128xbf16> to vector<128x128xbf16>
    %cst_413 = arith.constant dense<0.000000e+00> : vector<96x128xf32>
    %494 = tpu.matmul %491, %493, %cst_413 {dimension_numbers = #tpu.dot_dimension_numbers<[1], [0], [0], [1], [0, 0, 1, 1], [], []>} : vector<96x128xbf16>, vector<128x128xbf16>, vector<96x128xf32> -> vector<96x128xf32>
    %495 = arith.truncf %489 : vector<96x128xf32> to vector<96x128xbf16>
    %c10_414 = arith.constant 10 : index
    %c0_415 = arith.constant 0 : index
    %c0_416 = arith.constant 0 : index
    %496 = vector.load %arg2[%c10_414, %c0_415, %c0_416] : memref<18x128x128xbf16, #tpu.memory_space<vmem>>, vector<1x128x128xbf16>
    %497 = vector.shape_cast %496 : vector<1x128x128xbf16> to vector<128x128xbf16>
    %cst_417 = arith.constant dense<0.000000e+00> : vector<96x128xf32>
    %498 = tpu.matmul %495, %497, %cst_417 {dimension_numbers = #tpu.dot_dimension_numbers<[1], [0], [0], [1], [0, 0, 1, 1], [], []>} : vector<96x128xbf16>, vector<128x128xbf16>, vector<96x128xf32> -> vector<96x128xf32>
    %499 = arith.addf %494, %498 : vector<96x128xf32>
    %c95_i32_418 = arith.constant 95 : i32
    %500 = tpu.dynamic_rotate %489 by %c95_i32_418 dim 0 : vector<96x128xf32>, i32 -> vector<96x128xf32>
    %501 = arith.truncf %500 : vector<96x128xf32> to vector<96x128xbf16>
    %c11_419 = arith.constant 11 : index
    %c0_420 = arith.constant 0 : index
    %c0_421 = arith.constant 0 : index
    %502 = vector.load %arg2[%c11_419, %c0_420, %c0_421] : memref<18x128x128xbf16, #tpu.memory_space<vmem>>, vector<1x128x128xbf16>
    %503 = vector.shape_cast %502 : vector<1x128x128xbf16> to vector<128x128xbf16>
    %cst_422 = arith.constant dense<0.000000e+00> : vector<96x128xf32>
    %504 = tpu.matmul %501, %503, %cst_422 {dimension_numbers = #tpu.dot_dimension_numbers<[1], [0], [0], [1], [0, 0, 1, 1], [], []>} : vector<96x128xbf16>, vector<128x128xbf16>, vector<96x128xf32> -> vector<96x128xf32>
    %505 = arith.addf %499, %504 : vector<96x128xf32>
    %c13_423 = arith.constant 13 : index
    %c0_424 = arith.constant 0 : index
    %c0_425 = arith.constant 0 : index
    %506 = vector.load %arg5[%c13_423, %c0_424, %c0_425] : memref<18x24x128xf32, #tpu.memory_space<vmem>>, vector<4x24x128xf32>
    %507 = vector.shape_cast %506 : vector<4x24x128xf32> to vector<96x128xf32>
    %c1_i32_426 = arith.constant 1 : i32
    %508 = tpu.dynamic_rotate %507 by %c1_i32_426 dim 0 : vector<96x128xf32>, i32 -> vector<96x128xf32>
    %509 = arith.truncf %508 : vector<96x128xf32> to vector<96x128xbf16>
    %c12_427 = arith.constant 12 : index
    %c0_428 = arith.constant 0 : index
    %c0_429 = arith.constant 0 : index
    %510 = vector.load %arg2[%c12_427, %c0_428, %c0_429] : memref<18x128x128xbf16, #tpu.memory_space<vmem>>, vector<1x128x128xbf16>
    %511 = vector.shape_cast %510 : vector<1x128x128xbf16> to vector<128x128xbf16>
    %cst_430 = arith.constant dense<0.000000e+00> : vector<96x128xf32>
    %512 = tpu.matmul %509, %511, %cst_430 {dimension_numbers = #tpu.dot_dimension_numbers<[1], [0], [0], [1], [0, 0, 1, 1], [], []>} : vector<96x128xbf16>, vector<128x128xbf16>, vector<96x128xf32> -> vector<96x128xf32>
    %513 = arith.addf %505, %512 : vector<96x128xf32>
    %514 = arith.truncf %507 : vector<96x128xf32> to vector<96x128xbf16>
    %c13_431 = arith.constant 13 : index
    %c0_432 = arith.constant 0 : index
    %c0_433 = arith.constant 0 : index
    %515 = vector.load %arg2[%c13_431, %c0_432, %c0_433] : memref<18x128x128xbf16, #tpu.memory_space<vmem>>, vector<1x128x128xbf16>
    %516 = vector.shape_cast %515 : vector<1x128x128xbf16> to vector<128x128xbf16>
    %cst_434 = arith.constant dense<0.000000e+00> : vector<96x128xf32>
    %517 = tpu.matmul %514, %516, %cst_434 {dimension_numbers = #tpu.dot_dimension_numbers<[1], [0], [0], [1], [0, 0, 1, 1], [], []>} : vector<96x128xbf16>, vector<128x128xbf16>, vector<96x128xf32> -> vector<96x128xf32>
    %518 = arith.addf %513, %517 : vector<96x128xf32>
    %c95_i32_435 = arith.constant 95 : i32
    %519 = tpu.dynamic_rotate %507 by %c95_i32_435 dim 0 : vector<96x128xf32>, i32 -> vector<96x128xf32>
    %520 = arith.truncf %519 : vector<96x128xf32> to vector<96x128xbf16>
    %c14_436 = arith.constant 14 : index
    %c0_437 = arith.constant 0 : index
    %c0_438 = arith.constant 0 : index
    %521 = vector.load %arg2[%c14_436, %c0_437, %c0_438] : memref<18x128x128xbf16, #tpu.memory_space<vmem>>, vector<1x128x128xbf16>
    %522 = vector.shape_cast %521 : vector<1x128x128xbf16> to vector<128x128xbf16>
    %cst_439 = arith.constant dense<0.000000e+00> : vector<96x128xf32>
    %523 = tpu.matmul %520, %522, %cst_439 {dimension_numbers = #tpu.dot_dimension_numbers<[1], [0], [0], [1], [0, 0, 1, 1], [], []>} : vector<96x128xbf16>, vector<128x128xbf16>, vector<96x128xf32> -> vector<96x128xf32>
    %524 = arith.addf %518, %523 : vector<96x128xf32>
    %c14_440 = arith.constant 14 : index
    %c0_441 = arith.constant 0 : index
    %c0_442 = arith.constant 0 : index
    %525 = vector.load %arg5[%c14_440, %c0_441, %c0_442] : memref<18x24x128xf32, #tpu.memory_space<vmem>>, vector<4x24x128xf32>
    %526 = vector.shape_cast %525 : vector<4x24x128xf32> to vector<96x128xf32>
    %c1_i32_443 = arith.constant 1 : i32
    %527 = tpu.dynamic_rotate %526 by %c1_i32_443 dim 0 : vector<96x128xf32>, i32 -> vector<96x128xf32>
    %528 = arith.truncf %527 : vector<96x128xf32> to vector<96x128xbf16>
    %c15_444 = arith.constant 15 : index
    %c0_445 = arith.constant 0 : index
    %c0_446 = arith.constant 0 : index
    %529 = vector.load %arg2[%c15_444, %c0_445, %c0_446] : memref<18x128x128xbf16, #tpu.memory_space<vmem>>, vector<1x128x128xbf16>
    %530 = vector.shape_cast %529 : vector<1x128x128xbf16> to vector<128x128xbf16>
    %cst_447 = arith.constant dense<0.000000e+00> : vector<96x128xf32>
    %531 = tpu.matmul %528, %530, %cst_447 {dimension_numbers = #tpu.dot_dimension_numbers<[1], [0], [0], [1], [0, 0, 1, 1], [], []>} : vector<96x128xbf16>, vector<128x128xbf16>, vector<96x128xf32> -> vector<96x128xf32>
    %532 = arith.addf %524, %531 : vector<96x128xf32>
    %533 = arith.truncf %526 : vector<96x128xf32> to vector<96x128xbf16>
    %c16_448 = arith.constant 16 : index
    %c0_449 = arith.constant 0 : index
    %c0_450 = arith.constant 0 : index
    %534 = vector.load %arg2[%c16_448, %c0_449, %c0_450] : memref<18x128x128xbf16, #tpu.memory_space<vmem>>, vector<1x128x128xbf16>
    %535 = vector.shape_cast %534 : vector<1x128x128xbf16> to vector<128x128xbf16>
    %cst_451 = arith.constant dense<0.000000e+00> : vector<96x128xf32>
    %536 = tpu.matmul %533, %535, %cst_451 {dimension_numbers = #tpu.dot_dimension_numbers<[1], [0], [0], [1], [0, 0, 1, 1], [], []>} : vector<96x128xbf16>, vector<128x128xbf16>, vector<96x128xf32> -> vector<96x128xf32>
    %537 = arith.addf %532, %536 : vector<96x128xf32>
    %c95_i32_452 = arith.constant 95 : i32
    %538 = tpu.dynamic_rotate %526 by %c95_i32_452 dim 0 : vector<96x128xf32>, i32 -> vector<96x128xf32>
    %539 = arith.truncf %538 : vector<96x128xf32> to vector<96x128xbf16>
    %c17_453 = arith.constant 17 : index
    %c0_454 = arith.constant 0 : index
    %c0_455 = arith.constant 0 : index
    %540 = vector.load %arg2[%c17_453, %c0_454, %c0_455] : memref<18x128x128xbf16, #tpu.memory_space<vmem>>, vector<1x128x128xbf16>
    %541 = vector.shape_cast %540 : vector<1x128x128xbf16> to vector<128x128xbf16>
    %cst_456 = arith.constant dense<0.000000e+00> : vector<96x128xf32>
    %542 = tpu.matmul %539, %541, %cst_456 {dimension_numbers = #tpu.dot_dimension_numbers<[1], [0], [0], [1], [0, 0, 1, 1], [], []>} : vector<96x128xbf16>, vector<128x128xbf16>, vector<96x128xf32> -> vector<96x128xf32>
    %543 = arith.addf %537, %542 : vector<96x128xf32>
    %544 = vector.broadcast %4 : vector<1x128xf32> to vector<96x128xf32>
    %545 = arith.addf %543, %544 : vector<96x128xf32>
    %546 = vector.shape_cast %545 : vector<96x128xf32> to vector<4x24x128xf32>
    %c0_457 = arith.constant 0 : index
    %c13_458 = arith.constant 13 : index
    %c0_459 = arith.constant 0 : index
    %c0_460 = arith.constant 0 : index
    %547 = vector.load %arg1[%c0_457, %c13_458, %c0_459, %c0_460] : memref<1x18x24x128xf32, #tpu.memory_space<vmem>>, vector<1x4x24x128xf32>
    %548 = vector.shape_cast %547 : vector<1x4x24x128xf32> to vector<4x24x128xf32>
    %549 = arith.addf %546, %548 : vector<4x24x128xf32>
    %cst_461 = arith.constant 0.000000e+00 : f32
    %550 = vector.broadcast %cst_461 : f32 to vector<4x24x128xf32>
    %551 = arith.maximumf %549, %550 : vector<4x24x128xf32>
    %552 = vector.extract_strided_slice %551 {offsets = [0, 0, 0], sizes = [4, 16, 128], strides = [1, 1, 1]} : vector<4x24x128xf32> to vector<4x16x128xf32>
    %c0_462 = arith.constant 0 : index
    %c12_463 = arith.constant 12 : index
    %c0_464 = arith.constant 0 : index
    %c0_465 = arith.constant 0 : index
    %553 = vector.load %arg4[%c0_462, %c12_463, %c0_464, %c0_465] : memref<1x16x16x128xf32, #tpu.memory_space<vmem>>, vector<1x4x16x128xf32>
    %554 = vector.shape_cast %553 : vector<1x4x16x128xf32> to vector<4x16x128xf32>
    %555 = vector.shape_cast %552 : vector<4x16x128xf32> to vector<1x4x16x128xf32>
    tpu.vector_store %arg4[%c0_462, %c12_463, %c0_464, %c0_465], %555 {strides = array<i32>} : memref<1x16x16x128xf32, #tpu.memory_space<vmem>>, vector<1x4x16x128xf32>,
    return
  }
  func.func @transform_0(%arg0: i32) -> (i32, i32, i32, i32) {
    %c0_i32 = arith.constant 0 : i32
    %c0_i32_0 = arith.constant 0 : i32
    %c0_i32_1 = arith.constant 0 : i32
    %c0_i32_2 = arith.constant 0 : i32
    return %arg0, %c0_i32, %c0_i32_0, %c0_i32_1 : i32, i32, i32, i32
  }
  func.func @transform_1(%arg0: i32) -> (i32, i32, i32) {
    %c0_i32 = arith.constant 0 : i32
    %c0_i32_0 = arith.constant 0 : i32
    %c0_i32_1 = arith.constant 0 : i32
    %c0_i32_2 = arith.constant 0 : i32
    return %c0_i32, %c0_i32_0, %c0_i32_1 : i32, i32, i32
  }
  func.func @transform_2(%arg0: i32) -> (i32, i32) {
    %c0_i32 = arith.constant 0 : i32
    %c0_i32_0 = arith.constant 0 : i32
    %c0_i32_1 = arith.constant 0 : i32
    return %c0_i32, %c0_i32_0 : i32, i32
  }
  func.func @transform_3(%arg0: i32) -> (i32, i32, i32, i32) {
    %c0_i32 = arith.constant 0 : i32
    %c0_i32_0 = arith.constant 0 : i32
    %c0_i32_1 = arith.constant 0 : i32
    %c0_i32_2 = arith.constant 0 : i32
    return %arg0, %c0_i32, %c0_i32_0, %c0_i32_1 : i32, i32, i32, i32
  }
}

</mosaic_0001>

<bundles_post_ra>
// kernel: base_block_forward.1
= control target key start
LH: loop header
LB: loop body
LE: loop exit
PB: predicated region body
PF: predicated region fallthrough
CT: control target
= control target key end

     0   :  { %8 = vsyncpa [#allocation4], 0  ;;  %s19822_s0 = inlined_call_operand.vmem [shape: f32[2,18,24,128], index: 0, kind: input, shape index: {}]   ;;  %s19823_s1 = inlined_call_operand.vmem [shape: bf16[18,128,128], index: 1, kind: input, shape index: {}]   ;;  %s19824_s2 = inlined_call_operand.vmem [shape: f32[2,128], index: 2, kind: input, shape index: {}]   ;;  %s19825_s3 = inlined_call_operand.hbm [shape: f32[2,16,16,128], index: 3, kind: output, shape index: {}]  }
   0x1   :  { %10 = vsyncpa [#allocation4 + $0x1], 0  ;;  %s14679_s12 = smov 0   ;;  %s14681_s13 = smov 0  }
   0x2   :  { %s14683_s14 = smov 0   ;;  %s14685_s15 = smov 0  }
   0x3 LB: > { %s14700_s16 = sadd.s32 4294967295, %s14653_s15   ;;  %s10371_s17 = sadd.s32 4294967294, %s14653_s15   ;;  %s14653_s15 = sphi %s14685_s15, %s20352_s15   ;;  %s14649_s14 = sphi %s14683_s14, %s20351_s14   ;;  %s14645_s13 = sphi %s14681_s13, %s20350_s13   ;;  %s14641_s12 = sphi %s14679_s12, %s20349_s12  }
   0x4   : > { %s14704_s18 = sadd.s32 1, %s14653_s15   ;;  %s91_s19 = sadd.s32 1, %s14649_s14 }
   0x5   : > { %s88_s20 = ssub.s32 %s14653_s15, %s14704_s18  ;;  %p101_p0 = scmp.ne.s32.totalorder %s14649_s14, %s14645_s13 }
   0x6   : > { %p89_p1 = scmp.eq.s32.totalorder %s88_s20, 0  ;;  %p102_p2 = scmp.eq.s32.totalorder %s14700_s16, 1 }
   0x7   : > { %p107_p3 = scmp.ne.s32.totalorder %s14645_s13, %s14641_s12  ;;  %p108_p4 = scmp.eq.s32.totalorder %s10371_s17, 1 }
   0x8   : > { %s14715_s21 = scalar_select %p89_p1, %s14649_s14, %s91_s19  }
   0x9   : > { %p14717_p5 = por %p102_p2, %p101_p0  ;;  %p14721_p6 = por %p108_p4, %p107_p3 }
   0xa   : > { %p10374_p7 = scmp.ge.s32.totalorder %s14653_s15, 1  ;;  %p140_p8 = scmp.lt.s32.totalorder %s14653_s15, 3 }
   0xc   : > { %p141_p9 = pnand %p10374_p7, %p140_p8 }
   0xe   : > { %144 = sbr.rel (%p141_p9) target bundleno = 1911 (0x777), region = 32 }
  0x13   : > { %v13977_v0 = vld [vmem:[%s19823_s1 + $0x78] sm:$0xff]  ;;  %v13976_v4 = vld [vmem:[%s19823_s1 + $0x70] sm:$0xff]  ;;  %p164_p10 = scmp.lt.s32.totalorder %s14700_s16, 1  ;;  %v13975_v8 = vld [vmem:[%s19823_s1 + $0x68] sm:$0xff]  ;;  %v169_v16 = vlaneseq  ;;  %s161_s24 = sand.u32 1, %s14645_s13  }
  0x14   : > { %v13969_v1 = vld [vmem:[%s19823_s1 + $0x38] sm:$0xff]  ;;  %315 = vmatpush.bf16.msra.mxu0 %v13977_v0  ;;  %v13968_v5 = vld [vmem:[%s19823_s1 + $0x30] sm:$0xff]  ;;  %v13967_v9 = vld [vmem:[%s19823_s1 + $0x28] sm:$0xff]  ;;  %s10375_s27 = sshll.u32 %s161_s24, 8  ;;  %s14538_s25 = sshll.u32 %s14700_s16, 8 }
  0x15   : > { %v13985_v2 = vld [vmem:[%s19823_s1 + $0xb8] sm:$0xff]  ;;  %402 = vmatpush.bf16.msra.mxu1 %v13969_v1  ;;  %v13984_v6 = vld [vmem:[%s19823_s1 + $0xb0] sm:$0xff]  ;;  %v13983_v10 = vld [vmem:[%s19823_s1 + $0xa8] sm:$0xff]  ;;  %s165_s30 = scalar_select %p164_p10, %s14700_s16, 1  ;;  %v14800_v23 = vshrl.u32 %v169_v16, 7 }
  0x16   : > { %v13993_v3 = vld [vmem:[%s19823_s1 + $0xf8] sm:$0xff]  ;;  %537 = vmatpush.bf16.msra.mxu2 %v13985_v2  ;;  %v13992_v7 = vld [vmem:[%s19823_s1 + $0xf0] sm:$0xff]  ;;  %v13991_v11 = vld [vmem:[%s19823_s1 + $0xe8] sm:$0xff]  ;;  %s18812_s28 = scalar_lea.vmem [#allocation3], %s10375_s27  ;;  %s10305_s29 = scalar_lea.hbm %s19825_s3, %s14538_s25 }
  0x17   : > { %696 = vmatpush.bf16.msra.mxu3 %v13993_v3  ;;  %v13974_v12 = vld [vmem:[%s19823_s1 + $0x60] sm:$0xff]  ;;  %s14539_s17 = smul.u32 432, %s165_s30  ;;  %v13973_v17 = vld [vmem:[%s19823_s1 + $0x58] sm:$0xff]  ;;  %v13972_v21 = vld [vmem:[%s19823_s1 + $0x50] sm:$0xff]  ;;  %vm209_vm0 = vcmp.lt.s32.totalorder %v14800_v23, 1  ;;  %vm453_vm1 = vcmp.lt.s32.totalorder %v14800_v23, 7 }
  0x18   : > { %316 = vmatpush.bf16.msra.mxu0 %v13976_v4  ;;  %v13966_v13 = vld [vmem:[%s19823_s1 + $0x20] sm:$0xff]  ;;  %v13965_v18 = vld [vmem:[%s19823_s1 + $0x18] sm:$0xff]  ;;  %v13964_v22 = vld [vmem:[%s19823_s1 + $0x10] sm:$0xff]  ;;  %s10306_s30 = sshll.u32 %s18812_s28, 4  ;;  %s10308_s16 = sshll.u32 %s10305_s29, 4  ;;  %s10307_s30 = int_to_ptr.vmem [resolvable:$true] %s10306_s30  ;;  %s10309_s16 = int_to_ptr.hbm [resolvable:$true] %s10308_s16 }
  0x19   : > { %403 = vmatpush.bf16.msra.mxu1 %v13968_v5  ;;  %v13982_v14 = vld [vmem:[%s19823_s1 + $0xa0] sm:$0xff]  ;;  %v13981_v19 = vld [vmem:[%s19823_s1 + $0x98] sm:$0xff]  ;;  %s14792_s5 = scalar_lea.vmem %s19822_s0, %s14539_s17  ;;  %v13980_v24 = vld [vmem:[%s19823_s1 + $0x90] sm:$0xff]  ;;  %s10294_s4 = scalar_lea.sflag [#allocation4], %s161_s24 }
  0x1a   : > { %538 = vmatpush.bf16.msra.mxu2 %v13984_v6  ;;  %v13990_v15 = vld [vmem:[%s19823_s1 + $0xe0] sm:$0xff]  ;;  %v13989_v20 = vld [vmem:[%s19823_s1 + $0xd8] sm:$0xff]  ;;  %v13988_v25 = vld [vmem:[%s19823_s1 + $0xd0] sm:$0xff]  ;;  %s14605_s6 = sshra.s32 %s10309_s16, 4  ;;  %s14611_s9 = scalar_lea.hbm %s19825_s3, 512  ;;  %s14606_s6 = int_to_ptr.hbm [resolvable:$true] %s14605_s6 }
  0x1b   : > { %697 = vmatpush.bf16.msra.mxu3 %v13992_v7  ;;  %v14809_v26 = vld [vmem:[%s14792_s5] sm:$0xff]  ;;  %v14812_v27 = vld [vmem:[%s14792_s5 + $0x8] sm:$0xff]  ;;  %v14815_v28 = vld [vmem:[%s14792_s5 + $0x58] sm:$0xff]  ;;  %s14607_s7 = scalar_lea.hbm %s14606_s6, 256  ;;  %p14612_p0 = scmp.lt.s32.totalorder %s14606_s6, %s19825_s3 }
  0x1c   : > { %317 = vmatpush.bf16.msra.mxu0 %v13975_v8  ;;  %v14818_v29 = vld [vmem:[%s14792_s5 + $0x10] sm:$0xff]  ;;  %v14821_v30 = vld [vmem:[%s14792_s5 + $0x18] sm:$0xff]  ;;  %v14824_v31 = vld [vmem:[%s14792_s5 + $0x20] sm:$0xff]  ;;  %v197_v33 = vrot.slane %v14809_v26, 7  ;;  %v198_v36 = vrot.slane %v14812_v27, 7  ;;  %v441_v37 = vrot.slane %v14809_v26, 1  ;;  %v244_v58 = vpack.c.bf16 %v14812_v27, %v14809_v26  ;;  %p14608_p11 = scmp.ne.s32.totalorder %s14606_s6, %s14607_s7  ;;  %p14613_p1 = scmp.lt.s32.totalorder %s14611_s9, %s14607_s7 }
  0x1d   : > { %404 = vmatpush.bf16.msra.mxu1 %v13967_v9  ;;  %v14827_v32 = vld [vmem:[%s14792_s5 + $0x70] sm:$0xff]  ;;  %v13971_v34 = vld [vmem:[%s19823_s1 + $0x48] sm:$0xff]  ;;  %v442_v38 = vrot.slane %v14812_v27, 1  ;;  %v14842_v39 = vrot.slane %v14815_v28, 7  ;;  %v443_v42 = vrot.slane %v14818_v29, 1  ;;  %v601_v43 = vrot.slane %v14821_v30, 7 }
  0x1e   : > { %539 = vmatpush.bf16.msra.mxu2 %v13983_v10  ;;  %v13963_v35 = vld [vmem:[%s19823_s1 + $0x8] sm:$0xff]  ;;  %v602_v44 = vrot.slane %v14824_v31, 7  ;;  %v14854_v45 = vrot.slane %v14827_v32, 7  ;;  %v13970_v46 = vld [vmem:[%s19823_s1 + $0x40] sm:$0xff]  ;;  %v220_v48 = vsel %vm209_vm0, %v197_v33, %v198_v36  ;;  %v14017_v56 = vld [vmem:[%s19823_s1 + $0x1b8] sm:$0xff]  ;;  %v14932_v8 = vrot.slane %v14821_v30, 1  ;;  %p14609_p12 = pnand %p14608_p11, %p14717_p5  ;;  %p14614_p2 = por %p14613_p1, %p14612_p0 }
  0x1f   : > { %698 = vmatpush.bf16.msra.mxu3 %v13991_v11  ;;  %v13979_v40 = vld [vmem:[%s19823_s1 + $0x88] sm:$0xff]  ;;  %v13962_v47 = vld [vmem:[%s19823_s1] sm:$0xff]  ;;  %v221_v49 = vsel %vm209_vm0, %v14842_v39, %v197_v33  ;;  %v464_v50 = vsel %vm453_vm1, %v441_v37, %v442_v38  ;;  %v463_v53 = vsel %vm453_vm1, %v442_v38, %v443_v42  ;;  %v14001_v57 = vld [vmem:[%s19823_s1 + $0x138] sm:$0xff]  ;;  %v199_v9 = vrot.slane %v14818_v29, 7 }
  0x20   : > { %318 = vmatpush.bf16.msra.mxu0 %v13974_v12  ;;  %v13987_v41 = vld [vmem:[%s19823_s1 + $0xc8] sm:$0xff]  ;;  %v13978_v51 = vld [vmem:[%s19823_s1 + $0x80] sm:$0xff]  ;;  %v14887_v54 = vsel %vm209_vm0, %v601_v43, %v602_v44  ;;  %v624_v55 = vsel %vm209_vm0, %v14854_v45, %v601_v43  ;;  %v222_v59 = vpack.c.bf16 %v220_v48, %v221_v49  ;;  %v466_v60 = vpack.c.bf16 %v463_v53, %v464_v50  ;;  %v14025_v62 = vld [vmem:[%s19823_s1 + $0x1f8] sm:$0xff]  ;;  %p14610_p13 = pneg %p14609_p12 }
  0x21   : > { %405 = vmatpush.bf16.msra.mxu1 %v13966_v13  ;;  %v13986_v52 = vld [vmem:[%s19823_s1 + $0xc0] sm:$0xff]  ;;  %v625_v61 = vpack.c.bf16 %v14887_v54, %v624_v55  ;;  %v14009_v63 = vld [vmem:[%s19823_s1 + $0x178] sm:$0xff]  ;;  %v14016_v0 = vld [vmem:[%s19823_s1 + $0x1b0] sm:$0xff]  ;;  %v445_v10 = vrot.slane %v14824_v31, 1  ;;  %v245_v27 = vpack.c.bf16 %v14821_v30, %v14818_v29 }
  0x22   : > { %540 = vmatpush.bf16.msra.mxu2 %v13982_v14  ;;  %v14000_v1 = vld [vmem:[%s19823_s1 + $0x130] sm:$0xff]  ;;  %v14917_v3 = vld [vmem:[%s14792_s5 + $0x28] sm:$0xff]  ;;  %v13998_v16 = vld [vmem:[%s19823_s1 + $0x120] sm:$0xff]  ;;  %p14615_p3 = pnand %p14614_p2, %p14610_p13 }
  0x23   : > { %699 = vmatpush.bf16.msra.mxu3 %v13990_v15  ;;  %v14024_v2 = vld [vmem:[%s19823_s1 + $0x1f0] sm:$0xff]  ;;  %v14015_v6 = vld [vmem:[%s19823_s1 + $0x1a8] sm:$0xff]  ;;  %v603_v11 = vrot.slane %v14917_v3, 7  ;;  %v14014_v15 = vld [vmem:[%s19823_s1 + $0x1a0] sm:$0xff] }
  0x24   : > { %319 = vmatpush.bf16.msra.mxu0 %v13973_v17  ;;  %v14008_v4 = vld [vmem:[%s19823_s1 + $0x170] sm:$0xff]  ;;  %v13999_v7 = vld [vmem:[%s19823_s1 + $0x128] sm:$0xff]  ;;  %v218_v17 = vsel %vm209_vm0, %v199_v9, %v601_v43  ;;  %v13997_v38 = vld [vmem:[%s19823_s1 + $0x118] sm:$0xff] }
  0x25   : > { %406 = vmatpush.bf16.msra.mxu1 %v13965_v18  ;;  %v14923_v5 = vld [vmem:[%s14792_s5 + $0x30] sm:$0xff]  ;;  %v14023_v13 = vld [vmem:[%s19823_s1 + $0x1e8] sm:$0xff]  ;;  %v219_v18 = vsel %vm209_vm0, %v198_v36, %v199_v9  ;;  %v14013_v36 = vld [vmem:[%s19823_s1 + $0x198] sm:$0xff] }
  0x26   : > { %541 = vmatpush.bf16.msra.mxu2 %v13981_v19  ;;  %v14938_v12 = vrot.slane %v14923_v5, 7  ;;  %v14007_v14 = vld [vmem:[%s19823_s1 + $0x168] sm:$0xff]  ;;  %v462_v19 = vsel %vm453_vm1, %v443_v42, %v14932_v8  ;;  %v223_v33 = vpack.c.bf16 %v218_v17, %v219_v18  ;;  %v14021_v29 = vld [vmem:[%s19823_s1 + $0x1d8] sm:$0xff]  ;;  %v15003_v42 = vld [vmem:[%s14792_s5 + $0x40] sm:$0xff]  ;;  %v15016_v48 = vrot.slane %v14923_v5, 1 }
  0x27   : > { %700 = vmatpush.bf16.msra.mxu3 %v13989_v20  ;;  %v14966_v20 = vsel %vm453_vm1, %v14932_v8, %v445_v10  ;;  %v14012_v43 = vld [vmem:[%s19823_s1 + $0x190] sm:$0xff]  ;;  %v606_v50 = vrot.slane %v15003_v42, 7  ;;  %v14010_v18 = vld [vmem:[%s19823_s1 + $0x180] sm:$0xff]  ;;  %v14529_v23 = vld [vmem:[%s19823_s1 + $0x438] sm:$0xff] }
  0x28   : > { %320 = vmatpush.bf16.msra.mxu0 %v13972_v21  ;;  %v14971_v21 = vsel %vm209_vm0, %v603_v11, %v14938_v12 }
  0x29   : > { %407 = vmatpush.bf16.msra.mxu1 %v13964_v22  ;;  %v622_v22 = vsel %vm209_vm0, %v602_v44, %v603_v11  ;;  %v13996_v44 = vld [vmem:[%s19823_s1 + $0x110] sm:$0xff] }
  0x2a   : > { %542 = vmatpush.bf16.msra.mxu2 %v13980_v24  ;;  %v14022_v24 = vld [vmem:[%s19823_s1 + $0x1e0] sm:$0xff] }
  0x2b   : > { %701 = vmatpush.bf16.msra.mxu3 %v13988_v25  ;;  %v14006_v25 = vld [vmem:[%s19823_s1 + $0x160] sm:$0xff] }
  0x2c   : > { %321 = vmatpush.bf16.msra.mxu0 %v13971_v34  ;;  %v467_v34 = vpack.c.bf16 %v14966_v20, %v462_v19  ;;  %v13994_v19 = vld [vmem:[%s19823_s1 + $0x100] sm:$0xff] }
  0x2d   : > { %408 = vmatpush.bf16.msra.mxu1 %v13963_v35  ;;  %v626_v35 = vpack.c.bf16 %v14971_v21, %v622_v22 }
  0x2e   : > { %543 = vmatpush.bf16.msra.mxu2 %v13979_v40  ;;  %v14997_v40 = vld [vmem:[%s14792_s5 + $0x38] sm:$0xff] }
  0x2f   : > { %702 = vmatpush.bf16.msra.mxu3 %v13987_v41  ;;  %v14005_v41 = vld [vmem:[%s19823_s1 + $0x158] sm:$0xff]  ;;  %v605_v49 = vrot.slane %v14997_v40, 7 }
  0x30   : > { %322 = vmatpush.bf16.msra.mxu0 %v13970_v46  ;;  %v14020_v46 = vld [vmem:[%s19823_s1 + $0x1d0] sm:$0xff] }
  0x31   : > { %409 = vmatpush.bf16.msra.mxu1 %v13962_v47  ;;  %v446_v47 = vrot.slane %v14917_v3, 1  ;;  %v619_v53 = vsel %vm209_vm0, %v605_v49, %v606_v50  ;;  %v15034_v55 = vsel %vm209_vm0, %v14938_v12, %v605_v49  ;;  %v14049_v49 = vld [vmem:[%s19823_s1 + $0x78] sm:$0xff] }
  0x32   : > { %544 = vmatpush.bf16.msra.mxu2 %v13978_v51 }
  0x33   : > { %703 = vmatpush.bf16.msra.mxu3 %v13986_v52  ;;  %323 = vmatmul.bf16.vlgmr.msra.gmra.mxu0 %v244_v58  ;;  %v15023_v51 = vsel %vm453_vm1, %v446_v47, %v15016_v48  ;;  %v15027_v52 = vsel %vm453_vm1, %v445_v10, %v446_v47  ;;  %v14057_v47 = vld [vmem:[%s19823_s1 + $0xb8] sm:$0xff] }
  0x34   : > { %818 = vmatpush.bf16.msrb.mxu0 %v14001_v57  ;;  %410 = vmatmul.bf16.vlgmr.msra.gmra.mxu1 %v222_v59  ;;  %v224_v57 = vpack.c.bf16 %v622_v22, %v14887_v54  ;;  %v468_v58 = vpack.c.bf16 %v15023_v51, %v15027_v52  ;;  %v627_v59 = vpack.c.bf16 %v619_v53, %v15034_v55  ;;  %v13995_v54 = vld [vmem:[%s19823_s1 + $0x108] sm:$0xff]  ;;  %v14002_v22 = vld [vmem:[%s19823_s1 + $0x140] sm:$0xff] }
  0x35   : > { %545 = vmatmul.bf16.vlgmr.msra.gmra.mxu2 %v466_v60  ;;  %964 = vmatpush.bf16.msrb.mxu1 %v14009_v63  ;;  %v14004_v60 = vld [vmem:[%s19823_s1 + $0x150] sm:$0xff]  ;;  %v15055_v63 = vld [vmem:[%s14792_s5 + $0x48] sm:$0xff] }
  0x36   : > { %1123 = vmatpush.bf16.msrb.mxu2 %v14017_v56  ;;  %704 = vmatmul.bf16.vlgmr.msra.gmra.mxu3 %v625_v61  ;;  %v246_v56 = vpack.c.bf16 %v14917_v3, %v14824_v31  ;;  %v14011_v61 = vld [vmem:[%s19823_s1 + $0x188] sm:$0xff] }
  0x37   : > { %1245 = vmatpush.bf16.msrb.mxu3 %v14025_v62  ;;  %v14019_v62 = vld [vmem:[%s19823_s1 + $0x1c8] sm:$0xff] }
  0x38   : > { %819 = vmatpush.bf16.msrb.mxu0 %v14000_v1  ;;  %v14003_v1 = vld [vmem:[%s19823_s1 + $0x148] sm:$0xff] }
  0x39   : > { %965 = vmatpush.bf16.msrb.mxu1 %v14008_v4  ;;  %v449_v4 = vrot.slane %v15003_v42, 1 }
  0x3a   : > { %1124 = vmatpush.bf16.msrb.mxu2 %v14016_v0  ;;  %v15058_v0 = vld [vmem:[%s14792_s5 + $0x50] sm:$0xff] }
  0x3b   : > { %1246 = vmatpush.bf16.msrb.mxu3 %v14024_v2  ;;  %v448_v2 = vrot.slane %v14997_v40, 1  ;;  %v249_v26 = vpack.c.bf16 %v14815_v28, %v15058_v0 }
  0x3c   : > { %820 = vmatpush.bf16.msrb.mxu0 %v13999_v7  ;;  %v608_v7 = vrot.slane %v15058_v0, 7 }
  0x3d   : > { %966 = vmatpush.bf16.msrb.mxu1 %v14007_v14  ;;  %v15069_v9 = vsel %vm453_vm1, %v448_v2, %v449_v4  ;;  %v15074_v10 = vsel %vm453_vm1, %v15016_v48, %v448_v2  ;;  %v15082_v14 = vpack.c.bf16 %v14997_v40, %v14923_v5 }
  0x3e   : > { %1125 = vmatpush.bf16.msrb.mxu2 %v14015_v6  ;;  %v607_v6 = vrot.slane %v15055_v63, 7 }
  0x3f   : > { %1247 = vmatpush.bf16.msrb.mxu3 %v14023_v13 }
  0x40   : > { %821 = vmatpush.bf16.msrb.mxu0 %v13998_v16  ;;  %v617_v11 = vsel %vm209_vm0, %v607_v6, %v608_v7  ;;  %v618_v13 = vsel %vm209_vm0, %v606_v50, %v607_v6  ;;  %v15088_v16 = vpack.c.bf16 %v15069_v9, %v15074_v10  ;;  %v15156_v50 = vld [vmem:[%s14792_s5 + $0x68] sm:$0xff] }
  0x41   : > { %967 = vmatpush.bf16.msrb.mxu1 %v14006_v25  ;;  %v628_v17 = vpack.c.bf16 %v617_v11, %v618_v13  ;;  %v450_v25 = vrot.slane %v15055_v63, 1  ;;  %v14039_v6 = vld [vmem:[%s19823_s1 + $0x28] sm:$0xff] }
  0x42   : > { %1126 = vmatpush.bf16.msrb.mxu2 %v14014_v15  ;;  %v225_v15 = vpack.c.bf16 %v15034_v55, %v14971_v21  ;;  %v14018_v21 = vld [vmem:[%s19823_s1 + $0x1c0] sm:$0xff] }
  0x43   : > { %1248 = vmatpush.bf16.msrb.mxu3 %v14022_v24  ;;  %328 = vmatmul.bf16.gmra.mxu0 %v245_v27  ;;  %v15105_v24 = vld [vmem:[%s14792_s5 + $0x60] sm:$0xff]  ;;  %v451_v27 = vrot.slane %v15058_v0, 1 }
  0x44   : > { %415 = vmatmul.bf16.gmra.mxu1 %v223_v33  ;;  %822 = vmatpush.bf16.msrb.mxu0 %v13997_v38  ;;  %v15110_v33 = vrot.slane %v15105_v24, 7  ;;  %v616_v38 = vsel %vm209_vm0, %v608_v7, %v14842_v39  ;;  %v14031_v7 = vld [vmem:[%s19823_s1 + $0x228] sm:$0xff] }
  0x45   : > { %550 = vmatmul.bf16.gmra.mxu2 %v467_v34  ;;  %968 = vmatpush.bf16.msrb.mxu1 %v14005_v41  ;;  %v15114_v34 = vsel %vm453_vm1, %v450_v25, %v451_v27  ;;  %v15133_v41 = vpack.c.bf16 %v618_v13, %v619_v53  ;;  %v14040_v53 = vld [vmem:[%s19823_s1 + $0x30] sm:$0xff]  ;;  %v15213_v13 = vld [vmem:[%s14792_s5 + $0x88] sm:$0xff] }
  0x46   : > { %709 = vmatmul.bf16.gmra.mxu3 %v626_v35  ;;  %1127 = vmatpush.bf16.msrb.mxu2 %v14013_v36  ;;  %v15118_v35 = vsel %vm453_vm1, %v449_v4, %v450_v25  ;;  %v15124_v36 = vsel %vm209_vm0, %v14842_v39, %v15110_v33  ;;  %v14041_v39 = vld [vmem:[%s19823_s1 + $0x38] sm:$0xff]  ;;  %v14048_v4 = vld [vmem:[%s19823_s1 + $0x70] sm:$0xff]  ;;  %v14038_v25 = vld [vmem:[%s19823_s1 + $0x20] sm:$0xff] }
  0x47   : > { %1249 = vmatpush.bf16.msrb.mxu3 %v14021_v29  ;;  %v15131_v29 = vpack.c.bf16 %v15055_v63, %v15003_v42 }
  0x48   : > { %823 = vmatpush.bf16.msrb.mxu0 %v13996_v44  ;;  %v629_v44 = vpack.c.bf16 %v15124_v36, %v616_v38 }
  0x49   : > { %969 = vmatpush.bf16.msrb.mxu1 %v14004_v60 }
  0x4a   : > { %1128 = vmatpush.bf16.msrb.mxu2 %v14012_v43  ;;  %v15137_v43 = vpack.c.bf16 %v15114_v34, %v15118_v35 }
  0x4b   : > { %1250 = vmatpush.bf16.msrb.mxu3 %v14020_v46  ;;  %v14033_v46 = vld [vmem:[%s19823_s1 + $0x238] sm:$0xff] }
  0x4c   : > { %824 = vmatpush.bf16.msrb.mxu0 %v13995_v54 }
  0x4d   : > { %970 = vmatpush.bf16.msrb.mxu1 %v14003_v1  ;;  %v227_v1 = vpack.c.bf16 %v616_v38, %v617_v11  ;;  %v14055_v11 = vld [vmem:[%s19823_s1 + $0xa8] sm:$0xff] }
  0x4e   : > { %1129 = vmatpush.bf16.msrb.mxu2 %v14011_v61 }
  0x4f   : > { %1251 = vmatpush.bf16.msrb.mxu3 %v14019_v62 }
  0x50   : > { %825 = vmatpush.bf16.msrb.mxu0 %v13994_v19  ;;  %v747_v19 = vpack.c.bf16 %v14824_v31, %v14821_v30  ;;  %v14054_v30 = vld [vmem:[%s19823_s1 + $0xa0] sm:$0xff] }
  0x51   : > { %971 = vmatpush.bf16.msrb.mxu1 %v14002_v22  ;;  %v14046_v31 = vld [vmem:[%s19823_s1 + $0x60] sm:$0xff] }
  0x52   : > { %1130 = vmatpush.bf16.msrb.mxu2 %v14010_v18 }
  0x53   : > { %333 = vmatmul.bf16.gmra.mxu0 %v246_v56  ;;  %1252 = vmatpush.bf16.msrb.mxu3 %v14018_v21  ;;  %v14032_v56 = vld [vmem:[%s19823_s1 + $0x230] sm:$0xff]  ;;  %v893_v21 = vpack.c.bf16 %v15027_v52, %v14966_v20  ;;  %v748_v20 = vpack.c.bf16 %v14923_v5, %v14917_v3  ;;  %v894_v52 = vpack.c.bf16 %v15074_v10, %v15023_v51  ;;  %v14053_v3 = vld [vmem:[%s19823_s1 + $0x98] sm:$0xff] }
  0x54   : > { %420 = vmatmul.bf16.gmra.mxu1 %v224_v57  ;;  %1391 = vmatpush.bf16.msra.mxu0 %v14033_v46  ;;  %v14056_v57 = vld [vmem:[%s19823_s1 + $0xb0] sm:$0xff]  ;;  %v14045_v5 = vld [vmem:[%s19823_s1 + $0x58] sm:$0xff]  ;;  %v749_v51 = vpack.c.bf16 %v15003_v42, %v14997_v40  ;;  %v895_v10 = vpack.c.bf16 %v15118_v35, %v15069_v9 }
  0x55   : > { %555 = vmatmul.bf16.gmra.mxu2 %v468_v58  ;;  %1627 = vmatpush.bf16.msra.mxu1 %v14049_v49  ;;  %v15168_v58 = vrot.slane %v14815_v28, 1  ;;  %v14044_v40 = vld [vmem:[%s19823_s1 + $0x50] sm:$0xff] }
  0x56   : > { %714 = vmatmul.bf16.gmra.mxu3 %v627_v59  ;;  %1714 = vmatpush.bf16.msra.mxu2 %v14041_v39  ;;  %v15171_v59 = vrot.slane %v15156_v50, 7  ;;  %v14052_v39 = vld [vmem:[%s19823_s1 + $0x90] sm:$0xff] }
  0x57   : > { %1847 = vmatpush.bf16.msra.mxu3 %v14057_v47  ;;  %v15176_v60 = vsel %vm453_vm1, %v451_v27, %v15168_v58  ;;  %v465_v61 = vsel %vm453_vm1, %v15168_v58, %v441_v37 }
  0x58   : > { %1392 = vmatpush.bf16.msra.mxu0 %v14032_v56  ;;  %v15187_v54 = vsel %vm209_vm0, %v15171_v59, %v14854_v45  ;;  %v15193_v62 = vsel %vm209_vm0, %v15110_v33, %v15171_v59  ;;  %v471_v2 = vpack.c.bf16 %v465_v61, %v15176_v60  ;;  %v14035_v56 = vld [vmem:[%s19823_s1 + $0x8] sm:$0xff] }
  0x59   : > { %v630_v37 = vpack.c.bf16 %v15187_v54, %v15193_v62  ;;  %1628 = vmatpush.bf16.msra.mxu1 %v14048_v4  ;;  %v14051_v61 = vld [vmem:[%s19823_s1 + $0x88] sm:$0xff] }
  0x5a   : > { %1715 = vmatpush.bf16.msra.mxu2 %v14040_v53  ;;  %v14043_v4 = vld [vmem:[%s19823_s1 + $0x48] sm:$0xff] }
  0x5b   : > { %1848 = vmatpush.bf16.msra.mxu3 %v14056_v57  ;;  %v14027_v57 = vld [vmem:[%s19823_s1 + $0x208] sm:$0xff] }
  0x5c   : > { %1393 = vmatpush.bf16.msra.mxu0 %v14031_v7 }
  0x5e   : > { %1716 = vmatpush.bf16.msra.mxu2 %v14039_v6 }
  0x5f   : > { %1849 = vmatpush.bf16.msra.mxu3 %v14055_v11 }
  0x62   : > { %1717 = vmatpush.bf16.msra.mxu2 %v14038_v25  ;;  %v15311_v25 = vrot.slane %v15156_v50, 1 }
  0x63   : > { %338 = vmatmul.bf16.gmra.mxu0 %v15082_v14  ;;  %1850 = vmatpush.bf16.msra.mxu3 %v14054_v30 }
  0x64   : > { %425 = vmatmul.bf16.gmra.mxu1 %v225_v15  ;;  %v14047_v15 = vld [vmem:[%s19823_s1 + $0x68] sm:$0xff] }
  0x65   : > { %560 = vmatmul.bf16.gmra.mxu2 %v15088_v16  ;;  %1629 = vmatpush.bf16.msra.mxu1 %v14047_v15  ;;  %v1055_v15 = vpack.c.bf16 %v15193_v62, %v15124_v36  ;;  %v15308_v36 = vrot.slane %v15105_v24, 1 }
  0x66   : > { %719 = vmatmul.bf16.gmra.mxu3 %v628_v17  ;;  %v15219_v17 = vrot.slane %v15213_v13, 7 }
  0x67   : > { %1851 = vmatpush.bf16.msra.mxu3 %v14053_v3  ;;  %v15338_v3 = vsel %vm453_vm1, %v15168_v58, %v15308_v36 }
  0x68   : > { %v1051_v18 = vsel %vm209_vm0, %v15219_v17, %v14938_v12  ;;  %v14030_v12 = vld [vmem:[%s19823_s1 + $0x220] sm:$0xff] }
  0x69   : > { %v1052_v22 = vpack.c.bf16 %v15034_v55, %v1051_v18  ;;  %1394 = vmatpush.bf16.msra.mxu0 %v14030_v12  ;;  %1630 = vmatpush.bf16.msra.mxu1 %v14046_v31  ;;  %v14037_v55 = vld [vmem:[%s19823_s1 + $0x18] sm:$0xff]  ;;  %v15299_v18 = vpack.c.bf16 %v15156_v50, %v15105_v24  ;;  %v14034_v31 = vld [vmem:[%s19823_s1] sm:$0xff] }
  0x6a   : > { %1718 = vmatpush.bf16.msra.mxu2 %v14037_v55  ;;  %v14042_v55 = vld [vmem:[%s19823_s1 + $0x40] sm:$0xff] }
  0x6b   : > { %1852 = vmatpush.bf16.msra.mxu3 %v14052_v39 }
  0x6d   : > { %1631 = vmatpush.bf16.msra.mxu1 %v14045_v5 }
  0x6f   : > { %1853 = vmatpush.bf16.msra.mxu3 %v14051_v61 }
  0x71   : > { %1632 = vmatpush.bf16.msra.mxu1 %v14044_v40 }
  0x73   : > { %343 = vmatmul.bf16.gmra.mxu0 %v15131_v29 }
  0x74   : > { %430 = vmatmul.bf16.gmra.mxu1 %v15133_v41 }
  0x75   : > { %565 = vmatmul.bf16.gmra.mxu2 %v15137_v43  ;;  %1633 = vmatpush.bf16.msra.mxu1 %v14043_v4 }
  0x76   : > { %724 = vmatmul.bf16.gmra.mxu3 %v629_v44  ;;  %v14028_v44 = vld [vmem:[%s19823_s1 + $0x210] sm:$0xff] }
  0x79   : > { %1634 = vmatpush.bf16.msra.mxu1 %v14042_v55 }
  0x83   : > { %348 = vmatmul.bf16.gmra.mxu0 %v249_v26 }
  0x84   : > { %435 = vmatmul.bf16.gmra.mxu1 %v227_v1 }
  0x85   : > { %570 = vmatmul.bf16.gmra.mxu2 %v471_v2  ;;  %v750_v2 = vpack.c.bf16 %v15058_v0, %v15055_v63  ;;  %v15305_v63 = vld [vmem:[%s14792_s5 + $0x78] sm:$0xff] }
  0x86   : > { %729 = vmatmul.bf16.gmra.mxu3 %v630_v37  ;;  %v896_v37 = vpack.c.bf16 %v15176_v60, %v15114_v34  ;;  %v15314_v30 = vrot.slane %v15305_v63, 7  ;;  %v1178_v39 = vpack.c.bf16 %v15305_v63, %v14827_v32 }
  0x88   : > { %v1042_v5 = vsel %vm209_vm0, %v14854_v45, %v15314_v30 }
  0x93   : > { %826 = vmatmul.bf16.vlgmr.msrb.gmra.mxu0 %v747_v19 }
  0x94   : > { %972 = vmatmul.bf16.vlgmr.msrb.gmra.mxu1 %v893_v21 }
  0x95   : > { %1131 = vmatmul.bf16.vlgmr.msrb.gmra.mxu2 %v1052_v22 }
  0x96   : > { %1253 = vmatmul.bf16.vlgmr.msrb.gmra.mxu3 %v15082_v14  ;;  %v14029_v14 = vld [vmem:[%s19823_s1 + $0x218] sm:$0xff] }
  0x97   : > { %1395 = vmatpush.bf16.msra.mxu0 %v14029_v14  ;;  %v15332_v14 = vsel %vm453_vm1, %v15308_v36, %v15311_v25 }
  0x9b   : > { %1396 = vmatpush.bf16.msra.mxu0 %v14028_v44  ;;  %v1056_v44 = vpack.c.bf16 %v1042_v5, %v15187_v54  ;;  %v14089_v54 = vld [vmem:[%s19823_s1 + $0x1b8] sm:$0xff] }
  0x9f   : > { %1397 = vmatpush.bf16.msra.mxu0 %v14027_v57  ;;  %v15369_v57 = vrot.slane %v14827_v32, 1 }
  0xa3   : > { %831 = vmatmul.bf16.gmra.mxu0 %v748_v20  ;;  %v14026_v20 = vld [vmem:[%s19823_s1 + $0x200] sm:$0xff] }
  0xa4   : > { %977 = vmatmul.bf16.gmra.mxu1 %v894_v52  ;;  %v14050_v52 = vld [vmem:[%s19823_s1 + $0x80] sm:$0xff]  ;;  %1398 = vmatpush.bf16.msra.mxu0 %v14026_v20  ;;  %v15421_v20 = vld [vmem:[%s14792_s5 + $0xb8] sm:$0xff] }
  0xa5   : > { %1136 = vmatmul.bf16.gmra.mxu2 %v15133_v41  ;;  %v14036_v41 = vld [vmem:[%s19823_s1 + $0x10] sm:$0xff]  ;;  %1854 = vmatpush.bf16.msra.mxu3 %v14050_v52 }
  0xa6   : > { %1258 = vmatmul.bf16.gmra.mxu3 %v15131_v29  ;;  %1719 = vmatpush.bf16.msra.mxu2 %v14036_v41  ;;  %v15424_v52 = vld [vmem:[%s14792_s5 + $0x70] sm:$0xff] }
  0xa9   : > { %2429 = vmatpush.bf16.msrb.mxu3 %v14089_v54 }
  0xaa   : > { %1720 = vmatpush.bf16.msra.mxu2 %v14035_v56 }
  0xae   : > { %1721 = vmatpush.bf16.msra.mxu2 %v14034_v31  ;;  %v14072_v31 = vld [vmem:[%s19823_s1 + $0x130] sm:$0xff] }
  0xb0   : > { %v324_v27 = vpop.f32.mrf.mxu0 }
  0xb1   : > { %v411_v38 = vpop.f32.mrf.mxu1 }
  0xb2   : > { %v412_v29 = vadd.f32 %v411_v38, %v324_v27  ;;  %v751_v27 = vpack.c.bf16 %v15105_v24, %v14815_v28  ;;  %v897_v38 = vpack.c.bf16 %v15332_v14, %v15338_v3  ;;  %v14081_v28 = vld [vmem:[%s19823_s1 + $0x178] sm:$0xff] }
  0xb3   : > { %836 = vmatmul.bf16.gmra.mxu0 %v749_v51  ;;  %v14065_v24 = vld [vmem:[%s19823_s1 + $0xf8] sm:$0xff]  ;;  %2271 = vmatpush.bf16.msrb.mxu2 %v14081_v28 }
  0xb4   : > { %982 = vmatmul.bf16.gmra.mxu1 %v895_v10  ;;  %2005 = vmatpush.bf16.msrb.mxu0 %v14065_v24 }
  0xb5   : > { %1141 = vmatmul.bf16.gmra.mxu2 %v227_v1 }
  0xb6   : > { %1263 = vmatmul.bf16.gmra.mxu3 %v249_v26 }
  0xb8   : > { %v546_v42 = vpop.f32.mrf.mxu2  ;;  %v326_v46 = vpop.f32.mrf.mxu0 }
  0xb9   : > { %v705_v9 = vpop.f32.mrf.mxu3  ;;  %v576_v35 = vadd.f32 %v546_v42, %v412_v29  ;;  %v413_v47 = vpop.f32.mrf.mxu1  ;;  %v15363_v42 = vld [vmem:[%s14792_s5 + $0x80] sm:$0xff] }
  0xba   : > { %v414_v49 = vadd.f32 %v413_v47, %v326_v46  ;;  %v14073_v46 = vld [vmem:[%s19823_s1 + $0x138] sm:$0xff]  ;;  %v15372_v61 = vrot.slane %v15363_v42, 7 }
  0xbb   : > { %v15277_v53 = vadd.f32 %v705_v9, %v576_v35  ;;  %2126 = vmatpush.bf16.msrb.mxu1 %v14073_v46 }
  0xbc   : > { %v15394_v4 = vsel %vm209_vm0, %v15314_v30, %v15372_v61 }
  0xbf   : > { %2127 = vmatpush.bf16.msrb.mxu1 %v14072_v31 }
  0xc0   : > { %v548_v26 = vpop.f32.mrf.mxu2  ;;  %v329_v7 = vpop.f32.mrf.mxu0 }
  0xc1   : > { %v707_v1 = vpop.f32.mrf.mxu3  ;;  %v577_v6 = vadd.f32 %v548_v26, %v414_v49  ;;  %v416_v11 = vpop.f32.mrf.mxu1 }
  0xc2   : > { %v752_v11 = vpack.c.bf16 %v14827_v32, %v15156_v50  ;;  %v14064_v32 = vld [vmem:[%s19823_s1 + $0xf0] sm:$0xff] }
  0xc3   : > { %v15301_v19 = vadd.f32 %v707_v1, %v577_v6  ;;  %841 = vmatmul.bf16.gmra.mxu0 %v750_v2  ;;  %v15380_v1 = vsel %vm453_vm1, %v15311_v25, %v15369_v57  ;;  %v892_v2 = vsel %vm453_vm1, %v15369_v57, %v14932_v8  ;;  %v14088_v50 = vld [vmem:[%s19823_s1 + $0x1b0] sm:$0xff] }
  0xc4   : > { %987 = vmatmul.bf16.gmra.mxu1 %v896_v37  ;;  %v1040_v37 = vsel %vm209_vm0, %v15372_v61, %v15219_v17  ;;  %2006 = vmatpush.bf16.msrb.mxu0 %v14064_v32 }
  0xc5   : > { %1146 = vmatmul.bf16.gmra.mxu2 %v1055_v15  ;;  %v898_v15 = vpack.c.bf16 %v892_v2, %v15380_v1  ;;  %2430 = vmatpush.bf16.msrb.mxu3 %v14088_v50 }
  0xc6   : > { %1268 = vmatmul.bf16.gmra.mxu3 %v15299_v18 }
  0xc8   : > { %v551_v0 = vpop.f32.mrf.mxu2  ;;  %v331_v21 = vpop.f32.mrf.mxu0 }
  0xc9   : > { %v710_v34 = vpop.f32.mrf.mxu3  ;;  %v418_v22 = vpop.f32.mrf.mxu1 }
  0xca   : > { %v419_v12 = vadd.f32 %v418_v22, %v331_v21  ;;  %v15400_v34 = vpack.c.bf16 %v1040_v37, %v15394_v4  ;;  %v15404_v21 = vpack.c.bf16 %v15213_v13, %v15363_v42 }
  0xd0   : > { %v553_v51 = vpop.f32.mrf.mxu2  ;;  %v334_v29 = vpop.f32.mrf.mxu0 }
  0xd1   : > { %v712_v10 = vpop.f32.mrf.mxu3  ;;  %v579_v58 = vadd.f32 %v553_v51, %v419_v12  ;;  %v421_v41 = vpop.f32.mrf.mxu1  ;;  %v14080_v12 = vld [vmem:[%s19823_s1 + $0x170] sm:$0xff] }
  0xd2   : > { %v422_v45 = vadd.f32 %v421_v41, %v334_v29  ;;  %2272 = vmatpush.bf16.msrb.mxu2 %v14080_v12  ;;  %v1755_v29 = vrot.slane %v15424_v52, 1 }
  0xd3   : > { %v15351_v40 = vadd.f32 %v712_v10, %v579_v58  ;;  %846 = vmatmul.bf16.gmra.mxu0 %v751_v27  ;;  %v15427_v58 = vrot.slane %v15421_v20, 7 }
  0xd4   : > { %992 = vmatmul.bf16.gmra.mxu1 %v897_v38  ;;  %v1774_v24 = vsel %vm453_vm1, %v15311_v25, %v1755_v29 }
  0xd5   : > { %1151 = vmatmul.bf16.gmra.mxu2 %v1056_v44  ;;  %v14079_v44 = vld [vmem:[%s19823_s1 + $0x168] sm:$0xff]  ;;  %v1534_v28 = vsel %vm209_vm0, %v15427_v58, %v15110_v33  ;;  %v1777_v2 = vpack.c.bf16 %v1774_v24, %v15332_v14  ;;  %v15507_v24 = vld [vmem:[%s14792_s5 + $0x90] sm:$0xff] }
  0xd6   : > { %1273 = vmatmul.bf16.gmra.mxu3 %v1178_v39  ;;  %v14063_v39 = vld [vmem:[%s19823_s1 + $0xe8] sm:$0xff]  ;;  %2273 = vmatpush.bf16.msrb.mxu2 %v14079_v44 }
  0xd7   : > { %2007 = vmatpush.bf16.msrb.mxu0 %v14063_v39 }
  0xd8   : > { %v556_v9 = vpop.f32.mrf.mxu2  ;;  %v336_v49 = vpop.f32.mrf.mxu0 }
  0xd9   : > { %v715_v35 = vpop.f32.mrf.mxu3  ;;  %v580_v47 = vadd.f32 %v556_v9, %v422_v45  ;;  %v423_v56 = vpop.f32.mrf.mxu1  ;;  %v14087_v45 = vld [vmem:[%s19823_s1 + $0x1a8] sm:$0xff] }
  0xda   : > { %2431 = vmatpush.bf16.msrb.mxu3 %v14087_v45  ;;  %v1535_v56 = vpack.c.bf16 %v15193_v62, %v1534_v28  ;;  %v15459_v62 = vrot.slane %v15305_v63, 1  ;;  %v14085_v28 = vld [vmem:[%s19823_s1 + $0x198] sm:$0xff] }
  0xdb   : > { %v15374_v26 = vadd.f32 %v715_v35, %v580_v47  ;;  %v14071_v35 = vld [vmem:[%s19823_s1 + $0x128] sm:$0xff] }
  0xdc   : > { %2128 = vmatpush.bf16.msrb.mxu1 %v14071_v35  ;;  %v1773_v31 = vsel %vm453_vm1, %v1755_v29, %v15459_v62  ;;  %v14077_v29 = vld [vmem:[%s19823_s1 + $0x158] sm:$0xff] }
  0xe0   : > { %v558_v6 = vpop.f32.mrf.mxu2  ;;  %v339_v8 = vpop.f32.mrf.mxu0 }
  0xe1   : > { %v717_v7 = vpop.f32.mrf.mxu3  ;;  %v426_v0 = vpop.f32.mrf.mxu1 }
  0xe2   : > { %v427_v22 = vadd.f32 %v426_v0, %v339_v8  ;;  %v15462_v8 = vrot.slane %v15363_v42, 1  ;;  %v14086_v0 = vld [vmem:[%s19823_s1 + $0x1a0] sm:$0xff] }
  0xe3   : > { %851 = vmatmul.bf16.gmra.mxu0 %v752_v11  ;;  %v1513_v11 = vrot.slane %v15424_v52, 7  ;;  %2432 = vmatpush.bf16.msrb.mxu3 %v14086_v0  ;;  %v14076_v0 = vld [vmem:[%s19823_s1 + $0x150] sm:$0xff] }
  0xe4   : > { %997 = vmatmul.bf16.gmra.mxu1 %v898_v15  ;;  %v15486_v50 = vsel %vm453_vm1, %v15459_v62, %v15462_v8 }
  0xe5   : > { %1156 = vmatmul.bf16.gmra.mxu2 %v15400_v34  ;;  %v1531_v12 = vsel %vm209_vm0, %v1513_v11, %v15314_v30  ;;  %v1532_v32 = vsel %vm209_vm0, %v15171_v59, %v1513_v11  ;;  %v1778_v44 = vpack.c.bf16 %v15486_v50, %v1773_v31 }
  0xe6   : > { %1278 = vmatmul.bf16.gmra.mxu3 %v15404_v21 }
  0xe7   : > { %2433 = vmatpush.bf16.msrb.mxu3 %v14085_v28 }
  0xe8   : > { %v561_v55 = vpop.f32.mrf.mxu2  ;;  %v341_v10 = vpop.f32.mrf.mxu0 }
  0xe9   : > { %v720_v5 = vpop.f32.mrf.mxu3  ;;  %v582_v51 = vadd.f32 %v561_v55, %v427_v22  ;;  %v428_v27 = vpop.f32.mrf.mxu1  ;;  %v14070_v22 = vld [vmem:[%s19823_s1 + $0x120] sm:$0xff] }
  0xea   : > { %v429_v38 = vadd.f32 %v428_v27, %v341_v10  ;;  %2129 = vmatpush.bf16.msrb.mxu1 %v14070_v22 }
  0xeb   : > { %v15430_v41 = vadd.f32 %v720_v5, %v582_v51  ;;  %v1558_v51 = vpack.c.bf16 %v15305_v63, %v15424_v52  ;;  %v14061_v52 = vld [vmem:[%s19823_s1 + $0xd8] sm:$0xff] }
  0xf0   : > { %v563_v54 = vpop.f32.mrf.mxu2  ;;  %v344_v47 = vpop.f32.mrf.mxu0 }
  0xf1   : > { %v722_v9 = vpop.f32.mrf.mxu3  ;;  %v583_v46 = vadd.f32 %v563_v54, %v429_v38  ;;  %v431_v49 = vpop.f32.mrf.mxu1  ;;  %v1536_v38 = vpack.c.bf16 %v1531_v12, %v1532_v32  ;;  %v14060_v12 = vld [vmem:[%s19823_s1 + $0xd0] sm:$0xff] }
  0xf2   : > { %v15513_v49 = vrot.slane %v15213_v13, 1 }
  0xf3   : > { %v15453_v33 = vadd.f32 %v722_v9, %v583_v46  ;;  %1399 = vmatmul.bf16.vlgmr.msra.gmra.mxu0 %v15088_v16  ;;  %v14078_v16 = vld [vmem:[%s19823_s1 + $0x160] sm:$0xff]  ;;  %v14069_v9 = vld [vmem:[%s19823_s1 + $0x118] sm:$0xff] }
  0xf4   : > { %1635 = vmatmul.bf16.vlgmr.msra.gmra.mxu1 %v15299_v18  ;;  %v14062_v18 = vld [vmem:[%s19823_s1 + $0xe0] sm:$0xff]  ;;  %2274 = vmatpush.bf16.msrb.mxu2 %v14078_v16 }
  0xf5   : > { %1722 = vmatmul.bf16.vlgmr.msra.gmra.mxu2 %v1535_v56  ;;  %2008 = vmatpush.bf16.msrb.mxu0 %v14062_v18  ;;  %v15516_v56 = vrot.slane %v15507_v24, 1 }
  0xf6   : > { %1855 = vmatmul.bf16.vlgmr.msra.gmra.mxu3 %v1777_v2  ;;  %2130 = vmatpush.bf16.msrb.mxu1 %v14069_v9 }
  0xf8   : > { %v566_v25 = vpop.f32.mrf.mxu2  ;;  %v346_v6 = vpop.f32.mrf.mxu0  ;;  %2275 = vmatpush.bf16.msrb.mxu2 %v14077_v29  ;;  %v14059_v29 = vld [vmem:[%s19823_s1 + $0xc8] sm:$0xff] }
  0xf9   : > { %v725_v37 = vpop.f32.mrf.mxu3  ;;  %v433_v7 = vpop.f32.mrf.mxu1  ;;  %2009 = vmatpush.bf16.msrb.mxu0 %v14061_v52  ;;  %v1770_v25 = vsel %vm453_vm1, %v15513_v49, %v15516_v56 }
  0xfa   : > { %v434_v15 = vadd.f32 %v433_v7, %v346_v6  ;;  %v15528_v37 = vsel %vm453_vm1, %v15462_v8, %v15513_v49  ;;  %v1322_v7 = vpack.c.bf16 %v15338_v3, %v15176_v60  ;;  %v14084_v60 = vld [vmem:[%s19823_s1 + $0x190] sm:$0xff]  ;;  %v15549_v3 = vld [vmem:[%s14792_s5 + $0x98] sm:$0xff] }
  0xfb   : > { %v1779_v16 = vpack.c.bf16 %v1770_v25, %v15528_v37  ;;  %2434 = vmatpush.bf16.msrb.mxu3 %v14084_v60  ;;  %v14067_v25 = vld [vmem:[%s19823_s1 + $0x108] sm:$0xff] }
  0xfc   : > { %2276 = vmatpush.bf16.msrb.mxu2 %v14076_v0 }
  0xfd   : > { %2010 = vmatpush.bf16.msrb.mxu0 %v14060_v12 }
 0x100   : > { %v568_v55 = vpop.f32.mrf.mxu2  ;;  %v349_v10 = vpop.f32.mrf.mxu0 }
 0x101   : > { %v727_v5 = vpop.f32.mrf.mxu3  ;;  %v585_v59 = vadd.f32 %v568_v55, %v434_v15  ;;  %v436_v27 = vpop.f32.mrf.mxu1  ;;  %2011 = vmatpush.bf16.msrb.mxu0 %v14059_v29 }
 0x102   : > { %v437_v39 = vadd.f32 %v436_v27, %v349_v10  ;;  %v1760_v10 = vrot.slane %v15549_v3, 1  ;;  %v15558_v27 = vrot.slane %v15507_v24, 7 }
 0x103   : > { %v15494_v45 = vadd.f32 %v727_v5, %v585_v59  ;;  %1404 = vmatmul.bf16.gmra.mxu0 %v15137_v43 }
 0x104   : > { %1640 = vmatmul.bf16.gmra.mxu1 %v1558_v51  ;;  %v15588_v9 = vsel %vm453_vm1, %v15516_v56, %v1760_v10 }
 0x105   : > { %1727 = vmatmul.bf16.gmra.mxu2 %v1536_v38 }
 0x106   : > { %1860 = vmatmul.bf16.gmra.mxu3 %v1778_v44 }
 0x108   : > { %v571_v43 = vpop.f32.mrf.mxu2  ;;  %v351_v46 = vpop.f32.mrf.mxu0 }
 0x109   : > { %v730_v54 = vpop.f32.mrf.mxu3  ;;  %v586_v35 = vadd.f32 %v571_v43, %v437_v39  ;;  %v438_v47 = vpop.f32.mrf.mxu1  ;;  %v14075_v39 = vld [vmem:[%s19823_s1 + $0x148] sm:$0xff]  ;;  %v1528_v43 = vsel %vm209_vm0, %v15219_v17, %v15558_v27  ;;  %v15594_v17 = vpack.c.bf16 %v15549_v3, %v15507_v24 }
 0x10a   : > { %2277 = vmatpush.bf16.msrb.mxu2 %v14075_v39  ;;  %v1323_v47 = vpack.c.bf16 %v15380_v1, %v15332_v14  ;;  %v15609_v14 = vld [vmem:[%s14792_s5 + $0xa8] sm:$0xff]  ;;  %v15612_v1 = vld [vmem:[%s14792_s5 + $0xb0] sm:$0xff]  ;;  %v1310_v39 = vsel %vm453_vm1, %v15369_v57, %v15459_v62 }
 0x10b   : > { %v15518_v2 = vadd.f32 %v730_v54, %v586_v35  ;;  %v1520_v60 = vrot.slane %v15609_v14, 7 }
 0x110   : > { %v573_v6 = vpop.f32.mrf.mxu2  ;;  %v827_v11 = vpop.f32.mrf.mxu0 }
 0x111   : > { %v732_v13 = vpop.f32.mrf.mxu3  ;;  %v973_v15 = vpop.f32.mrf.mxu1  ;;  %v857_v18 = vadd.f32 %v827_v11, %v15277_v53  ;;  %v14068_v53 = vld [vmem:[%s19823_s1 + $0x110] sm:$0xff] }
 0x112   : > { %2131 = vmatpush.bf16.msrb.mxu1 %v14068_v53 }
 0x113   : > { %v1003_v22 = vadd.f32 %v973_v15, %v857_v18  ;;  %1409 = vmatmul.bf16.gmra.mxu0 %v1322_v7 }
 0x114   : > { %1645 = vmatmul.bf16.gmra.mxu1 %v15404_v21  ;;  %v15552_v21 = vld [vmem:[%s14792_s5 + $0xa0] sm:$0xff] }
 0x115   : > { %1732 = vmatmul.bf16.gmra.mxu2 %v15400_v34  ;;  %v1518_v34 = vrot.slane %v15549_v3, 7  ;;  %v1761_v38 = vrot.slane %v15552_v21, 1  ;;  %v1519_v53 = vrot.slane %v15552_v21, 7 }
 0x116   : > { %1865 = vmatmul.bf16.gmra.mxu3 %v1779_v16  ;;  %2132 = vmatpush.bf16.msrb.mxu1 %v14067_v25 }
 0x117   : > { %v15575_v28 = vsel %vm209_vm0, %v15558_v27, %v1518_v34  ;;  %v15583_v54 = vsel %vm453_vm1, %v1760_v10, %v1761_v38  ;;  %v14082_v10 = vld [vmem:[%s19823_s1 + $0x180] sm:$0xff]  ;;  %v15639_v29 = vsel %vm209_vm0, %v1519_v53, %v1520_v60 }
 0x118   : > { %v1132_v32 = vpop.f32.mrf.mxu2  ;;  %v829_v5 = vpop.f32.mrf.mxu0  ;;  %v1538_v11 = vpack.c.bf16 %v15575_v28, %v1528_v43  ;;  %v15602_v15 = vpack.c.bf16 %v15583_v54, %v15588_v9 }
 0x119   : > { %v1254_v31 = vpop.f32.mrf.mxu3  ;;  %v1162_v55 = vadd.f32 %v1132_v32, %v1003_v22  ;;  %v975_v51 = vpop.f32.mrf.mxu1  ;;  %v858_v59 = vadd.f32 %v829_v5, %v15301_v19  ;;  %v14083_v19 = vld [vmem:[%s19823_s1 + $0x188] sm:$0xff]  ;;  %v14074_v5 = vld [vmem:[%s19823_s1 + $0x140] sm:$0xff] }
 0x11a   : > { %2435 = vmatpush.bf16.msrb.mxu3 %v14083_v19  ;;  %2278 = vmatpush.bf16.msrb.mxu2 %v14074_v5  ;;  %v15643_v19 = vsel %vm209_vm0, %v1518_v34, %v1519_v53  ;;  %v15657_v34 = vpack.c.bf16 %v15609_v14, %v15552_v21 }
 0x11b   : > { %v15561_v44 = vadd.f32 %v1254_v31, %v1162_v55  ;;  %v1004_v52 = vadd.f32 %v975_v51, %v858_v59  ;;  %v1762_v31 = vrot.slane %v15609_v14, 1  ;;  %v15619_v55 = vrot.slane %v15612_v1, 1  ;;  %v14058_v59 = vld [vmem:[%s19823_s1 + $0xc0] sm:$0xff] }
 0x11c   : > { %2012 = vmatpush.bf16.msrb.mxu0 %v14058_v59  ;;  %v15686_v59 = vrot.slane %v15612_v1, 7 }
 0x11d   : > { %v15652_v43 = vsel %vm453_vm1, %v1761_v38, %v1762_v31 }
 0x11e   : > { %2436 = vmatpush.bf16.msrb.mxu3 %v14082_v10  ;;  %v1764_v10 = vrot.slane %v15421_v20, 1 }
 0x120   : > { %v1134_v35 = vpop.f32.mrf.mxu2  ;;  %v832_v13 = vpop.f32.mrf.mxu0 }
 0x121   : > { %v1256_v46 = vpop.f32.mrf.mxu3  ;;  %v1163_v6 = vadd.f32 %v1134_v35, %v1004_v52  ;;  %v978_v7 = vpop.f32.mrf.mxu1  ;;  %v15648_v52 = vsel %vm453_vm1, %v1762_v31, %v15619_v55  ;;  %v15661_v13 = vpack.c.bf16 %v15639_v29, %v15643_v19 }
 0x122   : > { %v15665_v38 = vpack.c.bf16 %v15648_v52, %v15652_v43 }
 0x123   : > { %v15604_v16 = vadd.f32 %v1256_v46, %v1163_v6  ;;  %1414 = vmatmul.bf16.gmra.mxu0 %v1323_v47  ;;  %v1324_v46 = vpack.c.bf16 %v15486_v50, %v1310_v39  ;;  %v1319_v39 = vsel %vm453_vm1, %v15513_v49, %v15016_v48 }
 0x124   : > { %1650 = vmatmul.bf16.gmra.mxu1 %v15594_v17  ;;  %v1325_v49 = vpack.c.bf16 %v1319_v39, %v15528_v37  ;;  %v14112_v37 = vld [vmem:[%s19823_s1 + $0x30] sm:$0xff] }
 0x125   : > { %1737 = vmatmul.bf16.gmra.mxu2 %v1538_v11 }
 0x126   : > { %1870 = vmatmul.bf16.gmra.mxu3 %v15602_v15 }
 0x128   : > { %v1137_v18 = vpop.f32.mrf.mxu2  ;;  %v834_v22 = vpop.f32.mrf.mxu0 }
 0x129   : > { %v1259_v0 = vpop.f32.mrf.mxu3  ;;  %v980_v12 = vpop.f32.mrf.mxu1  ;;  %v860_v32 = vadd.f32 %v834_v22, %v15351_v40  ;;  %v14066_v40 = vld [vmem:[%s19823_s1 + $0x100] sm:$0xff]  ;;  %v14097_v22 = vld [vmem:[%s19823_s1 + $0x1f8] sm:$0xff] }
 0x12a   : > { %2133 = vmatpush.bf16.msrb.mxu1 %v14066_v40  ;;  %v14121_v0 = vld [vmem:[%s19823_s1 + $0x78] sm:$0xff]  ;;  %2550 = vmatpush.bf16.msra.mxu0 %v14097_v22 }
 0x12b   : > { %v1006_v51 = vadd.f32 %v980_v12, %v860_v32  ;;  %2924 = vmatpush.bf16.msra.mxu2 %v14121_v0  ;;  %v14105_v32 = vld [vmem:[%s19823_s1 + $0x238] sm:$0xff] }
 0x12e   : > { %2695 = vmatpush.bf16.msra.mxu1 %v14105_v32  ;;  %v15737_v32 = vld [vmem:[%s14792_s5 + $0xe8] sm:$0xff] }
 0x130   : > { %v1139_v57 = vpop.f32.mrf.mxu2  ;;  %v837_v25 = vpop.f32.mrf.mxu0 }
 0x131   : > { %v1261_v35 = vpop.f32.mrf.mxu3  ;;  %v1165_v47 = vadd.f32 %v1139_v57, %v1006_v51  ;;  %v983_v6 = vpop.f32.mrf.mxu1  ;;  %v861_v7 = vadd.f32 %v837_v25, %v15374_v26  ;;  %v14113_v26 = vld [vmem:[%s19823_s1 + $0x38] sm:$0xff]  ;;  %v1523_v57 = vsel %vm209_vm0, %v15686_v59, %v15427_v58 }
 0x132   : > { %3011 = vmatpush.bf16.msra.mxu3 %v14113_v26 }
 0x133   : > { %v15668_v11 = vadd.f32 %v1261_v35, %v1165_v47  ;;  %v1007_v18 = vadd.f32 %v983_v6, %v861_v7  ;;  %1419 = vmatmul.bf16.gmra.mxu0 %v1324_v46  ;;  %v15702_v35 = vsel %vm209_vm0, %v1520_v60, %v15686_v59  ;;  %v1765_v46 = vsel %vm453_vm1, %v15619_v55, %v1764_v10 }
 0x134   : > { %1655 = vmatmul.bf16.gmra.mxu1 %v15657_v34  ;;  %v1776_v47 = vsel %vm453_vm1, %v1764_v10, %v15308_v36  ;;  %v1562_v6 = vpack.c.bf16 %v15421_v20, %v15612_v1  ;;  %v15714_v60 = vpack.c.bf16 %v1523_v57, %v15702_v35  ;;  %v14120_v36 = vld [vmem:[%s19823_s1 + $0x70] sm:$0xff] }
 0x135   : > { %1742 = vmatmul.bf16.gmra.mxu2 %v15661_v13  ;;  %v1782_v0 = vpack.c.bf16 %v1776_v47, %v1765_v46  ;;  %v14096_v20 = vld [vmem:[%s19823_s1 + $0x1f0] sm:$0xff] }
 0x136   : > { %1875 = vmatmul.bf16.gmra.mxu3 %v15665_v38  ;;  %2925 = vmatpush.bf16.msra.mxu2 %v14120_v36 }
 0x137   : > { %2551 = vmatpush.bf16.msra.mxu0 %v14096_v20  ;;  %3012 = vmatpush.bf16.msra.mxu3 %v14112_v37  ;;  %v2056_v37 = vpack.c.bf16 %v15363_v42, %v15305_v63 }
 0x138   : > { %v1142_v12 = vpop.f32.mrf.mxu2  ;;  %v839_v5 = vpop.f32.mrf.mxu0 }
 0x139   : > { %v1264_v53 = vpop.f32.mrf.mxu3  ;;  %v1166_v31 = vadd.f32 %v1142_v12, %v1007_v18  ;;  %v985_v51 = vpop.f32.mrf.mxu1  ;;  %v15731_v12 = vld [vmem:[%s14792_s5 + $0xd0] sm:$0xff] }
 0x13a   : > { %v15740_v57 = vrot.slane %v15731_v12, 7 }
 0x13b   : > { %v15689_v40 = vadd.f32 %v1264_v53, %v1166_v31  ;;  %v15734_v53 = vld [vmem:[%s14792_s5 + $0x88] sm:$0xff] }
 0x13c   : > { %v2179_v47 = vrot.slane %v15734_v53, 1 }
 0x140   : > { %v1144_v25 = vpop.f32.mrf.mxu2  ;;  %v842_v7 = vpop.f32.mrf.mxu0 }
 0x141   : > { %v1266_v48 = vpop.f32.mrf.mxu3  ;;  %v988_v18 = vpop.f32.mrf.mxu1  ;;  %v863_v22 = vadd.f32 %v842_v7, %v15430_v41  ;;  %v14104_v41 = vld [vmem:[%s19823_s1 + $0x230] sm:$0xff]  ;;  %v15745_v25 = vrot.slane %v15737_v32, 7  ;;  %v14111_v7 = vld [vmem:[%s19823_s1 + $0x28] sm:$0xff] }
 0x142   : > { %2696 = vmatpush.bf16.msra.mxu1 %v14104_v41  ;;  %3013 = vmatpush.bf16.msra.mxu3 %v14111_v7 }
 0x143   : > { %v1009_v26 = vadd.f32 %v988_v18, %v863_v22  ;;  %1424 = vmatmul.bf16.gmra.mxu0 %v1325_v49  ;;  %v14119_v49 = vld [vmem:[%s19823_s1 + $0x68] sm:$0xff]  ;;  %v1934_v18 = vsel %vm209_vm0, %v15740_v57, %v15314_v30  ;;  %v2358_v22 = vsel %vm209_vm0, %v15745_v25, %v15558_v27 }
 0x144   : > { %1660 = vmatmul.bf16.gmra.mxu1 %v1562_v6  ;;  %v14095_v6 = vld [vmem:[%s19823_s1 + $0x1e8] sm:$0xff]  ;;  %2926 = vmatpush.bf16.msra.mxu2 %v14119_v49  ;;  %v1935_v20 = vpack.c.bf16 %v15394_v4, %v1934_v18  ;;  %v2197_v18 = vsel %vm453_vm1, %v2179_v47, %v15516_v56 }
 0x145   : > { %1747 = vmatmul.bf16.gmra.mxu2 %v15714_v60  ;;  %2552 = vmatpush.bf16.msra.mxu0 %v14095_v6  ;;  %v14103_v30 = vld [vmem:[%s19823_s1 + $0x228] sm:$0xff] }
 0x146   : > { %1880 = vmatmul.bf16.gmra.mxu3 %v1782_v0  ;;  %v2198_v0 = vsel %vm453_vm1, %v15462_v8, %v2179_v47  ;;  %2697 = vmatpush.bf16.msra.mxu1 %v14103_v30  ;;  %v2202_v30 = vpack.c.bf16 %v15588_v9, %v2197_v18  ;;  %v14093_v9 = vld [vmem:[%s19823_s1 + $0x1d8] sm:$0xff] }
 0x148   : > { %v1147_v31 = vpop.f32.mrf.mxu2  ;;  %v844_v10 = vpop.f32.mrf.mxu0 }
 0x149   : > { %v1269_v5 = vpop.f32.mrf.mxu3  ;;  %v1168_v51 = vadd.f32 %v1147_v31, %v1009_v26  ;;  %v990_v39 = vpop.f32.mrf.mxu1  ;;  %v864_v46 = vadd.f32 %v844_v10, %v15453_v33 }
 0x14b   : > { %v15747_v48 = vadd.f32 %v1269_v5, %v1168_v51  ;;  %v1010_v33 = vadd.f32 %v990_v39, %v864_v46  ;;  %v2201_v5 = vpack.c.bf16 %v2198_v0, %v15486_v50  ;;  %v2359_v51 = vpack.c.bf16 %v15575_v28, %v2358_v22  ;;  %v14118_v50 = vld [vmem:[%s19823_s1 + $0x60] sm:$0xff] }
 0x14c   : > { %v1913_v46 = vrot.slane %v15734_v53, 7  ;;  %2927 = vmatpush.bf16.msra.mxu2 %v14118_v50  ;;  %v2058_v50 = vpack.c.bf16 %v15552_v21, %v15549_v3  ;;  %v14092_v3 = vld [vmem:[%s19823_s1 + $0x1d0] sm:$0xff] }
 0x14d   : > { %v14108_v21 = vld [vmem:[%s19823_s1 + $0x10] sm:$0xff] }
 0x14e   : > { %v1931_v7 = vsel %vm209_vm0, %v1913_v46, %v15558_v27  ;;  %v14110_v27 = vld [vmem:[%s19823_s1 + $0x20] sm:$0xff] }
 0x14f   : > { %3014 = vmatpush.bf16.msra.mxu3 %v14110_v27 }
 0x150   : > { %v1149_v36 = vpop.f32.mrf.mxu2  ;;  %v847_v31 = vpop.f32.mrf.mxu0 }
 0x151   : > { %v1271_v26 = vpop.f32.mrf.mxu3  ;;  %v1169_v41 = vadd.f32 %v1149_v36, %v1010_v33  ;;  %v993_v8 = vpop.f32.mrf.mxu1  ;;  %v1932_v33 = vsel %vm209_vm0, %v15372_v61, %v1913_v46  ;;  %v2057_v36 = vpack.c.bf16 %v15507_v24, %v15734_v53  ;;  %v14102_v61 = vld [vmem:[%s19823_s1 + $0x220] sm:$0xff]  ;;  %v14117_v31 = vld [vmem:[%s19823_s1 + $0x58] sm:$0xff] }
 0x152   : > { %v1936_v22 = vpack.c.bf16 %v1931_v7, %v1932_v33  ;;  %2698 = vmatpush.bf16.msra.mxu1 %v14102_v61  ;;  %2928 = vmatpush.bf16.msra.mxu2 %v14117_v31  ;;  %v2203_v33 = vpack.c.bf16 %v15652_v43, %v15583_v54  ;;  %v15849_v54 = vld [vmem:[%s14792_s5 + $0xb8] sm:$0xff]  ;;  %v15855_v43 = vld [vmem:[%s14792_s5 + $0xc8] sm:$0xff] }
 0x153   : > { %v15777_v10 = vadd.f32 %v1271_v26, %v1169_v41  ;;  %2013 = vmatmul.bf16.vlgmr.msrb.gmra.mxu0 %v1935_v20  ;;  %v14094_v26 = vld [vmem:[%s19823_s1 + $0x1e0] sm:$0xff] }
 0x154   : > { %2134 = vmatmul.bf16.vlgmr.msrb.gmra.mxu1 %v2056_v37  ;;  %2553 = vmatpush.bf16.msra.mxu0 %v14094_v26 }
 0x155   : > { %2279 = vmatmul.bf16.vlgmr.msrb.gmra.mxu2 %v2201_v5 }
 0x156   : > { %2437 = vmatmul.bf16.vlgmr.msrb.gmra.mxu3 %v2359_v51 }
 0x158   : > { %v1152_v4 = vpop.f32.mrf.mxu2  ;;  %v849_v42 = vpop.f32.mrf.mxu0  ;;  %2554 = vmatpush.bf16.msra.mxu0 %v14093_v9 }
 0x159   : > { %v1274_v63 = vpop.f32.mrf.mxu3  ;;  %v995_v39 = vpop.f32.mrf.mxu1  ;;  %v866_v49 = vadd.f32 %v849_v42, %v15494_v45 }
 0x15b   : > { %v1012_v6 = vadd.f32 %v995_v39, %v866_v49  ;;  %v1937_v49 = vpack.c.bf16 %v15643_v19, %v15575_v28  ;;  %v15836_v28 = vld [vmem:[%s19824_s2] ss:$0 sm:$0xff] }
 0x15c   : > { %v15852_v19 = vld [vmem:[%s14792_s5 + $0xc0] sm:$0xff]  ;;  %2555 = vmatpush.bf16.msra.mxu0 %v14092_v3 }
 0x160   : > { %v1154_v0 = vpop.f32.mrf.mxu2  ;;  %v852_v47 = vpop.f32.mrf.mxu0 }
 0x161   : > { %v1276_v45 = vpop.f32.mrf.mxu3  ;;  %v1171_v20 = vadd.f32 %v1154_v0, %v1012_v6  ;;  %v998_v37 = vpop.f32.mrf.mxu1  ;;  %v867_v41 = vadd.f32 %v852_v47, %v15518_v2  ;;  %v14109_v2 = vld [vmem:[%s19823_s1 + $0x18] sm:$0xff]  ;;  %v14116_v0 = vld [vmem:[%s19823_s1 + $0x50] sm:$0xff]  ;;  %v15861_v47 = vrot.slane %v15852_v19, 7 }
 0x162   : > { %3015 = vmatpush.bf16.msra.mxu3 %v14109_v2  ;;  %2929 = vmatpush.bf16.msra.mxu2 %v14116_v0 }
 0x163   : > { %v15806_v24 = vadd.f32 %v1276_v45, %v1171_v20  ;;  %v1013_v53 = vadd.f32 %v998_v37, %v867_v41  ;;  %2018 = vmatmul.bf16.gmra.mxu0 %v1936_v22  ;;  %v2185_v20 = vrot.slane %v15849_v54, 1  ;;  %v2342_v37 = vrot.slane %v15855_v43, 7  ;;  %v14115_v41 = vld [vmem:[%s19823_s1 + $0x48] sm:$0xff] }
 0x164   : > { %2139 = vmatmul.bf16.gmra.mxu1 %v2057_v36 }
 0x165   : > { %2284 = vmatmul.bf16.gmra.mxu2 %v2202_v30 }
 0x166   : > { %2442 = vmatmul.bf16.gmra.mxu3 %v15661_v13  ;;  %v14101_v13 = vld [vmem:[%s19823_s1 + $0x218] sm:$0xff]  ;;  %2930 = vmatpush.bf16.msra.mxu2 %v14115_v41 }
 0x167   : > { %2699 = vmatpush.bf16.msra.mxu1 %v14101_v13  ;;  %3016 = vmatpush.bf16.msra.mxu3 %v14108_v21  ;;  %v2352_v13 = vsel %vm209_vm0, %v15427_v58, %v15861_v47  ;;  %v14099_v58 = vld [vmem:[%s19823_s1 + $0x208] sm:$0xff] }
 0x168   : > { %v1157_v8 = vpop.f32.mrf.mxu2  ;;  %v854_v4 = vpop.f32.mrf.mxu0 }
 0x169   : > { %v1279_v5 = vpop.f32.mrf.mxu3  ;;  %v1172_v51 = vadd.f32 %v1157_v8, %v1013_v53  ;;  %v1000_v63 = vpop.f32.mrf.mxu1  ;;  %v14091_v53 = vld [vmem:[%s19823_s1 + $0x1c8] sm:$0xff]  ;;  %v2192_v8 = vsel %vm453_vm1, %v15619_v55, %v2185_v20  ;;  %v19828_v4 = vmov 0.0  }
 0x16a   : > { %2556 = vmatpush.bf16.msra.mxu0 %v14091_v53  ;;  %v15899_v63 = vrot.slane %v19828_v4, 7 }
 0x16b   : > { %v15821_v42 = vadd.f32 %v1279_v5, %v1172_v51  ;;  %v15890_v5 = vsel %vm209_vm0, %v15861_v47, %v2342_v37  ;;  %v1938_v51 = vpack.c.bf16 %v15702_v35, %v15639_v29 }
 0x16c   : > { %v2362_v0 = vpack.c.bf16 %v15890_v5, %v2352_v13  ;;  %v1919_v13 = vrot.slane %v15849_v54, 7 }
 0x170   : > { %v1159_v39 = vpop.f32.mrf.mxu2  ;;  %v1400_v6 = vpop.f32.mrf.mxu0 }
 0x171   : > { %v1281_v46 = vpop.f32.mrf.mxu3  ;;  %v1636_v7 = vpop.f32.mrf.mxu1  ;;  %v1430_v18 = vadd.f32 %v1400_v6, %v15561_v44  ;;  %v14100_v44 = vld [vmem:[%s19823_s1 + $0x210] sm:$0xff]  ;;  %v2059_v6 = vpack.c.bf16 %v15612_v1, %v15609_v14 }
 0x172   : > { %2700 = vmatpush.bf16.msra.mxu1 %v14100_v44  ;;  %v15917_v44 = vrot.slane %v19828_v4, 1 }
 0x173   : > { %2023 = vmatmul.bf16.gmra.mxu0 %v1937_v49 }
 0x174   : > { %2144 = vmatmul.bf16.gmra.mxu1 %v2058_v50 }
 0x175   : > { %2289 = vmatmul.bf16.gmra.mxu2 %v2203_v33 }
 0x176   : > { %2447 = vmatmul.bf16.gmra.mxu3 %v15714_v60  ;;  %v1443_v60 = vadd.f32 %v15836_v28, %v1430_v18  ;;  %v2204_v18 = vpack.c.bf16 %v2192_v8, %v15648_v52  ;;  %2701 = vmatpush.bf16.msra.mxu1 %v14099_v58  ;;  %v1925_v58 = vsel %vm209_vm0, %v1919_v13, %v15861_v47 }
 0x178   : > { %v1723_v45 = vpop.f32.mrf.mxu2  ;;  %v1402_v26 = vpop.f32.mrf.mxu0  ;;  %v15875_v31 = vmax.f32 %v1443_v60, 0.0 }
 0x179   : > { %v1856_v22 = vpop.f32.mrf.mxu3  ;;  %v1724_v36 = vadd.f32 %v1723_v45, %v1636_v7  ;;  %v1638_v27 = vpop.f32.mrf.mxu1  ;;  %v1431_v61 = vadd.f32 %v1402_v26, %v15604_v16  ;;  %v14107_v16 = vld [vmem:[%s19823_s1 + $0x8] sm:$0xff] }
 0x17a   : > { %3017 = vmatpush.bf16.msra.mxu3 %v14107_v16  ;;  %v5404_v39 = vrot.slane %v15875_v31, 7  ;;  %v19827_v14 = vrot.slane %v15875_v31, 1 }
 0x17b   : > { %v15864_v30 = vadd.f32 %v1856_v22, %v1724_v36  ;;  %v1444_v9 = vadd.f32 %v15836_v28, %v1431_v61  ;;  %v15949_v61 = vld [vmem:[%s14792_s5 + $0xd8] sm:$0xff] }
 0x17c   : > { %v15926_v52 = vsel %vm209_vm0, %v15899_v63, %v5404_v39 }
 0x17d   : > { %v15878_v2 = vmax.f32 %v1444_v9, 0.0 }
 0x17f   : > { %20017 = vst [vmem:[#allocation6_spill] sm:$0xff] %v15878_v2  ;;  %v5405_v46 = vrot.slane %v15878_v2, 7  ;;  %v5641_v7 = vrot.slane %v15878_v2, 1 }
 0x180   : > { %v1725_v49 = vpop.f32.mrf.mxu2  ;;  %v1405_v35 = vpop.f32.mrf.mxu0 }
 0x181   : > { %v1858_v50 = vpop.f32.mrf.mxu3  ;;  %v1726_v29 = vadd.f32 %v1725_v49, %v1638_v27  ;;  %v1641_v33 = vpop.f32.mrf.mxu1  ;;  %v15921_v60 = vsel %vm209_vm0, %v5404_v39, %v5405_v46  ;;  %v15932_v45 = vsel %vm453_vm1, %v19827_v14, %v5641_v7  ;;  %v15939_v36 = vsel %vm209_vm0, %v5405_v46, %v15899_v63 }
 0x182   : > { %v15946_v27 = vsel %vm453_vm1, %v5641_v7, %v15917_v44  ;;  %v2187_v39 = vrot.slane %v15855_v43, 1  ;;  %v15960_v49 = vrot.slane %v15949_v61, 7  ;;  %v1926_v7 = vsel %vm209_vm0, %v15686_v59, %v1919_v13 }
 0x183   : > { %v15914_v21 = vadd.f32 %v1858_v50, %v1726_v29  ;;  %2028 = vmatmul.bf16.gmra.mxu0 %v1938_v51  ;;  %20018 = vst [vmem:[#allocation7_spill] sm:$0xff] %v15946_v27  ;;  %v15955_v51 = vrot.slane %v15852_v19, 1  ;;  %v14114_v50 = vld [vmem:[%s19823_s1 + $0x40] sm:$0xff]  ;;  %v15995_v33 = vsel %vm209_vm0, %v2342_v37, %v15740_v57  ;;  %v2060_v13 = vpack.c.bf16 %v15852_v19, %v15849_v54 }
 0x184   : > { %2149 = vmatmul.bf16.gmra.mxu1 %v2059_v6  ;;  %2931 = vmatpush.bf16.msra.mxu2 %v14114_v50  ;;  %v2349_v59 = vsel %vm209_vm0, %v15740_v57, %v15960_v49 }
 0x185   : > { %2294 = vmatmul.bf16.gmra.mxu2 %v2204_v18  ;;  %v2191_v35 = vsel %vm453_vm1, %v2185_v20, %v15955_v51  ;;  %v14090_v18 = vld [vmem:[%s19823_s1 + $0x1c0] sm:$0xff]  ;;  %v16011_v41 = vpack.c.bf16 %v2349_v59, %v15995_v33 }
 0x186   : > { %2452 = vmatmul.bf16.gmra.mxu3 %v2362_v0  ;;  %v14106_v20 = vld [vmem:[%s19823_s1] sm:$0xff]  ;;  %2557 = vmatpush.bf16.msra.mxu0 %v14090_v18 }
 0x187   : > { %v14098_v0 = vld [vmem:[%s19823_s1 + $0x200] sm:$0xff]  ;;  %3018 = vmatpush.bf16.msra.mxu3 %v14106_v20 }
 0x188   : > { %v1728_v53 = vpop.f32.mrf.mxu2  ;;  %v1407_v9 = vpop.f32.mrf.mxu0  ;;  %2702 = vmatpush.bf16.msra.mxu1 %v14098_v0  ;;  %v16037_v18 = vld [vmem:[%s14792_s5 + $0xe0] sm:$0xff] }
 0x189   : > { %v1861_v16 = vpop.f32.mrf.mxu3  ;;  %v1643_v8 = vpop.f32.mrf.mxu1  ;;  %v1433_v46 = vadd.f32 %v1407_v9, %v15668_v11  ;;  %v15977_v11 = vsel %vm453_vm1, %v15955_v51, %v2187_v39  ;;  %v1939_v9 = vpack.c.bf16 %v1925_v58, %v1926_v7  ;;  %v14145_v7 = vld [vmem:[%s19823_s1 + $0x138] sm:$0xff] }
 0x18a   : > { %3423 = vmatpush.bf16.msrb.mxu2 %v14145_v7  ;;  %v16050_v7 = vrot.slane %v15731_v12, 1 }
 0x18b   : > { %v1446_v6 = vadd.f32 %v15836_v28, %v1433_v46 }
 0x18d   : > { %v15979_v29 = vmax.f32 %v1446_v6, 0.0  ;;  %v2205_v6 = vpack.c.bf16 %v15977_v11, %v2191_v35  ;;  %v2061_v35 = vpack.c.bf16 %v15731_v12, %v15855_v43 }
 0x18f   : > { %20019 = vst [vmem:[#allocation8_spill] sm:$0xff] %v15979_v29  ;;  %v5407_v57 = vrot.slane %v15979_v29, 7 }
 0x190   : > { %v1730_v53 = vpop.f32.mrf.mxu2  ;;  %v1410_v46 = vpop.f32.mrf.mxu0 }
 0x191   : > { %v1863_v16 = vpop.f32.mrf.mxu3  ;;  %v1731_v37 = vadd.f32 %v1730_v53, %v1643_v8  ;;  %v1646_v50 = vpop.f32.mrf.mxu1  ;;  %v1434_v3 = vadd.f32 %v1410_v46, %v15689_v40  ;;  %v16020_v8 = vsel %vm209_vm0, %v15899_v63, %v5407_v57  ;;  %v14129_v40 = vld [vmem:[%s19823_s1 + $0xb8] sm:$0xff] }
 0x192   : > { %3144 = vmatpush.bf16.msrb.mxu0 %v14129_v40  ;;  %v14137_v53 = vld [vmem:[%s19823_s1 + $0xf8] sm:$0xff]  ;;  %v16053_v40 = vrot.slane %v16037_v18, 7 }
 0x193   : > { %v16014_v58 = vadd.f32 %v1863_v16, %v1731_v37  ;;  %v1447_v54 = vadd.f32 %v15836_v28, %v1434_v3  ;;  %2033 = vmatmul.bf16.gmra.mxu0 %v1939_v9  ;;  %v14153_v3 = vld [vmem:[%s19823_s1 + $0x178] sm:$0xff]  ;;  %v19826_v16 = vrot.slane %v15979_v29, 1  ;;  %3302 = vmatpush.bf16.msrb.mxu1 %v14137_v53 }
 0x194   : > { %2154 = vmatmul.bf16.gmra.mxu1 %v2060_v13  ;;  %3568 = vmatpush.bf16.msrb.mxu3 %v14153_v3 }
 0x195   : > { %2299 = vmatmul.bf16.gmra.mxu2 %v2205_v6  ;;  %v16034_v59 = vmax.f32 %v1447_v54, 0.0 }
 0x196   : > { %2457 = vmatmul.bf16.gmra.mxu3 %v16011_v41 }
 0x197   : > { %20020 = vst [vmem:[#allocation9_spill] sm:$0xff] %v16034_v59  ;;  %v5408_v9 = vrot.slane %v16034_v59, 7  ;;  %v16046_v13 = vpack.c.bf16 %v16034_v59, %v15979_v29  ;;  %v5644_v37 = vrot.slane %v16034_v59, 1 }
 0x198   : > { %v1733_v20 = vpop.f32.mrf.mxu2  ;;  %v1412_v6 = vpop.f32.mrf.mxu0 }
 0x199   : > { %v1866_v0 = vpop.f32.mrf.mxu3  ;;  %20021 = vst [vmem:[#allocation10_spill] sm:$0xff] %v16046_v13  ;;  %v1734_v46 = vadd.f32 %v1733_v20, %v1646_v50  ;;  %v1648_v54 = vpop.f32.mrf.mxu1  ;;  %v16058_v3 = vsel %vm209_vm0, %v5408_v9, %v15899_v63  ;;  %v16062_v26 = vsel %vm209_vm0, %v5407_v57, %v5408_v9  ;;  %v16067_v50 = vsel %vm453_vm1, %v5644_v37, %v15917_v44 }
 0x19a   : > { %20022 = vst [vmem:[#allocation11_spill] sm:$0xff] %v16058_v3  ;;  %v16073_v20 = vsel %vm453_vm1, %v19826_v16, %v5644_v37  ;;  %v16081_v57 = vpack.c.bf16 %v16062_v26, %v16020_v8  ;;  %v16092_v37 = vsel %vm453_vm1, %v2187_v39, %v16050_v7  ;;  %v16106_v54 = vsel %vm209_vm0, %v15960_v49, %v16053_v40 }
 0x19b   : > { %20023 = vst [vmem:[#allocation12_spill] sm:$0xff] %v16062_v26  ;;  %v16075_v53 = vadd.f32 %v1866_v0, %v1734_v46  ;;  %v16085_v9 = vpack.c.bf16 %v16067_v50, %v16073_v20  ;;  %v2200_v0 = vsel %vm453_vm1, %v16050_v7, %v15459_v62  ;;  %v2347_v46 = vsel %vm209_vm0, %v16053_v40, %v15745_v25 }
 0x19c   : > { %20024 = vst [vmem:[#allocation13_spill] sm:$0xff] %v16067_v50  ;;  %v1940_v39 = vpack.c.bf16 %v15995_v33, %v15890_v5  ;;  %v2206_v4 = vpack.c.bf16 %v2200_v0, %v16092_v37  ;;  %v16114_v22 = vpack.c.bf16 %v2347_v46, %v16106_v54  ;;  %v14128_v0 = vld [vmem:[%s19823_s1 + $0xb0] sm:$0xff]  ;;  %v16134_v46 = vld [vmem:[%s14792_s5 + $0x118] sm:$0xff]  ;;  %v16183_v50 = vpack.c.bf16 %v15855_v43, %v15852_v19 }
 0x19d   : > { %20025 = vst [vmem:[#allocation14_spill] sm:$0xff] %v16073_v20  ;;  %3145 = vmatpush.bf16.msrb.mxu0 %v14128_v0 }
 0x19e   : > { %20026 = vst [vmem:[#allocation15_spill] sm:$0xff] %v16081_v57  ;;  %v16140_v57 = vrot.slane %v16134_v46, 7 }
 0x19f   : > { %20027 = vst [vmem:[#allocation16_spill] sm:$0xff] %v16085_v9 }
 0x1a0   : > { %v1735_v6 = vpop.f32.mrf.mxu2  ;;  %v1415_v62 = vpop.f32.mrf.mxu0  ;;  %v2831_v26 = vsel %vm209_vm0, %v16140_v57, %v15861_v47 }
 0x1a1   : > { %v1868_v16 = vpop.f32.mrf.mxu3  ;;  %v1651_v14 = vpop.f32.mrf.mxu1  ;;  %v1436_v59 = vadd.f32 %v1415_v62, %v15747_v48  ;;  %v14152_v48 = vld [vmem:[%s19823_s1 + $0x170] sm:$0xff]  ;;  %v2832_v47 = vpack.c.bf16 %v15890_v5, %v2831_v26 }
 0x1a2   : > { %v14144_v16 = vld [vmem:[%s19823_s1 + $0x130] sm:$0xff]  ;;  %3569 = vmatpush.bf16.msrb.mxu3 %v14152_v48 }
 0x1a3   : > { %v1449_v6 = vadd.f32 %v15836_v28, %v1436_v59  ;;  %2038 = vmatmul.bf16.gmra.mxu0 %v1940_v39  ;;  %3424 = vmatpush.bf16.msrb.mxu2 %v14144_v16  ;;  %v14136_v59 = vld [vmem:[%s19823_s1 + $0xf0] sm:$0xff] }
 0x1a4   : > { %2159 = vmatmul.bf16.gmra.mxu1 %v2061_v35 }
 0x1a5   : > { %2304 = vmatmul.bf16.gmra.mxu2 %v2206_v4  ;;  %v16122_v33 = vmax.f32 %v1449_v6, 0.0  ;;  %3303 = vmatpush.bf16.msrb.mxu1 %v14136_v59  ;;  %v14151_v59 = vld [vmem:[%s19823_s1 + $0x168] sm:$0xff] }
 0x1a6   : > { %2462 = vmatmul.bf16.gmra.mxu3 %v16114_v22 }
 0x1a7   : > { %20028 = vst [vmem:[#allocation17_spill] sm:$0xff] %v16122_v33  ;;  %v5410_v39 = vrot.slane %v16122_v33, 7  ;;  %v5646_v62 = vrot.slane %v16122_v33, 1  ;;  %3570 = vmatpush.bf16.msrb.mxu3 %v14151_v59  ;;  %v16242_v59 = vpack.c.bf16 %v15949_v61, %v15731_v12  ;;  %v14141_v12 = vld [vmem:[%s19823_s1 + $0x118] sm:$0xff] }
 0x1a8   : > { %v1738_v4 = vpop.f32.mrf.mxu2  ;;  %v1417_v6 = vpop.f32.mrf.mxu0 }
 0x1a9   : > { %v1871_v35 = vpop.f32.mrf.mxu3  ;;  %v1739_v16 = vadd.f32 %v1738_v4, %v1651_v14  ;;  %v1653_v20 = vpop.f32.mrf.mxu1  ;;  %v1437_v9 = vadd.f32 %v1417_v6, %v15777_v10  ;;  %v16145_v13 = vsel %vm209_vm0, %v15899_v63, %v5410_v39  ;;  %v16150_v0 = vsel %vm453_vm1, %v15917_v44, %v5646_v62  ;;  %v14143_v14 = vld [vmem:[%s19823_s1 + $0x128] sm:$0xff] }
 0x1aa   : > { %20029 = vst [vmem:[#allocation18_spill] sm:$0xff] %v16145_v13  ;;  %v14127_v10 = vld [vmem:[%s19823_s1 + $0xa8] sm:$0xff]  ;;  %v16165_v4 = vpack.c.bf16 %v16145_v13, %v16058_v3  ;;  %3425 = vmatpush.bf16.msrb.mxu2 %v14143_v14 }
 0x1ab   : > { %20030 = vst [vmem:[#allocation19_spill] sm:$0xff] %v16150_v0  ;;  %v16152_v48 = vadd.f32 %v1871_v35, %v1739_v16  ;;  %v1450_v16 = vadd.f32 %v15836_v28, %v1437_v9  ;;  %3146 = vmatpush.bf16.msrb.mxu0 %v14127_v10 }
 0x1ac   : > { %20031 = vst [vmem:[#allocation20_spill] sm:$0xff] %v16165_v4  ;;  %v14135_v4 = vld [vmem:[%s19823_s1 + $0xe8] sm:$0xff] }
 0x1ad   : > { %v16170_v6 = vmax.f32 %v1450_v16, 0.0  ;;  %3304 = vmatpush.bf16.msrb.mxu1 %v14135_v4 }
 0x1af   : > { %20032 = vst [vmem:[#allocation21_spill] sm:$0xff] %v16170_v6  ;;  %v5411_v35 = vrot.slane %v16170_v6, 7  ;;  %v5647_v9 = vrot.slane %v16170_v6, 1 }
 0x1b0   : > { %v1740_v27 = vpop.f32.mrf.mxu2  ;;  %v1420_v10 = vpop.f32.mrf.mxu0 }
 0x1b1   : > { %v1873_v2 = vpop.f32.mrf.mxu3  ;;  %v1741_v14 = vadd.f32 %v1740_v27, %v1653_v20  ;;  %v1656_v16 = vpop.f32.mrf.mxu1  ;;  %v16190_v3 = vsel %vm209_vm0, %v5410_v39, %v5411_v35  ;;  %v16194_v29 = vsel %vm453_vm1, %v5646_v62, %v5647_v9  ;;  %v16209_v5 = vsel %vm209_vm0, %v5411_v35, %v15899_v63  ;;  %v14142_v35 = vld [vmem:[%s19823_s1 + $0x120] sm:$0xff] }
 0x1b2   : > { %20033 = vst [vmem:[#allocation22_spill] sm:$0xff] %v16194_v29  ;;  %v16204_v43 = vpack.c.bf16 %v16194_v29, %v16150_v0  ;;  %v14150_v10 = vld [vmem:[%s19823_s1 + $0x160] sm:$0xff]  ;;  %3426 = vmatpush.bf16.msrb.mxu2 %v14142_v35 }
 0x1b3   : > { %v16196_v27 = vadd.f32 %v1873_v2, %v1741_v14  ;;  %2558 = vmatmul.bf16.vlgmr.msra.gmra.mxu0 %v15594_v17  ;;  %20035 = vst [vmem:[#allocation24_spill] sm:$0xff] %v16209_v5  ;;  %v16214_v17 = vpack.c.bf16 %v16209_v5, %v16190_v3  ;;  %v14134_v16 = vld [vmem:[%s19823_s1 + $0xe0] sm:$0xff]  ;;  %3571 = vmatpush.bf16.msrb.mxu3 %v14150_v10 }
 0x1b4   : > { %2703 = vmatmul.bf16.vlgmr.msra.gmra.mxu1 %v15602_v15  ;;  %20034 = vst [vmem:[#allocation23_spill] sm:$0xff] %v16204_v43  ;;  %v16219_v15 = vsel %vm453_vm1, %v5647_v9, %v15917_v44  ;;  %v14126_v9 = vld [vmem:[%s19823_s1 + $0xa0] sm:$0xff] }
 0x1b5   : > { %2932 = vmatmul.bf16.vlgmr.msra.gmra.mxu2 %v16183_v50  ;;  %20036 = vst [vmem:[#allocation25_spill] sm:$0xff] %v16214_v17  ;;  %3147 = vmatpush.bf16.msrb.mxu0 %v14126_v9 }
 0x1b6   : > { %3019 = vmatmul.bf16.vlgmr.msra.gmra.mxu3 %v2832_v47  ;;  %20037 = vst [vmem:[#allocation26_spill] sm:$0xff] %v16219_v15  ;;  %3305 = vmatpush.bf16.msrb.mxu1 %v14134_v16 }
 0x1b7   : > { %3427 = vmatpush.bf16.msrb.mxu2 %v14141_v12  ;;  %v14585_v12 = vld [vmem:[%s14792_s5 + $0xb8] sm:$0xff] }
 0x1b8   : > { %v1743_v26 = vpop.f32.mrf.mxu2  ;;  %v1422_v39 = vpop.f32.mrf.mxu0 }
 0x1b9   : > { %v1876_v20 = vpop.f32.mrf.mxu3  ;;  %v1658_v62 = vpop.f32.mrf.mxu1  ;;  %v1439_v4 = vadd.f32 %v1422_v39, %v15806_v24 }
 0x1bb   : > { %v1452_v14 = vadd.f32 %v15836_v28, %v1439_v4 }
 0x1bd   : > { %v16237_v24 = vmax.f32 %v1452_v14, 0.0 }
 0x1bf   : > { %20038 = vst [vmem:[#allocation27_spill] sm:$0xff] %v16237_v24  ;;  %v5796_v20 = vrot.slane %v16237_v24, 7 }
 0x1c0   : > { %v1745_v47 = vpop.f32.mrf.mxu2  ;;  %v1425_v4 = vpop.f32.mrf.mxu0 }
 0x1c1   : > { %v1878_v26 = vpop.f32.mrf.mxu3  ;;  %v1746_v39 = vadd.f32 %v1745_v47, %v1658_v62  ;;  %v1661_v2 = vpop.f32.mrf.mxu1  ;;  %v1440_v19 = vadd.f32 %v1425_v4, %v15821_v42  ;;  %v16248_v35 = vsel %vm209_vm0, %v15899_v63, %v5796_v20  ;;  %v14125_v42 = vld [vmem:[%s19823_s1 + $0x98] sm:$0xff]  ;;  %v19845_v47 = vrot.slane %v16237_v24, 1 }
 0x1c2   : > { %20039 = vst [vmem:[#allocation28_spill] sm:$0xff] %v16248_v35  ;;  %3148 = vmatpush.bf16.msrb.mxu0 %v14125_v42  ;;  %v2606_v42 = vrot.slane %v14585_v12, 1 }
 0x1c3   : > { %v16250_v14 = vadd.f32 %v1878_v26, %v1746_v39  ;;  %v1453_v9 = vadd.f32 %v15836_v28, %v1440_v19  ;;  %2563 = vmatmul.bf16.gmra.mxu0 %v15657_v34  ;;  %v14149_v34 = vld [vmem:[%s19823_s1 + $0x158] sm:$0xff] }
 0x1c4   : > { %2708 = vmatmul.bf16.gmra.mxu1 %v15665_v38  ;;  %3572 = vmatpush.bf16.msrb.mxu3 %v14149_v34 }
 0x1c5   : > { %2937 = vmatmul.bf16.gmra.mxu2 %v16242_v59  ;;  %v16268_v38 = vmax.f32 %v1453_v9, 0.0 }
 0x1c6   : > { %3024 = vmatmul.bf16.gmra.mxu3 %v16011_v41  ;;  %v14133_v41 = vld [vmem:[%s19823_s1 + $0xd8] sm:$0xff] }
 0x1c7   : > { %20040 = vst [vmem:[#allocation29_spill] sm:$0xff] %v16268_v38  ;;  %v19846_v10 = vrot.slane %v16268_v38, 7  ;;  %v16276_v16 = vpack.c.bf16 %v16268_v38, %v16237_v24  ;;  %v6049_v26 = vrot.slane %v16268_v38, 1  ;;  %3306 = vmatpush.bf16.msrb.mxu1 %v14133_v41 }
 0x1c8   : > { %v1748_v28 = vpop.f32.mrf.mxu2  ;;  %v1427_v4 = vpop.f32.mrf.mxu0 }
 0x1c9   : > { %v1881_v19 = vpop.f32.mrf.mxu3  ;;  %20041 = vst [vmem:[#allocation30_spill] sm:$0xff] %v16276_v16  ;;  %v1749_v39 = vadd.f32 %v1748_v28, %v1661_v2  ;;  %v1663_v9 = vpop.f32.mrf.mxu1  ;;  %v16285_v34 = vsel %vm209_vm0, %v5796_v20, %v19846_v10  ;;  %v16291_v62 = vsel %vm453_vm1, %v19845_v47, %v6049_v26  ;;  %v16296_v2 = vsel %vm453_vm1, %v6049_v26, %v15917_v44  ;;  %v14146_v16 = vld [vmem:[%s19823_s1 + $0x140] sm:$0xff] }
 0x1ca   : > { %20042 = vst [vmem:[#allocation31_spill] sm:$0xff] %v16285_v34  ;;  %v16302_v41 = vpack.c.bf16 %v16285_v34, %v16248_v35  ;;  %v16306_v20 = vpack.c.bf16 %v16296_v2, %v16291_v62  ;;  %v2618_v4 = vsel %vm453_vm1, %v2606_v42, %v15955_v51  ;;  %v2619_v9 = vsel %vm453_vm1, %v15619_v55, %v2606_v42 }
 0x1cb   : > { %20043 = vst [vmem:[#allocation32_spill] sm:$0xff] %v16291_v62  ;;  %v16298_v28 = vadd.f32 %v1881_v19, %v1749_v39  ;;  %v2482_v19 = vpack.c.bf16 %v14585_v12, %v15612_v1  ;;  %v2627_v39 = vpack.c.bf16 %v2618_v4, %v2619_v9  ;;  %v14140_v62 = vld [vmem:[%s19823_s1 + $0x110] sm:$0xff] }
 0x1cc   : > { %20044 = vst [vmem:[#allocation33_spill] sm:$0xff] %v16296_v2  ;;  %v14124_v1 = vld [vmem:[%s19823_s1 + $0x90] sm:$0xff]  ;;  %3428 = vmatpush.bf16.msrb.mxu2 %v14140_v62 }
 0x1cd   : > { %20045 = vst [vmem:[#allocation34_spill] sm:$0xff] %v16302_v41  ;;  %3149 = vmatpush.bf16.msrb.mxu0 %v14124_v1  ;;  %v14123_v1 = vld [vmem:[%s19823_s1 + $0x88] sm:$0xff] }
 0x1ce   : > { %20046 = vst [vmem:[#allocation35_spill] sm:$0xff] %v16306_v20  ;;  %v16317_v20 = vpack.c.bf16 %v15737_v32, %v16037_v18 }
 0x1d0   : > { %v1750_v26 = vpop.f32.mrf.mxu2  ;;  %v2014_v10 = vpop.f32.mrf.mxu0 }
 0x1d1   : > { %v1883_v47 = vpop.f32.mrf.mxu3  ;;  %v2135_v24 = vpop.f32.mrf.mxu1  ;;  %v2044_v2 = vadd.f32 %v2014_v10, %v15864_v30  ;;  %v14132_v30 = vld [vmem:[%s19823_s1 + $0xd0] sm:$0xff]  ;;  %v16338_v10 = vld [vmem:[%s14792_s5 + $0xf8] sm:$0xff]  ;;  %3150 = vmatpush.bf16.msrb.mxu0 %v14123_v1 }
 0x1d2   : > { %v14148_v47 = vld [vmem:[%s19823_s1 + $0x150] sm:$0xff]  ;;  %3307 = vmatpush.bf16.msrb.mxu1 %v14132_v30 }
 0x1d3   : > { %v2165_v55 = vadd.f32 %v2135_v24, %v2044_v2  ;;  %2568 = vmatmul.bf16.gmra.mxu0 %v2482_v19  ;;  %v16335_v24 = vld [vmem:[%s14792_s5 + $0xf0] sm:$0xff]  ;;  %3573 = vmatpush.bf16.msrb.mxu3 %v14148_v47  ;;  %v2815_v19 = vrot.slane %v16338_v10, 7 }
 0x1d4   : > { %2713 = vmatmul.bf16.gmra.mxu1 %v2627_v39  ;;  %v14139_v39 = vld [vmem:[%s19823_s1 + $0x108] sm:$0xff]  ;;  %v16374_v1 = vpack.c.bf16 %v16338_v10, %v16335_v24 }
 0x1d5   : > { %2942 = vmatmul.bf16.gmra.mxu2 %v16317_v20 }
 0x1d6   : > { %3029 = vmatmul.bf16.gmra.mxu3 %v16114_v22  ;;  %v16342_v22 = vrot.slane %v16335_v24, 7  ;;  %3429 = vmatpush.bf16.msrb.mxu2 %v14139_v39 }
 0x1d8   : > { %v2280_v12 = vpop.f32.mrf.mxu2  ;;  %v2016_v4 = vpop.f32.mrf.mxu0  ;;  %v16359_v47 = vsel %vm209_vm0, %v16342_v22, %v2815_v19  ;;  %v2825_v30 = vsel %vm209_vm0, %v15745_v25, %v16342_v22 }
 0x1d9   : > { %v2438_v42 = vpop.f32.mrf.mxu3  ;;  %v2310_v2 = vadd.f32 %v2280_v12, %v2165_v55  ;;  %v2137_v9 = vpop.f32.mrf.mxu1  ;;  %v2045_v26 = vadd.f32 %v2016_v4, %v15914_v21  ;;  %v14147_v55 = vld [vmem:[%s19823_s1 + $0x148] sm:$0xff]  ;;  %v2835_v25 = vpack.c.bf16 %v16359_v47, %v2825_v30  ;;  %v16392_v30 = vrot.slane %v16037_v18, 1 }
 0x1da   : > { %3574 = vmatpush.bf16.msrb.mxu3 %v14147_v55  ;;  %v14131_v4 = vld [vmem:[%s19823_s1 + $0xc8] sm:$0xff] }
 0x1db   : > { %v16345_v62 = vadd.f32 %v2438_v42, %v2310_v2  ;;  %v2166_v21 = vadd.f32 %v2137_v9, %v2045_v26  ;;  %v16367_v2 = vpack.c.bf16 %v16092_v37, %v15977_v11  ;;  %3308 = vmatpush.bf16.msrb.mxu1 %v14131_v4  ;;  %v16383_v11 = vld [vmem:[%s14792_s5 + $0x100] sm:$0xff]  ;;  %v16386_v37 = vld [vmem:[%s14792_s5 + $0x108] sm:$0xff] }
 0x1dc   : > { %v16432_v15 = vpack.c.bf16 %v16386_v37, %v16383_v11 }
 0x1de   : > { %3575 = vmatpush.bf16.msrb.mxu3 %v14146_v16 }
 0x1e0   : > { %v2282_v12 = vpop.f32.mrf.mxu2  ;;  %v2019_v26 = vpop.f32.mrf.mxu0 }
 0x1e1   : > { %v2440_v42 = vpop.f32.mrf.mxu3  ;;  %v2311_v9 = vadd.f32 %v2282_v12, %v2166_v21  ;;  %v2140_v39 = vpop.f32.mrf.mxu1  ;;  %v16389_v26 = vrot.slane %v15949_v61, 1 }
 0x1e2   : > { %v2817_v39 = vrot.slane %v16386_v37, 7 }
 0x1e3   : > { %v16377_v55 = vadd.f32 %v2440_v42, %v2311_v9  ;;  %2573 = vmatmul.bf16.gmra.mxu0 %v16183_v50  ;;  %v2816_v9 = vrot.slane %v16383_v11, 7 }
 0x1e4   : > { %2718 = vmatmul.bf16.gmra.mxu1 %v16367_v2 }
 0x1e5   : > { %2947 = vmatmul.bf16.gmra.mxu2 %v16374_v1  ;;  %v16425_v41 = vsel %vm209_vm0, %v2815_v19, %v2816_v9 }
 0x1e6   : > { %3034 = vmatmul.bf16.gmra.mxu3 %v2835_v25  ;;  %v14138_v25 = vld [vmem:[%s19823_s1 + $0x100] sm:$0xff] }
 0x1e7   : > { %3430 = vmatpush.bf16.msrb.mxu2 %v14138_v25 }
 0x1e8   : > { %v2285_v21 = vpop.f32.mrf.mxu2  ;;  %v2021_v42 = vpop.f32.mrf.mxu0 }
 0x1e9   : > { %v2443_v12 = vpop.f32.mrf.mxu3  ;;  %v2142_v4 = vpop.f32.mrf.mxu1  ;;  %v2047_v50 = vadd.f32 %v2021_v42, %v16014_v58  ;;  %v14130_v58 = vld [vmem:[%s19823_s1 + $0xc0] sm:$0xff]  ;;  %v16413_v42 = vsel %vm453_vm1, %v16389_v26, %v16392_v30 }
 0x1ea   : > { %v14122_v12 = vld [vmem:[%s19823_s1 + $0x80] sm:$0xff]  ;;  %3309 = vmatpush.bf16.msrb.mxu1 %v14130_v58  ;;  %v14169_v58 = vld [vmem:[%s19823_s1 + $0x1f8] sm:$0xff] }
 0x1eb   : > { %v2168_v21 = vadd.f32 %v2142_v4, %v2047_v50  ;;  %v2615_v4 = vsel %vm453_vm1, %v16050_v7, %v16389_v26  ;;  %v16421_v50 = vsel %vm209_vm0, %v2816_v9, %v2817_v39  ;;  %3151 = vmatpush.bf16.msrb.mxu0 %v14122_v12 }
 0x1ec   : > { %v16428_v17 = vpack.c.bf16 %v16413_v42, %v2615_v4  ;;  %v16436_v19 = vpack.c.bf16 %v16421_v50, %v16425_v41  ;;  %v16461_v4 = vrot.slane %v15737_v32, 1 }
 0x1ee   : > { %3847 = vmatpush.bf16.msra.mxu1 %v14169_v58  ;;  %v2624_v32 = vsel %vm453_vm1, %v16461_v4, %v15516_v56 }
 0x1f0   : > { %v2287_v29 = vpop.f32.mrf.mxu2  ;;  %v2024_v7 = vpop.f32.mrf.mxu0 }
 0x1f1   : > { %v2445_v0 = vpop.f32.mrf.mxu3  ;;  %v2313_v34 = vadd.f32 %v2287_v29, %v2168_v21  ;;  %v2145_v25 = vpop.f32.mrf.mxu1  ;;  %v2048_v16 = vadd.f32 %v2024_v7, %v16075_v53  ;;  %v14177_v29 = vld [vmem:[%s19823_s1 + $0x238] sm:$0xff] }
 0x1f2   : > { %v14161_v21 = vld [vmem:[%s19823_s1 + $0x1b8] sm:$0xff]  ;;  %3992 = vmatpush.bf16.msra.mxu2 %v14177_v29  ;;  %v16472_v29 = vsel %vm453_vm1, %v16392_v30, %v16461_v4 }
 0x1f3   : > { %v16439_v9 = vadd.f32 %v2445_v0, %v2313_v34  ;;  %v2169_v12 = vadd.f32 %v2145_v25, %v2048_v16  ;;  %2578 = vmatmul.bf16.gmra.mxu0 %v16242_v59  ;;  %v14193_v53 = vld [vmem:[%s19823_s1 + $0x78] sm:$0xff]  ;;  %v16455_v0 = vld [vmem:[%s14792_s5 + $0x110] sm:$0xff] }
 0x1f4   : > { %2723 = vmatmul.bf16.gmra.mxu1 %v16428_v17  ;;  %3726 = vmatpush.bf16.msra.mxu0 %v14161_v21  ;;  %v16464_v6 = vrot.slane %v16455_v0, 7  ;;  %v2859_v56 = vpack.c.bf16 %v16134_v46, %v16455_v0 }
 0x1f5   : > { %2952 = vmatmul.bf16.gmra.mxu2 %v16432_v15  ;;  %4221 = vmatpush.bf16.msra.mxu3 %v14193_v53 }
 0x1f6   : > { %3039 = vmatmul.bf16.gmra.mxu3 %v16436_v19  ;;  %v16487_v21 = vsel %vm209_vm0, %v2817_v39, %v16464_v6  ;;  %v14176_v39 = vld [vmem:[%s19823_s1 + $0x230] sm:$0xff] }
 0x1f7   : > { %3993 = vmatpush.bf16.msra.mxu2 %v14176_v39  ;;  %v14175_v39 = vld [vmem:[%s19823_s1 + $0x228] sm:$0xff] }
 0x1f8   : > { %v2290_v59 = vpop.f32.mrf.mxu2  ;;  %v2026_v25 = vpop.f32.mrf.mxu0 }
 0x1f9   : > { %v2448_v34 = vpop.f32.mrf.mxu3  ;;  %v2314_v7 = vadd.f32 %v2290_v59, %v2169_v12  ;;  %v2147_v16 = vpop.f32.mrf.mxu1  ;;  %v16482_v12 = vsel %vm209_vm0, %v16464_v6, %v16140_v57 }
 0x1fa   : > { %v2837_v25 = vpack.c.bf16 %v16482_v12, %v16487_v21 }
 0x1fb   : > { %v16466_v38 = vadd.f32 %v2448_v34, %v2314_v7  ;;  %v2630_v34 = vpack.c.bf16 %v2624_v32, %v16472_v29  ;;  %v14160_v32 = vld [vmem:[%s19823_s1 + $0x1b0] sm:$0xff]  ;;  %3994 = vmatpush.bf16.msra.mxu2 %v14175_v39 }
 0x1fc   : > { %3727 = vmatpush.bf16.msra.mxu0 %v14160_v32  ;;  %v14159_v32 = vld [vmem:[%s19823_s1 + $0x1a8] sm:$0xff] }
 0x200   : > { %v2292_v53 = vpop.f32.mrf.mxu2  ;;  %v2029_v58 = vpop.f32.mrf.mxu0  ;;  %3728 = vmatpush.bf16.msra.mxu0 %v14159_v32 }
 0x201   : > { %v2450_v59 = vpop.f32.mrf.mxu3  ;;  %v2150_v7 = vpop.f32.mrf.mxu1  ;;  %v2050_v16 = vadd.f32 %v2029_v58, %v16152_v48  ;;  %v14168_v48 = vld [vmem:[%s19823_s1 + $0x1f0] sm:$0xff] }
 0x202   : > { %v14192_v59 = vld [vmem:[%s19823_s1 + $0x70] sm:$0xff]  ;;  %3848 = vmatpush.bf16.msra.mxu1 %v14168_v48 }
 0x203   : > { %v2171_v53 = vadd.f32 %v2150_v7, %v2050_v16  ;;  %2583 = vmatmul.bf16.gmra.mxu0 %v16317_v20  ;;  %v16509_v58 = vld [vmem:[%s14792_s5 + $0x130] sm:$0xff]  ;;  %v16512_v20 = vld [vmem:[%s14792_s5 + $0xe8] sm:$0xff]  ;;  %4222 = vmatpush.bf16.msra.mxu3 %v14192_v59 }
 0x204   : > { %2728 = vmatmul.bf16.gmra.mxu1 %v2630_v34  ;;  %v3476_v43 = vrot.slane %v16512_v20, 1 }
 0x205   : > { %2957 = vmatmul.bf16.gmra.mxu2 %v2859_v56  ;;  %v16515_v56 = vrot.slane %v16509_v58, 7 }
 0x206   : > { %3044 = vmatmul.bf16.gmra.mxu3 %v2837_v25 }
 0x208   : > { %v2295_v34 = vpop.f32.mrf.mxu2  ;;  %v2031_v5 = vpop.f32.mrf.mxu0 }
 0x209   : > { %v2453_v7 = vpop.f32.mrf.mxu3  ;;  %v2316_v16 = vadd.f32 %v2295_v34, %v2171_v53  ;;  %v2152_v35 = vpop.f32.mrf.mxu1  ;;  %v2051_v25 = vadd.f32 %v2031_v5, %v16196_v27  ;;  %v14191_v53 = vld [vmem:[%s19823_s1 + $0x68] sm:$0xff]  ;;  %v3231_v27 = vsel %vm209_vm0, %v16515_v56, %v15960_v49  ;;  %v3495_v5 = vsel %vm453_vm1, %v16392_v30, %v3476_v43 }
 0x20a   : > { %4223 = vmatpush.bf16.msra.mxu3 %v14191_v53  ;;  %v3353_v49 = vpack.c.bf16 %v16037_v18, %v15949_v61  ;;  %v3498_v39 = vpack.c.bf16 %v3495_v5, %v16413_v42  ;;  %v14174_v61 = vld [vmem:[%s19823_s1 + $0x220] sm:$0xff]  ;;  %v16552_v18 = vrot.slane %v16335_v24, 1 }
 0x20b   : > { %v16519_v33 = vadd.f32 %v2453_v7, %v2316_v16  ;;  %v2172_v59 = vadd.f32 %v2152_v35, %v2051_v25  ;;  %v3232_v7 = vpack.c.bf16 %v16106_v54, %v3231_v27  ;;  %v14167_v35 = vld [vmem:[%s19823_s1 + $0x1e8] sm:$0xff]  ;;  %3995 = vmatpush.bf16.msra.mxu2 %v14174_v61 }
 0x20c   : > { %3849 = vmatpush.bf16.msra.mxu1 %v14167_v35 }
 0x210   : > { %v2297_v48 = vpop.f32.mrf.mxu2  ;;  %v2034_v25 = vpop.f32.mrf.mxu0 }
 0x211   : > { %v2455_v34 = vpop.f32.mrf.mxu3  ;;  %v2317_v16 = vadd.f32 %v2297_v48, %v2172_v59  ;;  %v2155_v13 = vpop.f32.mrf.mxu1  ;;  %v3210_v59 = vrot.slane %v16512_v20, 7  ;;  %v14158_v25 = vld [vmem:[%s19823_s1 + $0x1a0] sm:$0xff] }
 0x212   : > { %v3057_v13 = vrot.slane %v16338_v10, 1  ;;  %3729 = vmatpush.bf16.msra.mxu0 %v14158_v25  ;;  %v3067_v25 = vsel %vm453_vm1, %v16461_v4, %v16552_v18 }
 0x213   : > { %v16544_v32 = vadd.f32 %v2455_v34, %v2317_v16  ;;  %3152 = vmatmul.bf16.vlgmr.msrb.gmra.mxu0 %v16367_v2  ;;  %v3228_v5 = vsel %vm209_vm0, %v3210_v59, %v16342_v22  ;;  %v3229_v48 = vsel %vm209_vm0, %v16053_v40, %v3210_v59  ;;  %v14190_v40 = vld [vmem:[%s19823_s1 + $0x60] sm:$0xff] }
 0x214   : > { %3310 = vmatmul.bf16.vlgmr.msrb.gmra.mxu1 %v3232_v7  ;;  %v16565_v34 = vsel %vm453_vm1, %v16552_v18, %v3057_v13  ;;  %v3494_v7 = vsel %vm453_vm1, %v3476_v43, %v16552_v18  ;;  %v3233_v16 = vpack.c.bf16 %v3228_v5, %v3229_v48  ;;  %v3354_v43 = vpack.c.bf16 %v16335_v24, %v16512_v20  ;;  %v14157_v24 = vld [vmem:[%s19823_s1 + $0x198] sm:$0xff] }
 0x215   : > { %3431 = vmatmul.bf16.vlgmr.msrb.gmra.mxu2 %v3353_v49  ;;  %v14166_v49 = vld [vmem:[%s19823_s1 + $0x1e0] sm:$0xff]  ;;  %4224 = vmatpush.bf16.msra.mxu3 %v14190_v40 }
 0x216   : > { %3576 = vmatmul.bf16.vlgmr.msrb.gmra.mxu3 %v3498_v39  ;;  %3850 = vmatpush.bf16.msra.mxu1 %v14166_v49 }
 0x217   : > { %3730 = vmatpush.bf16.msra.mxu0 %v14157_v24 }
 0x218   : > { %v2300_v54 = vpop.f32.mrf.mxu2  ;;  %v2036_v53 = vpop.f32.mrf.mxu0 }
 0x219   : > { %v2458_v30 = vpop.f32.mrf.mxu3  ;;  %v2157_v27 = vpop.f32.mrf.mxu1  ;;  %v2053_v2 = vadd.f32 %v2036_v53, %v16250_v14  ;;  %v3499_v53 = vpack.c.bf16 %v16565_v34, %v3494_v7 }
 0x21b   : > { %v2174_v42 = vadd.f32 %v2157_v27, %v2053_v2  ;;  %v14173_v2 = vld [vmem:[%s19823_s1 + $0x218] sm:$0xff] }
 0x21c   : > { %3996 = vmatpush.bf16.msra.mxu2 %v14173_v2  ;;  %v14172_v2 = vld [vmem:[%s19823_s1 + $0x210] sm:$0xff] }
 0x220   : > { %v2302_v14 = vpop.f32.mrf.mxu2  ;;  %v2039_v54 = vpop.f32.mrf.mxu0  ;;  %3997 = vmatpush.bf16.msra.mxu2 %v14172_v2 }
 0x221   : > { %v2460_v35 = vpop.f32.mrf.mxu3  ;;  %v2319_v39 = vadd.f32 %v2302_v14, %v2174_v42  ;;  %v2160_v30 = vpop.f32.mrf.mxu1  ;;  %v2054_v27 = vadd.f32 %v2039_v54, %v16298_v28  ;;  %v14189_v28 = vld [vmem:[%s19823_s1 + $0x58] sm:$0xff]  ;;  %v3058_v14 = vrot.slane %v16383_v11, 1 }
 0x222   : > { %4225 = vmatpush.bf16.msra.mxu3 %v14189_v28  ;;  %v16634_v28 = vld [vmem:[%s19824_s2] ss:$0 sm:$0xff] }
 0x223   : > { %v16583_v59 = vadd.f32 %v2460_v35, %v2319_v39  ;;  %v2175_v61 = vadd.f32 %v2160_v30, %v2054_v27  ;;  %3157 = vmatmul.bf16.gmra.mxu0 %v16428_v17  ;;  %v14165_v17 = vld [vmem:[%s19823_s1 + $0x1d8] sm:$0xff]  ;;  %v3059_v35 = vrot.slane %v16386_v37, 1  ;;  %v3492_v49 = vsel %vm453_vm1, %v3057_v13, %v3058_v14 }
 0x224   : > { %3315 = vmatmul.bf16.gmra.mxu1 %v3233_v16  ;;  %v3076_v30 = vpack.c.bf16 %v3067_v25, %v16472_v29  ;;  %v16647_v25 = vrot.slane %v16134_v46, 1 }
 0x225   : > { %3436 = vmatmul.bf16.gmra.mxu2 %v3354_v43  ;;  %3851 = vmatpush.bf16.msra.mxu1 %v14165_v17  ;;  %v16608_v40 = vsel %vm453_vm1, %v3058_v14, %v3059_v35  ;;  %v3234_v43 = vpack.c.bf16 %v16425_v41, %v16359_v47 }
 0x226   : > { %3581 = vmatmul.bf16.gmra.mxu3 %v3499_v53  ;;  %v3500_v4 = vpack.c.bf16 %v16608_v40, %v3492_v49 }
 0x228   : > { %v2305_v20 = vpop.f32.mrf.mxu2  ;;  %v2041_v48 = vpop.f32.mrf.mxu0 }
 0x229   : > { %v2463_v42 = vpop.f32.mrf.mxu3  ;;  %v2320_v5 = vadd.f32 %v2305_v20, %v2175_v61  ;;  %v2162_v7 = vpop.f32.mrf.mxu1  ;;  %v3355_v61 = vpack.c.bf16 %v16383_v11, %v16338_v10  ;;  %v14156_v10 = vld [vmem:[%s19823_s1 + $0x190] sm:$0xff]  ;;  %v14171_v48 = vld [vmem:[%s19823_s1 + $0x208] sm:$0xff] }
 0x22a   : > { %v14188_v11 = vld [vmem:[%s19823_s1 + $0x50] sm:$0xff]  ;;  %v16643_v7 = vrot.slane %v16455_v0, 1  ;;  %3731 = vmatpush.bf16.msra.mxu0 %v14156_v10  ;;  %3998 = vmatpush.bf16.msra.mxu2 %v14171_v48 }
 0x22b   : > { %v16600_v16 = vadd.f32 %v2463_v42, %v2320_v5  ;;  %4226 = vmatpush.bf16.msra.mxu3 %v14188_v11  ;;  %v3356_v11 = vpack.c.bf16 %v16455_v0, %v16386_v37 }
 0x230   : > { %v2307_v39 = vpop.f32.mrf.mxu2  ;;  %v2559_v53 = vpop.f32.mrf.mxu0 }
 0x231   : > { %v2465_v54 = vpop.f32.mrf.mxu3  ;;  %v2704_v27 = vpop.f32.mrf.mxu1  ;;  %v2589_v13 = vadd.f32 %v2559_v53, %v16345_v62  ;;  %v14164_v62 = vld [vmem:[%s19823_s1 + $0x1d0] sm:$0xff]  ;;  %v14155_v39 = vld [vmem:[%s19823_s1 + $0x188] sm:$0xff]  ;;  %v16662_v53 = vsel %vm453_vm1, %v16643_v7, %v16647_v25 }
 0x232   : > { %v14187_v54 = vld [vmem:[%s19823_s1 + $0x48] sm:$0xff]  ;;  %3852 = vmatpush.bf16.msra.mxu1 %v14164_v62  ;;  %3732 = vmatpush.bf16.msra.mxu0 %v14155_v39 }
 0x233   : > { %v2734_v24 = vadd.f32 %v2704_v27, %v2589_v13  ;;  %3162 = vmatmul.bf16.gmra.mxu0 %v3076_v30  ;;  %v3490_v27 = vsel %vm453_vm1, %v3059_v35, %v16643_v7  ;;  %4227 = vmatpush.bf16.msra.mxu3 %v14187_v54  ;;  %v16670_v13 = vpack.c.bf16 %v3492_v49, %v16565_v34 }
 0x234   : > { %3320 = vmatmul.bf16.gmra.mxu1 %v3234_v43  ;;  %v3501_v62 = vpack.c.bf16 %v16662_v53, %v3490_v27 }
 0x235   : > { %3441 = vmatmul.bf16.gmra.mxu2 %v3355_v61  ;;  %v2746_v20 = vadd.f32 %v16634_v28, %v2734_v24  ;;  %v3235_v24 = vpack.c.bf16 %v16487_v21, %v16421_v50 }
 0x236   : > { %3586 = vmatmul.bf16.gmra.mxu3 %v3500_v4 }
 0x237   : > { %v16655_v43 = vmax.f32 %v2746_v20, 0.0 }
 0x238   : > { %v2933_v41 = vpop.f32.mrf.mxu2  ;;  %v2561_v17 = vpop.f32.mrf.mxu0 }
 0x239   : > { %v3020_v29 = vpop.f32.mrf.mxu3  ;;  %v2706_v5 = vpop.f32.mrf.mxu1  ;;  %v2590_v14 = vadd.f32 %v2561_v17, %v16377_v55  ;;  %20047 = vst [vmem:[#allocation36_spill] sm:$0xff] %v16655_v43  ;;  %v6199_v34 = vrot.slane %v16655_v43, 7  ;;  %v19870_v49 = vrot.slane %v16655_v43, 1  ;;  %v16759_v17 = vpack.c.bf16 %v3490_v27, %v16608_v40 }
 0x23a   : > { %v16637_v42 = vadd.f32 %v3020_v29, %v2933_v41  ;;  %v14163_v41 = vld [vmem:[%s19823_s1 + $0x1c8] sm:$0xff] }
 0x23b   : > { %v2735_v30 = vadd.f32 %v2706_v5, %v2590_v14  ;;  %3853 = vmatpush.bf16.msra.mxu1 %v14163_v41  ;;  %v16690_v37 = vsel %vm209_vm0, %v15899_v63, %v6199_v34  ;;  %v16695_v5 = vld [vmem:[%s14792_s5 + $0x120] sm:$0xff] }
 0x23c   : > { %20049 = vst [vmem:[#allocation38_spill] sm:$0xff] %v16690_v37  ;;  %v3357_v40 = vpack.c.bf16 %v16695_v5, %v16134_v46  ;;  %v14209_v46 = vld [vmem:[%s19823_s1 + $0xf8] sm:$0xff] }
 0x23d   : > { %v2747_v55 = vadd.f32 %v16634_v28, %v2735_v30  ;;  %v16718_v30 = vld [vmem:[%s14792_s5 + $0x128] sm:$0xff] }
 0x23f   : > { %v16667_v61 = vmax.f32 %v2747_v55, 0.0 }
 0x240   : > { %v2935_v4 = vpop.f32.mrf.mxu2  ;;  %v2564_v35 = vpop.f32.mrf.mxu0 }
 0x241   : > { %20048 = vst [vmem:[#allocation37_spill] sm:$0xff] %v16667_v61  ;;  %v3022_v2 = vpop.f32.mrf.mxu3  ;;  %v2709_v10 = vpop.f32.mrf.mxu1  ;;  %v6200_v50 = vrot.slane %v16667_v61, 7  ;;  %v6452_v20 = vrot.slane %v16667_v61, 1 }
 0x242   : > { %v16677_v29 = vadd.f32 %v3022_v2, %v2935_v4  ;;  %v14186_v4 = vld [vmem:[%s19823_s1 + $0x40] sm:$0xff] }
 0x243   : > { %3167 = vmatmul.bf16.gmra.mxu0 %v16670_v13  ;;  %v16700_v48 = vsel %vm209_vm0, %v6200_v50, %v15899_v63  ;;  %v16704_v14 = vsel %vm209_vm0, %v6199_v34, %v6200_v50  ;;  %v16709_v39 = vsel %vm453_vm1, %v6452_v20, %v15917_v44  ;;  %v16715_v54 = vsel %vm453_vm1, %v19870_v49, %v6452_v20 }
 0x244   : > { %3325 = vmatmul.bf16.gmra.mxu1 %v3235_v24  ;;  %20050 = vst [vmem:[#allocation39_spill] sm:$0xff] %v16700_v48  ;;  %v16722_v55 = vpack.c.bf16 %v16700_v48, %v16704_v14  ;;  %v16736_v50 = vrot.slane %v16695_v5, 1  ;;  %v16739_v20 = vrot.slane %v16718_v30, 1  ;;  %4228 = vmatpush.bf16.msra.mxu3 %v14186_v4 }
 0x245   : > { %3446 = vmatmul.bf16.gmra.mxu2 %v3356_v11  ;;  %20051 = vst [vmem:[#allocation40_spill] sm:$0xff] %v16704_v14  ;;  %v16729_v11 = vrot.slane %v16695_v5, 7 }
 0x246   : > { %3591 = vmatmul.bf16.gmra.mxu3 %v3501_v62  ;;  %20052 = vst [vmem:[#allocation41_spill] sm:$0xff] %v16709_v39  ;;  %v14170_v62 = vld [vmem:[%s19823_s1 + $0x200] sm:$0xff] }
 0x247   : > { %20053 = vst [vmem:[#allocation42_spill] sm:$0xff] %v16715_v54  ;;  %3999 = vmatpush.bf16.msra.mxu2 %v14170_v62 }
 0x248   : > { %20054 = vst [vmem:[#allocation43_spill] sm:$0xff] %v16722_v55  ;;  %v2938_v24 = vpop.f32.mrf.mxu2  ;;  %v2566_v35 = vpop.f32.mrf.mxu0 }
 0x249   : > { %v3025_v41 = vpop.f32.mrf.mxu3  ;;  %v2711_v10 = vpop.f32.mrf.mxu1  ;;  %v2592_v34 = vadd.f32 %v2566_v35, %v16439_v9  ;;  %v16750_v9 = vsel %vm453_vm1, %v16736_v50, %v16739_v20  ;;  %v3488_v35 = vsel %vm453_vm1, %v16647_v25, %v16736_v50 }
 0x24a   : > { %v3222_v41 = vsel %vm209_vm0, %v16140_v57, %v16729_v11 }
 0x24b   : > { %v2737_v24 = vadd.f32 %v2711_v10, %v2592_v34  ;;  %v3236_v57 = vpack.c.bf16 %v3222_v41, %v16482_v12  ;;  %v3502_v12 = vpack.c.bf16 %v16750_v9, %v3488_v35  ;;  %v16797_v35 = vrot.slane %v16718_v30, 7  ;;  %4599 = vmatpush.bf16.msrb.mxu2 %v14209_v46 }
 0x24d   : > { %v2749_v2 = vadd.f32 %v16634_v28, %v2737_v24  ;;  %v14154_v24 = vld [vmem:[%s19823_s1 + $0x180] sm:$0xff] }
 0x24e   : > { %3733 = vmatpush.bf16.msra.mxu0 %v14154_v24 }
 0x24f   : > { %v16756_v62 = vmax.f32 %v2749_v2, 0.0  ;;  %v14162_v2 = vld [vmem:[%s19823_s1 + $0x1c0] sm:$0xff] }
 0x250   : > { %v2940_v10 = vpop.f32.mrf.mxu2  ;;  %v2569_v14 = vpop.f32.mrf.mxu0  ;;  %3854 = vmatpush.bf16.msra.mxu1 %v14162_v2  ;;  %v14201_v2 = vld [vmem:[%s19823_s1 + $0xb8] sm:$0xff] }
 0x251   : > { %20055 = vst [vmem:[#allocation44_spill] sm:$0xff] %v16756_v62  ;;  %v3027_v34 = vpop.f32.mrf.mxu3  ;;  %v2714_v39 = vpop.f32.mrf.mxu1  ;;  %v2593_v27 = vadd.f32 %v2569_v14, %v16466_v38  ;;  %v6640_v41 = vrot.slane %v16756_v62, 7  ;;  %v14185_v38 = vld [vmem:[%s19823_s1 + $0x38] sm:$0xff]  ;;  %v19876_v46 = vrot.slane %v16756_v62, 1 }
 0x252   : > { %v16771_v49 = vadd.f32 %v3027_v34, %v2940_v10  ;;  %v14217_v14 = vld [vmem:[%s19823_s1 + $0x138] sm:$0xff]  ;;  %4308 = vmatpush.bf16.msrb.mxu0 %v14185_v38 }
 0x253   : > { %v2738_v54 = vadd.f32 %v2714_v39, %v2593_v27  ;;  %3172 = vmatmul.bf16.gmra.mxu0 %v16759_v17  ;;  %v16782_v10 = vsel %vm209_vm0, %v15899_v63, %v6640_v41  ;;  %4720 = vmatpush.bf16.msrb.mxu3 %v14217_v14 }
 0x254   : > { %3330 = vmatmul.bf16.gmra.mxu1 %v3236_v57  ;;  %20056 = vst [vmem:[#allocation45_spill] sm:$0xff] %v16782_v10 }
 0x255   : > { %3451 = vmatmul.bf16.gmra.mxu2 %v3357_v40  ;;  %v2750_v4 = vadd.f32 %v16634_v28, %v2738_v54  ;;  %v16807_v54 = vrot.slane %v16509_v58, 1  ;;  %4441 = vmatpush.bf16.msrb.mxu1 %v14201_v2 }
 0x256   : > { %3596 = vmatmul.bf16.gmra.mxu3 %v3502_v12 }
 0x257   : > { %v16799_v34 = vmax.f32 %v2750_v4, 0.0 }
 0x258   : > { %v2943_v57 = vpop.f32.mrf.mxu2  ;;  %v2571_v12 = vpop.f32.mrf.mxu0 }
 0x259   : > { %20057 = vst [vmem:[#allocation46_spill] sm:$0xff] %v16799_v34  ;;  %v3030_v24 = vpop.f32.mrf.mxu3  ;;  %v2716_v27 = vpop.f32.mrf.mxu1  ;;  %v16812_v38 = vpack.c.bf16 %v16799_v34, %v16756_v62  ;;  %v6641_v14 = vrot.slane %v16799_v34, 7  ;;  %v6875_v4 = vrot.slane %v16799_v34, 1 }
 0x25a   : > { %v16804_v40 = vadd.f32 %v3030_v24, %v2943_v57  ;;  %v3073_v57 = vsel %vm453_vm1, %v16647_v25, %v15955_v51  ;;  %v16824_v24 = vsel %vm209_vm0, %v16797_v35, %v16515_v56 }
 0x25b   : > { %20058 = vst [vmem:[#allocation47_spill] sm:$0xff] %v16812_v38  ;;  %v16828_v2 = vsel %vm209_vm0, %v6640_v41, %v6641_v14  ;;  %v16833_v12 = vsel %vm453_vm1, %v6875_v4, %v15917_v44  ;;  %v16839_v51 = vsel %vm453_vm1, %v19876_v46, %v6875_v4  ;;  %v16844_v25 = vsel %vm209_vm0, %v6641_v14, %v15899_v63  ;;  %v14208_v38 = vld [vmem:[%s19823_s1 + $0xf0] sm:$0xff] }
 0x25c   : > { %20059 = vst [vmem:[#allocation48_spill] sm:$0xff] %v16828_v2  ;;  %v16850_v41 = vsel %vm209_vm0, %v16729_v11, %v16797_v35  ;;  %v16854_v27 = vpack.c.bf16 %v16828_v2, %v16782_v10  ;;  %v16858_v39 = vpack.c.bf16 %v16833_v12, %v16839_v51  ;;  %v16866_v14 = vsel %vm453_vm1, %v16739_v20, %v16807_v54 }
 0x25d   : > { %20060 = vst [vmem:[#allocation49_spill] sm:$0xff] %v16833_v12  ;;  %v3497_v46 = vsel %vm453_vm1, %v16807_v54, %v16389_v26  ;;  %v3079_v10 = vpack.c.bf16 %v3073_v57, %v16662_v53  ;;  %4600 = vmatpush.bf16.msrb.mxu2 %v14208_v38  ;;  %v14216_v38 = vld [vmem:[%s19823_s1 + $0x130] sm:$0xff] }
 0x25e   : > { %20061 = vst [vmem:[#allocation50_spill] sm:$0xff] %v16839_v51  ;;  %v3237_v51 = vpack.c.bf16 %v16824_v24, %v16850_v41  ;;  %4721 = vmatpush.bf16.msrb.mxu3 %v14216_v38 }
 0x25f   : > { %20062 = vst [vmem:[#allocation51_spill] sm:$0xff] %v16844_v25 }
 0x260   : > { %20063 = vst [vmem:[#allocation52_spill] sm:$0xff] %v16854_v27  ;;  %v2945_v34 = vpop.f32.mrf.mxu2  ;;  %v2574_v4 = vpop.f32.mrf.mxu0  ;;  %v3503_v27 = vpack.c.bf16 %v3497_v46, %v16866_v14 }
 0x261   : > { %20064 = vst [vmem:[#allocation53_spill] sm:$0xff] %v16858_v39  ;;  %v3032_v48 = vpop.f32.mrf.mxu3  ;;  %v2719_v2 = vpop.f32.mrf.mxu1  ;;  %v3358_v39 = vpack.c.bf16 %v16509_v58, %v16718_v30  ;;  %v2595_v26 = vadd.f32 %v2574_v4, %v16519_v33  ;;  %v16884_v34 = vld [vmem:[%s14792_s5 + $0x148] sm:$0xff] }
 0x262   : > { %v16891_v33 = vrot.slane %v16884_v34, 7  ;;  %v14215_v4 = vld [vmem:[%s19823_s1 + $0x128] sm:$0xff] }
 0x263   : > { %v2740_v48 = vadd.f32 %v2719_v2, %v2595_v26  ;;  %3177 = vmatmul.bf16.gmra.mxu0 %v3079_v10  ;;  %v14207_v2 = vld [vmem:[%s19823_s1 + $0xe8] sm:$0xff]  ;;  %4722 = vmatpush.bf16.msrb.mxu3 %v14215_v4 }
 0x264   : > { %3335 = vmatmul.bf16.gmra.mxu1 %v3237_v51  ;;  %v3655_v26 = vsel %vm209_vm0, %v16891_v33, %v16342_v22  ;;  %4601 = vmatpush.bf16.msrb.mxu2 %v14207_v2  ;;  %v14199_v2 = vld [vmem:[%s19823_s1 + $0xa8] sm:$0xff] }
 0x265   : > { %3456 = vmatmul.bf16.gmra.mxu2 %v3358_v39  ;;  %v2752_v53 = vadd.f32 %v16634_v28, %v2740_v48  ;;  %v14184_v39 = vld [vmem:[%s19823_s1 + $0x30] sm:$0xff] }
 0x266   : > { %3601 = vmatmul.bf16.gmra.mxu3 %v3503_v27  ;;  %4309 = vmatpush.bf16.msrb.mxu0 %v14184_v39  ;;  %v14183_v27 = vld [vmem:[%s19823_s1 + $0x28] sm:$0xff] }
 0x267   : > { %v16886_v57 = vmax.f32 %v2752_v53, 0.0 }
 0x268   : > { %v2948_v62 = vpop.f32.mrf.mxu2  ;;  %v2576_v61 = vpop.f32.mrf.mxu0 }
 0x269   : > { %20065 = vst [vmem:[#allocation54_spill] sm:$0xff] %v16886_v57  ;;  %v3035_v46 = vpop.f32.mrf.mxu3  ;;  %v2721_v43 = vpop.f32.mrf.mxu1  ;;  %v2596_v10 = vadd.f32 %v2576_v61, %v16544_v32  ;;  %v6643_v51 = vrot.slane %v16886_v57, 7  ;;  %v6877_v32 = vrot.slane %v16886_v57, 1 }
 0x26a   : > { %v16888_v55 = vadd.f32 %v3035_v46, %v2948_v62  ;;  %v14200_v62 = vld [vmem:[%s19823_s1 + $0xb0] sm:$0xff]  ;;  %4310 = vmatpush.bf16.msrb.mxu0 %v14183_v27 }
 0x26b   : > { %v2741_v61 = vadd.f32 %v2721_v43, %v2596_v10  ;;  %4442 = vmatpush.bf16.msrb.mxu1 %v14200_v62  ;;  %v16921_v43 = vsel %vm209_vm0, %v15899_v63, %v6643_v51  ;;  %v16926_v48 = vsel %vm453_vm1, %v15917_v44, %v6877_v32  ;;  %v3656_v62 = vpack.c.bf16 %v16359_v47, %v3655_v26 }
 0x26c   : > { %20066 = vst [vmem:[#allocation55_spill] sm:$0xff] %v16921_v43  ;;  %v16931_v46 = vpack.c.bf16 %v16921_v43, %v16844_v25 }
 0x26d   : > { %20067 = vst [vmem:[#allocation56_spill] sm:$0xff] %v16926_v48  ;;  %v2753_v53 = vadd.f32 %v16634_v28, %v2741_v61 }
 0x26e   : > { %20068 = vst [vmem:[#allocation57_spill] sm:$0xff] %v16931_v46  ;;  %v16945_v46 = vpack.c.bf16 %v16718_v30, %v16695_v5 }
 0x26f   : > { %v16935_v10 = vmax.f32 %v2753_v53, 0.0  ;;  %4443 = vmatpush.bf16.msrb.mxu1 %v14199_v2  ;;  %v14206_v2 = vld [vmem:[%s19823_s1 + $0xe0] sm:$0xff] }
 0x270   : > { %v2950_v39 = vpop.f32.mrf.mxu2  ;;  %v2579_v37 = vpop.f32.mrf.mxu0  ;;  %4602 = vmatpush.bf16.msrb.mxu2 %v14206_v2 }
 0x271   : > { %20069 = vst [vmem:[#allocation58_spill] sm:$0xff] %v16935_v10  ;;  %v3037_v38 = vpop.f32.mrf.mxu3  ;;  %v2724_v25 = vpop.f32.mrf.mxu1  ;;  %v6878_v53 = vrot.slane %v16935_v10, 1  ;;  %v6644_v27 = vrot.slane %v16935_v10, 7 }
 0x272   : > { %v16941_v61 = vadd.f32 %v3037_v38, %v2950_v39  ;;  %v14214_v25 = vld [vmem:[%s19823_s1 + $0x120] sm:$0xff] }
 0x273   : > { %3734 = vmatmul.bf16.vlgmr.msra.gmra.mxu0 %v3656_v62  ;;  %v16951_v47 = vsel %vm453_vm1, %v6877_v32, %v6878_v53  ;;  %v16957_v37 = vsel %vm453_vm1, %v6878_v53, %v15917_v44  ;;  %v16972_v30 = vsel %vm209_vm0, %v6643_v51, %v6644_v27  ;;  %4723 = vmatpush.bf16.msrb.mxu3 %v14214_v25 }
 0x274   : > { %3855 = vmatmul.bf16.vlgmr.msra.gmra.mxu1 %v16374_v1  ;;  %20070 = vst [vmem:[#allocation59_spill] sm:$0xff] %v16951_v47  ;;  %v16963_v5 = vpack.c.bf16 %v16951_v47, %v16926_v48  ;;  %v16968_v1 = vsel %vm209_vm0, %v6644_v27, %v15899_v63  ;;  %v14182_v27 = vld [vmem:[%s19823_s1 + $0x20] sm:$0xff] }
 0x275   : > { %20071 = vst [vmem:[#allocation60_spill] sm:$0xff] %v16957_v37  ;;  %4000 = vmatmul.bf16.vlgmr.msra.gmra.mxu2 %v16670_v13  ;;  %v16978_v13 = vpack.c.bf16 %v16968_v1, %v16972_v30  ;;  %4311 = vmatpush.bf16.msrb.mxu0 %v14182_v27 }
 0x276   : > { %4229 = vmatmul.bf16.vlgmr.msra.gmra.mxu3 %v16945_v46  ;;  %20072 = vst [vmem:[#allocation61_spill] sm:$0xff] %v16963_v5 }
 0x277   : > { %20073 = vst [vmem:[#allocation62_spill] sm:$0xff] %v16968_v1 }
 0x278   : > { %20074 = vst [vmem:[#allocation63_spill] sm:$0xff] %v16972_v30  ;;  %v2953_v26 = vpop.f32.mrf.mxu2  ;;  %v2581_v38 = vpop.f32.mrf.mxu0 }
 0x279   : > { %20075 = vst [vmem:[#allocation64_spill] sm:$0xff] %v16978_v13  ;;  %v3040_v39 = vpop.f32.mrf.mxu3  ;;  %v2726_v62 = vpop.f32.mrf.mxu1  ;;  %v2598_v51 = vadd.f32 %v2581_v38, %v16583_v59  ;;  %v14198_v26 = vld [vmem:[%s19823_s1 + $0xa0] sm:$0xff] }
 0x27a   : > { %v16999_v39 = vld [vmem:[%s14792_s5 + $0x138] sm:$0xff]  ;;  %4444 = vmatpush.bf16.msrb.mxu1 %v14198_v26 }
 0x27b   : > { %v2743_v53 = vadd.f32 %v2726_v62, %v2598_v51  ;;  %v4152_v47 = vpack.c.bf16 %v16999_v39, %v16509_v58  ;;  %v14205_v58 = vld [vmem:[%s19823_s1 + $0xd8] sm:$0xff] }
 0x27c   : > { %4603 = vmatpush.bf16.msrb.mxu2 %v14205_v58 }
 0x27d   : > { %v2755_v59 = vadd.f32 %v16634_v28, %v2743_v53 }
 0x27f   : > { %v17001_v38 = vmax.f32 %v2755_v59, 0.0 }
 0x280   : > { %v2955_v62 = vpop.f32.mrf.mxu2  ;;  %v2584_v32 = vpop.f32.mrf.mxu0 }
 0x281   : > { %20076 = vst [vmem:[#allocation65_spill] sm:$0xff] %v17001_v38  ;;  %v3042_v51 = vpop.f32.mrf.mxu3  ;;  %v2729_v22 = vpop.f32.mrf.mxu1  ;;  %v2599_v2 = vadd.f32 %v2584_v32, %v16600_v16  ;;  %v7026_v53 = vrot.slane %v17001_v38, 7  ;;  %v14181_v16 = vld [vmem:[%s19823_s1 + $0x18] sm:$0xff] }
 0x282   : > { %v17003_v4 = vadd.f32 %v3042_v51, %v2955_v62  ;;  %4312 = vmatpush.bf16.msrb.mxu0 %v14181_v16  ;;  %v19898_v16 = vrot.slane %v17001_v38, 1 }
 0x283   : > { %v2744_v43 = vadd.f32 %v2729_v22, %v2599_v2  ;;  %3739 = vmatmul.bf16.gmra.mxu0 %v16436_v19  ;;  %v17014_v25 = vsel %vm209_vm0, %v15899_v63, %v7026_v53  ;;  %v17025_v22 = vld [vmem:[%s14792_s5 + $0x118] sm:$0xff] }
 0x284   : > { %3860 = vmatmul.bf16.gmra.mxu1 %v16432_v15  ;;  %20077 = vst [vmem:[#allocation66_spill] sm:$0xff] %v17014_v25  ;;  %v14213_v15 = vld [vmem:[%s19823_s1 + $0x118] sm:$0xff]  ;;  %v3637_v62 = vrot.slane %v17025_v22, 7  ;;  %v3903_v51 = vrot.slane %v17025_v22, 1 }
 0x285   : > { %4005 = vmatmul.bf16.gmra.mxu2 %v16759_v17  ;;  %v2756_v19 = vadd.f32 %v16634_v28, %v2744_v43  ;;  %4724 = vmatpush.bf16.msrb.mxu3 %v14213_v15  ;;  %v14197_v28 = vld [vmem:[%s19823_s1 + $0x98] sm:$0xff]  ;;  %v17084_v17 = vld [vmem:[%s14792_s5 + $0x140] sm:$0xff] }
 0x286   : > { %4234 = vmatmul.bf16.gmra.mxu3 %v4152_v47  ;;  %4445 = vmatpush.bf16.msrb.mxu1 %v14197_v28  ;;  %v4650_v5 = vpack.c.bf16 %v17084_v17, %v16999_v39 }
 0x287   : > { %v17032_v47 = vmax.f32 %v2756_v19, 0.0 }
 0x288   : > { %v2958_v32 = vpop.f32.mrf.mxu2  ;;  %v2586_v26 = vpop.f32.mrf.mxu0 }
 0x289   : > { %20078 = vst [vmem:[#allocation67_spill] sm:$0xff] %v17032_v47  ;;  %v3045_v27 = vpop.f32.mrf.mxu3  ;;  %v2731_v59 = vpop.f32.mrf.mxu1  ;;  %v17043_v2 = vpack.c.bf16 %v17032_v47, %v17001_v38  ;;  %v7027_v58 = vrot.slane %v17032_v47, 7  ;;  %v7277_v19 = vrot.slane %v17032_v47, 1 }
 0x28a   : > { %v17037_v43 = vadd.f32 %v3045_v27, %v2958_v32  ;;  %v3779_v59 = vpack.c.bf16 %v17025_v22, %v16455_v0  ;;  %v14180_v0 = vld [vmem:[%s19823_s1 + $0x10] sm:$0xff] }
 0x28b   : > { %20079 = vst [vmem:[#allocation68_spill] sm:$0xff] %v17043_v2  ;;  %v17050_v15 = vsel %vm209_vm0, %v7026_v53, %v7027_v58  ;;  %v17056_v32 = vsel %vm453_vm1, %v19898_v16, %v7277_v19  ;;  %v17061_v27 = vsel %vm209_vm0, %v7027_v58, %v15899_v63  ;;  %v17066_v28 = vsel %vm453_vm1, %v7277_v19, %v15917_v44 }
 0x28c   : > { %20080 = vst [vmem:[#allocation69_spill] sm:$0xff] %v17050_v15  ;;  %v3650_v53 = vsel %vm209_vm0, %v16464_v6, %v3637_v62  ;;  %v17073_v26 = vpack.c.bf16 %v17050_v15, %v17014_v25  ;;  %v3915_v58 = vsel %vm453_vm1, %v3903_v51, %v16736_v50  ;;  %v3916_v19 = vsel %vm453_vm1, %v16643_v7, %v3903_v51 }
 0x28d   : > { %20081 = vst [vmem:[#allocation70_spill] sm:$0xff] %v17056_v32  ;;  %v17088_v6 = vpack.c.bf16 %v17066_v28, %v17056_v32  ;;  %v3658_v47 = vpack.c.bf16 %v3650_v53, %v16487_v21  ;;  %v3924_v25 = vpack.c.bf16 %v3915_v58, %v3916_v19  ;;  %v17095_v7 = vpack.c.bf16 %v16884_v34, %v17084_v17  ;;  %v14212_v21 = vld [vmem:[%s19823_s1 + $0x110] sm:$0xff] }
 0x28e   : > { %20082 = vst [vmem:[#allocation71_spill] sm:$0xff] %v17061_v27  ;;  %4313 = vmatpush.bf16.msrb.mxu0 %v14180_v0  ;;  %4725 = vmatpush.bf16.msrb.mxu3 %v14212_v21 }
 0x28f   : > { %20083 = vst [vmem:[#allocation72_spill] sm:$0xff] %v17066_v28  ;;  %v17191_v28 = vld [vmem:[%s14792_s5 + $0x168] sm:$0xff] }
 0x290   : > { %20084 = vst [vmem:[#allocation73_spill] sm:$0xff] %v17073_v26  ;;  %v2960_v16 = vpop.f32.mrf.mxu2  ;;  %v3153_v15 = vpop.f32.mrf.mxu0 }
 0x291   : > { %20085 = vst [vmem:[#allocation74_spill] sm:$0xff] %v17088_v6  ;;  %v3047_v2 = vpop.f32.mrf.mxu3  ;;  %v3311_v1 = vpop.f32.mrf.mxu1  ;;  %v3183_v51 = vadd.f32 %v3153_v15, %v16637_v42  ;;  %v14204_v16 = vld [vmem:[%s19823_s1 + $0xd0] sm:$0xff] }
 0x292   : > { %v14196_v42 = vld [vmem:[%s19823_s1 + $0x90] sm:$0xff]  ;;  %4604 = vmatpush.bf16.msrb.mxu2 %v14204_v16  ;;  %v14179_v16 = vld [vmem:[%s19823_s1 + $0x8] sm:$0xff] }
 0x293   : > { %v3341_v2 = vadd.f32 %v3311_v1, %v3183_v51  ;;  %3744 = vmatmul.bf16.gmra.mxu0 %v3658_v47  ;;  %v17112_v1 = vld [vmem:[%s14792_s5 + $0x130] sm:$0xff]  ;;  %4446 = vmatpush.bf16.msrb.mxu1 %v14196_v42  ;;  %v14203_v51 = vld [vmem:[%s19823_s1 + $0xc8] sm:$0xff] }
 0x294   : > { %3865 = vmatmul.bf16.gmra.mxu1 %v3779_v59  ;;  %v3906_v58 = vrot.slane %v17112_v1, 1  ;;  %4314 = vmatpush.bf16.msrb.mxu0 %v14179_v16  ;;  %v17134_v42 = vld [vmem:[%s14792_s5 + $0x150] sm:$0xff] }
 0x295   : > { %4010 = vmatmul.bf16.gmra.mxu2 %v3924_v25  ;;  %v17309_v57 = vrot.slane %v17134_v42, 7 }
 0x296   : > { %4239 = vmatmul.bf16.gmra.mxu3 %v17095_v7  ;;  %4605 = vmatpush.bf16.msrb.mxu2 %v14203_v51  ;;  %v3913_v21 = vsel %vm453_vm1, %v16739_v20, %v3906_v58 }
 0x297   : > { %v3925_v16 = vpack.c.bf16 %v3913_v21, %v16750_v9 }
 0x298   : > { %v3432_v22 = vpop.f32.mrf.mxu2  ;;  %v3155_v53 = vpop.f32.mrf.mxu0 }
 0x299   : > { %v3577_v47 = vpop.f32.mrf.mxu3  ;;  %v3462_v15 = vadd.f32 %v3432_v22, %v3341_v2  ;;  %v3313_v59 = vpop.f32.mrf.mxu1  ;;  %v3184_v25 = vadd.f32 %v3155_v53, %v16677_v29  ;;  %v14211_v2 = vld [vmem:[%s19823_s1 + $0x108] sm:$0xff]  ;;  %v3649_v29 = vsel %vm209_vm0, %v3637_v62, %v16729_v11  ;;  %v17137_v22 = vld [vmem:[%s14792_s5 + $0x158] sm:$0xff] }
 0x29a   : > { %4726 = vmatpush.bf16.msrb.mxu3 %v14211_v2  ;;  %v3659_v53 = vpack.c.bf16 %v16850_v41, %v3649_v29  ;;  %v17146_v20 = vpack.c.bf16 %v17137_v22, %v17134_v42 }
 0x29b   : > { %v17116_v19 = vadd.f32 %v3577_v47, %v3462_v15  ;;  %v3342_v0 = vadd.f32 %v3313_v59, %v3184_v25  ;;  %v14195_v59 = vld [vmem:[%s19823_s1 + $0x88] sm:$0xff] }
 0x29c   : > { %4447 = vmatpush.bf16.msrb.mxu1 %v14195_v59  ;;  %v14202_v59 = vld [vmem:[%s19823_s1 + $0xc0] sm:$0xff] }
 0x29d   : > { %4606 = vmatpush.bf16.msrb.mxu2 %v14202_v59 }
 0x2a0   : > { %v3434_v47 = vpop.f32.mrf.mxu2  ;;  %v3158_v25 = vpop.f32.mrf.mxu0 }
 0x2a1   : > { %v3579_v15 = vpop.f32.mrf.mxu3  ;;  %v3463_v62 = vadd.f32 %v3434_v47, %v3342_v0  ;;  %v3316_v51 = vpop.f32.mrf.mxu1  ;;  %v17153_v0 = vrot.slane %v16999_v39, 7  ;;  %v3640_v25 = vrot.slane %v17112_v1, 7 }
 0x2a2   : > { %v14178_v51 = vld [vmem:[%s19823_s1] sm:$0xff] }
 0x2a3   : > { %v17148_v6 = vadd.f32 %v3579_v15, %v3463_v62  ;;  %3749 = vmatmul.bf16.gmra.mxu0 %v3659_v53  ;;  %v17157_v15 = vrot.slane %v16999_v39, 1  ;;  %v4351_v53 = vrot.slane %v17084_v17, 1 }
 0x2a4   : > { %3870 = vmatmul.bf16.gmra.mxu1 %v16945_v46  ;;  %4315 = vmatpush.bf16.msrb.mxu0 %v14178_v51 }
 0x2a5   : > { %4015 = vmatmul.bf16.gmra.mxu2 %v3925_v16  ;;  %v14210_v16 = vld [vmem:[%s19823_s1 + $0x100] sm:$0xff] }
 0x2a6   : > { %4244 = vmatmul.bf16.gmra.mxu3 %v17146_v20 }
 0x2a7   : > { %4727 = vmatpush.bf16.msrb.mxu3 %v14210_v16 }
 0x2a8   : > { %v3437_v2 = vpop.f32.mrf.mxu2  ;;  %v3160_v47 = vpop.f32.mrf.mxu0 }
 0x2a9   : > { %v3582_v29 = vpop.f32.mrf.mxu3  ;;  %v3318_v21 = vpop.f32.mrf.mxu1  ;;  %v3186_v46 = vadd.f32 %v3160_v47, %v16771_v49  ;;  %v14194_v2 = vld [vmem:[%s19823_s1 + $0x80] sm:$0xff]  ;;  %v3646_v49 = vsel %vm209_vm0, %v3640_v25, %v17153_v0  ;;  %v17182_v47 = vsel %vm453_vm1, %v17157_v15, %v4351_v53 }
 0x2aa   : > { %v3647_v29 = vsel %vm209_vm0, %v16797_v35, %v3640_v25  ;;  %4448 = vmatpush.bf16.msrb.mxu1 %v14194_v2  ;;  %v3781_v25 = vpack.c.bf16 %v16999_v39, %v17112_v1  ;;  %v14225_v1 = vld [vmem:[%s19823_s1 + $0x178] sm:$0xff]  ;;  %v4125_v39 = vsel %vm209_vm0, %v16515_v56, %v17153_v0  ;;  %v17333_v56 = vsel %vm209_vm0, %v16891_v33, %v17309_v57 }
 0x2ab   : > { %v3344_v62 = vadd.f32 %v3318_v21, %v3186_v46  ;;  %v3912_v21 = vsel %vm453_vm1, %v3906_v58, %v17157_v15  ;;  %v17188_v46 = vld [vmem:[%s14792_s5 + $0x160] sm:$0xff]  ;;  %v3660_v35 = vpack.c.bf16 %v3646_v49, %v3647_v29  ;;  %4865 = vmatpush.bf16.msra.mxu0 %v14225_v1  ;;  %v17218_v49 = vrot.slane %v16884_v34, 1 }
 0x2ac   : > { %v3926_v12 = vpack.c.bf16 %v17182_v47, %v3912_v21  ;;  %v17198_v58 = vpack.c.bf16 %v17191_v28, %v17188_v46 }
 0x2b0   : > { %v3439_v32 = vpop.f32.mrf.mxu2  ;;  %v3163_v26 = vpop.f32.mrf.mxu0 }
 0x2b1   : > { %v3584_v38 = vpop.f32.mrf.mxu3  ;;  %v3465_v59 = vadd.f32 %v3439_v32, %v3344_v62  ;;  %v3321_v30 = vpop.f32.mrf.mxu1  ;;  %v3187_v48 = vadd.f32 %v3163_v26, %v16804_v40  ;;  %v14241_v32 = vld [vmem:[%s19823_s1 + $0x1f8] sm:$0xff] }
 0x2b2   : > { %v14249_v40 = vld [vmem:[%s19823_s1 + $0x238] sm:$0xff]  ;;  %5144 = vmatpush.bf16.msra.mxu2 %v14241_v32 }
 0x2b3   : > { %v17201_v51 = vadd.f32 %v3584_v38, %v3465_v59  ;;  %v3345_v16 = vadd.f32 %v3321_v30, %v3187_v48  ;;  %3754 = vmatmul.bf16.gmra.mxu0 %v3660_v35  ;;  %5289 = vmatpush.bf16.msra.mxu3 %v14249_v40  ;;  %v14233_v30 = vld [vmem:[%s19823_s1 + $0x1b8] sm:$0xff]  ;;  %v4109_v38 = vrot.slane %v17084_v17, 7  ;;  %v3921_v59 = vsel %vm453_vm1, %v17218_v49, %v16552_v18  ;;  %v14238_v17 = vld [vmem:[%s19823_s1 + $0x1e0] sm:$0xff] }
 0x2b4   : > { %3875 = vmatmul.bf16.gmra.mxu1 %v3781_v25  ;;  %v17233_v25 = vsel %vm453_vm1, %v4351_v53, %v17218_v49  ;;  %v17243_v32 = vld [vmem:[%s14792_s5 + $0x178] sm:$0xff] }
 0x2b5   : > { %4020 = vmatmul.bf16.gmra.mxu2 %v3926_v12  ;;  %5023 = vmatpush.bf16.msra.mxu1 %v14233_v30  ;;  %v17225_v21 = vsel %vm209_vm0, %v4109_v38, %v16891_v33  ;;  %v3645_v35 = vsel %vm209_vm0, %v17153_v0, %v4109_v38  ;;  %v3927_v53 = vpack.c.bf16 %v3921_v59, %v17233_v25  ;;  %v14248_v59 = vld [vmem:[%s19823_s1 + $0x230] sm:$0xff] }
 0x2b6   : > { %4249 = vmatmul.bf16.gmra.mxu3 %v17198_v58  ;;  %v4530_v33 = vpack.c.bf16 %v17333_v56, %v17225_v21 }
 0x2b7   : > { %5290 = vmatpush.bf16.msra.mxu3 %v14248_v59 }
 0x2b8   : > { %v3442_v48 = vpop.f32.mrf.mxu2  ;;  %v3165_v62 = vpop.f32.mrf.mxu0 }
 0x2b9   : > { %v3587_v12 = vpop.f32.mrf.mxu3  ;;  %v3466_v26 = vadd.f32 %v3442_v48, %v3345_v16  ;;  %v3323_v2 = vpop.f32.mrf.mxu1  ;;  %v17240_v16 = vld [vmem:[%s14792_s5 + $0x170] sm:$0xff]  ;;  %v17246_v48 = vpack.c.bf16 %v17225_v21, %v3645_v35  ;;  %v14221_v21 = vld [vmem:[%s19823_s1 + $0x158] sm:$0xff] }
 0x2ba   : > { %v17251_v38 = vpack.c.bf16 %v17243_v32, %v17240_v16  ;;  %v14224_v2 = vld [vmem:[%s19823_s1 + $0x170] sm:$0xff] }
 0x2bb   : > { %v17220_v29 = vadd.f32 %v3587_v12, %v3466_v26  ;;  %v14240_v26 = vld [vmem:[%s19823_s1 + $0x1f0] sm:$0xff]  ;;  %4866 = vmatpush.bf16.msra.mxu0 %v14224_v2  ;;  %v14223_v2 = vld [vmem:[%s19823_s1 + $0x168] sm:$0xff] }
 0x2bc   : > { %5145 = vmatpush.bf16.msra.mxu2 %v14240_v26  ;;  %v14239_v26 = vld [vmem:[%s19823_s1 + $0x1e8] sm:$0xff] }
 0x2bf   : > { %4867 = vmatpush.bf16.msra.mxu0 %v14223_v2 }
 0x2c0   : > { %v3444_v1 = vpop.f32.mrf.mxu2  ;;  %v3168_v12 = vpop.f32.mrf.mxu0  ;;  %5146 = vmatpush.bf16.msra.mxu2 %v14239_v26 }
 0x2c1   : > { %v3589_v40 = vpop.f32.mrf.mxu3  ;;  %v3326_v30 = vpop.f32.mrf.mxu1  ;;  %v3189_v18 = vadd.f32 %v3168_v12, %v16888_v55  ;;  %v14232_v55 = vld [vmem:[%s19823_s1 + $0x1b0] sm:$0xff]  ;;  %v17273_v12 = vrot.slane %v17243_v32, 7 }
 0x2c2   : > { %v17270_v1 = vld [vmem:[%s14792_s5 + $0x190] sm:$0xff]  ;;  %5024 = vmatpush.bf16.msra.mxu1 %v14232_v55 }
 0x2c3   : > { %v3347_v62 = vadd.f32 %v3326_v30, %v3189_v18  ;;  %3759 = vmatmul.bf16.gmra.mxu0 %v17246_v48  ;;  %v17277_v37 = vrot.slane %v17270_v1, 7 }
 0x2c4   : > { %3880 = vmatmul.bf16.gmra.mxu1 %v17095_v7  ;;  %5147 = vmatpush.bf16.msra.mxu2 %v14238_v17  ;;  %v4113_v17 = vrot.slane %v17188_v46, 7 }
 0x2c5   : > { %4025 = vmatmul.bf16.gmra.mxu2 %v3927_v53  ;;  %v4528_v55 = vsel %vm209_vm0, %v17277_v37, %v17153_v0 }
 0x2c6   : > { %4254 = vmatmul.bf16.gmra.mxu3 %v17251_v38  ;;  %v4529_v2 = vpack.c.bf16 %v3645_v35, %v4528_v55  ;;  %v14222_v55 = vld [vmem:[%s19823_s1 + $0x160] sm:$0xff] }
 0x2c7   : > { %4868 = vmatpush.bf16.msra.mxu0 %v14222_v55 }
 0x2c8   : > { %v3447_v7 = vpop.f32.mrf.mxu2  ;;  %v3170_v18 = vpop.f32.mrf.mxu0 }
 0x2c9   : > { %v3592_v40 = vpop.f32.mrf.mxu3  ;;  %v3468_v30 = vadd.f32 %v3447_v7, %v3347_v62  ;;  %v3328_v53 = vpop.f32.mrf.mxu1  ;;  %v3190_v13 = vadd.f32 %v3170_v18, %v16941_v61  ;;  %v14247_v62 = vld [vmem:[%s19823_s1 + $0x228] sm:$0xff]  ;;  %v4128_v61 = vsel %vm209_vm0, %v17273_v12, %v16729_v11 }
 0x2ca   : > { %5291 = vmatpush.bf16.msra.mxu3 %v14247_v62  ;;  %v14231_v18 = vld [vmem:[%s19823_s1 + $0x1a8] sm:$0xff] }
 0x2cb   : > { %v17279_v10 = vadd.f32 %v3592_v40, %v3468_v30  ;;  %v3348_v59 = vadd.f32 %v3328_v53, %v3190_v13  ;;  %v4129_v30 = vpack.c.bf16 %v16850_v41, %v4128_v61  ;;  %v4371_v13 = vpack.c.bf16 %v16866_v14, %v16750_v9  ;;  %5025 = vmatpush.bf16.msra.mxu1 %v14231_v18 }
 0x2cc   : > { %4869 = vmatpush.bf16.msra.mxu0 %v14221_v21  ;;  %v4354_v21 = vrot.slane %v17137_v22, 1 }
 0x2d0   : > { %v3449_v7 = vpop.f32.mrf.mxu2  ;;  %v3173_v53 = vpop.f32.mrf.mxu0 }
 0x2d1   : > { %v3594_v40 = vpop.f32.mrf.mxu3  ;;  %v3469_v11 = vadd.f32 %v3449_v7, %v3348_v59  ;;  %v3331_v26 = vpop.f32.mrf.mxu1  ;;  %v4651_v53 = vpack.c.bf16 %v17134_v42, %v16884_v34  ;;  %v14245_v34 = vld [vmem:[%s19823_s1 + $0x218] sm:$0xff] }
 0x2d3   : > { %v17306_v62 = vadd.f32 %v3594_v40, %v3469_v11  ;;  %4316 = vmatmul.bf16.vlgmr.msrb.gmra.mxu0 %v4129_v30  ;;  %v4130_v40 = vpack.c.bf16 %v4125_v39, %v16824_v24  ;;  %v14237_v24 = vld [vmem:[%s19823_s1 + $0x1d8] sm:$0xff] }
 0x2d4   : > { %4449 = vmatmul.bf16.vlgmr.msrb.gmra.mxu1 %v4371_v13  ;;  %5148 = vmatpush.bf16.msra.mxu2 %v14237_v24 }
 0x2d5   : > { %4607 = vmatmul.bf16.vlgmr.msrb.gmra.mxu2 %v4529_v2 }
 0x2d6   : > { %4728 = vmatmul.bf16.vlgmr.msrb.gmra.mxu3 %v4650_v5  ;;  %v4367_v5 = vsel %vm453_vm1, %v16807_v54, %v17157_v15  ;;  %v14230_v54 = vld [vmem:[%s19823_s1 + $0x1a0] sm:$0xff] }
 0x2d7   : > { %v4372_v30 = vpack.c.bf16 %v17182_v47, %v4367_v5  ;;  %5026 = vmatpush.bf16.msra.mxu1 %v14230_v54  ;;  %v4112_v5 = vrot.slane %v17137_v22, 7 }
 0x2d8   : > { %v3452_v41 = vpop.f32.mrf.mxu2  ;;  %v3175_v14 = vpop.f32.mrf.mxu0 }
 0x2d9   : > { %v3597_v9 = vpop.f32.mrf.mxu3  ;;  %v3333_v61 = vpop.f32.mrf.mxu1  ;;  %v3192_v59 = vadd.f32 %v3175_v14, %v17003_v4  ;;  %v14246_v4 = vld [vmem:[%s19823_s1 + $0x220] sm:$0xff]  ;;  %v14229_v14 = vld [vmem:[%s19823_s1 + $0x198] sm:$0xff]  ;;  %v17379_v54 = vsel %vm209_vm0, %v17309_v57, %v4112_v5 }
 0x2da   : > { %5292 = vmatpush.bf16.msra.mxu3 %v14246_v4 }
 0x2db   : > { %v3350_v35 = vadd.f32 %v3333_v61, %v3192_v59  ;;  %v17360_v61 = vrot.slane %v17134_v42, 1  ;;  %5027 = vmatpush.bf16.msra.mxu1 %v14229_v14  ;;  %v17374_v42 = vsel %vm209_vm0, %v4112_v5, %v4113_v17  ;;  %v17411_v5 = vld [vmem:[%s19824_s2] ss:$0 sm:$0xff] }
 0x2dd   : > { %v17370_v4 = vsel %vm453_vm1, %v17218_v49, %v17360_v61  ;;  %v4531_v49 = vpack.c.bf16 %v17374_v42, %v17379_v54 }
 0x2de   : > { %5293 = vmatpush.bf16.msra.mxu3 %v14245_v34  ;;  %v19922_v34 = vrot.slane %v17188_v46, 1 }
 0x2e0   : > { %v3454_v0 = vpop.f32.mrf.mxu2  ;;  %v3178_v18 = vpop.f32.mrf.mxu0 }
 0x2e1   : > { %v3599_v7 = vpop.f32.mrf.mxu3  ;;  %v3471_v13 = vadd.f32 %v3454_v0, %v3350_v35  ;;  %v3336_v11 = vpop.f32.mrf.mxu1  ;;  %v3193_v26 = vadd.f32 %v3178_v18, %v17037_v43  ;;  %v4652_v18 = vpack.c.bf16 %v17188_v46, %v17137_v22 }
 0x2e3   : > { %v17345_v2 = vadd.f32 %v3599_v7, %v3471_v13  ;;  %v3351_v41 = vadd.f32 %v3336_v11, %v3193_v26  ;;  %4321 = vmatmul.bf16.gmra.mxu0 %v4130_v40  ;;  %v4373_v40 = vpack.c.bf16 %v17370_v4, %v17233_v25  ;;  %v14220_v26 = vld [vmem:[%s19823_s1 + $0x150] sm:$0xff] }
 0x2e4   : > { %4454 = vmatmul.bf16.gmra.mxu1 %v4372_v30  ;;  %4870 = vmatpush.bf16.msra.mxu0 %v14220_v26 }
 0x2e5   : > { %4612 = vmatmul.bf16.gmra.mxu2 %v4530_v33 }
 0x2e6   : > { %4733 = vmatmul.bf16.gmra.mxu3 %v4651_v53  ;;  %v14236_v53 = vld [vmem:[%s19823_s1 + $0x1d0] sm:$0xff] }
 0x2e7   : > { %5149 = vmatpush.bf16.msra.mxu2 %v14236_v53 }
 0x2e8   : > { %v3457_v43 = vpop.f32.mrf.mxu2  ;;  %v3180_v35 = vpop.f32.mrf.mxu0 }
 0x2e9   : > { %v3602_v9 = vpop.f32.mrf.mxu3  ;;  %v3472_v59 = vadd.f32 %v3457_v43, %v3351_v41  ;;  %v3338_v39 = vpop.f32.mrf.mxu1  ;;  %v14244_v41 = vld [vmem:[%s19823_s1 + $0x210] sm:$0xff]  ;;  %v19921_v35 = vrot.slane %v17240_v16, 7 }
 0x2ea   : > { %5294 = vmatpush.bf16.msra.mxu3 %v14244_v41  ;;  %v4132_v41 = vpack.c.bf16 %v17379_v54, %v17333_v56 }
 0x2eb   : > { %v17364_v55 = vadd.f32 %v3602_v9, %v3472_v59  ;;  %v4114_v59 = vrot.slane %v17191_v28, 7 }
 0x2f0   : > { %v3459_v0 = vpop.f32.mrf.mxu2  ;;  %v3735_v30 = vpop.f32.mrf.mxu0 }
 0x2f1   : > { %v3604_v7 = vpop.f32.mrf.mxu3  ;;  %v3856_v13 = vpop.f32.mrf.mxu1  ;;  %v3765_v11 = vadd.f32 %v3735_v30, %v17116_v19  ;;  %v14228_v19 = vld [vmem:[%s19823_s1 + $0x190] sm:$0xff]  ;;  %v14235_v30 = vld [vmem:[%s19823_s1 + $0x1c8] sm:$0xff] }
 0x2f2   : > { %5028 = vmatpush.bf16.msra.mxu1 %v14228_v19  ;;  %5150 = vmatpush.bf16.msra.mxu2 %v14235_v30 }
 0x2f3   : > { %v3886_v33 = vadd.f32 %v3856_v13, %v3765_v11  ;;  %4326 = vmatmul.bf16.gmra.mxu0 %v17246_v48  ;;  %v14219_v13 = vld [vmem:[%s19823_s1 + $0x148] sm:$0xff]  ;;  %v4522_v11 = vsel %vm209_vm0, %v4113_v17, %v4114_v59 }
 0x2f4   : > { %4459 = vmatmul.bf16.gmra.mxu1 %v4373_v40  ;;  %v17420_v40 = vsel %vm453_vm1, %v4354_v21, %v19922_v34  ;;  %4871 = vmatpush.bf16.msra.mxu0 %v14219_v13  ;;  %v14227_v17 = vld [vmem:[%s19823_s1 + $0x188] sm:$0xff] }
 0x2f5   : > { %4617 = vmatmul.bf16.gmra.mxu2 %v4531_v49  ;;  %v14243_v49 = vld [vmem:[%s19823_s1 + $0x208] sm:$0xff] }
 0x2f6   : > { %4738 = vmatmul.bf16.gmra.mxu3 %v4652_v18  ;;  %v17440_v18 = vsel %vm209_vm0, %v4114_v59, %v19921_v35  ;;  %5029 = vmatpush.bf16.msra.mxu1 %v14227_v17  ;;  %v19924_v17 = vrot.slane %v17240_v16, 1 }
 0x2f7   : > { %5295 = vmatpush.bf16.msra.mxu3 %v14243_v49 }
 0x2f8   : > { %v4001_v48 = vpop.f32.mrf.mxu2  ;;  %v3737_v9 = vpop.f32.mrf.mxu0 }
 0x2f9   : > { %v17401_v24 = vpop.f32.mrf.mxu3  ;;  %v4031_v43 = vadd.f32 %v4001_v48, %v3886_v33  ;;  %v3858_v14 = vpop.f32.mrf.mxu1  ;;  %v3766_v39 = vadd.f32 %v3737_v9, %v17148_v6  ;;  %v17425_v6 = vsel %vm453_vm1, %v17360_v61, %v4354_v21  ;;  %v4532_v9 = vpack.c.bf16 %v17440_v18, %v4522_v11 }
 0x2fa   : > { %v17451_v19 = vpack.c.bf16 %v17420_v40, %v17425_v6 }
 0x2fb   : > { %v4043_v0 = vadd.f32 %v17411_v5, %v4031_v43  ;;  %v3887_v7 = vadd.f32 %v3858_v14, %v3766_v39  ;;  %v4653_v14 = vpack.c.bf16 %v17240_v16, %v17191_v28 }
 0x2fd   : > { %v17414_v22 = vmax.f32 %v4043_v0, 0.0 }
 0x2ff   : > { %20086 = vst [vmem:[#allocation75_spill] sm:$0xff] %v17414_v22  ;;  %v7426_v33 = vrot.slane %v17414_v22, 7  ;;  %v19923_v13 = vrot.slane %v17414_v22, 1 }
 0x300   : > { %v4003_v53 = vpop.f32.mrf.mxu2  ;;  %v3740_v21 = vpop.f32.mrf.mxu0 }
 0x301   : > { %v17445_v26 = vpop.f32.mrf.mxu3  ;;  %v4032_v48 = vadd.f32 %v4003_v53, %v3887_v7  ;;  %v3861_v43 = vpop.f32.mrf.mxu1  ;;  %v17462_v56 = vsel %vm209_vm0, %v15899_v63, %v7426_v33  ;;  %v17473_v7 = vld [vmem:[%s14792_s5 + $0x180] sm:$0xff] }
 0x302   : > { %20087 = vst [vmem:[#allocation76_spill] sm:$0xff] %v17462_v56  ;;  %v17468_v39 = vpack.c.bf16 %v17462_v56, %v17061_v27  ;;  %v17549_v56 = vpack.c.bf16 %v4522_v11, %v17374_v42 }
 0x303   : > { %v4044_v59 = vadd.f32 %v17411_v5, %v4032_v48  ;;  %4331 = vmatmul.bf16.gmra.mxu0 %v4132_v41  ;;  %v4356_v41 = vrot.slane %v17191_v28, 1 }
 0x304   : > { %4464 = vmatmul.bf16.gmra.mxu1 %v17451_v19  ;;  %20088 = vst [vmem:[#allocation77_spill] sm:$0xff] %v17468_v39 }
 0x305   : > { %v17470_v0 = vmax.f32 %v4044_v59, 0.0  ;;  %4622 = vmatmul.bf16.gmra.mxu2 %v4532_v9 }
 0x306   : > { %4743 = vmatmul.bf16.gmra.mxu3 %v4653_v14 }
 0x307   : > { %20089 = vst [vmem:[#allocation78_spill] sm:$0xff] %v17470_v0  ;;  %v7427_v30 = vrot.slane %v17470_v0, 7  ;;  %v7677_v49 = vrot.slane %v17470_v0, 1 }
 0x308   : > { %v4006_v48 = vpop.f32.mrf.mxu2  ;;  %v3742_v43 = vpop.f32.mrf.mxu0 }
 0x309   : > { %v4235_v21 = vpop.f32.mrf.mxu3  ;;  %v3863_v9 = vpop.f32.mrf.mxu1  ;;  %v17485_v14 = vsel %vm209_vm0, %v7427_v30, %v15899_v63  ;;  %v17489_v59 = vsel %vm209_vm0, %v7426_v33, %v7427_v30  ;;  %v17494_v53 = vsel %vm453_vm1, %v7677_v49, %v15917_v44  ;;  %v17500_v28 = vsel %vm453_vm1, %v19923_v13, %v7677_v49  ;;  %v14234_v33 = vld [vmem:[%s19823_s1 + $0x1c0] sm:$0xff] }
 0x30a   : > { %20090 = vst [vmem:[#allocation79_spill] sm:$0xff] %v17485_v14  ;;  %v3768_v48 = vadd.f32 %v3742_v43, %v17201_v51  ;;  %v4514_v21 = vrot.slane %v17473_v7, 7  ;;  %v17506_v35 = vpack.c.bf16 %v17485_v14, %v17489_v59  ;;  %v17516_v49 = vsel %vm453_vm1, %v4356_v41, %v19924_v17  ;;  %v14226_v30 = vld [vmem:[%s19823_s1 + $0x180] sm:$0xff]  ;;  %5151 = vmatpush.bf16.msra.mxu2 %v14234_v33 }
 0x30b   : > { %20091 = vst [vmem:[#allocation80_spill] sm:$0xff] %v17489_v59  ;;  %v20095_v51 = vrot.slane %v17188_v46, 1  ;;  %5030 = vmatpush.bf16.msra.mxu1 %v14226_v30  ;;  %v4654_v33 = vpack.c.bf16 %v17473_v7, %v17243_v32 }
 0x30c   : > { %20092 = vst [vmem:[#allocation81_spill] sm:$0xff] %v17494_v53  ;;  %v3889_v34 = vadd.f32 %v3863_v9, %v3768_v48  ;;  %v14218_v9 = vld [vmem:[%s19823_s1 + $0x140] sm:$0xff]  ;;  %v17536_v46 = vsel %vm209_vm0, %v17273_v12, %v4514_v21 }
 0x30d   : > { %20093 = vst [vmem:[#allocation82_spill] sm:$0xff] %v17500_v28  ;;  %v17522_v43 = vsel %vm453_vm1, %v20095_v51, %v4356_v41  ;;  %v14242_v48 = vld [vmem:[%s19823_s1 + $0x200] sm:$0xff]  ;;  %v20096_v41 = vrot.slane %v17240_v16, 7  ;;  %4872 = vmatpush.bf16.msra.mxu0 %v14218_v9 }
 0x30e   : > { %20094 = vst [vmem:[#allocation83_spill] sm:$0xff] %v17506_v35  ;;  %v17553_v59 = vpack.c.bf16 %v17516_v49, %v17522_v43  ;;  %5296 = vmatpush.bf16.msra.mxu3 %v14242_v48 }
 0x30f   : > { %v4520_v51 = vsel %vm209_vm0, %v20096_v41, %v17273_v12 }
 0x310   : > { %v4008_v13 = vpop.f32.mrf.mxu2  ;;  %v3745_v12 = vpop.f32.mrf.mxu0  ;;  %v4533_v28 = vpack.c.bf16 %v17536_v46, %v4520_v51  ;;  %v17624_v14 = vpack.c.bf16 %v4520_v51, %v17440_v18 }
 0x311   : > { %v17546_v17 = vpop.f32.mrf.mxu3  ;;  %v4034_v53 = vadd.f32 %v4008_v13, %v3889_v34  ;;  %v3866_v41 = vpop.f32.mrf.mxu1  ;;  %v3769_v9 = vadd.f32 %v3745_v12, %v17220_v29  ;;  %v14273_v34 = vld [vmem:[%s19823_s1 + $0x2f8] sm:$0xff] }
 0x312   : > { %v14265_v13 = vld [vmem:[%s19823_s1 + $0x2b8] sm:$0xff]  ;;  %5732 = vmatpush.bf16.msrb.mxu2 %v14273_v34 }
 0x313   : > { %v4046_v42 = vadd.f32 %v17411_v5, %v4034_v53  ;;  %v3890_v11 = vadd.f32 %v3866_v41, %v3769_v9  ;;  %4336 = vmatmul.bf16.gmra.mxu0 %v17549_v56  ;;  %v14281_v29 = vld [vmem:[%s19823_s1 + $0x338] sm:$0xff]  ;;  %v17574_v53 = vld [vmem:[%s14792_s5 + $0x188] sm:$0xff] }
 0x314   : > { %4469 = vmatmul.bf16.gmra.mxu1 %v17553_v59  ;;  %5519 = vmatpush.bf16.msrb.mxu0 %v14265_v13  ;;  %v4515_v22 = vrot.slane %v17574_v53, 7 }
 0x315   : > { %v17562_v48 = vmax.f32 %v4046_v42, 0.0  ;;  %4627 = vmatmul.bf16.gmra.mxu2 %v4533_v28  ;;  %v17578_v28 = vrot.slane %v17243_v32, 1  ;;  %5882 = vmatpush.bf16.msrb.mxu3 %v14281_v29  ;;  %v20099_v29 = vrot.slane %v17240_v16, 1 }
 0x316   : > { %4748 = vmatmul.bf16.gmra.mxu3 %v4654_v33  ;;  %v14257_v33 = vld [vmem:[%s19823_s1 + $0x278] sm:$0xff] }
 0x317   : > { %20097 = vst [vmem:[#allocation84_spill] sm:$0xff] %v17562_v48  ;;  %v7864_v30 = vrot.slane %v17562_v48, 7  ;;  %5602 = vmatpush.bf16.msrb.mxu1 %v14257_v33  ;;  %v17610_v33 = vsel %vm209_vm0, %v4515_v22, %v17277_v37  ;;  %v20103_v51 = vrot.slane %v17562_v48, 1 }
 0x318   : > { %v4011_v12 = vpop.f32.mrf.mxu2  ;;  %v3747_v42 = vpop.f32.mrf.mxu0 }
 0x319   : > { %v17580_v41 = vpop.f32.mrf.mxu3  ;;  %v4035_v9 = vadd.f32 %v4011_v12, %v3890_v11  ;;  %v3868_v0 = vpop.f32.mrf.mxu1  ;;  %v17589_v34 = vsel %vm209_vm0, %v15899_v63, %v7864_v30  ;;  %v17599_v11 = vsel %vm453_vm1, %v20099_v29, %v17578_v28  ;;  %v4370_v12 = vsel %vm453_vm1, %v17578_v28, %v16736_v50 }
 0x31a   : > { %20098 = vst [vmem:[#allocation85_spill] sm:$0xff] %v17589_v34  ;;  %v4376_v35 = vpack.c.bf16 %v4370_v12, %v17599_v11 }
 0x31b   : > { %v4047_v13 = vadd.f32 %v17411_v5, %v4035_v9  ;;  %v17614_v9 = vsel %vm209_vm0, %v4514_v21, %v4515_v22  ;;  %v4655_v21 = vpack.c.bf16 %v17270_v1, %v17574_v53 }
 0x31c   : > { %v4534_v22 = vpack.c.bf16 %v17610_v33, %v17614_v9 }
 0x31d   : > { %v17601_v0 = vmax.f32 %v4047_v13, 0.0 }
 0x31f   : > { %20100 = vst [vmem:[#allocation86_spill] sm:$0xff] %v17601_v0  ;;  %v17618_v16 = vpack.c.bf16 %v17601_v0, %v17562_v48  ;;  %v7865_v42 = vrot.slane %v17601_v0, 7  ;;  %v8099_v29 = vrot.slane %v17601_v0, 1 }
 0x320   : > { %v4013_v50 = vpop.f32.mrf.mxu2 }
 0x321   : > { %20101 = vst [vmem:[#allocation87_spill] sm:$0xff] %v17618_v16  ;;  %v4242_v32 = vpop.f32.mrf.mxu3  ;;  %v3750_v16 = vpop.f32.mrf.mxu0  ;;  %v17633_v13 = vsel %vm209_vm0, %v7864_v30, %v7865_v42  ;;  %v17638_v18 = vsel %vm209_vm0, %v7865_v42, %v15899_v63  ;;  %v17649_v12 = vsel %vm453_vm1, %v8099_v29, %v15917_v44  ;;  %v17673_v42 = vld [vmem:[%s14792_s5 + $0x1a8] sm:$0xff] }
 0x322   : > { %v3871_v27 = vpop.f32.mrf.mxu1  ;;  %20102 = vst [vmem:[#allocation88_spill] sm:$0xff] %v17633_v13  ;;  %v17644_v32 = vsel %vm453_vm1, %v20103_v51, %v8099_v29  ;;  %v3771_v30 = vadd.f32 %v3750_v16, %v17279_v10  ;;  %v17654_v50 = vpack.c.bf16 %v17633_v13, %v17589_v34  ;;  %v14272_v10 = vld [vmem:[%s19823_s1 + $0x2f0] sm:$0xff]  ;;  %v19947_v13 = vrot.slane %v17673_v42, 7 }
 0x323   : > { %20104 = vst [vmem:[#allocation89_spill] sm:$0xff] %v17644_v32  ;;  %v17660_v0 = vpack.c.bf16 %v17649_v12, %v17644_v32  ;;  %4341 = vmatmul.bf16.gmra.mxu0 %v17624_v14  ;;  %v14264_v16 = vld [vmem:[%s19823_s1 + $0x2b0] sm:$0xff]  ;;  %5733 = vmatpush.bf16.msrb.mxu2 %v14272_v10 }
 0x324   : > { %20105 = vst [vmem:[#allocation90_spill] sm:$0xff] %v17654_v50  ;;  %v3892_v51 = vadd.f32 %v3871_v27, %v3771_v30  ;;  %4474 = vmatmul.bf16.gmra.mxu1 %v4376_v35  ;;  %v14280_v29 = vld [vmem:[%s19823_s1 + $0x330] sm:$0xff]  ;;  %5520 = vmatpush.bf16.msrb.mxu0 %v14264_v16  ;;  %v4952_v10 = vsel %vm209_vm0, %v19947_v13, %v17309_v57  ;;  %v14263_v16 = vld [vmem:[%s19823_s1 + $0x2a8] sm:$0xff] }
 0x325   : > { %20106 = vst [vmem:[#allocation91_spill] sm:$0xff] %v17660_v0  ;;  %4632 = vmatmul.bf16.gmra.mxu2 %v4534_v22  ;;  %v14256_v27 = vld [vmem:[%s19823_s1 + $0x270] sm:$0xff]  ;;  %5883 = vmatpush.bf16.msrb.mxu3 %v14280_v29  ;;  %v4795_v57 = vpack.c.bf16 %v17233_v25, %v17182_v47 }
 0x326   : > { %4753 = vmatmul.bf16.gmra.mxu3 %v4655_v21  ;;  %5603 = vmatpush.bf16.msrb.mxu1 %v14256_v27  ;;  %v4953_v27 = vpack.c.bf16 %v17379_v54, %v4952_v10 }
 0x328   : > { %v4016_v35 = vpop.f32.mrf.mxu2  ;;  %5521 = vmatpush.bf16.msrb.mxu0 %v14263_v16 }
 0x329   : > { %v17678_v22 = vpop.f32.mrf.mxu3  ;;  %v4037_v21 = vadd.f32 %v4016_v35, %v3892_v51  ;;  %v3752_v30 = vpop.f32.mrf.mxu0  ;;  %v14271_v51 = vld [vmem:[%s19823_s1 + $0x2e8] sm:$0xff] }
 0x32a   : > { %v3873_v0 = vpop.f32.mrf.mxu1  ;;  %v3772_v34 = vadd.f32 %v3752_v30, %v17306_v62  ;;  %v14279_v62 = vld [vmem:[%s19823_s1 + $0x328] sm:$0xff]  ;;  %5734 = vmatpush.bf16.msrb.mxu2 %v14271_v51 }
 0x32b   : > { %v4049_v32 = vadd.f32 %v17411_v5, %v4037_v21  ;;  %v14255_v35 = vld [vmem:[%s19823_s1 + $0x268] sm:$0xff]  ;;  %5884 = vmatpush.bf16.msrb.mxu3 %v14279_v62 }
 0x32c   : > { %v3893_v48 = vadd.f32 %v3873_v0, %v3772_v34  ;;  %5604 = vmatpush.bf16.msrb.mxu1 %v14255_v35 }
 0x32d   : > { %v17683_v50 = vmax.f32 %v4049_v32, 0.0 }
 0x32f   : > { %v7867_v34 = vrot.slane %v17683_v50, 7  ;;  %v8101_v0 = vrot.slane %v17683_v50, 1 }
 0x330   : > { %v4018_v32 = vpop.f32.mrf.mxu2 }
 0x331   : > { %v17701_v29 = vpop.f32.mrf.mxu3  ;;  %v4038_v21 = vadd.f32 %v4018_v32, %v3893_v48  ;;  %v3755_v30 = vpop.f32.mrf.mxu0  ;;  %v17712_v39 = vsel %vm209_vm0, %v15899_v63, %v7867_v34  ;;  %v17717_v47 = vsel %vm453_vm1, %v15917_v44, %v8101_v0 }
 0x332   : > { %v3876_v13 = vpop.f32.mrf.mxu1  ;;  %v17722_v54 = vpack.c.bf16 %v17712_v39, %v17638_v18 }
 0x333   : > { %v4050_v25 = vadd.f32 %v17411_v5, %v4038_v21  ;;  %4873 = vmatmul.bf16.vlgmr.msra.gmra.mxu0 %v4795_v57 }
 0x334   : > { %5031 = vmatmul.bf16.vlgmr.msra.gmra.mxu1 %v4953_v27 }
 0x335   : > { %v17726_v13 = vmax.f32 %v4050_v25, 0.0  ;;  %5152 = vmatmul.bf16.vlgmr.msra.gmra.mxu2 %v17146_v20 }
 0x336   : > { %5297 = vmatmul.bf16.vlgmr.msra.gmra.mxu3 %v17451_v19 }
 0x337   : > { %v7868_v10 = vrot.slane %v17726_v13, 7  ;;  %v8102_v16 = vrot.slane %v17726_v13, 1 }
 0x338   : > { %v4021_v62 = vpop.f32.mrf.mxu2 }
 0x339   : > { %v4250_v32 = vpop.f32.mrf.mxu3  ;;  %v3757_v57 = vpop.f32.mrf.mxu0  ;;  %v17737_v35 = vsel %vm209_vm0, %v7868_v10, %v15899_v63  ;;  %v17741_v20 = vsel %vm209_vm0, %v7867_v34, %v7868_v10  ;;  %v17746_v19 = vsel %vm453_vm1, %v8102_v16, %v15917_v44  ;;  %v17750_v21 = vsel %vm453_vm1, %v8101_v0, %v8102_v16  ;;  %v14270_v10 = vld [vmem:[%s19823_s1 + $0x2e0] sm:$0xff] }
 0x33a   : > { %v3878_v27 = vpop.f32.mrf.mxu1  ;;  %20107 = vst [vmem:[#allocation92_spill] sm:$0xff] %v17746_v19  ;;  %v3774_v30 = vadd.f32 %v3757_v57, %v17345_v2  ;;  %v17755_v25 = vpack.c.bf16 %v17737_v35, %v17741_v20  ;;  %v17766_v0 = vpack.c.bf16 %v17750_v21, %v17717_v47  ;;  %v14262_v2 = vld [vmem:[%s19823_s1 + $0x2a0] sm:$0xff]  ;;  %5735 = vmatpush.bf16.msrb.mxu2 %v14270_v10 }
 0x33b   : > { %20108 = vst [vmem:[#allocation93_spill] sm:$0xff] %v17750_v21  ;;  %v14278_v32 = vld [vmem:[%s19823_s1 + $0x320] sm:$0xff]  ;;  %5522 = vmatpush.bf16.msrb.mxu0 %v14262_v2  ;;  %v14267_v2 = vld [vmem:[%s19823_s1 + $0x2c8] sm:$0xff] }
 0x33c   : > { %20109 = vst [vmem:[#allocation94_spill] sm:$0xff] %v17766_v0  ;;  %v3895_v16 = vadd.f32 %v3878_v27, %v3774_v30  ;;  %v14254_v57 = vld [vmem:[%s19823_s1 + $0x260] sm:$0xff]  ;;  %5885 = vmatpush.bf16.msrb.mxu3 %v14278_v32  ;;  %v4796_v27 = vpack.c.bf16 %v17425_v6, %v17370_v4  ;;  %v14269_v4 = vld [vmem:[%s19823_s1 + $0x2d8] sm:$0xff] }
 0x33d   : > { %5605 = vmatpush.bf16.msrb.mxu1 %v14254_v57  ;;  %v14277_v6 = vld [vmem:[%s19823_s1 + $0x318] sm:$0xff] }
 0x33e   : > { %5736 = vmatpush.bf16.msrb.mxu2 %v14269_v4 }
 0x340   : > { %v4023_v34 = vpop.f32.mrf.mxu2  ;;  %5886 = vmatpush.bf16.msrb.mxu3 %v14277_v6 }
 0x341   : > { %v17777_v51 = vpop.f32.mrf.mxu3  ;;  %v4040_v30 = vadd.f32 %v4023_v34, %v3895_v16  ;;  %v3760_v62 = vpop.f32.mrf.mxu0  ;;  %v5201_v16 = vrot.slane %v17473_v7, 1 }
 0x342   : > { %v3881_v48 = vpop.f32.mrf.mxu1  ;;  %v3775_v0 = vadd.f32 %v3760_v62, %v17364_v55  ;;  %v14261_v55 = vld [vmem:[%s19823_s1 + $0x298] sm:$0xff] }
 0x343   : > { %v4052_v21 = vadd.f32 %v17411_v5, %v4040_v30  ;;  %4878 = vmatmul.bf16.gmra.mxu0 %v4796_v27 }
 0x344   : > { %v3896_v19 = vadd.f32 %v3881_v48, %v3775_v0  ;;  %5036 = vmatmul.bf16.gmra.mxu1 %v17549_v56  ;;  %5523 = vmatpush.bf16.msrb.mxu0 %v14261_v55 }
 0x345   : > { %v17784_v10 = vmax.f32 %v4052_v21, 0.0  ;;  %5157 = vmatmul.bf16.gmra.mxu2 %v17198_v58 }
 0x346   : > { %5302 = vmatmul.bf16.gmra.mxu3 %v17553_v59  ;;  %v14253_v59 = vld [vmem:[%s19823_s1 + $0x258] sm:$0xff] }
 0x347   : > { %v8250_v56 = vrot.slane %v17784_v10, 7  ;;  %5606 = vmatpush.bf16.msrb.mxu1 %v14253_v59  ;;  %v19954_v30 = vrot.slane %v17784_v10, 1 }
 0x348   : > { %v4026_v48 = vpop.f32.mrf.mxu2 }
 0x349   : > { %v17798_v58 = vpop.f32.mrf.mxu3  ;;  %v4041_v21 = vadd.f32 %v4026_v48, %v3896_v19  ;;  %v3762_v62 = vpop.f32.mrf.mxu0  ;;  %v17806_v0 = vsel %vm209_vm0, %v15899_v63, %v8250_v56  ;;  %v17817_v19 = vsel %vm453_vm1, %v17578_v28, %v5201_v16 }
 0x34a   : > { %v3883_v34 = vpop.f32.mrf.mxu1  ;;  %v5221_v28 = vpack.c.bf16 %v17817_v19, %v17599_v11 }
 0x34b   : > { %v4053_v32 = vadd.f32 %v17411_v5, %v4041_v21  ;;  %v4797_v5 = vpack.c.bf16 %v17522_v43, %v17420_v40  ;;  %v14268_v40 = vld [vmem:[%s19823_s1 + $0x2d0] sm:$0xff] }
 0x34c   : > { %5737 = vmatpush.bf16.msrb.mxu2 %v14268_v40  ;;  %v5202_v40 = vrot.slane %v17574_v53, 1 }
 0x34d   : > { %v17812_v57 = vmax.f32 %v4053_v32, 0.0 }
 0x34f   : > { %v17821_v27 = vpack.c.bf16 %v17812_v57, %v17784_v10  ;;  %v8501_v4 = vrot.slane %v17812_v57, 1  ;;  %v19953_v55 = vrot.slane %v17812_v57, 7 }
 0x350   : > { %v4028_v6 = vpop.f32.mrf.mxu2  ;;  %5738 = vmatpush.bf16.msrb.mxu2 %v14267_v2  ;;  %v4956_v2 = vpack.c.bf16 %v17614_v9, %v17536_v46  ;;  %v17907_v46 = vld [vmem:[%s14792_s5 + $0x1a0] sm:$0xff] }
 0x351   : > { %20110 = vst [vmem:[#allocation95_spill] sm:$0xff] %v17821_v27  ;;  %v4257_v48 = vpop.f32.mrf.mxu3  ;;  %v4317_v59 = vpop.f32.mrf.mxu0  ;;  %v17834_v62 = vsel %vm453_vm1, %v19954_v30, %v8501_v4  ;;  %v17840_v34 = vsel %vm209_vm0, %v8250_v56, %v19953_v55  ;;  %v17849_v43 = vsel %vm453_vm1, %v8501_v4, %v15917_v44  ;;  %v14260_v56 = vld [vmem:[%s19823_s1 + $0x290] sm:$0xff] }
 0x352   : > { %v4450_v21 = vpop.f32.mrf.mxu1  ;;  %v4318_v32 = vadd.f32 %v4317_v59, %v17401_v24  ;;  %20111 = vst [vmem:[#allocation96_spill] sm:$0xff] %v17849_v43  ;;  %v14276_v24 = vld [vmem:[%s19823_s1 + $0x310] sm:$0xff]  ;;  %5524 = vmatpush.bf16.msrb.mxu0 %v14260_v56  ;;  %v17868_v48 = vpack.c.bf16 %v17849_v43, %v17834_v62  ;;  %v17873_v56 = vrot.slane %v17270_v1, 1 }
 0x353   : > { %4883 = vmatmul.bf16.gmra.mxu0 %v4797_v5  ;;  %v14252_v4 = vld [vmem:[%s19823_s1 + $0x250] sm:$0xff]  ;;  %5887 = vmatpush.bf16.msrb.mxu3 %v14276_v24  ;;  %v14259_v24 = vld [vmem:[%s19823_s1 + $0x288] sm:$0xff] }
 0x354   : > { %v4480_v6 = vadd.f32 %v4450_v21, %v4318_v32  ;;  %5041 = vmatmul.bf16.gmra.mxu1 %v17624_v14  ;;  %v17864_v14 = vpack.c.bf16 %v17840_v34, %v17806_v0  ;;  %20113 = vst [vmem:[#allocation98_spill] sm:$0xff] %v17868_v48 }
 0x355   : > { %5162 = vmatmul.bf16.gmra.mxu2 %v17251_v38  ;;  %5607 = vmatpush.bf16.msrb.mxu1 %v14252_v4  ;;  %v17889_v4 = vsel %vm453_vm1, %v5202_v40, %v17873_v56 }
 0x356   : > { %5307 = vmatmul.bf16.gmra.mxu3 %v5221_v28  ;;  %20112 = vst [vmem:[#allocation97_spill] sm:$0xff] %v17864_v14  ;;  %5525 = vmatpush.bf16.msrb.mxu0 %v14259_v24 }
 0x358   : > { %v4608_v5 = vpop.f32.mrf.mxu2 }
 0x359   : > { %v4729_v59 = vpop.f32.mrf.mxu3  ;;  %v4638_v38 = vadd.f32 %v4608_v5, %v4480_v6  ;;  %v4319_v21 = vpop.f32.mrf.mxu0  ;;  %v14275_v6 = vld [vmem:[%s19823_s1 + $0x308] sm:$0xff]  ;;  %v5211_v5 = vsel %vm453_vm1, %v5201_v16, %v5202_v40  ;;  %v5077_v16 = vpack.c.bf16 %v17574_v53, %v17473_v7  ;;  %v5205_v53 = vrot.slane %v17907_v46, 1 }
 0x35a   : > { %v4452_v28 = vpop.f32.mrf.mxu1  ;;  %v4320_v32 = vadd.f32 %v4319_v21, %v17445_v26  ;;  %5888 = vmatpush.bf16.msrb.mxu3 %v14275_v6  ;;  %v4798_v21 = vpack.c.bf16 %v17599_v11, %v17516_v49  ;;  %v5222_v40 = vpack.c.bf16 %v17889_v4, %v5211_v5  ;;  %v12026_v49 = vld [vmem:[%s14792_s5 + $0x198] sm:$0xff] }
 0x35b   : > { %v17875_v55 = vadd.f32 %v4729_v59, %v4638_v38  ;;  %v5204_v7 = vrot.slane %v12026_v49, 1 }
 0x35c   : > { %v4481_v26 = vadd.f32 %v4452_v28, %v4320_v32  ;;  %v14251_v28 = vld [vmem:[%s19823_s1 + $0x248] sm:$0xff] }
 0x35d   : > { %5608 = vmatpush.bf16.msrb.mxu1 %v14251_v28  ;;  %v14274_v28 = vld [vmem:[%s19823_s1 + $0x300] sm:$0xff] }
 0x35e   : > { %5889 = vmatpush.bf16.msrb.mxu3 %v14274_v28 }
 0x360   : > { %v4610_v59 = vpop.f32.mrf.mxu2 }
 0x361   : > { %v4731_v38 = vpop.f32.mrf.mxu3  ;;  %v4639_v32 = vadd.f32 %v4610_v59, %v4481_v26  ;;  %v4322_v24 = vpop.f32.mrf.mxu0 }
 0x362   : > { %v4455_v30 = vpop.f32.mrf.mxu1 }
 0x363   : > { %v17903_v6 = vadd.f32 %v4731_v38, %v4639_v32  ;;  %4888 = vmatmul.bf16.gmra.mxu0 %v4798_v21  ;;  %v4938_v30 = vrot.slane %v12026_v49, 7  ;;  %v14266_v38 = vld [vmem:[%s19823_s1 + $0x2c0] sm:$0xff] }
 0x364   : > { %5046 = vmatmul.bf16.gmra.mxu1 %v4956_v2  ;;  %v14258_v2 = vld [vmem:[%s19823_s1 + $0x280] sm:$0xff]  ;;  %5739 = vmatpush.bf16.msrb.mxu2 %v14266_v38  ;;  %v5078_v38 = vpack.c.bf16 %v12026_v49, %v17270_v1  ;;  %v14313_v1 = vld [vmem:[%s19823_s1 + $0x438] sm:$0xff] }
 0x365   : > { %5167 = vmatmul.bf16.gmra.mxu2 %v5077_v16  ;;  %v4943_v32 = vsel %vm209_vm0, %v17277_v37, %v4938_v30  ;;  %v5208_v16 = vsel %vm453_vm1, %v5204_v7, %v5205_v53  ;;  %5526 = vmatpush.bf16.msrb.mxu0 %v14258_v2  ;;  %v5206_v2 = vrot.slane %v17673_v42, 1 }
 0x366   : > { %5312 = vmatmul.bf16.gmra.mxu3 %v5222_v40  ;;  %v5209_v40 = vsel %vm453_vm1, %v17873_v56, %v5204_v7 }
 0x367   : > { %v5223_v14 = vpack.c.bf16 %v5208_v16, %v5209_v40  ;;  %6399 = vmatpush.bf16.msra.mxu3 %v14313_v1 }
 0x368   : > { %v4613_v11 = vpop.f32.mrf.mxu2 }
 0x369   : > { %v4734_v9 = vpop.f32.mrf.mxu3  ;;  %v4324_v26 = vpop.f32.mrf.mxu0 }
 0x36a   : > { %v4457_v59 = vpop.f32.mrf.mxu1  ;;  %v4325_v24 = vadd.f32 %v4324_v26, %v17546_v17  ;;  %v14250_v17 = vld [vmem:[%s19823_s1 + $0x240] sm:$0xff]  ;;  %v4799_v26 = vpack.c.bf16 %v5211_v5, %v17817_v19  ;;  %v14305_v19 = vld [vmem:[%s19823_s1 + $0x3f8] sm:$0xff] }
 0x36b   : > { %5609 = vmatpush.bf16.msrb.mxu1 %v14250_v17  ;;  %6285 = vmatpush.bf16.msra.mxu2 %v14305_v19  ;;  %v4794_v17 = vsel %vm453_vm1, %v17873_v56, %v17157_v15 }
 0x36c   : > { %v4483_v21 = vadd.f32 %v4457_v59, %v4325_v24  ;;  %v4957_v59 = vpack.c.bf16 %v4943_v32, %v17610_v33  ;;  %v14289_v33 = vld [vmem:[%s19823_s1 + $0x378] sm:$0xff]  ;;  %v20114_v32 = vrot.slane %v17673_v42, 7 }
 0x36d   : > { %5996 = vmatpush.bf16.msra.mxu0 %v14289_v33 }
 0x370   : > { %v4615_v11 = vpop.f32.mrf.mxu2 }
 0x371   : > { %v4736_v9 = vpop.f32.mrf.mxu3  ;;  %v4641_v24 = vadd.f32 %v4615_v11, %v4483_v21  ;;  %v4327_v48 = vpop.f32.mrf.mxu0  ;;  %v4939_v21 = vrot.slane %v17907_v46, 7  ;;  %v5207_v11 = vsel %vm453_vm1, %v5205_v53, %v5206_v2  ;;  %v14304_v53 = vld [vmem:[%s19823_s1 + $0x3f0] sm:$0xff] }
 0x372   : > { %v4460_v37 = vpop.f32.mrf.mxu1  ;;  %v4328_v27 = vadd.f32 %v4327_v48, %v17580_v41  ;;  %6286 = vmatpush.bf16.msra.mxu2 %v14304_v53  ;;  %v14302_v53 = vld [vmem:[%s19823_s1 + $0x3e0] sm:$0xff] }
 0x373   : > { %v17935_v43 = vadd.f32 %v4736_v9, %v4641_v24  ;;  %4893 = vmatmul.bf16.gmra.mxu0 %v4799_v26  ;;  %v4941_v16 = vsel %vm209_vm0, %v4939_v21, %v20114_v32  ;;  %v4942_v40 = vsel %vm209_vm0, %v4938_v30, %v4939_v21  ;;  %v5218_v9 = vsel %vm453_vm1, %v5206_v2, %v17360_v61  ;;  %v14288_v61 = vld [vmem:[%s19823_s1 + $0x370] sm:$0xff]  ;;  %v14295_v32 = vld [vmem:[%s19823_s1 + $0x3a8] sm:$0xff] }
 0x374   : > { %v4484_v7 = vadd.f32 %v4460_v37, %v4328_v27  ;;  %5051 = vmatmul.bf16.gmra.mxu1 %v4957_v59  ;;  %v4800_v24 = vpack.c.bf16 %v4794_v17, %v17889_v4  ;;  %v4958_v15 = vpack.c.bf16 %v4941_v16, %v4942_v40  ;;  %v14312_v4 = vld [vmem:[%s19823_s1 + $0x430] sm:$0xff]  ;;  %5997 = vmatpush.bf16.msra.mxu0 %v14288_v61  ;;  %v14310_v61 = vld [vmem:[%s19823_s1 + $0x420] sm:$0xff] }
 0x375   : > { %5172 = vmatmul.bf16.gmra.mxu2 %v5078_v38  ;;  %v5079_v38 = vpack.c.bf16 %v17673_v42, %v17907_v46  ;;  %v14296_v42 = vld [vmem:[%s19823_s1 + $0x3b0] sm:$0xff]  ;;  %6400 = vmatpush.bf16.msra.mxu3 %v14312_v4  ;;  %v17998_v17 = vpack.c.bf16 %v15899_v63, %v15899_v63 }
 0x376   : > { %5317 = vmatmul.bf16.gmra.mxu3 %v5223_v14  ;;  %v14297_v14 = vld [vmem:[%s19823_s1 + $0x3b8] sm:$0xff] }
 0x377   : > { %6134 = vmatpush.bf16.msra.mxu1 %v14297_v14  ;;  %20115 = vst [vmem:[#allocation99_spill] sm:$0xff] %v17998_v17 }
 0x378   : > { %v4618_v41 = vpop.f32.mrf.mxu2 }
 0x379   : > { %v4739_v27 = vpop.f32.mrf.mxu3  ;;  %v4642_v48 = vadd.f32 %v4618_v41, %v4484_v7  ;;  %v4329_v5 = vpop.f32.mrf.mxu0  ;;  %v5224_v7 = vpack.c.bf16 %v5218_v9, %v5207_v11  ;;  %v18005_v9 = vpack.c.bf16 %v15917_v44, %v15917_v44 }
 0x37a   : > { %v4462_v49 = vpop.f32.mrf.mxu1  ;;  %v14287_v5 = vld [vmem:[%s19823_s1 + $0x368] sm:$0xff] }
 0x37b   : > { %v17951_v28 = vadd.f32 %v4739_v27, %v4642_v48  ;;  %6135 = vmatpush.bf16.msra.mxu1 %v14296_v42  ;;  %v14303_v48 = vld [vmem:[%s19823_s1 + $0x3e8] sm:$0xff]  ;;  %5998 = vmatpush.bf16.msra.mxu0 %v14287_v5  ;;  %20116 = vst [vmem:[#allocation100_spill] sm:$0xff] %v18005_v9  ;;  %v20119_v5 = vrot.slane %v15875_v31, 1 }
 0x37c   : > { %v14311_v49 = vld [vmem:[%s19823_s1 + $0x428] sm:$0xff]  ;;  %6287 = vmatpush.bf16.msra.mxu2 %v14303_v48  ;;  %v5426_v48 = vpack.c.bf16 %v15926_v52, %v15899_v63 }
 0x37d   : > { %6401 = vmatpush.bf16.msra.mxu3 %v14311_v49  ;;  %v18038_v49 = vsel %vm453_vm1, %v15917_v44, %v20119_v5  ;;  %v20127_v5 = vld [vmem:[#allocation12_spill] sm:$0xff] }
 0x37f   : > { %6136 = vmatpush.bf16.msra.mxu1 %v14295_v32  ;;  %v14285_v32 = vld [vmem:[%s19823_s1 + $0x358] sm:$0xff] }
 0x380   : > { %v4620_v26 = vpop.f32.mrf.mxu2  ;;  %6288 = vmatpush.bf16.msra.mxu2 %v14302_v53 }
 0x381   : > { %v4741_v59 = vpop.f32.mrf.mxu3  ;;  %v4332_v56 = vpop.f32.mrf.mxu0  ;;  %6402 = vmatpush.bf16.msra.mxu3 %v14310_v61 }
 0x382   : > { %v4465_v37 = vpop.f32.mrf.mxu1  ;;  %v4333_v30 = vadd.f32 %v4332_v56, %v17678_v22  ;;  %v19959_v59 = vmov 0.0|0.0  }
 0x383   : > { %4898 = vmatmul.bf16.gmra.mxu0 %v4800_v24  ;;  %v20117_v24 = vpack.c.bf16 %v15921_v60, %v15926_v52  ;;  %v20120_v52 = vpack.c.bf16 %v16020_v8, %v15939_v36 }
 0x384   : > { %v4486_v19 = vadd.f32 %v4465_v37, %v4333_v30  ;;  %5056 = vmatmul.bf16.gmra.mxu1 %v4958_v15 }
 0x385   : > { %5177 = vmatmul.bf16.gmra.mxu2 %v5079_v38 }
 0x386   : > { %5322 = vmatmul.bf16.gmra.mxu3 %v5224_v7 }
 0x388   : > { %v4623_v22 = vpop.f32.mrf.mxu2 }
 0x389   : > { %v4744_v46 = vpop.f32.mrf.mxu3  ;;  %v4644_v33 = vadd.f32 %v4623_v22, %v4486_v19  ;;  %v4334_v1 = vpop.f32.mrf.mxu0  ;;  %v14286_v19 = vld [vmem:[%s19823_s1 + $0x360] sm:$0xff] }
 0x38a   : > { %v4467_v41 = vpop.f32.mrf.mxu1  ;;  %v4335_v27 = vadd.f32 %v4334_v1, %v17701_v29  ;;  %v14294_v22 = vld [vmem:[%s19823_s1 + $0x3a0] sm:$0xff]  ;;  %v20118_v1 = vmov 0.0   ;;  %5999 = vmatpush.bf16.msra.mxu0 %v14286_v19 }
 0x38b   : > { %v17985_v14 = vadd.f32 %v4744_v46, %v4644_v33  ;;  %6137 = vmatpush.bf16.msra.mxu1 %v14294_v22  ;;  %v20123_v22 = vld [vmem:[#allocation6_spill] sm:$0xff] }
 0x38c   : > { %v4487_v21 = vadd.f32 %v4467_v41, %v4335_v27  ;;  %v5449_v41 = vpack.c.bf16 %v15875_v31, %v20118_v1 }
 0x38e   : > { %6000 = vmatpush.bf16.msra.mxu0 %v14285_v32 }
 0x390   : > { %v4625_v2 = vpop.f32.mrf.mxu2 }
 0x391   : > { %v4746_v29 = vpop.f32.mrf.mxu3  ;;  %v4645_v16 = vadd.f32 %v4625_v2, %v4487_v21  ;;  %v4337_v40 = vpop.f32.mrf.mxu0  ;;  %v5662_v2 = vpack.c.bf16 %v15932_v45, %v18038_v49 }
 0x392   : > { %v4470_v11 = vpop.f32.mrf.mxu1 }
 0x393   : > { %v18007_v26 = vadd.f32 %v4746_v29, %v4645_v16  ;;  %5527 = vmatmul.bf16.vlgmr.msrb.gmra.mxu0 %v19959_v59  ;;  %v14309_v16 = vld [vmem:[%s19823_s1 + $0x418] sm:$0xff] }
 0x394   : > { %5610 = vmatmul.bf16.vlgmr.msrb.gmra.mxu1 %v17998_v17  ;;  %6403 = vmatpush.bf16.msra.mxu3 %v14309_v16 }
 0x395   : > { %5740 = vmatmul.bf16.vlgmr.msrb.gmra.mxu2 %v18005_v9  ;;  %v20152_v9 = vld [vmem:[#allocation21_spill] sm:$0xff] }
 0x396   : > { %5890 = vmatmul.bf16.vlgmr.msrb.gmra.mxu3 %v20117_v24  ;;  %v14293_v24 = vld [vmem:[%s19823_s1 + $0x398] sm:$0xff] }
 0x397   : > { %6138 = vmatpush.bf16.msra.mxu1 %v14293_v24 }
 0x398   : > { %v4628_v15 = vpop.f32.mrf.mxu2 }
 0x399   : > { %v4749_v56 = vpop.f32.mrf.mxu3  ;;  %v4339_v37 = vpop.f32.mrf.mxu0 }
 0x39a   : > { %v4472_v38 = vpop.f32.mrf.mxu1  ;;  %v4340_v7 = vadd.f32 %v4339_v37, %v17777_v51 }
 0x39c   : > { %v4489_v30 = vadd.f32 %v4472_v38, %v4340_v7 }
 0x3a0   : > { %v4630_v4 = vpop.f32.mrf.mxu2 }
 0x3a1   : > { %v4751_v42 = vpop.f32.mrf.mxu3  ;;  %v4647_v51 = vadd.f32 %v4630_v4, %v4489_v30  ;;  %v4342_v46 = vpop.f32.mrf.mxu0  ;;  %v20121_v30 = vld [vmem:[#allocation8_spill] sm:$0xff] }
 0x3a2   : > { %v4475_v33 = vpop.f32.mrf.mxu1  ;;  %v4343_v27 = vadd.f32 %v4342_v46, %v17798_v58  ;;  %v14301_v58 = vld [vmem:[%s19823_s1 + $0x3d8] sm:$0xff]  ;;  %v20122_v53 = vrot.slane %v20121_v30, 1  ;;  %v20124_v46 = vld [vmem:[#allocation7_spill] sm:$0xff] }
 0x3a3   : > { %v18040_v21 = vadd.f32 %v4751_v42, %v4647_v51  ;;  %5532 = vmatmul.bf16.gmra.mxu0 %v5449_v41  ;;  %6289 = vmatpush.bf16.msra.mxu2 %v14301_v58  ;;  %v5450_v51 = vpack.c.bf16 0.0, %v20123_v22 }
 0x3a4   : > { %v4490_v29 = vadd.f32 %v4475_v33, %v4343_v27  ;;  %5615 = vmatmul.bf16.gmra.mxu1 %v5426_v48  ;;  %v18066_v19 = vsel %vm453_vm1, %v15917_v44, %v20122_v53  ;;  %v20125_v27 = vpack.c.bf16 %v15939_v36, %v15921_v60  ;;  %v20126_v48 = vld [vmem:[#allocation11_spill] sm:$0xff]  ;;  %v14292_v36 = vld [vmem:[%s19823_s1 + $0x390] sm:$0xff] }
 0x3a5   : > { %5745 = vmatmul.bf16.gmra.mxu2 %v5662_v2  ;;  %v5663_v33 = vpack.c.bf16 %v18066_v19, %v20124_v46  ;;  %v20128_v2 = vpack.c.bf16 %v20126_v48, %v20127_v5  ;;  %6139 = vmatpush.bf16.msra.mxu1 %v14292_v36  ;;  %v20129_v48 = vld [vmem:[#allocation10_spill] sm:$0xff]  ;;  %v20130_v5 = vld [vmem:[#allocation15_spill] sm:$0xff] }
 0x3a6   : > { %5895 = vmatmul.bf16.gmra.mxu3 %v20120_v52  ;;  %v14308_v52 = vld [vmem:[%s19823_s1 + $0x410] sm:$0xff] }
 0x3a7   : > { %6404 = vmatpush.bf16.msra.mxu3 %v14308_v52 }
 0x3a8   : > { %v4633_v40 = vpop.f32.mrf.mxu2 }
 0x3a9   : > { %v4754_v11 = vpop.f32.mrf.mxu3  ;;  %v4648_v8 = vadd.f32 %v4633_v40, %v4490_v29  ;;  %v4344_v15 = vpop.f32.mrf.mxu0  ;;  %v14284_v29 = vld [vmem:[%s19823_s1 + $0x350] sm:$0xff] }
 0x3aa   : > { %v4477_v56 = vpop.f32.mrf.mxu1  ;;  %6001 = vmatpush.bf16.msra.mxu0 %v14284_v29  ;;  %v14299_v15 = vld [vmem:[%s19823_s1 + $0x3c8] sm:$0xff]  ;;  %v20132_v29 = vld [vmem:[#allocation18_spill] sm:$0xff] }
 0x3ab   : > { %v18059_v37 = vadd.f32 %v4754_v11, %v4648_v8  ;;  %v14283_v56 = vld [vmem:[%s19823_s1 + $0x348] sm:$0xff]  ;;  %v20133_v52 = vpack.c.bf16 %v16190_v3, %v20132_v29 }
 0x3ae   : > { %6002 = vmatpush.bf16.msra.mxu0 %v14283_v56 }
 0x3b0   : > { %v4635_v38 = vpop.f32.mrf.mxu2 }
 0x3b1   : > { %v4756_v7 = vpop.f32.mrf.mxu3  ;;  %v4874_v61 = vpop.f32.mrf.mxu0  ;;  %v14307_v38 = vld [vmem:[%s19823_s1 + $0x408] sm:$0xff] }
 0x3b2   : > { %v5032_v4 = vpop.f32.mrf.mxu1  ;;  %v4904_v42 = vadd.f32 %v4874_v61, %v17875_v55  ;;  %v14300_v55 = vld [vmem:[%s19823_s1 + $0x3d0] sm:$0xff]  ;;  %6405 = vmatpush.bf16.msra.mxu3 %v14307_v38 }
 0x3b3   : > { %5536 = vmatmul.bf16.gmra.mxu0 %v5450_v51  ;;  %6290 = vmatpush.bf16.msra.mxu2 %v14300_v55  ;;  %v20131_v55 = vld [vmem:[#allocation16_spill] sm:$0xff] }
 0x3b4   : > { %v5062_v41 = vadd.f32 %v5032_v4, %v4904_v42  ;;  %5619 = vmatmul.bf16.gmra.mxu1 %v20125_v27  ;;  %v14291_v4 = vld [vmem:[%s19823_s1 + $0x388] sm:$0xff] }
 0x3b5   : > { %5749 = vmatmul.bf16.gmra.mxu2 %v5663_v33  ;;  %6140 = vmatpush.bf16.msra.mxu1 %v14291_v4  ;;  %v20141_v4 = vld [vmem:[#allocation20_spill] sm:$0xff] }
 0x3b6   : > { %5899 = vmatmul.bf16.gmra.mxu3 %v20128_v2 }
 0x3b7   : > { %6291 = vmatpush.bf16.msra.mxu2 %v14299_v15 }
 0x3b8   : > { %v5153_v58 = vpop.f32.mrf.mxu2 }
 0x3b9   : > { %v5298_v60 = vpop.f32.mrf.mxu3  ;;  %v5183_v32 = vadd.f32 %v5153_v58, %v5062_v41  ;;  %v4876_v16 = vpop.f32.mrf.mxu0 }
 0x3ba   : > { %v5034_v40 = vpop.f32.mrf.mxu1  ;;  %v4905_v11 = vadd.f32 %v4876_v16, %v17903_v6  ;;  %v18103_v6 = vld [vmem:[%s19824_s2] ss:$0 sm:$0xff] }
 0x3bb   : > { %v5328_v24 = vadd.f32 %v5298_v60, %v5183_v32 }
 0x3bc   : > { %v5063_v8 = vadd.f32 %v5034_v40, %v4905_v11 }
 0x3bd   : > { %v5340_v7 = vadd.f32 %v18103_v6, %v5328_v24 }
 0x3bf   : > { %v18109_v27 = vmax.f32 %v5340_v7, 0.0 }
 0x3c0   : > { %v5155_v53 = vpop.f32.mrf.mxu2 }
 0x3c1   : > { %v5300_v61 = vpop.f32.mrf.mxu3  ;;  %v5184_v42 = vadd.f32 %v5155_v53, %v5063_v8  ;;  %v4879_v51 = vpop.f32.mrf.mxu0  ;;  %v8650_v32 = vrot.slane %v18109_v27, 7  ;;  %v19961_v11 = vrot.slane %v18109_v27, 1 }
 0x3c2   : > { %v5037_v33 = vpop.f32.mrf.mxu1 }
 0x3c3   : > { %v5329_v41 = vadd.f32 %v5300_v61, %v5184_v42  ;;  %5540 = vmatmul.bf16.gmra.mxu0 %v20129_v48  ;;  %v18150_v61 = vsel %vm209_vm0, %v15899_v63, %v8650_v32  ;;  %v14298_v33 = vld [vmem:[%s19823_s1 + $0x3c0] sm:$0xff] }
 0x3c4   : > { %5623 = vmatmul.bf16.gmra.mxu1 %v20130_v5  ;;  %20138 = vst [vmem:[#allocation12_spill] sm:$0xff] %v18150_v61  ;;  %6292 = vmatpush.bf16.msra.mxu2 %v14298_v33  ;;  %v20143_v33 = vld [vmem:[#allocation28_spill] sm:$0xff] }
 0x3c5   : > { %v5341_v2 = vadd.f32 %v18103_v6, %v5329_v41  ;;  %5753 = vmatmul.bf16.gmra.mxu2 %v20131_v55  ;;  %v14282_v41 = vld [vmem:[%s19823_s1 + $0x340] sm:$0xff] }
 0x3c6   : > { %5903 = vmatmul.bf16.gmra.mxu3 %v20133_v52  ;;  %6003 = vmatpush.bf16.msra.mxu0 %v14282_v41  ;;  %v20144_v41 = vld [vmem:[#allocation24_spill] sm:$0xff] }
 0x3c7   : > { %v18118_v58 = vmax.f32 %v5341_v2, 0.0  ;;  %v14306_v2 = vld [vmem:[%s19823_s1 + $0x400] sm:$0xff]  ;;  %v20145_v15 = vpack.c.bf16 %v20143_v33, %v20144_v41 }
 0x3c8   : > { %v5158_v60 = vpop.f32.mrf.mxu2  ;;  %6406 = vmatpush.bf16.msra.mxu3 %v14306_v2  ;;  %v14329_v2 = vld [vmem:[%s19823_s1 + $0x278] sm:$0xff] }
 0x3c9   : > { %v5303_v36 = vpop.f32.mrf.mxu3  ;;  %v4881_v16 = vpop.f32.mrf.mxu0  ;;  %v8901_v24 = vrot.slane %v18118_v58, 1  ;;  %v8651_v8 = vrot.slane %v18118_v58, 7  ;;  %v14290_v60 = vld [vmem:[%s19823_s1 + $0x380] sm:$0xff]  ;;  %6833 = vmatpush.bf16.msrb.mxu2 %v14329_v2 }
 0x3ca   : > { %v5039_v40 = vpop.f32.mrf.mxu1  ;;  %v4907_v3 = vadd.f32 %v4881_v16, %v17935_v43  ;;  %6141 = vmatpush.bf16.msra.mxu1 %v14290_v60  ;;  %v14345_v60 = vld [vmem:[%s19823_s1 + $0x2f8] sm:$0xff] }
 0x3cb   : > { %v18130_v56 = vsel %vm453_vm1, %v8901_v24, %v15917_v44  ;;  %v18136_v38 = vsel %vm453_vm1, %v19961_v11, %v8901_v24  ;;  %v18141_v7 = vsel %vm209_vm0, %v8651_v8, %v15899_v63  ;;  %v18145_v53 = vsel %vm209_vm0, %v8650_v32, %v8651_v8  ;;  %v20140_v24 = vld [vmem:[#allocation17_spill] sm:$0xff] }
 0x3cc   : > { %20134 = vst [vmem:[#allocation8_spill] sm:$0xff] %v18130_v56  ;;  %v5065_v43 = vadd.f32 %v5039_v40, %v4907_v3  ;;  %v18156_v42 = vpack.c.bf16 %v18141_v7, %v18145_v53  ;;  %v18175_v8 = vpack.c.bf16 %v20140_v24, %v20118_v1  ;;  %6962 = vmatpush.bf16.msrb.mxu3 %v14345_v60 }
 0x3cd   : > { %20135 = vst [vmem:[#allocation6_spill] sm:$0xff] %v18136_v38  ;;  %v14327_v38 = vld [vmem:[%s19823_s1 + $0x268] sm:$0xff] }
 0x3ce   : > { %20136 = vst [vmem:[#allocation7_spill] sm:$0xff] %v18141_v7 }
 0x3cf   : > { %20137 = vst [vmem:[#allocation11_spill] sm:$0xff] %v18145_v53  ;;  %v20153_v53 = vld [vmem:[#allocation26_spill] sm:$0xff] }
 0x3d0   : > { %20139 = vst [vmem:[#allocation10_spill] sm:$0xff] %v18156_v42  ;;  %v5160_v29 = vpop.f32.mrf.mxu2  ;;  %v20154_v42 = vld [vmem:[#allocation31_spill] sm:$0xff] }
 0x3d1   : > { %v5305_v52 = vpop.f32.mrf.mxu3  ;;  %v5186_v36 = vadd.f32 %v5160_v29, %v5065_v43  ;;  %v4884_v32 = vpop.f32.mrf.mxu0  ;;  %v20142_v29 = vld [vmem:[#allocation23_spill] sm:$0xff] }
 0x3d2   : > { %v5042_v16 = vpop.f32.mrf.mxu1  ;;  %v4908_v40 = vadd.f32 %v4884_v32, %v17951_v28 }
 0x3d3   : > { %v5331_v3 = vadd.f32 %v5305_v52, %v5186_v36  ;;  %5545 = vmatmul.bf16.gmra.mxu0 %v18175_v8  ;;  %v14321_v52 = vld [vmem:[%s19823_s1 + $0x478] sm:$0xff] }
 0x3d4   : > { %v5066_v59 = vadd.f32 %v5042_v16, %v4908_v40  ;;  %5628 = vmatmul.bf16.gmra.mxu1 %v20141_v4  ;;  %6537 = vmatpush.bf16.msrb.mxu0 %v14321_v52 }
 0x3d5   : > { %v5343_v43 = vadd.f32 %v18103_v6, %v5331_v3  ;;  %5758 = vmatmul.bf16.gmra.mxu2 %v20142_v29 }
 0x3d6   : > { %5908 = vmatmul.bf16.gmra.mxu3 %v20145_v15  ;;  %v14337_v15 = vld [vmem:[%s19823_s1 + $0x2b8] sm:$0xff] }
 0x3d7   : > { %v18184_v28 = vmax.f32 %v5343_v43, 0.0  ;;  %6750 = vmatpush.bf16.msrb.mxu1 %v14337_v15 }
 0x3d8   : > { %v5163_v36 = vpop.f32.mrf.mxu2 }
 0x3d9   : > { %20146 = vst [vmem:[#allocation15_spill] sm:$0xff] %v18184_v28  ;;  %v5308_v32 = vpop.f32.mrf.mxu3  ;;  %v5187_v16 = vadd.f32 %v5163_v36, %v5066_v59  ;;  %v4886_v40 = vpop.f32.mrf.mxu0  ;;  %v9088_v43 = vrot.slane %v18184_v28, 7  ;;  %v9322_v33 = vrot.slane %v18184_v28, 1 }
 0x3da   : > { %v5044_v3 = vpop.f32.mrf.mxu1 }
 0x3db   : > { %v5332_v41 = vadd.f32 %v5308_v32, %v5187_v16  ;;  %v18203_v51 = vsel %vm209_vm0, %v15899_v63, %v9088_v43  ;;  %v18208_v59 = vsel %vm453_vm1, %v15917_v44, %v9322_v33  ;;  %v20150_v32 = vld [vmem:[#allocation29_spill] sm:$0xff] }
 0x3dc   : > { %20147 = vst [vmem:[#allocation16_spill] sm:$0xff] %v18203_v51  ;;  %v20151_v15 = vrot.slane %v20150_v32, 7 }
 0x3dd   : > { %20148 = vst [vmem:[#allocation18_spill] sm:$0xff] %v18208_v59  ;;  %v5344_v60 = vadd.f32 %v18103_v6, %v5332_v41 }
 0x3de   : > { %v18222_v16 = vsel %vm209_vm0, %v20151_v15, %v15899_v63  ;;  %v5666_v15 = vpack.c.bf16 %v15917_v44, %v20153_v53 }
 0x3df   : > { %v18215_v36 = vmax.f32 %v5344_v60, 0.0 }
 0x3e0   : > { %v5165_v40 = vpop.f32.mrf.mxu2 }
 0x3e1   : > { %20149 = vst [vmem:[#allocation17_spill] sm:$0xff] %v18215_v36  ;;  %v5310_v3 = vpop.f32.mrf.mxu3  ;;  %v4889_v11 = vpop.f32.mrf.mxu0  ;;  %v18226_v2 = vpack.c.bf16 %v18215_v36, %v18184_v28  ;;  %v9089_v52 = vrot.slane %v18215_v36, 7  ;;  %v9323_v41 = vrot.slane %v18215_v36, 1  ;;  %v5816_v40 = vpack.c.bf16 %v18222_v16, %v20154_v42  ;;  %v20160_v36 = vld [vmem:[#allocation25_spill] sm:$0xff] }
 0x3e2   : > { %v5047_v17 = vpop.f32.mrf.mxu1  ;;  %v4910_v60 = vadd.f32 %v4889_v11, %v17985_v14  ;;  %v20159_v42 = vpack.c.bf16 0.0, %v20152_v9 }
 0x3e3   : > { %v18239_v3 = vsel %vm209_vm0, %v9089_v52, %v15899_v63  ;;  %v18243_v28 = vsel %vm209_vm0, %v9088_v43, %v9089_v52  ;;  %v18248_v14 = vsel %vm453_vm1, %v9323_v41, %v15917_v44  ;;  %v18252_v11 = vsel %vm453_vm1, %v9322_v33, %v9323_v41  ;;  %v14328_v33 = vld [vmem:[%s19823_s1 + $0x270] sm:$0xff] }
 0x3e4   : > { %20155 = vst [vmem:[#allocation20_spill] sm:$0xff] %v18239_v3  ;;  %v5068_v7 = vadd.f32 %v5047_v17, %v4910_v60  ;;  %5549 = vmatmul.bf16.gmra.mxu0 %v20159_v42  ;;  %5632 = vmatmul.bf16.gmra.mxu1 %v20160_v36  ;;  %v18261_v43 = vpack.c.bf16 %v18243_v28, %v18203_v51  ;;  %v14320_v41 = vld [vmem:[%s19823_s1 + $0x470] sm:$0xff] }
 0x3e5   : > { %20156 = vst [vmem:[#allocation23_spill] sm:$0xff] %v18243_v28  ;;  %5762 = vmatmul.bf16.gmra.mxu2 %v5666_v15  ;;  %v18265_v52 = vpack.c.bf16 %v18248_v14, %v18252_v11  ;;  %v14344_v60 = vld [vmem:[%s19823_s1 + $0x2f0] sm:$0xff]  ;;  %6538 = vmatpush.bf16.msrb.mxu0 %v14320_v41 }
 0x3e6   : > { %20157 = vst [vmem:[#allocation28_spill] sm:$0xff] %v18248_v14  ;;  %5912 = vmatmul.bf16.gmra.mxu3 %v5816_v40  ;;  %v14336_v42 = vld [vmem:[%s19823_s1 + $0x2b0] sm:$0xff]  ;;  %6834 = vmatpush.bf16.msrb.mxu2 %v14328_v33  ;;  %v20176_v14 = vld [vmem:[#allocation14_spill] sm:$0xff] }
 0x3e7   : > { %20158 = vst [vmem:[#allocation24_spill] sm:$0xff] %v18252_v11  ;;  %6963 = vmatpush.bf16.msrb.mxu3 %v14344_v60  ;;  %6751 = vmatpush.bf16.msrb.mxu1 %v14336_v42 }
 0x3e8   : > { %20161 = vst [vmem:[#allocation29_spill] sm:$0xff] %v18261_v43  ;;  %v5168_v15 = vpop.f32.mrf.mxu2 }
 0x3e9   : > { %20162 = vst [vmem:[#allocation21_spill] sm:$0xff] %v18265_v52  ;;  %v5313_v40 = vpop.f32.mrf.mxu3  ;;  %v5189_v56 = vadd.f32 %v5168_v15, %v5068_v7  ;;  %v4891_v17 = vpop.f32.mrf.mxu0  ;;  %v14319_v7 = vld [vmem:[%s19823_s1 + $0x468] sm:$0xff] }
 0x3ea   : > { %v5049_v11 = vpop.f32.mrf.mxu1  ;;  %v4911_v52 = vadd.f32 %v4891_v17, %v18007_v26  ;;  %v14343_v26 = vld [vmem:[%s19823_s1 + $0x2e8] sm:$0xff]  ;;  %6835 = vmatpush.bf16.msrb.mxu2 %v14327_v38  ;;  %6539 = vmatpush.bf16.msrb.mxu0 %v14319_v7  ;;  %v20166_v38 = vpack.c.bf16 %v20123_v22, %v15875_v31 }
 0x3eb   : > { %v5334_v43 = vadd.f32 %v5313_v40, %v5189_v56  ;;  %v14335_v56 = vld [vmem:[%s19823_s1 + $0x2a8] sm:$0xff]  ;;  %6964 = vmatpush.bf16.msrb.mxu3 %v14343_v26  ;;  %v20167_v40 = vpack.c.bf16 %v20124_v46, %v15932_v45 }
 0x3ec   : > { %v5069_v28 = vadd.f32 %v5049_v11, %v4911_v52  ;;  %6752 = vmatpush.bf16.msrb.mxu1 %v14335_v56 }
 0x3ed   : > { %v5346_v59 = vadd.f32 %v18103_v6, %v5334_v43 }
 0x3ef   : > { %v18283_v51 = vmax.f32 %v5346_v59, 0.0 }
 0x3f0   : > { %v5170_v17 = vpop.f32.mrf.mxu2 }
 0x3f1   : > { %20163 = vst [vmem:[#allocation26_spill] sm:$0xff] %v18283_v51  ;;  %v5315_v33 = vpop.f32.mrf.mxu3  ;;  %v5190_v59 = vadd.f32 %v5170_v17, %v5069_v28  ;;  %v4894_v11 = vpop.f32.mrf.mxu0  ;;  %v9091_v52 = vrot.slane %v18283_v51, 7  ;;  %v9325_v41 = vrot.slane %v18283_v51, 1  ;;  %v20217_v51 = vld [vmem:[#allocation60_spill] sm:$0xff] }
 0x3f2   : > { %v5052_v43 = vpop.f32.mrf.mxu1 }
 0x3f3   : > { %v5335_v60 = vadd.f32 %v5315_v33, %v5190_v59  ;;  %v18302_v15 = vsel %vm209_vm0, %v15899_v63, %v9091_v52  ;;  %v18307_v28 = vsel %vm453_vm1, %v15917_v44, %v9325_v41  ;;  %v14342_v43 = vld [vmem:[%s19823_s1 + $0x2e0] sm:$0xff] }
 0x3f4   : > { %20164 = vst [vmem:[#allocation31_spill] sm:$0xff] %v18302_v15  ;;  %6004 = vmatmul.bf16.vlgmr.msra.gmra.mxu0 %v20166_v38  ;;  %6142 = vmatmul.bf16.vlgmr.msra.gmra.mxu1 %v20167_v40  ;;  %v18317_v42 = vpack.c.bf16 %v18302_v15, %v18239_v3 }
 0x3f5   : > { %20165 = vst [vmem:[#allocation25_spill] sm:$0xff] %v18307_v28  ;;  %v5347_v26 = vadd.f32 %v18103_v6, %v5335_v60  ;;  %6293 = vmatmul.bf16.vlgmr.msra.gmra.mxu2 %v20130_v5  ;;  %v14326_v5 = vld [vmem:[%s19823_s1 + $0x260] sm:$0xff]  ;;  %6965 = vmatpush.bf16.msrb.mxu3 %v14342_v43 }
 0x3f6   : > { %20168 = vst [vmem:[#allocation101_spill] sm:$0xff] %v18317_v42  ;;  %6407 = vmatmul.bf16.vlgmr.msra.gmra.mxu3 %v20129_v48  ;;  %v14318_v48 = vld [vmem:[%s19823_s1 + $0x460] sm:$0xff]  ;;  %6836 = vmatpush.bf16.msrb.mxu2 %v14326_v5 }
 0x3f7   : > { %v18324_v17 = vmax.f32 %v5347_v26, 0.0  ;;  %6540 = vmatpush.bf16.msrb.mxu0 %v14318_v48 }
 0x3f8   : > { %v5173_v31 = vpop.f32.mrf.mxu2 }
 0x3f9   : > { %20169 = vst [vmem:[#allocation102_spill] sm:$0xff] %v18324_v17  ;;  %v5318_v22 = vpop.f32.mrf.mxu3  ;;  %v4896_v33 = vpop.f32.mrf.mxu0  ;;  %v9092_v46 = vrot.slane %v18324_v17, 7  ;;  %v9326_v59 = vrot.slane %v18324_v17, 1  ;;  %v5926_v31 = vpack.c.bf16 %v20121_v30, %v20118_v1  ;;  %v14317_v30 = vld [vmem:[%s19823_s1 + $0x458] sm:$0xff] }
 0x3fa   : > { %v5054_v45 = vpop.f32.mrf.mxu1  ;;  %v4913_v11 = vadd.f32 %v4896_v33, %v18040_v21  ;;  %v20181_v33 = vld [vmem:[#allocation9_spill] sm:$0xff] }
 0x3fb   : > { %v18342_v60 = vsel %vm209_vm0, %v9091_v52, %v9092_v46  ;;  %v18346_v38 = vsel %vm453_vm1, %v9325_v41, %v9326_v59  ;;  %v18351_v21 = vsel %vm209_vm0, %v9092_v46, %v15899_v63  ;;  %v18356_v40 = vsel %vm453_vm1, %v9326_v59, %v15917_v44  ;;  %v14334_v52 = vld [vmem:[%s19823_s1 + $0x2a0] sm:$0xff]  ;;  %6541 = vmatpush.bf16.msrb.mxu0 %v14317_v30 }
 0x3fc   : > { %20170 = vst [vmem:[#allocation103_spill] sm:$0xff] %v18342_v60  ;;  %v5071_v26 = vadd.f32 %v5054_v45, %v4913_v11  ;;  %v18365_v41 = vpack.c.bf16 %v18346_v38, %v18307_v28  ;;  %v18369_v22 = vpack.c.bf16 %v18351_v21, %v18342_v60  ;;  %6753 = vmatpush.bf16.msrb.mxu1 %v14334_v52 }
 0x3fd   : > { %20171 = vst [vmem:[#allocation104_spill] sm:$0xff] %v18346_v38  ;;  %v6064_v28 = vpack.c.bf16 %v20176_v14, %v18066_v19  ;;  %v14341_v14 = vld [vmem:[%s19823_s1 + $0x2d8] sm:$0xff] }
 0x3fe   : > { %20172 = vst [vmem:[#allocation105_spill] sm:$0xff] %v18351_v21  ;;  %6966 = vmatpush.bf16.msrb.mxu3 %v14341_v14 }
 0x3ff   : > { %20173 = vst [vmem:[#allocation106_spill] sm:$0xff] %v18356_v40 }
 0x400   : > { %20174 = vst [vmem:[#allocation107_spill] sm:$0xff] %v18365_v41  ;;  %v5175_v45 = vpop.f32.mrf.mxu2 }
 0x401   : > { %20175 = vst [vmem:[#allocation108_spill] sm:$0xff] %v18369_v22  ;;  %v5320_v46 = vpop.f32.mrf.mxu3  ;;  %v5192_v59 = vadd.f32 %v5175_v45, %v5071_v26  ;;  %v4899_v11 = vpop.f32.mrf.mxu0  ;;  %v20189_v22 = vpack.c.bf16 0.0, %v20152_v9 }
 0x402   : > { %v5057_v7 = vpop.f32.mrf.mxu1  ;;  %v4914_v56 = vadd.f32 %v4899_v11, %v18059_v37  ;;  %v14325_v37 = vld [vmem:[%s19823_s1 + $0x258] sm:$0xff] }
 0x403   : > { %v5337_v5 = vadd.f32 %v5320_v46, %v5192_v59  ;;  %6837 = vmatpush.bf16.msrb.mxu2 %v14325_v37 }
 0x404   : > { %v5072_v48 = vadd.f32 %v5057_v7, %v4914_v56  ;;  %6009 = vmatmul.bf16.gmra.mxu0 %v5926_v31  ;;  %6147 = vmatmul.bf16.gmra.mxu1 %v6064_v28 }
 0x405   : > { %v5349_v43 = vadd.f32 %v18103_v6, %v5337_v5  ;;  %6298 = vmatmul.bf16.gmra.mxu2 %v20141_v4  ;;  %v5927_v5 = vpack.c.bf16 0.0, %v20181_v33 }
 0x406   : > { %6412 = vmatmul.bf16.gmra.mxu3 %v18175_v8  ;;  %v14333_v8 = vld [vmem:[%s19823_s1 + $0x298] sm:$0xff] }
 0x407   : > { %v18390_v7 = vmax.f32 %v5349_v43, 0.0  ;;  %6754 = vmatpush.bf16.msrb.mxu1 %v14333_v8 }
 0x408   : > { %v5178_v28 = vpop.f32.mrf.mxu2 }
 0x409   : > { %20177 = vst [vmem:[#allocation14_spill] sm:$0xff] %v18390_v7  ;;  %v5323_v4 = vpop.f32.mrf.mxu3  ;;  %v5193_v56 = vadd.f32 %v5178_v28, %v5072_v48  ;;  %v4901_v26 = vpop.f32.mrf.mxu0  ;;  %v9474_v31 = vrot.slane %v18390_v7, 7  ;;  %v9724_v45 = vrot.slane %v18390_v7, 1 }
 0x40a   : > { %v5059_v52 = vpop.f32.mrf.mxu1 }
 0x40b   : > { %v5338_v46 = vadd.f32 %v5323_v4, %v5193_v56  ;;  %v18400_v59 = vsel %vm209_vm0, %v15899_v63, %v9474_v31  ;;  %v18405_v11 = vsel %vm453_vm1, %v15917_v44, %v9724_v45  ;;  %v20187_v56 = vld [vmem:[#allocation13_spill] sm:$0xff] }
 0x40c   : > { %20178 = vst [vmem:[#allocation109_spill] sm:$0xff] %v18400_v59  ;;  %v20201_v59 = vld [vmem:[#allocation37_spill] sm:$0xff] }
 0x40d   : > { %20179 = vst [vmem:[#allocation110_spill] sm:$0xff] %v18405_v11  ;;  %v5350_v43 = vadd.f32 %v18103_v6, %v5338_v46  ;;  %v14324_v6 = vld [vmem:[%s19823_s1 + $0x250] sm:$0xff]  ;;  %v20002_v41 = vpack.c.bf16 0.0, %v20201_v59 }
 0x40e   : > { %v14316_v46 = vld [vmem:[%s19823_s1 + $0x450] sm:$0xff]  ;;  %6838 = vmatpush.bf16.msrb.mxu2 %v14324_v6  ;;  %v14339_v6 = vld [vmem:[%s19823_s1 + $0x2c8] sm:$0xff] }
 0x40f   : > { %v18412_v37 = vmax.f32 %v5350_v43, 0.0  ;;  %v14340_v43 = vld [vmem:[%s19823_s1 + $0x2d0] sm:$0xff]  ;;  %6542 = vmatpush.bf16.msrb.mxu0 %v14316_v46 }
 0x410   : > { %v5180_v30 = vpop.f32.mrf.mxu2  ;;  %6967 = vmatpush.bf16.msrb.mxu3 %v14340_v43  ;;  %v14331_v43 = vld [vmem:[%s19823_s1 + $0x288] sm:$0xff] }
 0x411   : > { %20180 = vst [vmem:[#allocation111_spill] sm:$0xff] %v18412_v37  ;;  %v5325_v14 = vpop.f32.mrf.mxu3  ;;  %v5528_v28 = vpop.f32.mrf.mxu0  ;;  %v9475_v8 = vrot.slane %v18412_v37, 7  ;;  %v9725_v26 = vrot.slane %v18412_v37, 1 }
 0x412   : > { %v5611_v4 = vpop.f32.mrf.mxu1 }
 0x413   : > { %v5612_v52 = vadd.f32 %v5611_v4, %v5528_v28  ;;  %v18431_v30 = vsel %vm209_vm0, %v9475_v8, %v15899_v63  ;;  %v18435_v33 = vsel %vm209_vm0, %v9474_v31, %v9475_v8  ;;  %v18440_v14 = vsel %vm453_vm1, %v9725_v26, %v15917_v44  ;;  %v20186_v4 = vld [vmem:[#allocation19_spill] sm:$0xff] }
 0x414   : > { %20182 = vst [vmem:[#allocation9_spill] sm:$0xff] %v18431_v30  ;;  %v18444_v28 = vsel %vm453_vm1, %v9724_v45, %v9725_v26  ;;  %6013 = vmatmul.bf16.gmra.mxu0 %v5927_v5  ;;  %v20188_v48 = vpack.c.bf16 %v20186_v4, %v20187_v56  ;;  %v14332_v45 = vld [vmem:[%s19823_s1 + $0x290] sm:$0xff]  ;;  %v14315_v5 = vld [vmem:[%s19823_s1 + $0x448] sm:$0xff]  ;;  %6968 = vmatpush.bf16.msrb.mxu3 %v14339_v6  ;;  %v20194_v6 = vld [vmem:[#allocation30_spill] sm:$0xff] }
 0x415   : > { %20183 = vst [vmem:[#allocation112_spill] sm:$0xff] %v18435_v33  ;;  %6302 = vmatmul.bf16.gmra.mxu2 %v20160_v36  ;;  %6755 = vmatpush.bf16.msrb.mxu1 %v14332_v45 }
 0x416   : > { %20184 = vst [vmem:[#allocation113_spill] sm:$0xff] %v18440_v14  ;;  %6151 = vmatmul.bf16.gmra.mxu1 %v20188_v48  ;;  %6416 = vmatmul.bf16.gmra.mxu3 %v20189_v22  ;;  %v14323_v22 = vld [vmem:[%s19823_s1 + $0x248] sm:$0xff] }
 0x417   : > { %20185 = vst [vmem:[#allocation114_spill] sm:$0xff] %v18444_v28  ;;  %6839 = vmatpush.bf16.msrb.mxu2 %v14323_v22  ;;  %6543 = vmatpush.bf16.msrb.mxu0 %v14315_v5  ;;  %v20193_v22 = vld [vmem:[#allocation34_spill] sm:$0xff] }
 0x418   : > { %v5741_v48 = vpop.f32.mrf.mxu2 }
 0x419   : > { %v5891_v56 = vpop.f32.mrf.mxu3  ;;  %v5767_v26 = vadd.f32 %v5741_v48, %v5612_v52  ;;  %v5530_v4 = vpop.f32.mrf.mxu0  ;;  %6756 = vmatpush.bf16.msrb.mxu1 %v14331_v43 }
 0x41a   : > { %v5613_v8 = vpop.f32.mrf.mxu1 }
 0x41b   : > { %v5614_v36 = vadd.f32 %v5613_v8, %v5530_v4  ;;  %v18463_v31 = vadd.f32 %v5891_v56, %v5767_v26  ;;  %v20190_v26 = vpack.c.bf16 %v20152_v9, %v20140_v24  ;;  %v20191_v4 = vld [vmem:[#allocation22_spill] sm:$0xff] }
 0x41c   : > { %v20192_v5 = vpack.c.bf16 %v20153_v53, %v20191_v4  ;;  %v14314_v9 = vld [vmem:[%s19823_s1 + $0x440] sm:$0xff]  ;;  %v20195_v4 = vld [vmem:[#allocation27_spill] sm:$0xff] }
 0x41d   : > { %v14338_v24 = vld [vmem:[%s19823_s1 + $0x2c0] sm:$0xff]  ;;  %6544 = vmatpush.bf16.msrb.mxu0 %v14314_v9  ;;  %v5929_v14 = vpack.c.bf16 %v20195_v4, %v20118_v1 }
 0x41e   : > { %6969 = vmatpush.bf16.msrb.mxu3 %v14338_v24 }
 0x420   : > { %v5743_v52 = vpop.f32.mrf.mxu2 }
 0x421   : > { %v5893_v46 = vpop.f32.mrf.mxu3  ;;  %v5768_v8 = vadd.f32 %v5743_v52, %v5614_v36  ;;  %v5533_v45 = vpop.f32.mrf.mxu0 }
 0x422   : > { %v5616_v48 = vpop.f32.mrf.mxu1 }
 0x423   : > { %v18477_v56 = vadd.f32 %v5893_v46, %v5768_v8  ;;  %v14322_v46 = vld [vmem:[%s19823_s1 + $0x240] sm:$0xff] }
 0x424   : > { %6017 = vmatmul.bf16.gmra.mxu0 %v20190_v26  ;;  %6840 = vmatpush.bf16.msrb.mxu2 %v14322_v46  ;;  %v20197_v46 = vld [vmem:[#allocation32_spill] sm:$0xff] }
 0x425   : > { %6306 = vmatmul.bf16.gmra.mxu2 %v20193_v22 }
 0x426   : > { %6155 = vmatmul.bf16.gmra.mxu1 %v20192_v5  ;;  %6420 = vmatmul.bf16.gmra.mxu3 %v20194_v6  ;;  %v20196_v5 = vrot.slane %v20195_v4, 1 }
 0x428   : > { %v5746_v38 = vpop.f32.mrf.mxu2 }
 0x429   : > { %v5896_v28 = vpop.f32.mrf.mxu3  ;;  %v5534_v36 = vpop.f32.mrf.mxu0  ;;  %v14330_v38 = vld [vmem:[%s19823_s1 + $0x280] sm:$0xff] }
 0x42a   : > { %v5617_v52 = vpop.f32.mrf.mxu1  ;;  %6757 = vmatpush.bf16.msrb.mxu1 %v14330_v38 }
 0x42b   : > { %v5618_v45 = vadd.f32 %v5617_v52, %v5534_v36  ;;  %v18504_v36 = vsel %vm453_vm1, %v15917_v44, %v20196_v5 }
 0x42c   : > { %v6067_v9 = vpack.c.bf16 %v20197_v46, %v18504_v36  ;;  %v6897_v61 = vpack.c.bf16 %v18504_v36, %v20217_v51 }
 0x430   : > { %v5747_v28 = vpop.f32.mrf.mxu2 }
 0x431   : > { %v5897_v43 = vpop.f32.mrf.mxu3  ;;  %v5769_v8 = vadd.f32 %v5747_v28, %v5618_v45  ;;  %v5537_v48 = vpop.f32.mrf.mxu0  ;;  %v20198_v45 = vld [vmem:[#allocation38_spill] sm:$0xff]  ;;  %v20199_v28 = vld [vmem:[#allocation36_spill] sm:$0xff] }
 0x432   : > { %v5620_v26 = vpop.f32.mrf.mxu1  ;;  %v18514_v38 = vpack.c.bf16 %v20198_v45, %v18222_v16  ;;  %v18518_v11 = vpack.c.bf16 %v20199_v28, %v20118_v1  ;;  %v14377_v16 = vld [vmem:[%s19823_s1 + $0x3f8] sm:$0xff] }
 0x433   : > { %v5621_v52 = vadd.f32 %v5620_v26, %v5537_v48  ;;  %v18510_v24 = vadd.f32 %v5897_v43, %v5769_v8  ;;  %v14369_v48 = vld [vmem:[%s19823_s1 + $0x3b8] sm:$0xff]  ;;  %7511 = vmatpush.bf16.msra.mxu3 %v14377_v16 }
 0x434   : > { %6022 = vmatmul.bf16.gmra.mxu0 %v5929_v14  ;;  %v14353_v43 = vld [vmem:[%s19823_s1 + $0x338] sm:$0xff]  ;;  %7361 = vmatpush.bf16.msra.mxu2 %v14369_v48  ;;  %v5930_v48 = vpack.c.bf16 0.0, %v20150_v32  ;;  %v20202_v32 = vld [vmem:[#allocation43_spill] sm:$0xff] }
 0x435   : > { %6311 = vmatmul.bf16.gmra.mxu2 %v18514_v38  ;;  %7111 = vmatpush.bf16.msra.mxu0 %v14353_v43  ;;  %v14361_v26 = vld [vmem:[%s19823_s1 + $0x378] sm:$0xff] }
 0x436   : > { %6160 = vmatmul.bf16.gmra.mxu1 %v6067_v9  ;;  %6425 = vmatmul.bf16.gmra.mxu3 %v18518_v11  ;;  %v20200_v43 = vld [vmem:[#allocation33_spill] sm:$0xff] }
 0x437   : > { %7224 = vmatpush.bf16.msra.mxu1 %v14361_v26  ;;  %v6068_v16 = vpack.c.bf16 %v18038_v49, %v20200_v43  ;;  %v14360_v49 = vld [vmem:[%s19823_s1 + $0x370] sm:$0xff]  ;;  %v14375_v43 = vld [vmem:[%s19823_s1 + $0x3e8] sm:$0xff] }
 0x438   : > { %v5750_v14 = vpop.f32.mrf.mxu2 }
 0x439   : > { %v5900_v8 = vpop.f32.mrf.mxu3  ;;  %v5770_v4 = vadd.f32 %v5750_v14, %v5621_v52  ;;  %v5539_v5 = vpop.f32.mrf.mxu0  ;;  %v14368_v52 = vld [vmem:[%s19823_s1 + $0x3b0] sm:$0xff] }
 0x43a   : > { %v5622_v46 = vpop.f32.mrf.mxu1  ;;  %v14352_v14 = vld [vmem:[%s19823_s1 + $0x330] sm:$0xff]  ;;  %7362 = vmatpush.bf16.msra.mxu2 %v14368_v52  ;;  %v14359_v52 = vld [vmem:[%s19823_s1 + $0x368] sm:$0xff] }
 0x43b   : > { %v18534_v9 = vadd.f32 %v5900_v8, %v5770_v4  ;;  %7112 = vmatpush.bf16.msra.mxu0 %v14352_v14  ;;  %7225 = vmatpush.bf16.msra.mxu1 %v14360_v49  ;;  %v14367_v46 = vld [vmem:[%s19823_s1 + $0x3a8] sm:$0xff] }
 0x43e   : > { %7363 = vmatpush.bf16.msra.mxu2 %v14367_v46 }
 0x43f   : > { %7226 = vmatpush.bf16.msra.mxu1 %v14359_v52 }
 0x440   : > { %v5752_v33 = vpop.f32.mrf.mxu2 }
 0x441   : > { %v5902_v30 = vpop.f32.mrf.mxu3  ;;  %v5541_v37 = vpop.f32.mrf.mxu0 }
 0x442   : > { %v5624_v40 = vpop.f32.mrf.mxu1  ;;  %v14376_v30 = vld [vmem:[%s19823_s1 + $0x3f0] sm:$0xff] }
 0x443   : > { %v5625_v21 = vadd.f32 %v5624_v40, %v5541_v37  ;;  %7512 = vmatpush.bf16.msra.mxu3 %v14376_v30 }
 0x444   : > { %6026 = vmatmul.bf16.gmra.mxu0 %v5930_v48  ;;  %v14351_v48 = vld [vmem:[%s19823_s1 + $0x328] sm:$0xff] }
 0x445   : > { %6315 = vmatmul.bf16.gmra.mxu2 %v20202_v32  ;;  %7113 = vmatpush.bf16.msra.mxu0 %v14351_v48 }
 0x446   : > { %6164 = vmatmul.bf16.gmra.mxu1 %v6068_v16  ;;  %6429 = vmatmul.bf16.gmra.mxu3 %v20002_v41 }
 0x447   : > { %7513 = vmatpush.bf16.msra.mxu3 %v14375_v43  ;;  %v14350_v43 = vld [vmem:[%s19823_s1 + $0x320] sm:$0xff] }
 0x448   : > { %v5754_v40 = vpop.f32.mrf.mxu2 }
 0x449   : > { %v5904_v37 = vpop.f32.mrf.mxu3  ;;  %v5771_v33 = vadd.f32 %v5754_v40, %v5625_v21  ;;  %v5543_v8 = vpop.f32.mrf.mxu0  ;;  %7114 = vmatpush.bf16.msra.mxu0 %v14350_v43  ;;  %v14373_v43 = vld [vmem:[%s19823_s1 + $0x3d8] sm:$0xff] }
 0x44a   : > { %v5626_v26 = vpop.f32.mrf.mxu1 }
 0x44b   : > { %v5627_v4 = vadd.f32 %v5626_v26, %v5543_v8  ;;  %v18555_v5 = vadd.f32 %v5904_v37, %v5771_v33  ;;  %v20203_v37 = vld [vmem:[#allocation35_spill] sm:$0xff] }
 0x450   : > { %v5756_v21 = vpop.f32.mrf.mxu2 }
 0x451   : > { %v5906_v16 = vpop.f32.mrf.mxu3  ;;  %v5772_v14 = vadd.f32 %v5756_v21, %v5627_v4  ;;  %v5546_v30 = vpop.f32.mrf.mxu0  ;;  %v14366_v4 = vld [vmem:[%s19823_s1 + $0x3a0] sm:$0xff] }
 0x452   : > { %v5629_v49 = vpop.f32.mrf.mxu1  ;;  %7364 = vmatpush.bf16.msra.mxu2 %v14366_v4  ;;  %v14349_v4 = vld [vmem:[%s19823_s1 + $0x318] sm:$0xff] }
 0x453   : > { %v18569_v40 = vadd.f32 %v5906_v16, %v5772_v14  ;;  %v20204_v49 = vrot.slane %v20199_v28, 1  ;;  %7115 = vmatpush.bf16.msra.mxu0 %v14349_v4 }
 0x454   : > { %6545 = vmatmul.bf16.vlgmr.msrb.gmra.mxu0 %v20131_v55  ;;  %v14374_v55 = vld [vmem:[%s19823_s1 + $0x3e0] sm:$0xff] }
 0x455   : > { %6841 = vmatmul.bf16.vlgmr.msrb.gmra.mxu2 %v20193_v22  ;;  %v14358_v22 = vld [vmem:[%s19823_s1 + $0x360] sm:$0xff]  ;;  %7514 = vmatpush.bf16.msra.mxu3 %v14374_v55 }
 0x456   : > { %6758 = vmatmul.bf16.vlgmr.msrb.gmra.mxu1 %v20194_v6  ;;  %6970 = vmatmul.bf16.vlgmr.msrb.gmra.mxu3 %v20203_v37 }
 0x457   : > { %7227 = vmatpush.bf16.msra.mxu1 %v14358_v22 }
 0x458   : > { %v5759_v33 = vpop.f32.mrf.mxu2 }
 0x459   : > { %v5909_v8 = vpop.f32.mrf.mxu3  ;;  %v5547_v26 = vpop.f32.mrf.mxu0  ;;  %v18592_v33 = vsel %vm453_vm1, %v15917_v44, %v20204_v49  ;;  %7515 = vmatpush.bf16.msra.mxu3 %v14373_v43 }
 0x45a   : > { %v5630_v46 = vpop.f32.mrf.mxu1 }
 0x45b   : > { %v5631_v48 = vadd.f32 %v5630_v46, %v5547_v26  ;;  %v20205_v26 = vld [vmem:[#allocation42_spill] sm:$0xff] }
 0x45c   : > { %v18598_v46 = vpack.c.bf16 %v20205_v26, %v18592_v33 }
 0x460   : > { %v5760_v6 = vpop.f32.mrf.mxu2 }
 0x461   : > { %v5910_v21 = vpop.f32.mrf.mxu3  ;;  %v5773_v16 = vadd.f32 %v5760_v6, %v5631_v48  ;;  %v5550_v52 = vpop.f32.mrf.mxu0  ;;  %v14365_v48 = vld [vmem:[%s19823_s1 + $0x398] sm:$0xff] }
 0x462   : > { %v5633_v14 = vpop.f32.mrf.mxu1  ;;  %7365 = vmatpush.bf16.msra.mxu2 %v14365_v48 }
 0x463   : > { %v5634_v30 = vadd.f32 %v5633_v14, %v5550_v52  ;;  %v18594_v8 = vadd.f32 %v5910_v21, %v5773_v16  ;;  %v20206_v14 = vld [vmem:[#allocation44_spill] sm:$0xff] }
 0x464   : > { %6550 = vmatmul.bf16.gmra.mxu0 %v20142_v29  ;;  %v20207_v49 = vrot.slane %v20206_v14, 1 }
 0x465   : > { %6846 = vmatmul.bf16.gmra.mxu2 %v18514_v38  ;;  %v14357_v38 = vld [vmem:[%s19823_s1 + $0x358] sm:$0xff] }
 0x466   : > { %6763 = vmatmul.bf16.gmra.mxu1 %v18518_v11  ;;  %6975 = vmatmul.bf16.gmra.mxu3 %v18598_v46  ;;  %v18623_v48 = vsel %vm453_vm1, %v15917_v44, %v20207_v49 }
 0x467   : > { %7228 = vmatpush.bf16.msra.mxu1 %v14357_v38  ;;  %v14364_v38 = vld [vmem:[%s19823_s1 + $0x390] sm:$0xff] }
 0x468   : > { %v5763_v29 = vpop.f32.mrf.mxu2  ;;  %7366 = vmatpush.bf16.msra.mxu2 %v14364_v38  ;;  %v14371_v38 = vld [vmem:[%s19823_s1 + $0x3c8] sm:$0xff] }
 0x469   : > { %v5913_v11 = vpop.f32.mrf.mxu3  ;;  %v5774_v55 = vadd.f32 %v5763_v29, %v5634_v30  ;;  %v5552_v22 = vpop.f32.mrf.mxu0  ;;  %v6468_v30 = vpack.c.bf16 %v18504_v36, %v20153_v53  ;;  %v20208_v29 = vld [vmem:[#allocation41_spill] sm:$0xff]  ;;  %v14372_v53 = vld [vmem:[%s19823_s1 + $0x3d0] sm:$0xff] }
 0x46a   : > { %v5635_v6 = vpop.f32.mrf.mxu1  ;;  %v20209_v22 = vpack.c.bf16 0.0, %v20201_v59  ;;  %7516 = vmatpush.bf16.msra.mxu3 %v14372_v53  ;;  %v14392_v36 = vld [vmem:[%s19823_s1 + $0x470] sm:$0xff] }
 0x46b   : > { %v18616_v21 = vadd.f32 %v5913_v11, %v5774_v55  ;;  %v6894_v11 = vpack.c.bf16 %v18623_v48, %v20208_v29  ;;  %v14348_v6 = vld [vmem:[%s19823_s1 + $0x310] sm:$0xff] }
 0x46c   : > { %7116 = vmatpush.bf16.msra.mxu0 %v14348_v6  ;;  %v14355_v6 = vld [vmem:[%s19823_s1 + $0x348] sm:$0xff] }
 0x46e   : > { %7517 = vmatpush.bf16.msra.mxu3 %v14371_v38 }
 0x470   : > { %v5765_v16 = vpop.f32.mrf.mxu2 }
 0x471   : > { %v5915_v52 = vpop.f32.mrf.mxu3  ;;  %v6005_v4 = vpop.f32.mrf.mxu0 }
 0x472   : > { %v6143_v43 = vpop.f32.mrf.mxu1  ;;  %v6031_v41 = vadd.f32 %v6005_v4, %v18463_v31  ;;  %v14356_v31 = vld [vmem:[%s19823_s1 + $0x350] sm:$0xff] }
 0x473   : > { %7229 = vmatpush.bf16.msra.mxu1 %v14356_v31 }
 0x474   : > { %v6169_v55 = vadd.f32 %v6143_v43, %v6031_v41  ;;  %6554 = vmatmul.bf16.gmra.mxu0 %v6468_v30 }
 0x475   : > { %6850 = vmatmul.bf16.gmra.mxu2 %v20202_v32  ;;  %v14363_v32 = vld [vmem:[%s19823_s1 + $0x388] sm:$0xff] }
 0x476   : > { %6767 = vmatmul.bf16.gmra.mxu1 %v20209_v22  ;;  %6979 = vmatmul.bf16.gmra.mxu3 %v6894_v11  ;;  %v14347_v11 = vld [vmem:[%s19823_s1 + $0x308] sm:$0xff] }
 0x477   : > { %7367 = vmatpush.bf16.msra.mxu2 %v14363_v32  ;;  %7117 = vmatpush.bf16.msra.mxu0 %v14347_v11 }
 0x478   : > { %v6294_v41 = vpop.f32.mrf.mxu2  ;;  %7230 = vmatpush.bf16.msra.mxu1 %v14355_v6  ;;  %v14354_v6 = vld [vmem:[%s19823_s1 + $0x340] sm:$0xff] }
 0x479   : > { %v6408_v16 = vpop.f32.mrf.mxu3  ;;  %v6320_v52 = vadd.f32 %v6294_v41, %v6169_v55  ;;  %v6007_v49 = vpop.f32.mrf.mxu0 }
 0x47a   : > { %v6145_v4 = vpop.f32.mrf.mxu1  ;;  %v6032_v43 = vadd.f32 %v6007_v49, %v18477_v56  ;;  %v20211_v49 = vld [vmem:[#allocation52_spill] sm:$0xff] }
 0x47b   : > { %v18646_v30 = vadd.f32 %v6408_v16, %v6320_v52  ;;  %v20210_v52 = vld [vmem:[#allocation47_spill] sm:$0xff] }
 0x47c   : > { %v6170_v22 = vadd.f32 %v6145_v4, %v6032_v43  ;;  %v20212_v4 = vld [vmem:[#allocation53_spill] sm:$0xff]  ;;  %7231 = vmatpush.bf16.msra.mxu1 %v14354_v6 }
 0x480   : > { %v6296_v55 = vpop.f32.mrf.mxu2 }
 0x481   : > { %v6410_v56 = vpop.f32.mrf.mxu3  ;;  %v6321_v53 = vadd.f32 %v6296_v55, %v6170_v22  ;;  %v6010_v31 = vpop.f32.mrf.mxu0  ;;  %v14362_v22 = vld [vmem:[%s19823_s1 + $0x380] sm:$0xff] }
 0x482   : > { %v6148_v41 = vpop.f32.mrf.mxu1  ;;  %7368 = vmatpush.bf16.msra.mxu2 %v14362_v22  ;;  %v20214_v22 = vld [vmem:[#allocation57_spill] sm:$0xff] }
 0x483   : > { %v18660_v16 = vadd.f32 %v6410_v56, %v6321_v53  ;;  %v14370_v56 = vld [vmem:[%s19823_s1 + $0x3c0] sm:$0xff] }
 0x484   : > { %6558 = vmatmul.bf16.gmra.mxu0 %v20203_v37  ;;  %v14346_v37 = vld [vmem:[%s19823_s1 + $0x300] sm:$0xff]  ;;  %7518 = vmatpush.bf16.msra.mxu3 %v14370_v56  ;;  %v14401_v56 = vld [vmem:[%s19823_s1 + $0x278] sm:$0xff] }
 0x485   : > { %6854 = vmatmul.bf16.gmra.mxu2 %v20211_v49  ;;  %7118 = vmatpush.bf16.msra.mxu0 %v14346_v37  ;;  %v20215_v37 = vld [vmem:[#allocation61_spill] sm:$0xff] }
 0x486   : > { %6771 = vmatmul.bf16.gmra.mxu1 %v20210_v52  ;;  %6983 = vmatmul.bf16.gmra.mxu3 %v20212_v4 }
 0x488   : > { %v6299_v43 = vpop.f32.mrf.mxu2  ;;  %8057 = vmatpush.bf16.msrb.mxu3 %v14401_v56  ;;  %v20216_v56 = vld [vmem:[#allocation58_spill] sm:$0xff] }
 0x489   : > { %v6413_v32 = vpop.f32.mrf.mxu3  ;;  %v6011_v11 = vpop.f32.mrf.mxu0  ;;  %v6685_v17 = vpack.c.bf16 0.0, %v20216_v56 }
 0x48a   : > { %v6149_v38 = vpop.f32.mrf.mxu1  ;;  %v6033_v42 = vadd.f32 %v6011_v11, %v18510_v24  ;;  %v20213_v32 = vld [vmem:[#allocation54_spill] sm:$0xff] }
 0x48b   : > { %v18682_v11 = vpack.c.bf16 %v20213_v32, %v20118_v1 }
 0x48c   : > { %v6171_v55 = vadd.f32 %v6149_v38, %v6033_v42 }
 0x490   : > { %v6300_v24 = vpop.f32.mrf.mxu2 }
 0x491   : > { %v6414_v53 = vpop.f32.mrf.mxu3  ;;  %v6322_v31 = vadd.f32 %v6300_v24, %v6171_v55  ;;  %v6014_v42 = vpop.f32.mrf.mxu0  ;;  %v14409_v55 = vld [vmem:[%s19823_s1 + $0x2b8] sm:$0xff] }
 0x492   : > { %v6034_v43 = vadd.f32 %v6014_v42, %v18534_v9  ;;  %v14385_v9 = vld [vmem:[%s19823_s1 + $0x438] sm:$0xff]  ;;  %7974 = vmatpush.bf16.msrb.mxu2 %v14409_v55 }
 0x493   : > { %v6152_v41 = vpop.f32.mrf.mxu1  ;;  %v18684_v38 = vadd.f32 %v6414_v53, %v6322_v31  ;;  %7624 = vmatpush.bf16.msrb.mxu0 %v14385_v9  ;;  %v14393_v24 = vld [vmem:[%s19823_s1 + $0x478] sm:$0xff]  ;;  %v6471_v9 = vpack.c.bf16 %v18066_v19, %v20208_v29  ;;  %v14400_v19 = vld [vmem:[%s19823_s1 + $0x270] sm:$0xff] }
 0x494   : > { %v6172_v7 = vadd.f32 %v6152_v41, %v6034_v43  ;;  %6563 = vmatmul.bf16.gmra.mxu0 %v18598_v46  ;;  %7761 = vmatpush.bf16.msrb.mxu1 %v14393_v24 }
 0x495   : > { %6859 = vmatmul.bf16.gmra.mxu2 %v20214_v22  ;;  %8058 = vmatpush.bf16.msrb.mxu3 %v14400_v19 }
 0x496   : > { %6776 = vmatmul.bf16.gmra.mxu1 %v18682_v11  ;;  %6988 = vmatmul.bf16.gmra.mxu3 %v20215_v37 }
 0x498   : > { %v6303_v46 = vpop.f32.mrf.mxu2  ;;  %7762 = vmatpush.bf16.msrb.mxu1 %v14392_v36 }
 0x499   : > { %v6417_v6 = vpop.f32.mrf.mxu3  ;;  %v6323_v53 = vadd.f32 %v6303_v46, %v6172_v7  ;;  %v6016_v31 = vpop.f32.mrf.mxu0  ;;  %v14408_v7 = vld [vmem:[%s19823_s1 + $0x2b0] sm:$0xff] }
 0x49a   : > { %7975 = vmatpush.bf16.msrb.mxu2 %v14408_v7 }
 0x49b   : > { %v6154_v42 = vpop.f32.mrf.mxu1  ;;  %v18702_v41 = vadd.f32 %v6417_v6, %v6323_v53 }
 0x4a0   : > { %v6305_v43 = vpop.f32.mrf.mxu2 }
 0x4a1   : > { %v6419_v15 = vpop.f32.mrf.mxu3  ;;  %v6018_v60 = vpop.f32.mrf.mxu0  ;;  %v14383_v43 = vld [vmem:[%s19823_s1 + $0x428] sm:$0xff] }
 0x4a2   : > { %v6035_v55 = vadd.f32 %v6018_v60, %v18555_v5  ;;  %v14384_v15 = vld [vmem:[%s19823_s1 + $0x430] sm:$0xff] }
 0x4a3   : > { %v6156_v3 = vpop.f32.mrf.mxu1  ;;  %v20218_v60 = vld [vmem:[#allocation64_spill] sm:$0xff]  ;;  %7625 = vmatpush.bf16.msrb.mxu0 %v14384_v15 }
 0x4a4   : > { %v6173_v46 = vadd.f32 %v6156_v3, %v6035_v55  ;;  %6567 = vmatmul.bf16.gmra.mxu0 %v6471_v9  ;;  %v14399_v55 = vld [vmem:[%s19823_s1 + $0x268] sm:$0xff] }
 0x4a5   : > { %6863 = vmatmul.bf16.gmra.mxu2 %v20218_v60  ;;  %8059 = vmatpush.bf16.msrb.mxu3 %v14399_v55 }
 0x4a6   : > { %6780 = vmatmul.bf16.gmra.mxu1 %v6685_v17  ;;  %6992 = vmatmul.bf16.gmra.mxu3 %v6897_v61  ;;  %v14407_v61 = vld [vmem:[%s19823_s1 + $0x2a8] sm:$0xff] }
 0x4a7   : > { %7976 = vmatpush.bf16.msrb.mxu2 %v14407_v61  ;;  %7626 = vmatpush.bf16.msrb.mxu0 %v14383_v43 }
 0x4a8   : > { %v6307_v3 = vpop.f32.mrf.mxu2 }
 0x4a9   : > { %v6421_v5 = vpop.f32.mrf.mxu3  ;;  %v6324_v6 = vadd.f32 %v6307_v3, %v6173_v46  ;;  %v6020_v24 = vpop.f32.mrf.mxu0  ;;  %v14391_v46 = vld [vmem:[%s19823_s1 + $0x468] sm:$0xff] }
 0x4aa   : > { %v6036_v31 = vadd.f32 %v6020_v24, %v18569_v40  ;;  %7763 = vmatpush.bf16.msrb.mxu1 %v14391_v46  ;;  %v20221_v24 = vpack.c.bf16 %v20201_v59, %v20199_v28 }
 0x4ab   : > { %v6158_v53 = vpop.f32.mrf.mxu1  ;;  %v18726_v42 = vadd.f32 %v6421_v5, %v6324_v6  ;;  %v20219_v5 = vld [vmem:[#allocation40_spill] sm:$0xff] }
 0x4ac   : > { %v6174_v9 = vadd.f32 %v6158_v53, %v6036_v31  ;;  %v20220_v6 = vpack.c.bf16 %v20219_v5, %v20198_v45  ;;  %v20222_v53 = vpack.c.bf16 %v20208_v29, %v20205_v26  ;;  %v14406_v45 = vld [vmem:[%s19823_s1 + $0x2a0] sm:$0xff] }
 0x4ad   : > { %7977 = vmatpush.bf16.msrb.mxu2 %v14406_v45 }
 0x4b0   : > { %v6309_v7 = vpop.f32.mrf.mxu2 }
 0x4b1   : > { %v6423_v40 = vpop.f32.mrf.mxu3  ;;  %v6325_v15 = vadd.f32 %v6309_v7, %v6174_v9  ;;  %v6023_v19 = vpop.f32.mrf.mxu0 }
 0x4b3   : > { %v6161_v36 = vpop.f32.mrf.mxu1  ;;  %v18740_v3 = vadd.f32 %v6423_v40, %v6325_v15  ;;  %v14398_v15 = vld [vmem:[%s19823_s1 + $0x260] sm:$0xff] }
 0x4b4   : > { %7119 = vmatmul.bf16.vlgmr.msra.gmra.mxu0 %v20220_v6  ;;  %v20223_v36 = vld [vmem:[#allocation50_spill] sm:$0xff]  ;;  %8060 = vmatpush.bf16.msrb.mxu3 %v14398_v15 }
 0x4b5   : > { %7369 = vmatmul.bf16.vlgmr.msra.gmra.mxu2 %v20222_v53  ;;  %v7292_v5 = vpack.c.bf16 %v20223_v36, %v18623_v48  ;;  %v20227_v15 = vld [vmem:[#allocation46_spill] sm:$0xff] }
 0x4b6   : > { %7232 = vmatmul.bf16.vlgmr.msra.gmra.mxu1 %v20221_v24  ;;  %7519 = vmatmul.bf16.vlgmr.msra.gmra.mxu3 %v20211_v49  ;;  %v7155_v49 = vpack.c.bf16 %v20206_v14, %v20118_v1  ;;  %v20224_v24 = vld [vmem:[#allocation45_spill] sm:$0xff]  ;;  %v20225_v14 = vld [vmem:[#allocation39_spill] sm:$0xff]  ;;  %v7156_v36 = vpack.c.bf16 0.0, %v20227_v15 }
 0x4b7   : > { %v20226_v53 = vpack.c.bf16 %v20224_v24, %v20225_v14  ;;  %v20228_v24 = vld [vmem:[#allocation51_spill] sm:$0xff]  ;;  %v20229_v14 = vld [vmem:[#allocation48_spill] sm:$0xff] }
 0x4b8   : > { %v6312_v31 = vpop.f32.mrf.mxu2  ;;  %v14403_v15 = vld [vmem:[%s19823_s1 + $0x288] sm:$0xff] }
 0x4b9   : > { %v6426_v61 = vpop.f32.mrf.mxu3  ;;  %v6024_v43 = vpop.f32.mrf.mxu0  ;;  %v14405_v31 = vld [vmem:[%s19823_s1 + $0x298] sm:$0xff] }
 0x4ba   : > { %v6037_v9 = vadd.f32 %v6024_v43, %v18594_v8  ;;  %v14382_v8 = vld [vmem:[%s19823_s1 + $0x420] sm:$0xff]  ;;  %v14381_v61 = vld [vmem:[%s19823_s1 + $0x418] sm:$0xff]  ;;  %7978 = vmatpush.bf16.msrb.mxu2 %v14405_v31  ;;  %v20231_v31 = vld [vmem:[#allocation56_spill] sm:$0xff] }
 0x4bb   : > { %v6162_v55 = vpop.f32.mrf.mxu1  ;;  %7627 = vmatpush.bf16.msrb.mxu0 %v14382_v8  ;;  %v14397_v43 = vld [vmem:[%s19823_s1 + $0x258] sm:$0xff] }
 0x4bc   : > { %v6175_v7 = vadd.f32 %v6162_v55, %v6037_v9  ;;  %8061 = vmatpush.bf16.msrb.mxu3 %v14397_v43 }
 0x4bf   : > { %7628 = vmatpush.bf16.msrb.mxu0 %v14381_v61  ;;  %v20232_v61 = vld [vmem:[#allocation49_spill] sm:$0xff] }
 0x4c0   : > { %v6313_v59 = vpop.f32.mrf.mxu2  ;;  %v20233_v43 = vpack.c.bf16 %v20231_v31, %v20232_v61 }
 0x4c1   : > { %v6427_v28 = vpop.f32.mrf.mxu3  ;;  %v6326_v40 = vadd.f32 %v6313_v59, %v6175_v7  ;;  %v6027_v46 = vpop.f32.mrf.mxu0 }
 0x4c2   : > { %v6038_v29 = vadd.f32 %v6027_v46, %v18616_v21  ;;  %v14390_v21 = vld [vmem:[%s19823_s1 + $0x460] sm:$0xff] }
 0x4c3   : > { %v6165_v26 = vpop.f32.mrf.mxu1  ;;  %v18765_v19 = vadd.f32 %v6427_v28, %v6326_v40  ;;  %7764 = vmatpush.bf16.msrb.mxu1 %v14390_v21  ;;  %v14404_v21 = vld [vmem:[%s19823_s1 + $0x290] sm:$0xff] }
 0x4c4   : > { %v6176_v6 = vadd.f32 %v6165_v26, %v6038_v29  ;;  %7124 = vmatmul.bf16.gmra.mxu0 %v20226_v53  ;;  %v18793_v26 = vld [vmem:[%s19824_s2 + $0x1] ss:$0 sm:$0xff]  ;;  %v20230_v53 = vpack.c.bf16 %v20228_v24, %v20229_v14  ;;  %7979 = vmatpush.bf16.msrb.mxu2 %v14404_v21 }
 0x4c5   : > { %7374 = vmatmul.bf16.gmra.mxu2 %v7292_v5  ;;  %v12605_v5 = vld [vmem:[%s14792_s5 + $0x18] sm:$0xff] }
 0x4c6   : > { %7237 = vmatmul.bf16.gmra.mxu1 %v7155_v49  ;;  %7524 = vmatmul.bf16.gmra.mxu3 %v20214_v22  ;;  %v14389_v22 = vld [vmem:[%s19823_s1 + $0x458] sm:$0xff] }
 0x4c7   : > { %7765 = vmatpush.bf16.msrb.mxu1 %v14389_v22 }
 0x4c8   : > { %v6316_v55 = vpop.f32.mrf.mxu2  ;;  %7980 = vmatpush.bf16.msrb.mxu2 %v14403_v15 }
 0x4c9   : > { %v6430_v9 = vpop.f32.mrf.mxu3  ;;  %v6327_v45 = vadd.f32 %v6316_v55, %v6176_v6  ;;  %v6029_v7 = vpop.f32.mrf.mxu0 }
 0x4cb   : > { %v6167_v59 = vpop.f32.mrf.mxu1  ;;  %v18788_v28 = vadd.f32 %v6430_v9, %v6327_v45 }
 0x4d0   : > { %v6318_v40 = vpop.f32.mrf.mxu2 }
 0x4d1   : > { %v6432_v46 = vpop.f32.mrf.mxu3  ;;  %v6546_v29 = vpop.f32.mrf.mxu0 }
 0x4d2   : > { %v6572_v8 = vadd.f32 %v6546_v29, %v18646_v30  ;;  %v14380_v46 = vld [vmem:[%s19823_s1 + $0x410] sm:$0xff] }
 0x4d3   : > { %v6759_v49 = vpop.f32.mrf.mxu1  ;;  %v14388_v29 = vld [vmem:[%s19823_s1 + $0x450] sm:$0xff]  ;;  %7629 = vmatpush.bf16.msrb.mxu0 %v14380_v46  ;;  %v20240_v46 = vld [vmem:[#allocation73_spill] sm:$0xff] }
 0x4d4   : > { %v6581_v6 = vadd.f32 %v18793_v26, %v6572_v8  ;;  %7128 = vmatmul.bf16.gmra.mxu0 %v20230_v53  ;;  %v12606_v8 = vld [vmem:[%s14792_s5 + $0x20] sm:$0xff]  ;;  %7766 = vmatpush.bf16.msrb.mxu1 %v14388_v29  ;;  %v14387_v53 = vld [vmem:[%s19823_s1 + $0x448] sm:$0xff] }
 0x4d5   : > { %7378 = vmatmul.bf16.gmra.mxu2 %v20233_v43 }
 0x4d6   : > { %7241 = vmatmul.bf16.gmra.mxu1 %v7156_v36  ;;  %7528 = vmatmul.bf16.gmra.mxu3 %v20218_v60  ;;  %v6597_v30 = vadd.f32 %v12605_v5, %v6581_v6  ;;  %v14396_v60 = vld [vmem:[%s19823_s1 + $0x250] sm:$0xff]  ;;  %v14379_v36 = vld [vmem:[%s19823_s1 + $0x408] sm:$0xff] }
 0x4d7   : > { %8062 = vmatpush.bf16.msrb.mxu3 %v14396_v60  ;;  %v14395_v5 = vld [vmem:[%s19823_s1 + $0x248] sm:$0xff]  ;;  %7630 = vmatpush.bf16.msrb.mxu0 %v14379_v36  ;;  %v14402_v36 = vld [vmem:[%s19823_s1 + $0x280] sm:$0xff] }
 0x4d8   : > { %v6605_v55 = vmax.f32 %v6597_v30, 0.0  ;;  %v6842_v9 = vpop.f32.mrf.mxu2  ;;  %7767 = vmatpush.bf16.msrb.mxu1 %v14387_v53  ;;  %7981 = vmatpush.bf16.msrb.mxu2 %v14402_v36  ;;  %v20247_v36 = vld [vmem:[#allocation77_spill] sm:$0xff] }
 0x4d9   : > { %v6971_v22 = vpop.f32.mrf.mxu3  ;;  %v6843_v45 = vadd.f32 %v6842_v9, %v6759_v49  ;;  %v6548_v7 = vpop.f32.mrf.mxu0  ;;  %v20235_v9 = vld [vmem:[#allocation55_spill] sm:$0xff] }
 0x4da   : > { %6613 = vst [vmem:[%s18812_s28] sm:$0xff] %v6605_v55  ;;  %v6573_v40 = vadd.f32 %v6548_v7, %v18660_v16  ;;  %v20234_v55 = vld [vmem:[#allocation63_spill] sm:$0xff] }
 0x4db   : > { %v6761_v59 = vpop.f32.mrf.mxu1  ;;  %v18825_v49 = vadd.f32 %v6971_v22, %v6843_v45  ;;  %8063 = vmatpush.bf16.msrb.mxu3 %v14395_v5  ;;  %v20236_v22 = vpack.c.bf16 %v20234_v55, %v20235_v9  ;;  %v20237_v45 = vpack.c.bf16 %v20216_v56, %v20213_v32  ;;  %v20238_v7 = vld [vmem:[#allocation59_spill] sm:$0xff] }
 0x4dc   : > { %v6582_v16 = vadd.f32 %v18793_v26, %v6573_v40  ;;  %v20239_v40 = vpack.c.bf16 %v20217_v51, %v20238_v7 }
 0x4de   : > { %v6598_v21 = vadd.f32 %v12606_v8, %v6582_v16  ;;  %v12607_v16 = vld [vmem:[%s14792_s5 + $0x30] sm:$0xff] }
 0x4e0   : > { %v6606_v6 = vmax.f32 %v6598_v21, 0.0  ;;  %v6844_v24 = vpop.f32.mrf.mxu2 }
 0x4e1   : > { %v6973_v14 = vpop.f32.mrf.mxu3  ;;  %v6845_v31 = vadd.f32 %v6844_v24, %v6761_v59  ;;  %v6551_v61 = vpop.f32.mrf.mxu0 }
 0x4e2   : > { %6614 = vst [vmem:[%s18812_s28 + $0x8] sm:$0xff] %v6606_v6 }
 0x4e3   : > { %v6764_v43 = vpop.f32.mrf.mxu1  ;;  %v18842_v30 = vadd.f32 %v6973_v14, %v6845_v31 }
 0x4e4   : > { %7132 = vmatmul.bf16.gmra.mxu0 %v20236_v22  ;;  %v14378_v22 = vld [vmem:[%s19823_s1 + $0x400] sm:$0xff] }
 0x4e5   : > { %7382 = vmatmul.bf16.gmra.mxu2 %v20239_v40  ;;  %v20243_v40 = vld [vmem:[#allocation70_spill] sm:$0xff]  ;;  %7631 = vmatpush.bf16.msrb.mxu0 %v14378_v22 }
 0x4e6   : > { %7245 = vmatmul.bf16.gmra.mxu1 %v20237_v45  ;;  %7532 = vmatmul.bf16.gmra.mxu3 %v20240_v46  ;;  %v14394_v45 = vld [vmem:[%s19823_s1 + $0x240] sm:$0xff] }
 0x4e7   : > { %8064 = vmatpush.bf16.msrb.mxu3 %v14394_v45 }
 0x4e8   : > { %v6847_v59 = vpop.f32.mrf.mxu2 }
 0x4e9   : > { %v6976_v60 = vpop.f32.mrf.mxu3  ;;  %v6552_v29 = vpop.f32.mrf.mxu0 }
 0x4ea   : > { %v6574_v15 = vadd.f32 %v6552_v29, %v18684_v38  ;;  %v20241_v38 = vld [vmem:[#allocation65_spill] sm:$0xff]  ;;  %v14386_v60 = vld [vmem:[%s19823_s1 + $0x440] sm:$0xff] }
 0x4eb   : > { %v6765_v8 = vpop.f32.mrf.mxu1  ;;  %v7158_v43 = vpack.c.bf16 %v20241_v38, %v20118_v1  ;;  %v20242_v55 = vrot.slane %v20241_v38, 1  ;;  %7768 = vmatpush.bf16.msrb.mxu1 %v14386_v60 }
 0x4ec   : > { %v6583_v32 = vadd.f32 %v18793_v26, %v6574_v15  ;;  %v20245_v15 = vld [vmem:[#allocation62_spill] sm:$0xff] }
 0x4ed   : > { %v18869_v9 = vsel %vm453_vm1, %v15917_v44, %v20242_v55 }
 0x4ee   : > { %v6599_v5 = vadd.f32 %v12607_v16, %v6583_v32  ;;  %v7295_v59 = vpack.c.bf16 %v20243_v40, %v18869_v9  ;;  %v14433_v32 = vld [vmem:[%s19823_s1 + $0x378] sm:$0xff] }
 0x4ef   : > { %8448 = vmatpush.bf16.msra.mxu2 %v14433_v32 }
 0x4f0   : > { %v6607_v21 = vmax.f32 %v6599_v5, 0.0  ;;  %v6848_v6 = vpop.f32.mrf.mxu2  ;;  %v14417_v5 = vld [vmem:[%s19823_s1 + $0x2f8] sm:$0xff] }
 0x4f1   : > { %v6977_v24 = vpop.f32.mrf.mxu3  ;;  %v6849_v14 = vadd.f32 %v6848_v6, %v6765_v8  ;;  %v6555_v53 = vpop.f32.mrf.mxu0  ;;  %v20244_v8 = vld [vmem:[#allocation66_spill] sm:$0xff]  ;;  %8186 = vmatpush.bf16.msra.mxu0 %v14417_v5 }
 0x4f2   : > { %6615 = vst [vmem:[%s18812_s28 + $0x10] sm:$0xff] %v6607_v21  ;;  %v6575_v61 = vadd.f32 %v6555_v53, %v18702_v41  ;;  %v12608_v41 = vld [vmem:[%s14792_s5 + $0x38] sm:$0xff]  ;;  %v20246_v16 = vpack.c.bf16 %v20244_v8, %v20245_v15  ;;  %v12609_v15 = vld [vmem:[%s14792_s5 + $0x48] sm:$0xff] }
 0x4f3   : > { %v6768_v31 = vpop.f32.mrf.mxu1  ;;  %v18877_v7 = vadd.f32 %v6977_v24, %v6849_v14  ;;  %v14441_v21 = vld [vmem:[%s19823_s1 + $0x3b8] sm:$0xff] }
 0x4f4   : > { %v6584_v29 = vadd.f32 %v18793_v26, %v6575_v61  ;;  %7137 = vmatmul.bf16.gmra.mxu0 %v20246_v16  ;;  %8585 = vmatpush.bf16.msra.mxu3 %v14441_v21  ;;  %v14425_v61 = vld [vmem:[%s19823_s1 + $0x338] sm:$0xff]  ;;  %v20249_v16 = vld [vmem:[#allocation72_spill] sm:$0xff]  ;;  %v20250_v21 = vld [vmem:[#allocation71_spill] sm:$0xff] }
 0x4f5   : > { %7387 = vmatmul.bf16.gmra.mxu2 %v7295_v59  ;;  %8335 = vmatpush.bf16.msra.mxu1 %v14425_v61  ;;  %v7296_v32 = vpack.c.bf16 %v18592_v33, %v20249_v16  ;;  %v14439_v16 = vld [vmem:[%s19823_s1 + $0x3a8] sm:$0xff] }
 0x4f6   : > { %7250 = vmatmul.bf16.gmra.mxu1 %v7158_v43  ;;  %7537 = vmatmul.bf16.gmra.mxu3 %v20247_v36  ;;  %v6600_v6 = vadd.f32 %v12608_v41, %v6584_v29  ;;  %v20248_v29 = vld [vmem:[#allocation67_spill] sm:$0xff] }
 0x4f7   : > { %v7159_v8 = vpack.c.bf16 0.0, %v20248_v29 }
 0x4f8   : > { %v6608_v24 = vmax.f32 %v6600_v6, 0.0  ;;  %v6851_v14 = vpop.f32.mrf.mxu2  ;;  %v20251_v6 = vld [vmem:[#allocation69_spill] sm:$0xff] }
 0x4f9   : > { %v6980_v53 = vpop.f32.mrf.mxu3  ;;  %v6852_v38 = vadd.f32 %v6851_v14, %v6768_v31  ;;  %v6557_v43 = vpop.f32.mrf.mxu0  ;;  %v14432_v31 = vld [vmem:[%s19823_s1 + $0x370] sm:$0xff] }
 0x4fa   : > { %6616 = vst [vmem:[%s18812_s28 + $0x18] sm:$0xff] %v6608_v24  ;;  %v20252_v24 = vpack.c.bf16 %v20250_v21, %v20251_v6  ;;  %8449 = vmatpush.bf16.msra.mxu2 %v14432_v31  ;;  %v14423_v6 = vld [vmem:[%s19823_s1 + $0x328] sm:$0xff] }
 0x4fb   : > { %v6770_v55 = vpop.f32.mrf.mxu1  ;;  %v18903_v41 = vadd.f32 %v6980_v53, %v6852_v38 }
 0x500   : > { %v6853_v22 = vpop.f32.mrf.mxu2 }
 0x501   : > { %v6982_v45 = vpop.f32.mrf.mxu3  ;;  %v6559_v40 = vpop.f32.mrf.mxu0 }
 0x502   : > { %v6576_v60 = vadd.f32 %v6559_v40, %v18726_v42  ;;  %v20253_v42 = vld [vmem:[#allocation83_spill] sm:$0xff]  ;;  %v14416_v45 = vld [vmem:[%s19823_s1 + $0x2f0] sm:$0xff] }
 0x503   : > { %v6772_v59 = vpop.f32.mrf.mxu1  ;;  %v14440_v40 = vld [vmem:[%s19823_s1 + $0x3b0] sm:$0xff]  ;;  %8187 = vmatpush.bf16.msra.mxu0 %v14416_v45 }
 0x504   : > { %v6585_v5 = vadd.f32 %v18793_v26, %v6576_v60  ;;  %7141 = vmatmul.bf16.gmra.mxu0 %v20252_v24  ;;  %v14424_v60 = vld [vmem:[%s19823_s1 + $0x330] sm:$0xff]  ;;  %8586 = vmatpush.bf16.msra.mxu3 %v14440_v40  ;;  %v12611_v40 = vld [vmem:[%s14792_s5 + $0x60] sm:$0xff] }
 0x505   : > { %7391 = vmatmul.bf16.gmra.mxu2 %v7296_v32  ;;  %8336 = vmatpush.bf16.msra.mxu1 %v14424_v60  ;;  %v14430_v60 = vld [vmem:[%s19823_s1 + $0x360] sm:$0xff] }
 0x506   : > { %7254 = vmatmul.bf16.gmra.mxu1 %v7159_v8  ;;  %7541 = vmatmul.bf16.gmra.mxu3 %v20253_v42  ;;  %v6601_v14 = vadd.f32 %v12609_v15, %v6585_v5  ;;  %v14431_v8 = vld [vmem:[%s19823_s1 + $0x368] sm:$0xff] }
 0x507   : > { %v14415_v15 = vld [vmem:[%s19823_s1 + $0x2e8] sm:$0xff]  ;;  %8450 = vmatpush.bf16.msra.mxu2 %v14431_v8 }
 0x508   : > { %v6609_v53 = vmax.f32 %v6601_v14, 0.0  ;;  %v6855_v61 = vpop.f32.mrf.mxu2  ;;  %8188 = vmatpush.bf16.msra.mxu0 %v14415_v15  ;;  %8587 = vmatpush.bf16.msra.mxu3 %v14439_v16 }
 0x509   : > { %v6984_v33 = vpop.f32.mrf.mxu3  ;;  %v6856_v38 = vadd.f32 %v6855_v61, %v6772_v59  ;;  %v6561_v43 = vpop.f32.mrf.mxu0  ;;  %v12610_v59 = vld [vmem:[%s14792_s5 + $0x50] sm:$0xff]  ;;  %8337 = vmatpush.bf16.msra.mxu1 %v14423_v6  ;;  %v12612_v6 = vld [vmem:[%s14792_s5 + $0x68] sm:$0xff] }
 0x50a   : > { %6617 = vst [vmem:[%s18812_s28 + $0x20] sm:$0xff] %v6609_v53  ;;  %v6577_v22 = vadd.f32 %v6561_v43, %v18740_v3 }
 0x50b   : > { %v6774_v55 = vpop.f32.mrf.mxu1  ;;  %v18929_v29 = vadd.f32 %v6984_v33, %v6856_v38  ;;  %v20254_v33 = vld [vmem:[#allocation68_spill] sm:$0xff]  ;;  %8451 = vmatpush.bf16.msra.mxu2 %v14430_v60 }
 0x50c   : > { %v6586_v3 = vadd.f32 %v18793_v26, %v6577_v22 }
 0x50e   : > { %v6602_v32 = vadd.f32 %v12610_v59, %v6586_v3 }
 0x510   : > { %v6610_v31 = vmax.f32 %v6602_v32, 0.0  ;;  %v6857_v5 = vpop.f32.mrf.mxu2 }
 0x511   : > { %v6986_v21 = vpop.f32.mrf.mxu3  ;;  %v6858_v24 = vadd.f32 %v6857_v5, %v6774_v55  ;;  %v6564_v14 = vpop.f32.mrf.mxu0 }
 0x512   : > { %6618 = vst [vmem:[%s18812_s28 + $0x28] sm:$0xff] %v6610_v31 }
 0x513   : > { %v6777_v53 = vpop.f32.mrf.mxu1  ;;  %v18946_v61 = vadd.f32 %v6986_v21, %v6858_v24  ;;  %v20255_v24 = vld [vmem:[#allocation75_spill] sm:$0xff] }
 0x514   : > { %7632 = vmatmul.bf16.vlgmr.msrb.gmra.mxu0 %v20210_v52  ;;  %v18974_v14 = vpack.c.bf16 %v20255_v24, %v20118_v1 }
 0x515   : > { %7982 = vmatmul.bf16.vlgmr.msrb.gmra.mxu2 %v20254_v33 }
 0x516   : > { %7769 = vmatmul.bf16.vlgmr.msrb.gmra.mxu1 %v20212_v4  ;;  %8065 = vmatmul.bf16.vlgmr.msrb.gmra.mxu3 %v20240_v46  ;;  %v14414_v4 = vld [vmem:[%s19823_s1 + $0x2e0] sm:$0xff] }
 0x517   : > { %v14438_v46 = vld [vmem:[%s19823_s1 + $0x3a0] sm:$0xff]  ;;  %8189 = vmatpush.bf16.msra.mxu0 %v14414_v4 }
 0x518   : > { %v6860_v38 = vpop.f32.mrf.mxu2  ;;  %8588 = vmatpush.bf16.msra.mxu3 %v14438_v46 }
 0x519   : > { %v6989_v43 = vpop.f32.mrf.mxu3  ;;  %v6565_v22 = vpop.f32.mrf.mxu0  ;;  %v14413_v38 = vld [vmem:[%s19823_s1 + $0x2d8] sm:$0xff] }
 0x51a   : > { %v6578_v55 = vadd.f32 %v6565_v22, %v18765_v19  ;;  %v14422_v19 = vld [vmem:[%s19823_s1 + $0x320] sm:$0xff]  ;;  %v14437_v43 = vld [vmem:[%s19823_s1 + $0x398] sm:$0xff] }
 0x51b   : > { %v6778_v45 = vpop.f32.mrf.mxu1  ;;  %8338 = vmatpush.bf16.msra.mxu1 %v14422_v19  ;;  %8190 = vmatpush.bf16.msra.mxu0 %v14413_v38 }
 0x51c   : > { %v6587_v52 = vadd.f32 %v18793_v26, %v6578_v55  ;;  %8589 = vmatpush.bf16.msra.mxu3 %v14437_v43 }
 0x51e   : > { %v6603_v59 = vadd.f32 %v12611_v40, %v6587_v52 }
 0x520   : > { %v6611_v8 = vmax.f32 %v6603_v59, 0.0  ;;  %v6861_v3 = vpop.f32.mrf.mxu2 }
 0x521   : > { %v6990_v15 = vpop.f32.mrf.mxu3  ;;  %v6862_v16 = vadd.f32 %v6861_v3, %v6778_v45  ;;  %v6568_v32 = vpop.f32.mrf.mxu0  ;;  %v7693_v3 = vpack.c.bf16 %v18869_v9, %v20217_v51  ;;  %v14420_v51 = vld [vmem:[%s19823_s1 + $0x310] sm:$0xff] }
 0x522   : > { %6619 = vst [vmem:[%s18812_s28 + $0x30] sm:$0xff] %v6611_v8  ;;  %v6579_v5 = vadd.f32 %v6568_v32, %v18788_v28  ;;  %v14429_v28 = vld [vmem:[%s19823_s1 + $0x358] sm:$0xff]  ;;  %v14428_v32 = vld [vmem:[%s19823_s1 + $0x350] sm:$0xff] }
 0x523   : > { %v6781_v31 = vpop.f32.mrf.mxu1  ;;  %v18969_v21 = vadd.f32 %v6990_v15, %v6862_v16  ;;  %8452 = vmatpush.bf16.msra.mxu2 %v14429_v28  ;;  %v20256_v15 = vld [vmem:[#allocation78_spill] sm:$0xff] }
 0x524   : > { %v6588_v53 = vadd.f32 %v18793_v26, %v6579_v5  ;;  %7637 = vmatmul.bf16.gmra.mxu0 %v18682_v11  ;;  %v7559_v16 = vpack.c.bf16 0.0, %v20256_v15  ;;  %v14412_v5 = vld [vmem:[%s19823_s1 + $0x2d0] sm:$0xff] }
 0x525   : > { %7987 = vmatmul.bf16.gmra.mxu2 %v18974_v14  ;;  %8191 = vmatpush.bf16.msra.mxu0 %v14412_v5 }
 0x526   : > { %7774 = vmatmul.bf16.gmra.mxu1 %v20215_v37  ;;  %8070 = vmatmul.bf16.gmra.mxu3 %v20247_v36  ;;  %v6604_v11 = vadd.f32 %v12612_v6, %v6588_v53  ;;  %v14421_v36 = vld [vmem:[%s19823_s1 + $0x318] sm:$0xff] }
 0x527   : > { %8339 = vmatpush.bf16.msra.mxu1 %v14421_v36  ;;  %8453 = vmatpush.bf16.msra.mxu2 %v14428_v32  ;;  %v14419_v36 = vld [vmem:[%s19823_s1 + $0x308] sm:$0xff] }
 0x528   : > { %v6612_v37 = vmax.f32 %v6604_v11, 0.0  ;;  %v6864_v22 = vpop.f32.mrf.mxu2  ;;  %v14411_v11 = vld [vmem:[%s19823_s1 + $0x2c8] sm:$0xff] }
 0x529   : > { %v6993_v45 = vpop.f32.mrf.mxu3  ;;  %v6865_v55 = vadd.f32 %v6864_v22, %v6781_v31  ;;  %v6570_v40 = vpop.f32.mrf.mxu0  ;;  %8192 = vmatpush.bf16.msra.mxu0 %v14411_v11 }
 0x52a   : > { %6620 = vst [vmem:[%s18812_s28 + $0x38] sm:$0xff] %v6612_v37  ;;  %v14435_v37 = vld [vmem:[%s19823_s1 + $0x388] sm:$0xff] }
 0x52b   : > { %v6783_v60 = vpop.f32.mrf.mxu1  ;;  %v18994_v52 = vadd.f32 %v6993_v45, %v6865_v55  ;;  %8340 = vmatpush.bf16.msra.mxu1 %v14420_v51 }
 0x52f   : > { %8341 = vmatpush.bf16.msra.mxu1 %v14419_v36  ;;  %v19067_v36 = vpack.c.bf16 %v17683_v50, %v20118_v1 }
 0x530   : > { %v6866_v4 = vpop.f32.mrf.mxu2 }
 0x531   : > { %v6995_v46 = vpop.f32.mrf.mxu3  ;;  %v7120_v19 = vpop.f32.mrf.mxu0 }
 0x532   : > { %v7146_v8 = vadd.f32 %v7120_v19, %v18825_v49  ;;  %v14436_v49 = vld [vmem:[%s19823_s1 + $0x390] sm:$0xff]  ;;  %v20257_v46 = vld [vmem:[#allocation74_spill] sm:$0xff]  ;;  %v20258_v19 = vld [vmem:[#allocation87_spill] sm:$0xff] }
 0x533   : > { %v7233_v59 = vpop.f32.mrf.mxu1  ;;  %8590 = vmatpush.bf16.msra.mxu3 %v14436_v49  ;;  %v14426_v49 = vld [vmem:[%s19823_s1 + $0x340] sm:$0xff] }
 0x534   : > { %v7259_v31 = vadd.f32 %v7233_v59, %v7146_v8  ;;  %7641 = vmatmul.bf16.gmra.mxu0 %v6685_v17  ;;  %v20259_v59 = vld [vmem:[#allocation90_spill] sm:$0xff] }
 0x535   : > { %7991 = vmatmul.bf16.gmra.mxu2 %v7559_v16 }
 0x536   : > { %7778 = vmatmul.bf16.gmra.mxu1 %v7693_v3  ;;  %8074 = vmatmul.bf16.gmra.mxu3 %v20253_v42  ;;  %v14427_v42 = vld [vmem:[%s19823_s1 + $0x348] sm:$0xff] }
 0x537   : > { %8454 = vmatpush.bf16.msra.mxu2 %v14427_v42  ;;  %8591 = vmatpush.bf16.msra.mxu3 %v14435_v37  ;;  %v20260_v42 = vrot.slane %v20255_v24, 1 }
 0x538   : > { %v7370_v17 = vpop.f32.mrf.mxu2 }
 0x539   : > { %v7520_v56 = vpop.f32.mrf.mxu3  ;;  %v7396_v6 = vadd.f32 %v7370_v17, %v7259_v31  ;;  %v7122_v53 = vpop.f32.mrf.mxu0  ;;  %v14434_v17 = vld [vmem:[%s19823_s1 + $0x380] sm:$0xff]  ;;  %v19056_v11 = vsel %vm453_vm1, %v15917_v44, %v20260_v42 }
 0x53a   : > { %v7147_v38 = vadd.f32 %v7122_v53, %v18842_v30 }
 0x53b   : > { %v7235_v28 = vpop.f32.mrf.mxu1  ;;  %v19018_v43 = vadd.f32 %v7520_v56, %v7396_v6  ;;  %v14418_v56 = vld [vmem:[%s19823_s1 + $0x300] sm:$0xff]  ;;  %8455 = vmatpush.bf16.msra.mxu2 %v14426_v49  ;;  %8592 = vmatpush.bf16.msra.mxu3 %v14434_v17 }
 0x53c   : > { %v7260_v22 = vadd.f32 %v7235_v28, %v7147_v38  ;;  %8342 = vmatpush.bf16.msra.mxu1 %v14418_v56 }
 0x540   : > { %v7372_v45 = vpop.f32.mrf.mxu2 }
 0x541   : > { %v7522_v30 = vpop.f32.mrf.mxu3  ;;  %v7397_v55 = vadd.f32 %v7372_v45, %v7260_v22  ;;  %v7125_v40 = vpop.f32.mrf.mxu0  ;;  %v20261_v22 = vld [vmem:[#allocation82_spill] sm:$0xff] }
 0x542   : > { %v19061_v45 = vpack.c.bf16 %v20261_v22, %v19056_v11  ;;  %v14449_v40 = vld [vmem:[%s19823_s1 + $0x3f8] sm:$0xff] }
 0x543   : > { %v7238_v60 = vpop.f32.mrf.mxu1  ;;  %v19032_v4 = vadd.f32 %v7522_v30, %v7397_v55 }
 0x544   : > { %7645 = vmatmul.bf16.gmra.mxu0 %v20254_v33  ;;  %v14410_v33 = vld [vmem:[%s19823_s1 + $0x2c0] sm:$0xff]  ;;  %v14481_v60 = vld [vmem:[%s19823_s1 + $0x2b8] sm:$0xff] }
 0x545   : > { %7995 = vmatmul.bf16.gmra.mxu2 %v20258_v19  ;;  %8193 = vmatpush.bf16.msra.mxu0 %v14410_v33 }
 0x546   : > { %7782 = vmatmul.bf16.gmra.mxu1 %v20257_v46  ;;  %8078 = vmatmul.bf16.gmra.mxu3 %v20259_v59 }
 0x547   : > { %9198 = vmatpush.bf16.msrb.mxu3 %v14481_v60 }
 0x548   : > { %v7375_v8 = vpop.f32.mrf.mxu2 }
 0x549   : > { %v7525_v3 = vpop.f32.mrf.mxu3  ;;  %v7126_v32 = vpop.f32.mrf.mxu0  ;;  %8735 = vmatpush.bf16.msrb.mxu0 %v14449_v40 }
 0x54a   : > { %v7148_v5 = vadd.f32 %v7126_v32, %v18877_v7  ;;  %v14457_v3 = vld [vmem:[%s19823_s1 + $0x438] sm:$0xff] }
 0x54b   : > { %v7239_v31 = vpop.f32.mrf.mxu1  ;;  %8848 = vmatpush.bf16.msrb.mxu1 %v14457_v3  ;;  %v14463_v3 = vld [vmem:[%s19823_s1 + $0x468] sm:$0xff] }
 0x54c   : > { %v7261_v51 = vadd.f32 %v7239_v31, %v7148_v5 }
 0x550   : > { %v7376_v7 = vpop.f32.mrf.mxu2 }
 0x551   : > { %v7526_v6 = vpop.f32.mrf.mxu3  ;;  %v7398_v53 = vadd.f32 %v7376_v7, %v7261_v51  ;;  %v7129_v28 = vpop.f32.mrf.mxu0 }
 0x552   : > { %v7149_v37 = vadd.f32 %v7129_v28, %v18903_v41  ;;  %v14465_v41 = vld [vmem:[%s19823_s1 + $0x478] sm:$0xff]  ;;  %v7909_v28 = vpack.c.bf16 0.0, %v17726_v13 }
 0x553   : > { %v7242_v38 = vpop.f32.mrf.mxu1  ;;  %v19063_v30 = vadd.f32 %v7526_v6, %v7398_v53  ;;  %8985 = vmatpush.bf16.msrb.mxu2 %v14465_v41  ;;  %v20262_v6 = vld [vmem:[#allocation81_spill] sm:$0xff] }
 0x554   : > { %v7262_v55 = vadd.f32 %v7242_v38, %v7149_v37  ;;  %7650 = vmatmul.bf16.gmra.mxu0 %v18974_v14  ;;  %v7696_v53 = vpack.c.bf16 %v18623_v48, %v20262_v6  ;;  %v14464_v38 = vld [vmem:[%s19823_s1 + $0x470] sm:$0xff] }
 0x555   : > { %8000 = vmatmul.bf16.gmra.mxu2 %v19067_v36  ;;  %v14448_v37 = vld [vmem:[%s19823_s1 + $0x3f0] sm:$0xff] }
 0x556   : > { %7787 = vmatmul.bf16.gmra.mxu1 %v19061_v45  ;;  %8083 = vmatmul.bf16.gmra.mxu3 %v17722_v54  ;;  %v14456_v48 = vld [vmem:[%s19823_s1 + $0x430] sm:$0xff] }
 0x557   : > { %8986 = vmatpush.bf16.msrb.mxu2 %v14464_v38  ;;  %8736 = vmatpush.bf16.msrb.mxu0 %v14448_v37  ;;  %v20263_v38 = vld [vmem:[#allocation80_spill] sm:$0xff] }
 0x558   : > { %v7379_v14 = vpop.f32.mrf.mxu2  ;;  %8849 = vmatpush.bf16.msrb.mxu1 %v14456_v48  ;;  %v20267_v48 = vpack.c.bf16 %v20262_v6, %v20261_v22 }
 0x559   : > { %v7529_v8 = vpop.f32.mrf.mxu3  ;;  %v7399_v32 = vadd.f32 %v7379_v14, %v7262_v55  ;;  %v7131_v31 = vpop.f32.mrf.mxu0 }
 0x55a   : > { %v14479_v31 = vld [vmem:[%s19823_s1 + $0x2a8] sm:$0xff] }
 0x55b   : > { %v7244_v5 = vpop.f32.mrf.mxu1  ;;  %v19085_v49 = vadd.f32 %v7529_v8, %v7399_v32  ;;  %v14447_v32 = vld [vmem:[%s19823_s1 + $0x3e8] sm:$0xff]  ;;  %8987 = vmatpush.bf16.msrb.mxu2 %v14463_v3 }
 0x55c   : > { %8737 = vmatpush.bf16.msrb.mxu0 %v14447_v32 }
 0x560   : > { %v7381_v51 = vpop.f32.mrf.mxu2 }
 0x561   : > { %v7531_v33 = vpop.f32.mrf.mxu3  ;;  %v7133_v17 = vpop.f32.mrf.mxu0 }
 0x562   : > { %v7150_v7 = vadd.f32 %v7133_v17, %v18929_v29  ;;  %v14480_v29 = vld [vmem:[%s19823_s1 + $0x2b0] sm:$0xff]  ;;  %v14455_v33 = vld [vmem:[%s19823_s1 + $0x428] sm:$0xff] }
 0x563   : > { %v7246_v56 = vpop.f32.mrf.mxu1  ;;  %9199 = vmatpush.bf16.msrb.mxu3 %v14480_v29  ;;  %8850 = vmatpush.bf16.msrb.mxu1 %v14455_v33  ;;  %v20266_v29 = vpack.c.bf16 %v20256_v15, %v20255_v24 }
 0x564   : > { %v7263_v42 = vadd.f32 %v7246_v56, %v7150_v7  ;;  %7654 = vmatmul.bf16.gmra.mxu0 %v7559_v16 }
 0x565   : > { %8004 = vmatmul.bf16.gmra.mxu2 %v7909_v28 }
 0x566   : > { %7791 = vmatmul.bf16.gmra.mxu1 %v7696_v53  ;;  %8087 = vmatmul.bf16.gmra.mxu3 %v17755_v25 }
 0x567   : > { %9200 = vmatpush.bf16.msrb.mxu3 %v14479_v31 }
 0x568   : > { %v7383_v16 = vpop.f32.mrf.mxu2 }
 0x569   : > { %v7533_v55 = vpop.f32.mrf.mxu3  ;;  %v7400_v41 = vadd.f32 %v7383_v16, %v7263_v42  ;;  %v7135_v40 = vpop.f32.mrf.mxu0  ;;  %v20264_v42 = vld [vmem:[#allocation76_spill] sm:$0xff] }
 0x56a   : > { %v7151_v14 = vadd.f32 %v7135_v40, %v18946_v61  ;;  %v20265_v37 = vpack.c.bf16 %v20263_v38, %v20264_v42  ;;  %v20271_v38 = vld [vmem:[#allocation85_spill] sm:$0xff] }
 0x56b   : > { %v7248_v60 = vpop.f32.mrf.mxu1  ;;  %v19109_v8 = vadd.f32 %v7533_v55, %v7400_v41 }
 0x56c   : > { %v7264_v5 = vadd.f32 %v7248_v60, %v7151_v14 }
 0x570   : > { %v7385_v51 = vpop.f32.mrf.mxu2 }
 0x571   : > { %v7535_v61 = vpop.f32.mrf.mxu3  ;;  %v7401_v17 = vadd.f32 %v7385_v51, %v7264_v5  ;;  %v7138_v56 = vpop.f32.mrf.mxu0  ;;  %v20268_v5 = vld [vmem:[#allocation84_spill] sm:$0xff] }
 0x572   : > { %v20269_v51 = vrot.slane %v20268_v5, 1  ;;  %v8379_v33 = vpack.c.bf16 %v20268_v5, %v20118_v1 }
 0x573   : > { %v7251_v7 = vpop.f32.mrf.mxu1  ;;  %v19123_v53 = vadd.f32 %v7535_v61, %v7401_v17  ;;  %v20270_v17 = vld [vmem:[#allocation89_spill] sm:$0xff] }
 0x574   : > { %8194 = vmatmul.bf16.vlgmr.msra.gmra.mxu0 %v20257_v46  ;;  %v14462_v46 = vld [vmem:[%s19823_s1 + $0x460] sm:$0xff]  ;;  %v19145_v61 = vsel %vm453_vm1, %v15917_v44, %v20269_v51 }
 0x575   : > { %8456 = vmatmul.bf16.vlgmr.msra.gmra.mxu2 %v20266_v29  ;;  %v8516_v56 = vpack.c.bf16 %v20270_v17, %v19145_v61  ;;  %v14478_v29 = vld [vmem:[%s19823_s1 + $0x2a0] sm:$0xff]  ;;  %v8118_v51 = vpack.c.bf16 %v19145_v61, %v20262_v6 }
 0x576   : > { %8343 = vmatmul.bf16.vlgmr.msra.gmra.mxu1 %v20265_v37  ;;  %8593 = vmatmul.bf16.vlgmr.msra.gmra.mxu3 %v20267_v48  ;;  %v14446_v37 = vld [vmem:[%s19823_s1 + $0x3e0] sm:$0xff] }
 0x577   : > { %8988 = vmatpush.bf16.msrb.mxu2 %v14462_v46  ;;  %v14454_v48 = vld [vmem:[%s19823_s1 + $0x420] sm:$0xff]  ;;  %8738 = vmatpush.bf16.msrb.mxu0 %v14446_v37 }
 0x578   : > { %v7388_v16 = vpop.f32.mrf.mxu2  ;;  %9201 = vmatpush.bf16.msrb.mxu3 %v14478_v29  ;;  %8851 = vmatpush.bf16.msrb.mxu1 %v14454_v48 }
 0x579   : > { %v7538_v55 = vpop.f32.mrf.mxu3  ;;  %v7139_v41 = vpop.f32.mrf.mxu0  ;;  %v14445_v16 = vld [vmem:[%s19823_s1 + $0x3d8] sm:$0xff] }
 0x57a   : > { %v7152_v60 = vadd.f32 %v7139_v41, %v18969_v21  ;;  %v14477_v55 = vld [vmem:[%s19823_s1 + $0x298] sm:$0xff] }
 0x57b   : > { %v7252_v40 = vpop.f32.mrf.mxu1  ;;  %8739 = vmatpush.bf16.msrb.mxu0 %v14445_v16 }
 0x57c   : > { %v7265_v14 = vadd.f32 %v7252_v40, %v7152_v60  ;;  %v14453_v60 = vld [vmem:[%s19823_s1 + $0x418] sm:$0xff]  ;;  %9202 = vmatpush.bf16.msrb.mxu3 %v14477_v55 }
 0x57d   : > { %8852 = vmatpush.bf16.msrb.mxu1 %v14453_v60  ;;  %v14452_v60 = vld [vmem:[%s19823_s1 + $0x410] sm:$0xff] }
 0x580   : > { %v7389_v3 = vpop.f32.mrf.mxu2 }
 0x581   : > { %v7539_v32 = vpop.f32.mrf.mxu3  ;;  %v7402_v24 = vadd.f32 %v7389_v3, %v7265_v14  ;;  %v7142_v15 = vpop.f32.mrf.mxu0  ;;  %8853 = vmatpush.bf16.msrb.mxu1 %v14452_v60 }
 0x582   : > { %v7153_v22 = vadd.f32 %v7142_v15, %v18994_v52  ;;  %v20272_v52 = vld [vmem:[#allocation79_spill] sm:$0xff] }
 0x583   : > { %v7255_v31 = vpop.f32.mrf.mxu1  ;;  %v19147_v21 = vadd.f32 %v7539_v32, %v7402_v24  ;;  %v20273_v42 = vpack.c.bf16 %v20271_v38, %v20272_v52  ;;  %v14460_v52 = vld [vmem:[%s19823_s1 + $0x450] sm:$0xff] }
 0x584   : > { %v7266_v7 = vadd.f32 %v7255_v31, %v7153_v22  ;;  %8199 = vmatmul.bf16.gmra.mxu0 %v19061_v45  ;;  %v14461_v45 = vld [vmem:[%s19823_s1 + $0x458] sm:$0xff] }
 0x585   : > { %8461 = vmatmul.bf16.gmra.mxu2 %v8379_v33  ;;  %v20274_v33 = vld [vmem:[#allocation86_spill] sm:$0xff] }
 0x586   : > { %8348 = vmatmul.bf16.gmra.mxu1 %v20273_v42  ;;  %8598 = vmatmul.bf16.gmra.mxu3 %v8516_v56  ;;  %v8380_v17 = vpack.c.bf16 0.0, %v20274_v33  ;;  %v13045_v42 = vld [vmem:[%s14792_s5 + $0x78] sm:$0xff] }
 0x587   : > { %8989 = vmatpush.bf16.msrb.mxu2 %v14461_v45 }
 0x588   : > { %v7392_v41 = vpop.f32.mrf.mxu2 }
 0x589   : > { %v7542_v40 = vpop.f32.mrf.mxu3  ;;  %v7403_v14 = vadd.f32 %v7392_v41, %v7266_v7  ;;  %v7144_v46 = vpop.f32.mrf.mxu0  ;;  %v20275_v7 = vld [vmem:[#allocation88_spill] sm:$0xff] }
 0x58a   : > { %v20276_v38 = vpack.c.bf16 %v17638_v18, %v20275_v7  ;;  %v14459_v46 = vld [vmem:[%s19823_s1 + $0x448] sm:$0xff] }
 0x58b   : > { %v7257_v3 = vpop.f32.mrf.mxu1  ;;  %v19178_v32 = vadd.f32 %v7542_v40, %v7403_v14  ;;  %8990 = vmatpush.bf16.msrb.mxu2 %v14460_v52  ;;  %v13046_v14 = vld [vmem:[%s14792_s5 + $0x80] sm:$0xff]  ;;  %v20278_v7 = vld [vmem:[#allocation91_spill] sm:$0xff]  ;;  %v20280_v52 = vpack.c.bf16 %v17726_v13, %v17683_v50 }
 0x58c   : > { %v14443_v3 = vld [vmem:[%s19823_s1 + $0x3c8] sm:$0xff] }
 0x58f   : > { %8991 = vmatpush.bf16.msrb.mxu2 %v14459_v46 }
 0x590   : > { %v7394_v24 = vpop.f32.mrf.mxu2 }
 0x591   : > { %v7544_v15 = vpop.f32.mrf.mxu3  ;;  %v7633_v31 = vpop.f32.mrf.mxu0  ;;  %v14475_v24 = vld [vmem:[%s19823_s1 + $0x288] sm:$0xff] }
 0x592   : > { %v7659_v5 = vadd.f32 %v7633_v31, %v19018_v43  ;;  %v20277_v43 = vpack.c.bf16 %v17717_v47, %v17649_v12  ;;  %v14444_v12 = vld [vmem:[%s19823_s1 + $0x3d0] sm:$0xff] }
 0x593   : > { %v7770_v22 = vpop.f32.mrf.mxu1  ;;  %v14476_v47 = vld [vmem:[%s19823_s1 + $0x290] sm:$0xff]  ;;  %8740 = vmatpush.bf16.msrb.mxu0 %v14444_v12 }
 0x594   : > { %v7796_v56 = vadd.f32 %v7770_v22, %v7659_v5  ;;  %8203 = vmatmul.bf16.gmra.mxu0 %v8118_v51  ;;  %9203 = vmatpush.bf16.msrb.mxu3 %v14476_v47  ;;  %v14451_v5 = vld [vmem:[%s19823_s1 + $0x408] sm:$0xff] }
 0x595   : > { %8465 = vmatmul.bf16.gmra.mxu2 %v8380_v17  ;;  %8854 = vmatpush.bf16.msrb.mxu1 %v14451_v5 }
 0x596   : > { %8352 = vmatmul.bf16.gmra.mxu1 %v20276_v38  ;;  %8602 = vmatmul.bf16.gmra.mxu3 %v20277_v43  ;;  %v7804_v6 = vadd.f32 %v18793_v26, %v7796_v56  ;;  %v20279_v38 = vpack.c.bf16 %v17741_v20, %v17712_v39  ;;  %v20282_v43 = vld [vmem:[#allocation93_spill] sm:$0xff]  ;;  %v14458_v39 = vld [vmem:[%s19823_s1 + $0x440] sm:$0xff]  ;;  %v13047_v20 = vld [vmem:[%s14792_s5 + $0x90] sm:$0xff] }
 0x597   : > { %8741 = vmatpush.bf16.msrb.mxu0 %v14443_v3  ;;  %8992 = vmatpush.bf16.msrb.mxu2 %v14458_v39 }
 0x598   : > { %v7820_v37 = vadd.f32 %v13045_v42, %v7804_v6  ;;  %v7983_v29 = vpop.f32.mrf.mxu2  ;;  %9204 = vmatpush.bf16.msrb.mxu3 %v14475_v24  ;;  %v20281_v42 = vld [vmem:[#allocation92_spill] sm:$0xff]  ;;  %v8382_v24 = vpack.c.bf16 %v17784_v10, %v20118_v1 }
 0x599   : > { %v8066_v48 = vpop.f32.mrf.mxu3  ;;  %v7635_v45 = vpop.f32.mrf.mxu0  ;;  %v20283_v6 = vpack.c.bf16 %v20281_v42, %v20282_v43 }
 0x59a   : > { %v19195_v18 = vadd.f32 %v8066_v48, %v7983_v29  ;;  %v7828_v55 = vmax.f32 %v7820_v37, 0.0  ;;  %v7660_v41 = vadd.f32 %v7635_v45, %v19032_v4 }
 0x59b   : > { %v7772_v16 = vpop.f32.mrf.mxu1 }
 0x59c   : > { %13053 = vst [vmem:[%s18812_s28 + $0x40] sm:$0xff] %v7828_v55  ;;  %v7797_v40 = vadd.f32 %v7772_v16, %v7660_v41 }
 0x59e   : > { %v7805_v4 = vadd.f32 %v18793_v26, %v7797_v40 }
 0x5a0   : > { %v7821_v15 = vadd.f32 %v13046_v14, %v7805_v4  ;;  %v7985_v31 = vpop.f32.mrf.mxu2  ;;  %v20284_v4 = vrot.slane %v17784_v10, 1  ;;  %v20286_v10 = vpack.c.bf16 %v17806_v0, %v17737_v35 }
 0x5a1   : > { %v8068_v22 = vpop.f32.mrf.mxu3  ;;  %v7638_v33 = vpop.f32.mrf.mxu0 }
 0x5a2   : > { %v19222_v51 = vadd.f32 %v8068_v22, %v7985_v31  ;;  %v7829_v56 = vmax.f32 %v7821_v15, 0.0  ;;  %v19249_v3 = vsel %vm453_vm1, %v15917_v44, %v20284_v4  ;;  %v14442_v31 = vld [vmem:[%s19823_s1 + $0x3c0] sm:$0xff]  ;;  %v13048_v33 = vld [vmem:[%s14792_s5 + $0x98] sm:$0xff] }
 0x5a3   : > { %v7775_v17 = vpop.f32.mrf.mxu1  ;;  %v8519_v15 = vpack.c.bf16 %v17834_v62, %v19249_v3  ;;  %v14450_v22 = vld [vmem:[%s19823_s1 + $0x400] sm:$0xff]  ;;  %v14497_v62 = vld [vmem:[%s19823_s1 + $0x338] sm:$0xff]  ;;  %8742 = vmatpush.bf16.msrb.mxu0 %v14442_v31 }
 0x5a4   : > { %13054 = vst [vmem:[%s18812_s28 + $0x48] sm:$0xff] %v7829_v56  ;;  %8207 = vmatmul.bf16.gmra.mxu0 %v20278_v7  ;;  %v20285_v17 = vld [vmem:[#allocation94_spill] sm:$0xff]  ;;  %v14473_v56 = vld [vmem:[%s19823_s1 + $0x278] sm:$0xff]  ;;  %8855 = vmatpush.bf16.msrb.mxu1 %v14450_v22 }
 0x5a5   : > { %8469 = vmatmul.bf16.gmra.mxu2 %v20280_v52 }
 0x5a6   : > { %8356 = vmatmul.bf16.gmra.mxu1 %v20279_v38  ;;  %8606 = vmatmul.bf16.gmra.mxu3 %v20283_v6  ;;  %v14505_v38 = vld [vmem:[%s19823_s1 + $0x378] sm:$0xff] }
 0x5a7   : > { %9559 = vmatpush.bf16.msra.mxu2 %v14497_v62  ;;  %9281 = vmatpush.bf16.msra.mxu0 %v14473_v56  ;;  %v14489_v6 = vld [vmem:[%s19823_s1 + $0x2f8] sm:$0xff]  ;;  %v14488_v62 = vld [vmem:[%s19823_s1 + $0x2f0] sm:$0xff] }
 0x5a8   : > { %v7988_v37 = vpop.f32.mrf.mxu2  ;;  %9410 = vmatpush.bf16.msra.mxu1 %v14489_v6  ;;  %v13050_v56 = vld [vmem:[%s14792_s5 + $0xb0] sm:$0xff] }
 0x5a9   : > { %v8071_v29 = vpop.f32.mrf.mxu3  ;;  %v7639_v48 = vpop.f32.mrf.mxu0 }
 0x5aa   : > { %v7661_v16 = vadd.f32 %v7639_v48, %v19063_v30 }
 0x5ab   : > { %v7776_v45 = vpop.f32.mrf.mxu1 }
 0x5ac   : > { %v7798_v55 = vadd.f32 %v7776_v45, %v7661_v16  ;;  %v20287_v16 = vrot.slane %v17812_v57, 7  ;;  %9411 = vmatpush.bf16.msra.mxu1 %v14488_v62 }
 0x5ae   : > { %v7806_v41 = vadd.f32 %v18793_v26, %v7798_v55  ;;  %v19291_v55 = vsel %vm209_vm0, %v20287_v16, %v15899_v63 }
 0x5b0   : > { %v7822_v50 = vadd.f32 %v13047_v20, %v7806_v41  ;;  %v7989_v40 = vpop.f32.mrf.mxu2 }
 0x5b1   : > { %v8072_v12 = vpop.f32.mrf.mxu3  ;;  %v7642_v60 = vpop.f32.mrf.mxu0 }
 0x5b2   : > { %v19241_v47 = vadd.f32 %v8072_v12, %v7989_v40  ;;  %v7830_v46 = vmax.f32 %v7822_v50, 0.0  ;;  %v7662_v30 = vadd.f32 %v7642_v60, %v19085_v49  ;;  %v14474_v49 = vld [vmem:[%s19823_s1 + $0x280] sm:$0xff]  ;;  %v8121_v12 = vpack.c.bf16 %v18869_v9, %v20281_v42 }
 0x5b3   : > { %v7779_v14 = vpop.f32.mrf.mxu1  ;;  %9205 = vmatpush.bf16.msrb.mxu3 %v14474_v49  ;;  %v8270_v60 = vpack.c.bf16 %v19291_v55, %v17840_v34 }
 0x5b4   : > { %13055 = vst [vmem:[%s18812_s28 + $0x50] sm:$0xff] %v7830_v46  ;;  %v7799_v5 = vadd.f32 %v7779_v14, %v7662_v30  ;;  %8212 = vmatmul.bf16.gmra.mxu0 %v20285_v17  ;;  %v8383_v14 = vpack.c.bf16 0.0, %v17812_v57  ;;  %v20288_v46 = vld [vmem:[#allocation96_spill] sm:$0xff] }
 0x5b5   : > { %8474 = vmatmul.bf16.gmra.mxu2 %v8382_v24  ;;  %v8520_v30 = vpack.c.bf16 %v19056_v11, %v20288_v46  ;;  %v14496_v24 = vld [vmem:[%s19823_s1 + $0x330] sm:$0xff]  ;;  %v14494_v46 = vld [vmem:[%s19823_s1 + $0x320] sm:$0xff] }
 0x5b6   : > { %8361 = vmatmul.bf16.gmra.mxu1 %v20286_v10  ;;  %8611 = vmatmul.bf16.gmra.mxu3 %v8519_v15  ;;  %v7807_v52 = vadd.f32 %v18793_v26, %v7799_v5  ;;  %v14472_v10 = vld [vmem:[%s19823_s1 + $0x270] sm:$0xff] }
 0x5b7   : > { %9672 = vmatpush.bf16.msra.mxu3 %v14505_v38  ;;  %9560 = vmatpush.bf16.msra.mxu2 %v14496_v24  ;;  %v14495_v38 = vld [vmem:[%s19823_s1 + $0x328] sm:$0xff] }
 0x5b8   : > { %v7823_v35 = vadd.f32 %v13048_v33, %v7807_v52  ;;  %v7992_v0 = vpop.f32.mrf.mxu2  ;;  %9282 = vmatpush.bf16.msra.mxu0 %v14472_v10  ;;  %v14493_v10 = vld [vmem:[%s19823_s1 + $0x318] sm:$0xff] }
 0x5b9   : > { %v8075_v43 = vpop.f32.mrf.mxu3  ;;  %v7644_v29 = vpop.f32.mrf.mxu0 }
 0x5ba   : > { %v19283_v37 = vadd.f32 %v8075_v43, %v7992_v0  ;;  %v7831_v45 = vmax.f32 %v7823_v35, 0.0  ;;  %v14471_v35 = vld [vmem:[%s19823_s1 + $0x268] sm:$0xff] }
 0x5bb   : > { %v7781_v48 = vpop.f32.mrf.mxu1  ;;  %v14503_v0 = vld [vmem:[%s19823_s1 + $0x368] sm:$0xff]  ;;  %9561 = vmatpush.bf16.msra.mxu2 %v14495_v38 }
 0x5bc   : > { %13056 = vst [vmem:[%s18812_s28 + $0x58] sm:$0xff] %v7831_v45  ;;  %v14487_v48 = vld [vmem:[%s19823_s1 + $0x2e8] sm:$0xff]  ;;  %9283 = vmatpush.bf16.msra.mxu0 %v14471_v35 }
 0x5bd   : > { %9412 = vmatpush.bf16.msra.mxu1 %v14487_v48 }
 0x5bf   : > { %9562 = vmatpush.bf16.msra.mxu2 %v14494_v46 }
 0x5c0   : > { %v7994_v39 = vpop.f32.mrf.mxu2 }
 0x5c1   : > { %v8077_v20 = vpop.f32.mrf.mxu3  ;;  %v7646_v41 = vpop.f32.mrf.mxu0 }
 0x5c2   : > { %v7663_v40 = vadd.f32 %v7646_v41, %v19109_v8  ;;  %v13049_v8 = vld [vmem:[%s14792_s5 + $0xa8] sm:$0xff] }
 0x5c3   : > { %v7783_v50 = vpop.f32.mrf.mxu1  ;;  %v20289_v41 = vld [vmem:[#allocation95_spill] sm:$0xff]  ;;  %9563 = vmatpush.bf16.msra.mxu2 %v14493_v10 }
 0x5c4   : > { %v7800_v4 = vadd.f32 %v7783_v50, %v7663_v40  ;;  %8216 = vmatmul.bf16.gmra.mxu0 %v8121_v12 }
 0x5c5   : > { %8478 = vmatmul.bf16.gmra.mxu2 %v8383_v14 }
 0x5c6   : > { %8365 = vmatmul.bf16.gmra.mxu1 %v8270_v60  ;;  %8615 = vmatmul.bf16.gmra.mxu3 %v8520_v30  ;;  %v7808_v9 = vadd.f32 %v18793_v26, %v7800_v4  ;;  %v14504_v26 = vld [vmem:[%s19823_s1 + $0x370] sm:$0xff]  ;;  %v13051_v4 = vld [vmem:[%s14792_s5 + $0xc0] sm:$0xff] }
 0x5c7   : > { %9673 = vmatpush.bf16.msra.mxu3 %v14504_v26  ;;  %v14501_v26 = vld [vmem:[%s19823_s1 + $0x358] sm:$0xff] }
 0x5c8   : > { %v7824_v34 = vadd.f32 %v13049_v8, %v7808_v9  ;;  %v7996_v57 = vpop.f32.mrf.mxu2 }
 0x5c9   : > { %v8079_v15 = vpop.f32.mrf.mxu3  ;;  %v7648_v11 = vpop.f32.mrf.mxu0 }
 0x5ca   : > { %v19306_v31 = vadd.f32 %v8079_v15, %v7996_v57  ;;  %v7832_v22 = vmax.f32 %v7824_v34, 0.0  ;;  %v7664_v5 = vadd.f32 %v7648_v11, %v19123_v53  ;;  %v19326_v53 = vld [vmem:[%s19824_s2 + $0x1] ss:$0 sm:$0xff] }
 0x5cb   : > { %v7785_v49 = vpop.f32.mrf.mxu1  ;;  %9674 = vmatpush.bf16.msra.mxu3 %v14503_v0 }
 0x5cc   : > { %13057 = vst [vmem:[%s18812_s28 + $0x60] sm:$0xff] %v7832_v22  ;;  %v7801_v33 = vadd.f32 %v7785_v49, %v7664_v5  ;;  %v19365_v22 = vpack.c.bf16 %v18109_v27, %v20118_v1 }
 0x5ce   : > { %v7809_v52 = vadd.f32 %v19326_v53, %v7801_v33  ;;  %v13052_v33 = vld [vmem:[%s14792_s5 + $0xc8] sm:$0xff] }
 0x5d0   : > { %v7825_v43 = vadd.f32 %v13050_v56, %v7809_v52  ;;  %v7998_v6 = vpop.f32.mrf.mxu2  ;;  %v14485_v56 = vld [vmem:[%s19823_s1 + $0x2d8] sm:$0xff] }
 0x5d1   : > { %v8081_v29 = vpop.f32.mrf.mxu3  ;;  %v7651_v16 = vpop.f32.mrf.mxu0 }
 0x5d2   : > { %v19338_v45 = vadd.f32 %v8081_v29, %v7998_v6  ;;  %v7833_v20 = vmax.f32 %v7825_v43, 0.0 }
 0x5d3   : > { %v7788_v39 = vpop.f32.mrf.mxu1 }
 0x5d4   : > { %13058 = vst [vmem:[%s18812_s28 + $0x68] sm:$0xff] %v7833_v20  ;;  %8743 = vmatmul.bf16.vlgmr.msrb.gmra.mxu0 %v20259_v59  ;;  %v14470_v59 = vld [vmem:[%s19823_s1 + $0x260] sm:$0xff]  ;;  %v8917_v39 = vpack.c.bf16 %v19249_v3, %v20281_v42  ;;  %v8783_v20 = vpack.c.bf16 0.0, %v18118_v58  ;;  %v14484_v42 = vld [vmem:[%s19823_s1 + $0x2d0] sm:$0xff] }
 0x5d5   : > { %8993 = vmatmul.bf16.vlgmr.msrb.gmra.mxu2 %v20278_v7  ;;  %v14486_v7 = vld [vmem:[%s19823_s1 + $0x2e0] sm:$0xff]  ;;  %9284 = vmatpush.bf16.msra.mxu0 %v14470_v59  ;;  %v14491_v59 = vld [vmem:[%s19823_s1 + $0x308] sm:$0xff] }
 0x5d6   : > { %8856 = vmatmul.bf16.vlgmr.msrb.gmra.mxu1 %v20258_v19  ;;  %9206 = vmatmul.bf16.vlgmr.msrb.gmra.mxu3 %v20289_v41  ;;  %v14502_v19 = vld [vmem:[%s19823_s1 + $0x360] sm:$0xff] }
 0x5d7   : > { %9675 = vmatpush.bf16.msra.mxu3 %v14502_v19  ;;  %9413 = vmatpush.bf16.msra.mxu1 %v14486_v7  ;;  %v14467_v19 = vld [vmem:[%s19823_s1 + $0x248] sm:$0xff] }
 0x5d8   : > { %v8001_v50 = vpop.f32.mrf.mxu2  ;;  %v14499_v7 = vld [vmem:[%s19823_s1 + $0x348] sm:$0xff] }
 0x5d9   : > { %v8084_v40 = vpop.f32.mrf.mxu3  ;;  %v7652_v12 = vpop.f32.mrf.mxu0  ;;  %v14492_v50 = vld [vmem:[%s19823_s1 + $0x310] sm:$0xff] }
 0x5da   : > { %v7665_v14 = vadd.f32 %v7652_v12, %v19147_v21  ;;  %v14468_v12 = vld [vmem:[%s19823_s1 + $0x250] sm:$0xff]  ;;  %9564 = vmatpush.bf16.msra.mxu2 %v14492_v50  ;;  %v20294_v50 = vld [vmem:[#allocation6_spill] sm:$0xff] }
 0x5db   : > { %v7789_v60 = vpop.f32.mrf.mxu1  ;;  %9676 = vmatpush.bf16.msra.mxu3 %v14501_v26  ;;  %9414 = vmatpush.bf16.msra.mxu1 %v14485_v56 }
 0x5dc   : > { %v7802_v30 = vadd.f32 %v7789_v60, %v7665_v14 }
 0x5de   : > { %v7810_v21 = vadd.f32 %v19326_v53, %v7802_v30  ;;  %9565 = vmatpush.bf16.msra.mxu2 %v14491_v59 }
 0x5df   : > { %9415 = vmatpush.bf16.msra.mxu1 %v14484_v42  ;;  %v14537_v42 = vld [vmem:[%s19823_s1 + $0x478] sm:$0xff] }
 0x5e0   : > { %v7826_v24 = vadd.f32 %v13051_v4, %v7810_v21  ;;  %v8002_v8 = vpop.f32.mrf.mxu2 }
 0x5e1   : > { %v8085_v9 = vpop.f32.mrf.mxu3  ;;  %v7655_v57 = vpop.f32.mrf.mxu0 }
 0x5e2   : > { %v19360_v34 = vadd.f32 %v8085_v9, %v8002_v8  ;;  %v7834_v11 = vmax.f32 %v7826_v24, 0.0  ;;  %v7666_v49 = vadd.f32 %v7655_v57, %v19178_v32  ;;  %v14469_v32 = vld [vmem:[%s19823_s1 + $0x258] sm:$0xff]  ;;  %v14483_v24 = vld [vmem:[%s19823_s1 + $0x2c8] sm:$0xff] }
 0x5e3   : > { %v7792_v15 = vpop.f32.mrf.mxu1  ;;  %9285 = vmatpush.bf16.msra.mxu0 %v14469_v32  ;;  %9416 = vmatpush.bf16.msra.mxu1 %v14483_v24 }
 0x5e4   : > { %13059 = vst [vmem:[%s18812_s28 + $0x70] sm:$0xff] %v7834_v11  ;;  %v7803_v5 = vadd.f32 %v7792_v15, %v7666_v49  ;;  %8748 = vmatmul.bf16.gmra.mxu0 %v17722_v54  ;;  %v20290_v11 = vld [vmem:[#allocation97_spill] sm:$0xff]  ;;  %v20291_v49 = vld [vmem:[#allocation98_spill] sm:$0xff] }
 0x5e5   : > { %8998 = vmatmul.bf16.gmra.mxu2 %v20285_v17 }
 0x5e6   : > { %8861 = vmatmul.bf16.gmra.mxu1 %v19067_v36  ;;  %9211 = vmatmul.bf16.gmra.mxu3 %v19365_v22  ;;  %v7811_v54 = vadd.f32 %v19326_v53, %v7803_v5 }
 0x5e7   : > { %9286 = vmatpush.bf16.msra.mxu0 %v14468_v12  ;;  %v20295_v12 = vld [vmem:[#allocation26_spill] sm:$0xff] }
 0x5e8   : > { %v7827_v36 = vadd.f32 %v13052_v33, %v7811_v54  ;;  %v8005_v17 = vpop.f32.mrf.mxu2  ;;  %v14490_v54 = vld [vmem:[%s19823_s1 + $0x300] sm:$0xff] }
 0x5e9   : > { %v8088_v62 = vpop.f32.mrf.mxu3  ;;  %v7657_v52 = vpop.f32.mrf.mxu0  ;;  %9566 = vmatpush.bf16.msra.mxu2 %v14490_v54 }
 0x5ea   : > { %v19386_v38 = vadd.f32 %v8088_v62, %v8005_v17  ;;  %v7835_v0 = vmax.f32 %v7827_v36, 0.0  ;;  %v14466_v17 = vld [vmem:[%s19823_s1 + $0x240] sm:$0xff] }
 0x5eb   : > { %v7794_v35 = vpop.f32.mrf.mxu1  ;;  %9287 = vmatpush.bf16.msra.mxu0 %v14467_v19  ;;  %v14482_v62 = vld [vmem:[%s19823_s1 + $0x2c0] sm:$0xff] }
 0x5ec   : > { %13060 = vst [vmem:[%s18812_s28 + $0x78] sm:$0xff] %v7835_v0  ;;  %9417 = vmatpush.bf16.msra.mxu1 %v14482_v62  ;;  %v14527_v62 = vld [vmem:[%s19823_s1 + $0x428] sm:$0xff] }
 0x5ed   : > { %10072 = vmatpush.bf16.msrb.mxu2 %v14529_v23 }
 0x5ef   : > { %9288 = vmatpush.bf16.msra.mxu0 %v14466_v17 }
 0x5f0   : > { %v8007_v43 = vpop.f32.mrf.mxu2 }
 0x5f1   : > { %v8090_v6 = vpop.f32.mrf.mxu3  ;;  %v8195_v29 = vpop.f32.mrf.mxu0 }
 0x5f2   : > { %v8221_v16 = vadd.f32 %v8195_v29, %v19195_v18  ;;  %v14500_v18 = vld [vmem:[%s19823_s1 + $0x350] sm:$0xff] }
 0x5f3   : > { %v8344_v48 = vpop.f32.mrf.mxu1  ;;  %9677 = vmatpush.bf16.msra.mxu3 %v14500_v18  ;;  %v20292_v6 = vld [vmem:[#allocation12_spill] sm:$0xff] }
 0x5f4   : > { %v8370_v40 = vadd.f32 %v8344_v48, %v8221_v16  ;;  %8752 = vmatmul.bf16.gmra.mxu0 %v17755_v25  ;;  %v19447_v29 = vpack.c.bf16 %v20292_v6, %v19291_v55  ;;  %v20293_v48 = vrot.slane %v18109_v27, 1  ;;  %v14513_v55 = vld [vmem:[%s19823_s1 + $0x3b8] sm:$0xff] }
 0x5f5   : > { %9002 = vmatmul.bf16.gmra.mxu2 %v8917_v39  ;;  %9809 = vmatpush.bf16.msrb.mxu0 %v14513_v55  ;;  %v20299_v55 = vld [vmem:[#allocation11_spill] sm:$0xff] }
 0x5f6   : > { %8865 = vmatmul.bf16.gmra.mxu1 %v7909_v28  ;;  %9215 = vmatmul.bf16.gmra.mxu3 %v8783_v20  ;;  %v19454_v16 = vsel %vm453_vm1, %v15917_v44, %v20293_v48 }
 0x5f7   : > { %9678 = vmatpush.bf16.msra.mxu3 %v14499_v7 }
 0x5f8   : > { %v8457_v13 = vpop.f32.mrf.mxu2 }
 0x5f9   : > { %v8594_v25 = vpop.f32.mrf.mxu3  ;;  %v8483_v28 = vadd.f32 %v8457_v13, %v8370_v40  ;;  %v8197_v60 = vpop.f32.mrf.mxu0  ;;  %v19460_v40 = vpack.c.bf16 %v20294_v50, %v19454_v16 }
 0x5fa   : > { %v8222_v46 = vadd.f32 %v8197_v60, %v19222_v51 }
 0x5fb   : > { %v8346_v14 = vpop.f32.mrf.mxu1  ;;  %v19411_v30 = vadd.f32 %v8594_v25, %v8483_v28  ;;  %v14521_v25 = vld [vmem:[%s19823_s1 + $0x3f8] sm:$0xff] }
 0x5fc   : > { %v8371_v4 = vadd.f32 %v8346_v14, %v8222_v46  ;;  %9959 = vmatpush.bf16.msrb.mxu1 %v14521_v25 }
 0x600   : > { %v8459_v21 = vpop.f32.mrf.mxu2 }
 0x601   : > { %v8596_v51 = vpop.f32.mrf.mxu3  ;;  %v8484_v8 = vadd.f32 %v8459_v21, %v8371_v4  ;;  %v8200_v9 = vpop.f32.mrf.mxu0 }
 0x603   : > { %v8349_v57 = vpop.f32.mrf.mxu1  ;;  %v19425_v15 = vadd.f32 %v8596_v51, %v8484_v8  ;;  %v20296_v51 = vld [vmem:[#allocation8_spill] sm:$0xff]  ;;  %v20297_v8 = vld [vmem:[#allocation102_spill] sm:$0xff] }
 0x604   : > { %8756 = vmatmul.bf16.gmra.mxu0 %v20290_v11  ;;  %v8920_v24 = vpack.c.bf16 %v19145_v61, %v20296_v51  ;;  %v9133_v9 = vpack.c.bf16 0.0, %v20297_v8  ;;  %v14528_v57 = vld [vmem:[%s19823_s1 + $0x430] sm:$0xff] }
 0x605   : > { %9006 = vmatmul.bf16.gmra.mxu2 %v20291_v49  ;;  %v14536_v61 = vld [vmem:[%s19823_s1 + $0x470] sm:$0xff] }
 0x606   : > { %8869 = vmatmul.bf16.gmra.mxu1 %v20289_v41  ;;  %9219 = vmatmul.bf16.gmra.mxu3 %v18226_v2  ;;  %v14498_v41 = vld [vmem:[%s19823_s1 + $0x340] sm:$0xff] }
 0x607   : > { %9679 = vmatpush.bf16.msra.mxu3 %v14498_v41  ;;  %10073 = vmatpush.bf16.msrb.mxu2 %v14528_v57  ;;  %v20302_v57 = vld [vmem:[#allocation15_spill] sm:$0xff] }
 0x608   : > { %v8462_v5 = vpop.f32.mrf.mxu2 }
 0x609   : > { %v8599_v33 = vpop.f32.mrf.mxu3  ;;  %v8201_v10 = vpop.f32.mrf.mxu0 }
 0x60a   : > { %v8223_v26 = vadd.f32 %v8201_v10, %v19241_v47  ;;  %v20298_v33 = vld [vmem:[#allocation10_spill] sm:$0xff]  ;;  %v14512_v10 = vld [vmem:[%s19823_s1 + $0x3b0] sm:$0xff] }
 0x60b   : > { %v8350_v32 = vpop.f32.mrf.mxu1  ;;  %10209 = vmatpush.bf16.msrb.mxu3 %v14537_v42  ;;  %9810 = vmatpush.bf16.msrb.mxu0 %v14512_v10  ;;  %v20300_v42 = vpack.c.bf16 %v20299_v55, %v20292_v6  ;;  %v14526_v6 = vld [vmem:[%s19823_s1 + $0x420] sm:$0xff] }
 0x60c   : > { %v8372_v36 = vadd.f32 %v8350_v32, %v8223_v26  ;;  %10074 = vmatpush.bf16.msrb.mxu2 %v14527_v62  ;;  %v14517_v62 = vld [vmem:[%s19823_s1 + $0x3d8] sm:$0xff] }
 0x60f   : > { %10210 = vmatpush.bf16.msrb.mxu3 %v14536_v61  ;;  %v20304_v61 = vld [vmem:[#allocation7_spill] sm:$0xff] }
 0x610   : > { %v8463_v47 = vpop.f32.mrf.mxu2  ;;  %10075 = vmatpush.bf16.msrb.mxu2 %v14526_v6 }
 0x611   : > { %v8600_v56 = vpop.f32.mrf.mxu3  ;;  %v8485_v52 = vadd.f32 %v8463_v47, %v8372_v36  ;;  %v8204_v35 = vpop.f32.mrf.mxu0  ;;  %v14511_v47 = vld [vmem:[%s19823_s1 + $0x3a8] sm:$0xff] }
 0x612   : > { %v8224_v43 = vadd.f32 %v8204_v35, %v19283_v37  ;;  %v19464_v37 = vpack.c.bf16 %v20295_v12, %v20118_v1  ;;  %9811 = vmatpush.bf16.msrb.mxu0 %v14511_v47 }
 0x613   : > { %v8353_v0 = vpop.f32.mrf.mxu1  ;;  %v19456_v39 = vadd.f32 %v8600_v56, %v8485_v52  ;;  %v14535_v56 = vld [vmem:[%s19823_s1 + $0x468] sm:$0xff] }
 0x614   : > { %v8373_v18 = vadd.f32 %v8353_v0, %v8224_v43  ;;  %8761 = vmatmul.bf16.gmra.mxu0 %v19447_v29  ;;  %10211 = vmatpush.bf16.msrb.mxu3 %v14535_v56  ;;  %v14519_v0 = vld [vmem:[%s19823_s1 + $0x3e8] sm:$0xff] }
 0x615   : > { %9011 = vmatmul.bf16.gmra.mxu2 %v19460_v40 }
 0x616   : > { %8874 = vmatmul.bf16.gmra.mxu1 %v19365_v22  ;;  %9224 = vmatmul.bf16.gmra.mxu3 %v19464_v37 }
 0x618   : > { %v8466_v13 = vpop.f32.mrf.mxu2 }
 0x619   : > { %v8603_v22 = vpop.f32.mrf.mxu3  ;;  %v8486_v28 = vadd.f32 %v8466_v13, %v8373_v18  ;;  %v8206_v60 = vpop.f32.mrf.mxu0  ;;  %v20301_v13 = vpack.c.bf16 %v18118_v58, %v18109_v27  ;;  %v14510_v27 = vld [vmem:[%s19823_s1 + $0x3a0] sm:$0xff] }
 0x61a   : > { %9812 = vmatpush.bf16.msrb.mxu0 %v14510_v27 }
 0x61b   : > { %v8355_v14 = vpop.f32.mrf.mxu1  ;;  %v19482_v46 = vadd.f32 %v8603_v22, %v8486_v28 }
 0x620   : > { %v8468_v59 = vpop.f32.mrf.mxu2 }
 0x621   : > { %v8605_v19 = vpop.f32.mrf.mxu3  ;;  %v8208_v7 = vpop.f32.mrf.mxu0 }
 0x622   : > { %v8225_v21 = vadd.f32 %v8208_v7, %v19306_v31  ;;  %v14520_v31 = vld [vmem:[%s19823_s1 + $0x3f0] sm:$0xff] }
 0x623   : > { %v8357_v4 = vpop.f32.mrf.mxu1  ;;  %9960 = vmatpush.bf16.msrb.mxu1 %v14520_v31 }
 0x624   : > { %v8374_v5 = vadd.f32 %v8357_v4, %v8225_v21  ;;  %8765 = vmatmul.bf16.gmra.mxu0 %v20298_v33  ;;  %v14518_v21 = vld [vmem:[%s19823_s1 + $0x3e0] sm:$0xff] }
 0x625   : > { %9015 = vmatmul.bf16.gmra.mxu2 %v8920_v24 }
 0x626   : > { %8878 = vmatmul.bf16.gmra.mxu1 %v8783_v20  ;;  %9228 = vmatmul.bf16.gmra.mxu3 %v9133_v9 }
 0x627   : > { %9961 = vmatpush.bf16.msrb.mxu1 %v14519_v0 }
 0x628   : > { %v8470_v20 = vpop.f32.mrf.mxu2 }
 0x629   : > { %v8607_v32 = vpop.f32.mrf.mxu3  ;;  %v8487_v26 = vadd.f32 %v8470_v20, %v8374_v5  ;;  %v8210_v54 = vpop.f32.mrf.mxu0  ;;  %v9603_v5 = vpack.c.bf16 %v20302_v57, %v20118_v1 }
 0x62a   : > { %v8226_v17 = vadd.f32 %v8210_v54, %v19338_v45 }
 0x62b   : > { %v8359_v36 = vpop.f32.mrf.mxu1  ;;  %v19506_v41 = vadd.f32 %v8607_v32, %v8487_v26  ;;  %9962 = vmatpush.bf16.msrb.mxu1 %v14518_v21 }
 0x62c   : > { %v8375_v52 = vadd.f32 %v8359_v36, %v8226_v17  ;;  %v14525_v17 = vld [vmem:[%s19823_s1 + $0x418] sm:$0xff] }
 0x62d   : > { %10076 = vmatpush.bf16.msrb.mxu2 %v14525_v17 }
 0x62f   : > { %9963 = vmatpush.bf16.msrb.mxu1 %v14517_v62 }
 0x630   : > { %v8472_v35 = vpop.f32.mrf.mxu2 }
 0x631   : > { %v8609_v45 = vpop.f32.mrf.mxu3  ;;  %v8488_v43 = vadd.f32 %v8472_v35, %v8375_v52  ;;  %v8213_v48 = vpop.f32.mrf.mxu0 }
 0x633   : > { %v8362_v18 = vpop.f32.mrf.mxu1  ;;  %v19520_v23 = vadd.f32 %v8609_v45, %v8488_v43  ;;  %v20306_v43 = vld [vmem:[#allocation17_spill] sm:$0xff] }
 0x634   : > { %9289 = vmatmul.bf16.vlgmr.msra.gmra.mxu0 %v20290_v11  ;;  %v9604_v48 = vpack.c.bf16 0.0, %v20306_v43  ;;  %v20307_v18 = vld [vmem:[#allocation18_spill] sm:$0xff] }
 0x635   : > { %9567 = vmatmul.bf16.vlgmr.msra.gmra.mxu2 %v20300_v42  ;;  %v20308_v55 = vpack.c.bf16 %v20307_v18, %v20296_v51  ;;  %v20309_v42 = vld [vmem:[#allocation20_spill] sm:$0xff] }
 0x636   : > { %9418 = vmatmul.bf16.vlgmr.msra.gmra.mxu1 %v20291_v49  ;;  %9680 = vmatmul.bf16.vlgmr.msra.gmra.mxu3 %v20301_v13  ;;  %v20310_v13 = vld [vmem:[#allocation23_spill] sm:$0xff] }
 0x638   : > { %v8475_v22 = vpop.f32.mrf.mxu2 }
 0x639   : > { %v8612_v25 = vpop.f32.mrf.mxu3  ;;  %v8214_v28 = vpop.f32.mrf.mxu0  ;;  %v20311_v22 = vpack.c.bf16 %v20309_v42, %v20310_v13 }
 0x63a   : > { %v8227_v14 = vadd.f32 %v8214_v28, %v19360_v34  ;;  %v14534_v34 = vld [vmem:[%s19823_s1 + $0x460] sm:$0xff] }
 0x63b   : > { %v8363_v60 = vpop.f32.mrf.mxu1  ;;  %10212 = vmatpush.bf16.msrb.mxu3 %v14534_v34 }
 0x63c   : > { %v8376_v59 = vadd.f32 %v8363_v60, %v8227_v14 }
 0x640   : > { %v8476_v19 = vpop.f32.mrf.mxu2 }
 0x641   : > { %v8613_v7 = vpop.f32.mrf.mxu3  ;;  %v8489_v11 = vadd.f32 %v8476_v19, %v8376_v59  ;;  %v8217_v4 = vpop.f32.mrf.mxu0  ;;  %v14508_v19 = vld [vmem:[%s19823_s1 + $0x390] sm:$0xff] }
 0x642   : > { %v8228_v58 = vadd.f32 %v8217_v4, %v19386_v38  ;;  %v20303_v38 = vld [vmem:[#allocation16_spill] sm:$0xff] }
 0x643   : > { %v8366_v49 = vpop.f32.mrf.mxu1  ;;  %v19544_v24 = vadd.f32 %v8613_v7, %v8489_v11  ;;  %v20305_v31 = vpack.c.bf16 %v20303_v38, %v20304_v61  ;;  %v14532_v7 = vld [vmem:[%s19823_s1 + $0x450] sm:$0xff]  ;;  %v13493_v11 = vld [vmem:[%s14792_s5 + $0xd8] sm:$0xff]  ;;  %v14523_v61 = vld [vmem:[%s19823_s1 + $0x408] sm:$0xff] }
 0x644   : > { %v8377_v10 = vadd.f32 %v8366_v49, %v8228_v58  ;;  %9294 = vmatmul.bf16.gmra.mxu0 %v19447_v29  ;;  %v14509_v29 = vld [vmem:[%s19823_s1 + $0x398] sm:$0xff]  ;;  %v14516_v4 = vld [vmem:[%s19823_s1 + $0x3d0] sm:$0xff] }
 0x645   : > { %9572 = vmatmul.bf16.gmra.mxu2 %v20305_v31  ;;  %9813 = vmatpush.bf16.msrb.mxu0 %v14509_v29  ;;  %v13494_v31 = vld [vmem:[%s14792_s5 + $0xe0] sm:$0xff]  ;;  %v20314_v29 = vld [vmem:[#allocation103_spill] sm:$0xff] }
 0x646   : > { %9423 = vmatmul.bf16.gmra.mxu1 %v19460_v40  ;;  %9685 = vmatmul.bf16.gmra.mxu3 %v9603_v5  ;;  %v14533_v40 = vld [vmem:[%s19823_s1 + $0x458] sm:$0xff] }
 0x647   : > { %10213 = vmatpush.bf16.msrb.mxu3 %v14533_v40  ;;  %9964 = vmatpush.bf16.msrb.mxu1 %v14516_v4  ;;  %v20315_v40 = vld [vmem:[#allocation31_spill] sm:$0xff]  ;;  %v20319_v4 = vld [vmem:[#allocation101_spill] sm:$0xff] }
 0x648   : > { %v8479_v20 = vpop.f32.mrf.mxu2  ;;  %v20316_v62 = vpack.c.bf16 %v20314_v29, %v20315_v40 }
 0x649   : > { %v8616_v32 = vpop.f32.mrf.mxu3  ;;  %v8490_v26 = vadd.f32 %v8479_v20, %v8377_v10  ;;  %v8219_v54 = vpop.f32.mrf.mxu0  ;;  %9814 = vmatpush.bf16.msrb.mxu0 %v14508_v19  ;;  %v14531_v20 = vld [vmem:[%s19823_s1 + $0x448] sm:$0xff] }
 0x64a   : > { %v20312_v54 = vld [vmem:[#allocation29_spill] sm:$0xff] }
 0x64b   : > { %v8368_v36 = vpop.f32.mrf.mxu1  ;;  %v19565_v47 = vadd.f32 %v8616_v32, %v8490_v26  ;;  %10214 = vmatpush.bf16.msrb.mxu3 %v14532_v7  ;;  %v14515_v32 = vld [vmem:[%s19823_s1 + $0x3c8] sm:$0xff]  ;;  %v20318_v7 = vld [vmem:[#allocation14_spill] sm:$0xff] }
 0x64c   : > { %v20313_v36 = vld [vmem:[#allocation21_spill] sm:$0xff]  ;;  %9965 = vmatpush.bf16.msrb.mxu1 %v14515_v32 }
 0x64f   : > { %10215 = vmatpush.bf16.msrb.mxu3 %v14531_v20 }
 0x650   : > { %v8481_v56 = vpop.f32.mrf.mxu2 }
 0x651   : > { %v8618_v52 = vpop.f32.mrf.mxu3  ;;  %v8744_v35 = vpop.f32.mrf.mxu0  ;;  %v20317_v56 = vpack.c.bf16 %v20297_v8, %v20295_v12  ;;  %v14522_v12 = vld [vmem:[%s19823_s1 + $0x400] sm:$0xff] }
 0x652   : > { %v8770_v0 = vadd.f32 %v8744_v35, %v19411_v30 }
 0x653   : > { %v8857_v45 = vpop.f32.mrf.mxu1 }
 0x654   : > { %9298 = vmatmul.bf16.gmra.mxu0 %v20298_v33  ;;  %v8883_v25 = vadd.f32 %v8857_v45, %v8770_v0  ;;  %v14524_v33 = vld [vmem:[%s19823_s1 + $0x410] sm:$0xff] }
 0x655   : > { %9576 = vmatmul.bf16.gmra.mxu2 %v20311_v22 }
 0x656   : > { %9427 = vmatmul.bf16.gmra.mxu1 %v20308_v55  ;;  %9689 = vmatmul.bf16.gmra.mxu3 %v9604_v48 }
 0x657   : > { %10077 = vmatpush.bf16.msrb.mxu2 %v14524_v33 }
 0x658   : > { %v8994_v28 = vpop.f32.mrf.mxu2 }
 0x659   : > { %v19576_v60 = vpop.f32.mrf.mxu3  ;;  %v9020_v14 = vadd.f32 %v8994_v28, %v8883_v25  ;;  %v8746_v59 = vpop.f32.mrf.mxu0 }
 0x65a   : > { %v8771_v6 = vadd.f32 %v8746_v59, %v19425_v15  ;;  %v14507_v15 = vld [vmem:[%s19823_s1 + $0x388] sm:$0xff]  ;;  %v13495_v59 = vld [vmem:[%s14792_s5 + $0xf0] sm:$0xff] }
 0x65b   : > { %v8859_v30 = vpop.f32.mrf.mxu1  ;;  %v9028_v49 = vadd.f32 %v19326_v53, %v9020_v14  ;;  %10078 = vmatpush.bf16.msrb.mxu2 %v14523_v61  ;;  %9815 = vmatpush.bf16.msrb.mxu0 %v14507_v15  ;;  %v14506_v14 = vld [vmem:[%s19823_s1 + $0x380] sm:$0xff]  ;;  %v13496_v15 = vld [vmem:[%s14792_s5 + $0xf8] sm:$0xff] }
 0x65c   : > { %v8884_v34 = vadd.f32 %v8859_v30, %v8771_v6  ;;  %v14514_v30 = vld [vmem:[%s19823_s1 + $0x3c0] sm:$0xff] }
 0x65d   : > { %v9044_v27 = vadd.f32 %v13493_v11, %v9028_v49  ;;  %v9606_v11 = vpack.c.bf16 %v20318_v7, %v20118_v1  ;;  %v20320_v49 = vld [vmem:[#allocation107_spill] sm:$0xff]  ;;  %9966 = vmatpush.bf16.msrb.mxu1 %v14514_v30 }
 0x65f   : > { %v9052_v58 = vmax.f32 %v9044_v27, 0.0  ;;  %10079 = vmatpush.bf16.msrb.mxu2 %v14522_v12  ;;  %9816 = vmatpush.bf16.msrb.mxu0 %v14506_v14  ;;  %v20321_v27 = vld [vmem:[#allocation109_spill] sm:$0xff] }
 0x660   : > { %v8996_v21 = vpop.f32.mrf.mxu2 }
 0x661   : > { %v19593_v57 = vpop.f32.mrf.mxu3  ;;  %13501 = vst [vmem:[%s18812_s28 + $0x80] sm:$0xff] %v9052_v58  ;;  %v9021_v5 = vadd.f32 %v8996_v21, %v8884_v34  ;;  %v8749_v10 = vpop.f32.mrf.mxu0  ;;  %v20322_v58 = vld [vmem:[#allocation105_spill] sm:$0xff] }
 0x662   : > { %v20323_v34 = vpack.c.bf16 %v20321_v27, %v20322_v58 }
 0x663   : > { %v8862_v38 = vpop.f32.mrf.mxu1  ;;  %v9029_v26 = vadd.f32 %v19326_v53, %v9021_v5 }
 0x664   : > { %9302 = vmatmul.bf16.gmra.mxu0 %v20312_v54 }
 0x665   : > { %v9045_v17 = vadd.f32 %v13494_v31, %v9029_v26  ;;  %9580 = vmatmul.bf16.gmra.mxu2 %v20316_v62  ;;  %v20324_v62 = vld [vmem:[#allocation106_spill] sm:$0xff] }
 0x666   : > { %9431 = vmatmul.bf16.gmra.mxu1 %v20313_v36  ;;  %9693 = vmatmul.bf16.gmra.mxu3 %v20317_v56  ;;  %v9345_v56 = vpack.c.bf16 %v19249_v3, %v20324_v62 }
 0x667   : > { %v9053_v52 = vmax.f32 %v9045_v17, 0.0 }
 0x668   : > { %v8999_v35 = vpop.f32.mrf.mxu2 }
 0x669   : > { %v9212_v45 = vpop.f32.mrf.mxu3  ;;  %13502 = vst [vmem:[%s18812_s28 + $0x88] sm:$0xff] %v9053_v52  ;;  %v8750_v0 = vpop.f32.mrf.mxu0  ;;  %v20325_v35 = vld [vmem:[#allocation111_spill] sm:$0xff] }
 0x66a   : > { %v8772_v48 = vadd.f32 %v8750_v0, %v19456_v39  ;;  %v14530_v39 = vld [vmem:[%s19823_s1 + $0x440] sm:$0xff]  ;;  %v9607_v45 = vpack.c.bf16 0.0, %v20325_v35  ;;  %v20326_v0 = vld [vmem:[#allocation108_spill] sm:$0xff] }
 0x66b   : > { %v8863_v43 = vpop.f32.mrf.mxu1  ;;  %10216 = vmatpush.bf16.msrb.mxu3 %v14530_v39 }
 0x66c   : > { %v8885_v55 = vadd.f32 %v8863_v43, %v8772_v48  ;;  %v20327_v43 = vld [vmem:[#allocation9_spill] sm:$0xff]  ;;  %v20328_v48 = vld [vmem:[#allocation112_spill] sm:$0xff] }
 0x670   : > { %v9000_v42 = vpop.f32.mrf.mxu2 }
 0x671   : > { %v19620_v13 = vpop.f32.mrf.mxu3  ;;  %v9022_v22 = vadd.f32 %v9000_v42, %v8885_v55  ;;  %v8753_v25 = vpop.f32.mrf.mxu0  ;;  %v20329_v55 = vpack.c.bf16 %v20327_v43, %v20328_v48 }
 0x672   : > { %v8773_v19 = vadd.f32 %v8753_v25, %v19482_v46 }
 0x673   : > { %v8866_v28 = vpop.f32.mrf.mxu1  ;;  %v9030_v33 = vadd.f32 %v19326_v53, %v9022_v22 }
 0x674   : > { %9307 = vmatmul.bf16.gmra.mxu0 %v20319_v4  ;;  %v8886_v21 = vadd.f32 %v8866_v28, %v8773_v19 }
 0x675   : > { %v9046_v6 = vadd.f32 %v13495_v59, %v9030_v33  ;;  %9585 = vmatmul.bf16.gmra.mxu2 %v20323_v34 }
 0x676   : > { %9436 = vmatmul.bf16.gmra.mxu1 %v20320_v49  ;;  %9698 = vmatmul.bf16.gmra.mxu3 %v9606_v11 }
 0x677   : > { %v9054_v46 = vmax.f32 %v9046_v6, 0.0 }
 0x678   : > { %v9003_v5 = vpop.f32.mrf.mxu2 }
 0x679   : > { %v19644_v1 = vpop.f32.mrf.mxu3  ;;  %13503 = vst [vmem:[%s18812_s28 + $0x90] sm:$0xff] %v9054_v46  ;;  %v9023_v10 = vadd.f32 %v9003_v5, %v8886_v21  ;;  %v8755_v38 = vpop.f32.mrf.mxu0  ;;  %v13498_v46 = vld [vmem:[%s14792_s5 + $0x110] sm:$0xff]  ;;  %v20330_v5 = vpack.c.bf16 %v20296_v51, %v20294_v50 }
 0x67b   : > { %v8868_v61 = vpop.f32.mrf.mxu1  ;;  %v9031_v31 = vadd.f32 %v19326_v53, %v9023_v10 }
 0x67d   : > { %v9047_v20 = vadd.f32 %v13496_v15, %v9031_v31 }
 0x67f   : > { %v9055_v32 = vmax.f32 %v9047_v20, 0.0 }
 0x680   : > { %v9005_v26 = vpop.f32.mrf.mxu2 }
 0x681   : > { %v9218_v17 = vpop.f32.mrf.mxu3  ;;  %13504 = vst [vmem:[%s18812_s28 + $0x98] sm:$0xff] %v9055_v32  ;;  %v8757_v29 = vpop.f32.mrf.mxu0 }
 0x682   : > { %v8774_v52 = vadd.f32 %v8757_v29, %v19506_v41  ;;  %v13497_v41 = vld [vmem:[%s14792_s5 + $0x108] sm:$0xff]  ;;  %v13499_v29 = vld [vmem:[%s14792_s5 + $0x120] sm:$0xff] }
 0x683   : > { %v8870_v40 = vpop.f32.mrf.mxu1 }
 0x684   : > { %9311 = vmatmul.bf16.gmra.mxu0 %v20326_v0  ;;  %v8887_v42 = vadd.f32 %v8870_v40, %v8774_v52  ;;  %v20331_v40 = vld [vmem:[#allocation24_spill] sm:$0xff] }
 0x685   : > { %9589 = vmatmul.bf16.gmra.mxu2 %v20329_v55 }
 0x686   : > { %9440 = vmatmul.bf16.gmra.mxu1 %v9345_v56  ;;  %9702 = vmatmul.bf16.gmra.mxu3 %v9607_v45  ;;  %v20332_v56 = vpack.c.bf16 %v20331_v40, %v20307_v18 }
 0x688   : > { %v9007_v22 = vpop.f32.mrf.mxu2 }
 0x689   : > { %v19658_v25 = vpop.f32.mrf.mxu3  ;;  %v9024_v28 = vadd.f32 %v9007_v22, %v8887_v42  ;;  %v8759_v3 = vpop.f32.mrf.mxu0 }
 0x68a   : > { %v8775_v59 = vadd.f32 %v8759_v3, %v19520_v23  ;;  %v13500_v3 = vld [vmem:[%s14792_s5 + $0x128] sm:$0xff] }
 0x68b   : > { %v8872_v12 = vpop.f32.mrf.mxu1  ;;  %v9032_v14 = vadd.f32 %v19326_v53, %v9024_v28 }
 0x68c   : > { %v8888_v33 = vadd.f32 %v8872_v12, %v8775_v59 }
 0x68d   : > { %v9048_v39 = vadd.f32 %v13497_v41, %v9032_v14 }
 0x68f   : > { %v9056_v30 = vmax.f32 %v9048_v39, 0.0 }
 0x690   : > { %v9009_v19 = vpop.f32.mrf.mxu2 }
 0x691   : > { %v19663_v11 = vpop.f32.mrf.mxu3  ;;  %13505 = vst [vmem:[%s18812_s28 + $0xa0] sm:$0xff] %v9056_v30  ;;  %v9025_v6 = vadd.f32 %v9009_v19, %v8888_v33  ;;  %v8762_v58 = vpop.f32.mrf.mxu0  ;;  %v20333_v33 = vld [vmem:[#allocation25_spill] sm:$0xff]  ;;  %v20334_v19 = vld [vmem:[#allocation28_spill] sm:$0xff] }
 0x693   : > { %v8875_v34 = vpop.f32.mrf.mxu1  ;;  %v9033_v21 = vadd.f32 %v19326_v53, %v9025_v6  ;;  %v20335_v6 = vpack.c.bf16 %v20333_v33, %v20334_v19  ;;  %v20348_v19 = vld [vmem:[#allocation99_spill] sm:$0xff] }
 0x694   : > { %9817 = vmatmul.bf16.vlgmr.msrb.gmra.mxu0 %v20330_v5 }
 0x695   : > { %v9049_v23 = vadd.f32 %v13498_v46, %v9033_v21  ;;  %10080 = vmatmul.bf16.vlgmr.msrb.gmra.mxu2 %v18226_v2 }
 0x696   : > { %9967 = vmatmul.bf16.vlgmr.msrb.gmra.mxu1 %v20312_v54  ;;  %10217 = vmatmul.bf16.vlgmr.msrb.gmra.mxu3 %v20313_v36 }
 0x697   : > { %v9057_v10 = vmax.f32 %v9049_v23, 0.0 }
 0x698   : > { %v9012_v38 = vpop.f32.mrf.mxu2 }
 0x699   : > { %v9225_v61 = vpop.f32.mrf.mxu3  ;;  %13506 = vst [vmem:[%s18812_s28 + $0xa8] sm:$0xff] %v9057_v10  ;;  %v8763_v15 = vpop.f32.mrf.mxu0 }
 0x69a   : > { %v8776_v20 = vadd.f32 %v8763_v15, %v19544_v24 }
 0x69b   : > { %v8876_v31 = vpop.f32.mrf.mxu1 }
 0x69c   : > { %v8889_v32 = vadd.f32 %v8876_v31, %v8776_v20  ;;  %v20338_v20 = vld [vmem:[#allocation104_spill] sm:$0xff] }
 0x6a0   : > { %v9013_v26 = vpop.f32.mrf.mxu2 }
 0x6a1   : > { %v19676_v50 = vpop.f32.mrf.mxu3  ;;  %v9026_v51 = vadd.f32 %v9013_v26, %v8889_v32  ;;  %v8766_v54 = vpop.f32.mrf.mxu0  ;;  %v20339_v32 = vpack.c.bf16 %v20324_v62, %v20338_v20  ;;  %v20340_v26 = vpack.c.bf16 %v20328_v48, %v20321_v27 }
 0x6a2   : > { %v8777_v36 = vadd.f32 %v8766_v54, %v19565_v47  ;;  %v20343_v54 = vld [vmem:[#allocation114_spill] sm:$0xff] }
 0x6a3   : > { %v8879_v17 = vpop.f32.mrf.mxu1  ;;  %v9034_v2 = vadd.f32 %v19326_v53, %v9026_v51  ;;  %v20342_v51 = vld [vmem:[#allocation113_spill] sm:$0xff] }
 0x6a4   : > { %9822 = vmatmul.bf16.gmra.mxu0 %v20332_v56  ;;  %v8890_v45 = vadd.f32 %v8879_v17, %v8777_v36  ;;  %v20344_v17 = vpack.c.bf16 %v20342_v51, %v20343_v54 }
 0x6a5   : > { %v9050_v24 = vadd.f32 %v13499_v29, %v9034_v2  ;;  %10085 = vmatmul.bf16.gmra.mxu2 %v19464_v37 }
 0x6a6   : > { %9972 = vmatmul.bf16.gmra.mxu1 %v20319_v4  ;;  %10222 = vmatmul.bf16.gmra.mxu3 %v20320_v49 }
 0x6a7   : > { %v9058_v52 = vmax.f32 %v9050_v24, 0.0 }
 0x6a8   : > { %v9016_v55 = vpop.f32.mrf.mxu2 }
 0x6a9   : > { %v19687_v42 = vpop.f32.mrf.mxu3  ;;  %13507 = vst [vmem:[%s18812_s28 + $0xb0] sm:$0xff] %v9058_v52  ;;  %v9027_v22 = vadd.f32 %v9016_v55, %v8890_v45  ;;  %v8768_v47 = vpop.f32.mrf.mxu0 }
 0x6ab   : > { %v8881_v28 = vpop.f32.mrf.mxu1  ;;  %v9035_v12 = vadd.f32 %v19326_v53, %v9027_v22  ;;  %v20336_v53 = vld [vmem:[#allocation110_spill] sm:$0xff] }
 0x6ac   : > { %v20337_v58 = vpack.c.bf16 %v20336_v53, %v20324_v62  ;;  %v20345_v47 = vpack.c.bf16 %v20343_v54, %v20336_v53  ;;  %v20347_v28 = vld [vmem:[#allocation100_spill] sm:$0xff] }
 0x6ad   : > { %v9051_v41 = vadd.f32 %v13500_v3, %v9035_v12 }
 0x6af   : > { %v9059_v4 = vmax.f32 %v9051_v41, 0.0 }
 0x6b0   : > { %v9018_v14 = vpop.f32.mrf.mxu2 }
 0x6b1   : > { %v9231_v59 = vpop.f32.mrf.mxu3  ;;  %13508 = vst [vmem:[%s18812_s28 + $0xb8] sm:$0xff] %v9059_v4  ;;  %v9290_v37 = vpop.f32.mrf.mxu0 }
 0x6b2   : > { %v9291_v49 = vadd.f32 %v9290_v37, %v19576_v60 }
 0x6b3   : > { %v9419_v39 = vpop.f32.mrf.mxu1 }
 0x6b4   : > { %v9445_v30 = vadd.f32 %v9419_v39, %v9291_v49  ;;  %9826 = vmatmul.bf16.gmra.mxu0 %v20335_v6  ;;  %v9744_v49 = vpack.c.bf16 %v19454_v16, %v20342_v51 }
 0x6b5   : > { %10089 = vmatmul.bf16.gmra.mxu2 %v9133_v9 }
 0x6b6   : > { %9976 = vmatmul.bf16.gmra.mxu1 %v20326_v0  ;;  %10226 = vmatmul.bf16.gmra.mxu3 %v20337_v58 }
 0x6b8   : > { %v9568_v34 = vpop.f32.mrf.mxu2 }
 0x6b9   : > { %v9681_v46 = vpop.f32.mrf.mxu3  ;;  %v9594_v21 = vadd.f32 %v9568_v34, %v9445_v30  ;;  %v9292_v5 = vpop.f32.mrf.mxu0  ;;  %v10144_v30 = vpack.c.bf16 %v20307_v18, %v15917_v44 }
 0x6ba   : > { %v9293_v60 = vadd.f32 %v9292_v5, %v19593_v57  ;;  %v20341_v57 = vpack.c.bf16 %v20325_v35, %v20318_v7  ;;  %v9893_v7 = vpack.c.bf16 %v15899_v63, %v20327_v43 }
 0x6bb   : > { %v9421_v23 = vpop.f32.mrf.mxu1  ;;  %v19704_v10 = vadd.f32 %v9681_v46, %v9594_v21 }
 0x6bc   : > { %v9446_v38 = vadd.f32 %v9421_v23, %v9293_v60 }
 0x6c0   : > { %v9570_v61 = vpop.f32.mrf.mxu2 }
 0x6c1   : > { %v9683_v15 = vpop.f32.mrf.mxu3  ;;  %v9595_v0 = vadd.f32 %v9570_v61, %v9446_v38  ;;  %v9295_v31 = vpop.f32.mrf.mxu0 }
 0x6c3   : > { %v9424_v8 = vpop.f32.mrf.mxu1  ;;  %v19706_v9 = vadd.f32 %v9683_v15, %v9595_v0 }
 0x6c4   : > { %9830 = vmatmul.bf16.gmra.mxu0 %v20339_v32 }
 0x6c5   : > { %10093 = vmatmul.bf16.gmra.mxu2 %v20341_v57 }
 0x6c6   : > { %9980 = vmatmul.bf16.gmra.mxu1 %v20340_v26  ;;  %10230 = vmatmul.bf16.gmra.mxu3 %v20344_v17 }
 0x6c8   : > { %v9573_v29 = vpop.f32.mrf.mxu2 }
 0x6c9   : > { %v9686_v2 = vpop.f32.mrf.mxu3  ;;  %v9296_v36 = vpop.f32.mrf.mxu0 }
 0x6ca   : > { %v9297_v56 = vadd.f32 %v9296_v36, %v19620_v13  ;;  %v20346_v13 = vmov 0.0|0.0  }
 0x6cb   : > { %v9425_v40 = vpop.f32.mrf.mxu1 }
 0x6cc   : > { %v9447_v62 = vadd.f32 %v9425_v40, %v9297_v56 }
 0x6d0   : > { %v9574_v24 = vpop.f32.mrf.mxu2 }
 0x6d1   : > { %v9687_v52 = vpop.f32.mrf.mxu3  ;;  %v9596_v45 = vadd.f32 %v9574_v24, %v9447_v62  ;;  %v9299_v27 = vpop.f32.mrf.mxu0 }
 0x6d2   : > { %v9300_v55 = vadd.f32 %v9299_v27, %v19644_v1 }
 0x6d3   : > { %v9428_v48 = vpop.f32.mrf.mxu1  ;;  %v19724_v35 = vadd.f32 %v9687_v52, %v9596_v45 }
 0x6d4   : > { %v9448_v22 = vadd.f32 %v9428_v48, %v9300_v55  ;;  %9835 = vmatmul.bf16.gmra.mxu0 %v20345_v47 }
 0x6d5   : > { %10098 = vmatmul.bf16.gmra.mxu2 %v20346_v13 }
 0x6d6   : > { %9985 = vmatmul.bf16.gmra.mxu1 %v9893_v7  ;;  %10235 = vmatmul.bf16.gmra.mxu3 %v20347_v28 }
 0x6d8   : > { %v9577_v3 = vpop.f32.mrf.mxu2 }
 0x6d9   : > { %v9690_v12 = vpop.f32.mrf.mxu3  ;;  %v9597_v41 = vadd.f32 %v9577_v3, %v9448_v22  ;;  %v9301_v4 = vpop.f32.mrf.mxu0 }
 0x6db   : > { %v9430_v1 = vpop.f32.mrf.mxu1  ;;  %v19731_v14 = vadd.f32 %v9690_v12, %v9597_v41  ;;  %v13941_v12 = vld [vmem:[%s14792_s5 + $0x138] sm:$0xff]  ;;  %v19757_v41 = vld [vmem:[%s19824_s2 + $0x1] ss:$0 sm:$0xff] }
 0x6e0   : > { %v9579_v63 = vpop.f32.mrf.mxu2 }
 0x6e1   : > { %v9692_v43 = vpop.f32.mrf.mxu3  ;;  %v9303_v59 = vpop.f32.mrf.mxu0 }
 0x6e2   : > { %v9304_v39 = vadd.f32 %v9303_v59, %v19658_v25 }
 0x6e3   : > { %v9432_v37 = vpop.f32.mrf.mxu1 }
 0x6e4   : > { %v9449_v33 = vadd.f32 %v9432_v37, %v9304_v39  ;;  %9839 = vmatmul.bf16.gmra.mxu0 %v9744_v49 }
 0x6e5   : > { %10102 = vmatmul.bf16.gmra.mxu2 %v20346_v13 }
 0x6e6   : > { %9989 = vmatmul.bf16.gmra.mxu1 %v20348_v19  ;;  %10239 = vmatmul.bf16.gmra.mxu3 %v10144_v30 }
 0x6e8   : > { %v9581_v6 = vpop.f32.mrf.mxu2 }
 0x6e9   : > { %v9694_v53 = vpop.f32.mrf.mxu3  ;;  %v9598_v58 = vadd.f32 %v9581_v6, %v9449_v33  ;;  %v9305_v34 = vpop.f32.mrf.mxu0 }
 0x6ea   : > { %v9306_v25 = vadd.f32 %v9305_v34, %v19663_v11 }
 0x6eb   : > { %v9434_v46 = vpop.f32.mrf.mxu1  ;;  %v19741_v21 = vadd.f32 %v9694_v53, %v9598_v58 }
 0x6ec   : > { %v9450_v16 = vadd.f32 %v9434_v46, %v9306_v25 }
 0x6f0   : > { %v9583_v5 = vpop.f32.mrf.mxu2 }
 0x6f1   : > { %v9696_v23 = vpop.f32.mrf.mxu3  ;;  %v9599_v44 = vadd.f32 %v9583_v5, %v9450_v16  ;;  %v9308_v18 = vpop.f32.mrf.mxu0 }
 0x6f3   : > { %v9437_v60 = vpop.f32.mrf.mxu1  ;;  %v19743_v38 = vadd.f32 %v9696_v23, %v9599_v44 }
 0x6f8   : > { %v9586_v61 = vpop.f32.mrf.mxu2 }
 0x6f9   : > { %v9699_v15 = vpop.f32.mrf.mxu3  ;;  %v9309_v0 = vpop.f32.mrf.mxu0 }
 0x6fa   : > { %v9310_v8 = vadd.f32 %v9309_v0, %v19676_v50  ;;  %v13943_v0 = vld [vmem:[%s14792_s5 + $0x150] sm:$0xff] }
 0x6fb   : > { %v9438_v31 = vpop.f32.mrf.mxu1 }
 0x6fc   : > { %v9451_v20 = vadd.f32 %v9438_v31, %v9310_v8 }
 0x700   : > { %v9587_v32 = vpop.f32.mrf.mxu2 }
 0x701   : > { %v9700_v26 = vpop.f32.mrf.mxu3  ;;  %v9600_v11 = vadd.f32 %v9587_v32, %v9451_v20  ;;  %v9312_v57 = vpop.f32.mrf.mxu0 }
 0x702   : > { %v9313_v54 = vadd.f32 %v9312_v57, %v19687_v42 }
 0x703   : > { %v9441_v51 = vpop.f32.mrf.mxu1  ;;  %v19747_v17 = vadd.f32 %v9700_v26, %v9600_v11 }
 0x704   : > { %v9452_v29 = vadd.f32 %v9441_v51, %v9313_v54 }
 0x708   : > { %v9590_v2 = vpop.f32.mrf.mxu2 }
 0x709   : > { %v9703_v36 = vpop.f32.mrf.mxu3  ;;  %v9601_v40 = vadd.f32 %v9590_v2, %v9452_v29  ;;  %v9314_v56 = vpop.f32.mrf.mxu0  ;;  %v13944_v29 = vld [vmem:[%s14792_s5 + $0x158] sm:$0xff] }
 0x70b   : > { %v9443_v62 = vpop.f32.mrf.mxu1  ;;  %v19749_v24 = vadd.f32 %v9703_v36, %v9601_v40 }
 0x710   : > { %v9592_v50 = vpop.f32.mrf.mxu2 }
 0x711   : > { %v9705_v52 = vpop.f32.mrf.mxu3  ;;  %v9818_v45 = vpop.f32.mrf.mxu0 }
 0x712   : > { %v9844_v48 = vadd.f32 %v9818_v45, %v19704_v10 }
 0x713   : > { %v9968_v27 = vpop.f32.mrf.mxu1 }
 0x714   : > { %v9994_v55 = vadd.f32 %v9968_v27, %v9844_v48 }
 0x718   : > { %v10081_v7 = vpop.f32.mrf.mxu2 }
 0x719   : > { %v10218_v42 = vpop.f32.mrf.mxu3  ;;  %v10107_v22 = vadd.f32 %v10081_v7, %v9994_v55  ;;  %v9820_v47 = vpop.f32.mrf.mxu0 }
 0x71a   : > { %v9845_v3 = vadd.f32 %v9820_v47, %v19706_v9  ;;  %v13942_v9 = vld [vmem:[%s14792_s5 + $0x140] sm:$0xff] }
 0x71b   : > { %v9970_v13 = vpop.f32.mrf.mxu1  ;;  %v10244_v28 = vadd.f32 %v10218_v42, %v10107_v22 }
 0x71c   : > { %v9995_v1 = vadd.f32 %v9970_v13, %v9845_v3  ;;  %v13945_v13 = vld [vmem:[%s14792_s5 + $0x168] sm:$0xff] }
 0x71d   : > { %v10252_v4 = vadd.f32 %v19757_v41, %v10244_v28 }
 0x71f   : > { %v10268_v10 = vadd.f32 %v13941_v12, %v10252_v4 }
 0x720   : > { %v10083_v63 = vpop.f32.mrf.mxu2 }
 0x721   : > { %v10220_v43 = vpop.f32.mrf.mxu3  ;;  %v10276_v59 = vmax.f32 %v10268_v10, 0.0  ;;  %v10108_v37 = vadd.f32 %v10083_v63, %v9995_v1  ;;  %v9823_v39 = vpop.f32.mrf.mxu0 }
 0x723   : > { %v9973_v49 = vpop.f32.mrf.mxu1  ;;  %13949 = vst [vmem:[%s18812_s28 + $0xc0] sm:$0xff] %v10276_v59  ;;  %v10245_v30 = vadd.f32 %v10220_v43, %v10108_v37  ;;  %v13946_v37 = vld [vmem:[%s14792_s5 + $0x170] sm:$0xff] }
 0x725   : > { %v10253_v33 = vadd.f32 %v19757_v41, %v10245_v30 }
 0x727   : > { %v10269_v19 = vadd.f32 %v13942_v9, %v10253_v33 }
 0x728   : > { %v10086_v6 = vpop.f32.mrf.mxu2 }
 0x729   : > { %v10223_v53 = vpop.f32.mrf.mxu3  ;;  %v10277_v58 = vmax.f32 %v10269_v19, 0.0  ;;  %v9824_v34 = vpop.f32.mrf.mxu0 }
 0x72a   : > { %v9846_v25 = vadd.f32 %v9824_v34, %v19724_v35 }
 0x72b   : > { %v9974_v46 = vpop.f32.mrf.mxu1  ;;  %13950 = vst [vmem:[%s18812_s28 + $0xc8] sm:$0xff] %v10277_v58 }
 0x72c   : > { %v9996_v16 = vadd.f32 %v9974_v46, %v9846_v25 }
 0x730   : > { %v10087_v5 = vpop.f32.mrf.mxu2 }
 0x731   : > { %v10224_v23 = vpop.f32.mrf.mxu3  ;;  %v10109_v44 = vadd.f32 %v10087_v5, %v9996_v16  ;;  %v9827_v18 = vpop.f32.mrf.mxu0 }
 0x732   : > { %v9847_v15 = vadd.f32 %v9827_v18, %v19731_v14 }
 0x733   : > { %v9977_v60 = vpop.f32.mrf.mxu1  ;;  %v10246_v61 = vadd.f32 %v10224_v23, %v10109_v44  ;;  %v13947_v44 = vld [vmem:[%s14792_s5 + $0x180] sm:$0xff] }
 0x734   : > { %v9997_v20 = vadd.f32 %v9977_v60, %v9847_v15 }
 0x735   : > { %v10254_v31 = vadd.f32 %v19757_v41, %v10246_v61 }
 0x737   : > { %v10270_v8 = vadd.f32 %v13943_v0, %v10254_v31 }
 0x738   : > { %v10090_v32 = vpop.f32.mrf.mxu2 }
 0x739   : > { %v10227_v26 = vpop.f32.mrf.mxu3  ;;  %v10278_v35 = vmax.f32 %v10270_v8, 0.0  ;;  %v10110_v11 = vadd.f32 %v10090_v32, %v9997_v20  ;;  %v9829_v57 = vpop.f32.mrf.mxu0  ;;  %v13948_v32 = vld [vmem:[%s14792_s5 + $0x188] sm:$0xff] }
 0x73b   : > { %v9979_v51 = vpop.f32.mrf.mxu1  ;;  %13951 = vst [vmem:[%s18812_s28 + $0xd0] sm:$0xff] %v10278_v35  ;;  %v10247_v54 = vadd.f32 %v10227_v26, %v10110_v11 }
 0x73d   : > { %v10255_v2 = vadd.f32 %v19757_v41, %v10247_v54 }
 0x73f   : > { %v10271_v36 = vadd.f32 %v13944_v29, %v10255_v2 }
 0x740   : > { %v10092_v14 = vpop.f32.mrf.mxu2 }
 0x741   : > { %v10229_v40 = vpop.f32.mrf.mxu3  ;;  %v10279_v56 = vmax.f32 %v10271_v36, 0.0  ;;  %v9831_v62 = vpop.f32.mrf.mxu0 }
 0x742   : > { %v9848_v52 = vadd.f32 %v9831_v62, %v19741_v21 }
 0x743   : > { %v9981_v50 = vpop.f32.mrf.mxu1  ;;  %13952 = vst [vmem:[%s18812_s28 + $0xd8] sm:$0xff] %v10279_v56 }
 0x744   : > { %v9998_v45 = vadd.f32 %v9981_v50, %v9848_v52 }
 0x748   : > { %v10094_v27 = vpop.f32.mrf.mxu2 }
 0x749   : > { %v10231_v48 = vpop.f32.mrf.mxu3  ;;  %v10111_v55 = vadd.f32 %v10094_v27, %v9998_v45  ;;  %v9833_v7 = vpop.f32.mrf.mxu0 }
 0x74a   : > { %v9849_v47 = vadd.f32 %v9833_v7, %v19743_v38 }
 0x74b   : > { %v9983_v42 = vpop.f32.mrf.mxu1  ;;  %v10248_v22 = vadd.f32 %v10231_v48, %v10111_v55 }
 0x74c   : > { %v9999_v12 = vadd.f32 %v9983_v42, %v9849_v47 }
 0x74d   : > { %v10256_v28 = vadd.f32 %v19757_v41, %v10248_v22 }
 0x74f   : > { %v10272_v3 = vadd.f32 %v13945_v13, %v10256_v28 }
 0x750   : > { %v10096_v4 = vpop.f32.mrf.mxu2 }
 0x751   : > { %v10233_v10 = vpop.f32.mrf.mxu3  ;;  %v10280_v21 = vmax.f32 %v10272_v3, 0.0  ;;  %v10112_v1 = vadd.f32 %v10096_v4, %v9999_v12  ;;  %v9836_v63 = vpop.f32.mrf.mxu0 }
 0x753   : > { %v9986_v43 = vpop.f32.mrf.mxu1  ;;  %13953 = vst [vmem:[%s18812_s28 + $0xe0] sm:$0xff] %v10280_v21  ;;  %v10249_v59 = vadd.f32 %v10233_v10, %v10112_v1 }
 0x755   : > { %v10257_v39 = vadd.f32 %v19757_v41, %v10249_v59 }
 0x757   : > { %v10273_v49 = vadd.f32 %v13946_v37, %v10257_v39 }
 0x758   : > { %v10099_v38 = vpop.f32.mrf.mxu2 }
 0x759   : > { %v10236_v30 = vpop.f32.mrf.mxu3  ;;  %v10281_v9 = vmax.f32 %v10273_v49, 0.0  ;;  %v9837_v33 = vpop.f32.mrf.mxu0 }
 0x75a   : > { %v9850_v6 = vadd.f32 %v9837_v33, %v19747_v17 }
 0x75b   : > { %v9987_v19 = vpop.f32.mrf.mxu1  ;;  %13954 = vst [vmem:[%s18812_s28 + $0xe8] sm:$0xff] %v10281_v9 }
 0x75c   : > { %v10000_v53 = vadd.f32 %v9987_v19, %v9850_v6 }
 0x760   : > { %v10100_v58 = vpop.f32.mrf.mxu2 }
 0x761   : > { %v10237_v34 = vpop.f32.mrf.mxu3  ;;  %v10113_v46 = vadd.f32 %v10100_v58, %v10000_v53  ;;  %v9840_v25 = vpop.f32.mrf.mxu0 }
 0x762   : > { %v9851_v23 = vadd.f32 %v9840_v25, %v19749_v24 }
 0x763   : > { %v9990_v16 = vpop.f32.mrf.mxu1  ;;  %v10250_v5 = vadd.f32 %v10237_v34, %v10113_v46 }
 0x764   : > { %v10001_v61 = vadd.f32 %v9990_v16, %v9851_v23 }
 0x765   : > { %v10258_v18 = vadd.f32 %v19757_v41, %v10250_v5 }
 0x767   : > { %v10274_v60 = vadd.f32 %v13947_v44, %v10258_v18 }
 0x768   : > { %v10103_v15 = vpop.f32.mrf.mxu2 }
 0x769   : > { %v10240_v17 = vpop.f32.mrf.mxu3  ;;  %v10282_v0 = vmax.f32 %v10274_v60, 0.0  ;;  %v10114_v31 = vadd.f32 %v10103_v15, %v10001_v61  ;;  %v9842_v8 = vpop.f32.mrf.mxu0 }
 0x76b   : > { %v9992_v20 = vpop.f32.mrf.mxu1  ;;  %13955 = vst [vmem:[%s18812_s28 + $0xf0] sm:$0xff] %v10282_v0  ;;  %v10251_v24 = vadd.f32 %v10240_v17, %v10114_v31 }
 0x76d   : > { %v10259_v26 = vadd.f32 %v19757_v41, %v10251_v24 }
 0x76f   : > { %v10275_v35 = vadd.f32 %v13948_v32, %v10259_v26 }
 0x770   : > { %v10105_v11 = vpop.f32.mrf.mxu2 }
 0x771   : > { %v10242_v57 = vpop.f32.mrf.mxu3  ;;  %v10283_v51 = vmax.f32 %v10275_v35, 0.0 }
 0x773   : > { %13956 = vst [vmem:[%s18812_s28 + $0xf8] sm:$0xff] %v10283_v51 }
 0x774   : > { %14618 = shalt.err (!%p14615_p3)
}
 0x775   : > { %s14657_s24 = smov 128   ;;  %s14658_s28 = smov 8  }
 0x776   : > { %14540 = dma.vmem_to_hbm [thread:$0]  (%p14717_p5), %s10307_s30, 4096, %s10309_s16, %s10294_s4, %s14657_s24, %s14657_s24, %s14658_s28  }
 0x777 PF: > { %p14546_p4 = scmp.ge.s32.totalorder %s14653_s15, 2  ;;  %s10323_s17 = sand.u32 1, %s14641_s12  }
 0x778   : > { %s10324_s19 = scalar_lea.sflag [#allocation4], %s10323_s17 }
 0x779   : > { %p14543_p7 = pnand %p14546_p4, %p14721_p6 }
 0x77b   : > { %p14544_p8 = pneg %p14543_p7 }
 0x77d   : > { %14636 = dma.done.wait (%p14544_p8), %s10324_s19, 4096  }
 0x77e   : > { %14638 = vsyncadd (%p14544_p8), %s10324_s19, 4294963200  ;;  %p13_p9 = scmp.ge.s32.totalorder %s14704_s18, 4   ;;  %s20349_s12 = smov %s14645_s13 }
 0x77f   : > { %s20350_s13 = smov %s14649_s14  ;;  %s20351_s14 = smov %s14715_s21 }
 0x780   : > { %s20352_s15 = smov %s14704_s18  ;;  %15 = sbr.rel (!%p13_p9) target bundleno = 3 (0x3), region = 110 }
 0x785   :  { %10330 = vsyncpa [#allocation4], 1 }
 0x786   :  { %10332 = vsyncpa [#allocation4 + $0x1], 1 }

</bundles_post_ra>
